<compile_context>
chip_gen: v7x
topology: tpu7x:2x2x1
jax: 0.10.0
libtpu: 0.0.40
codegen_flags: <defaults>
</compile_context>

<pallas_src>
import math

import jax
import jax.numpy as jnp
from jax.experimental import pallas as pl
from jax.experimental.pallas import tpu as pltpu


def _dot(a, b):
    return jnp.dot(a, b, preferred_element_type=jnp.float32)


# ---------------------------------------------------------------------------
# Fused whole-network kernel. One grid step == Bblk graphs (M = Bblk*V rows).
# ---------------------------------------------------------------------------
def mpnn_kernel(nodes_ref, edges_ref, mask_s_ref, mask_bd_ref, r_ref, w2e_t_ref,
                w1_ref, b1_ref, w2vw_ref, b2_ref,
                wi_ref, bi_ref, wh_ref, bh_ref, wc_ref, bc_ref,
                out_ref):
    L = w1_ref.shape[0]
    Hd = wi_ref.shape[1]
    H = wi_ref.shape[2]
    Fv = nodes_ref.shape[-1]

    # ---------------- per-step prework (edge path, lane-packed) ----------------
    mask_s = mask_s_ref[...]                                      # (M, V) bf16 0/1
    deg = jnp.sum(mask_s.astype(jnp.float32), axis=-1, keepdims=True)   # (M, 1)
    # Lane-expand the mask on the MXU: mask_rep[i, w*Fe+f] = mask[i, w].
    mask_rep = _dot(mask_s, r_ref[...]).astype(jnp.bfloat16)      # (M, V*Fe)
    masked_e = mask_rep * edges_ref[...]                          # (M, V*Fe) bf16, full lanes
    # pe for ALL layers/heads at once:  sum_{w,f} mask*E*W2e  via row-tiled W2e.
    pe_all = _dot(masked_e, w2e_t_ref[...])                       # (M, L*Hd*H) f32
    mask_bd = mask_bd_ref[...]                                    # (M, M) bf16 block-diag

    x = nodes_ref[...]                                            # (M, Fv) f32

    for l in range(L):
        x_bf = x.astype(jnp.bfloat16)
        # linear1, all heads packed along lanes.
        a_all = _dot(x_bf, w1_ref[l]) + b1_ref[l]                 # (M, Hd*Fv)
        # pv|pw for all heads via head-block-diagonal RHS (cols = [pv_h... | pw_h...]).
        pvw = _dot(a_all.astype(jnp.bfloat16), w2vw_ref[l])       # (M, 2*Hd*H)
        pw_all = pvw[:, Hd * H:]
        # Per-graph neighbor sum on the MXU (block-diagonal mask), all heads at once.
        nbr_all = _dot(mask_bd, pw_all.astype(jnp.bfloat16))      # (M, Hd*H)
        # Hidden-side GRU gates for all heads (shared x LHS).
        gh_all = _dot(x_bf, wh_ref[l]) + bh_ref[l]                # (M, Hd*3*Fv)
        b2_l = b2_ref[l]                                          # (1, Hd*H)

        y = bc_ref[l]                                             # (1, Fv), broadcasts
        for h in range(Hd):
            # ---------------- Pair_Message (relu AFTER neighbor sum) ----------------
            pv = pvw[:, h * H:(h + 1) * H]
            nbr = nbr_all[:, h * H:(h + 1) * H]
            pe = pe_all[:, (l * Hd + h) * H:(l * Hd + h + 1) * H]
            b2 = b2_l[:, h * H:(h + 1) * H]
            msg = jnp.maximum(deg * (pv + b2) + nbr + pe, 0.0)    # (M, H)

            # ---------------- Update: GRUCell(msg, x), gates fused ----------------
            gi = _dot(msg.astype(jnp.bfloat16), wi_ref[l, h]) + bi_ref[l, h]   # (M, 3*Fv)
            gh = gh_all[:, h * 3 * Fv:(h + 1) * 3 * Fv]
            r = jax.nn.sigmoid(gi[:, :Fv] + gh[:, :Fv])
            z = jax.nn.sigmoid(gi[:, Fv:2 * Fv] + gh[:, Fv:2 * Fv])
            n = jnp.tanh(gi[:, 2 * Fv:] + r * gh[:, 2 * Fv:])
            upd = (1.0 - z) * n + z * x                           # (M, Fv)

            # head combine: relu(upd_h) @ W_h (row-split of the concat linear)
            y = y + _dot(jnp.maximum(upd, 0.0).astype(jnp.bfloat16), wc_ref[l, h])
        x = x + y                                                 # residual
    out_ref[...] = x


_PARAM_ORDER = ("w1", "b1", "w2vw", "b2", "wi", "bi", "wh", "bh", "wc", "bc")


# ---------------------------------------------------------------------------
# Wrapper: one pallas_call for the whole forward, Bblk graphs per grid step.
# ---------------------------------------------------------------------------
def mpnn_forward(nodes, edges, adj, params, *, target_m=128):
    B, V, Fv = nodes.shape
    Fe = edges.shape[-1]
    L = params["w1"].shape[0]
    Hd = params["wi"].shape[1]
    H = params["wi"].shape[2]

    # --- batch block size: M = Bblk*V ~ target_m, M a multiple of 8 ---
    step = 8 // math.gcd(V, 8)                     # Bblk multiple of step => M % 8 == 0
    Bblk = max(step, (max(1, target_m // V) // step) * step)
    Bblk = min(Bblk, -(-B // step) * step)         # don't over-pad tiny batches
    B_p = -(-B // Bblk) * Bblk
    G = B_p // Bblk
    M = Bblk * V

    if B_p != B:
        pad = B_p - B
        nodes = jnp.pad(nodes, ((0, pad), (0, 0), (0, 0)))
        edges = jnp.pad(edges, ((0, pad), (0, 0), (0, 0), (0, 0)))
        adj = jnp.pad(adj, ((0, pad), (0, 0), (0, 0)))

    # Hoisted once: 0/1 mask matching masked_fill(adj == 0) semantics.
    mask = (adj != 0).astype(jnp.float32)                          # (B_p, V, V)

    nodes_flat = nodes.reshape(B_p * V, Fv)
    edges_flat = edges.astype(jnp.bfloat16).reshape(B_p * V, V * Fe)   # lane-packed
    mask_small = mask.astype(jnp.bfloat16).reshape(B_p * V, V)

    # Block-diagonal per-step mask for the neighbor sum: (G, M, M).
    mask_g = mask.reshape(G, Bblk, V, V)
    eye = jnp.eye(Bblk, dtype=jnp.float32)
    mask_bd = (mask_g[:, :, :, None, :] * eye[None, :, None, :, None]
               ).reshape(G, M, M).astype(jnp.bfloat16)

    # Lane-expansion selector R[w, w*Fe+f] = 1  (mask -> packed-edge mask via MXU).
    R = jnp.repeat(jnp.eye(V, dtype=jnp.float32), Fe, axis=1).astype(jnp.bfloat16)  # (V, V*Fe)
    # Row-tiled edge weight so pe_all = masked_edges_packed @ w2e_tiled.
    w2e_t = jnp.tile(params["w2e"], (V, 1))                         # (V*Fe, L*Hd*H) bf16

    plist = [params[k] for k in _PARAM_ORDER]

    def _block_rows(width):
        return pl.BlockSpec((M, width), lambda i: (i, 0))

    def _replicated(a):
        zeros = (0,) * a.ndim
        return pl.BlockSpec(a.shape, lambda i, z=zeros: z)

    in_specs = [
        _block_rows(Fv),                                            # nodes_flat
        _block_rows(V * Fe),                                        # edges_flat (bf16)
        _block_rows(V),                                             # mask_small (bf16)
        pl.BlockSpec((pl.Squeezed(), M, M), lambda i: (i, 0, 0)),   # mask_bd (bf16)
        _replicated(R),
        _replicated(w2e_t),
    ] + [_replicated(a) for a in plist]

    out_flat = pl.pallas_call(
        mpnn_kernel,
        out_shape=jax.ShapeDtypeStruct((B_p * V, Fv), jnp.float32),
        grid=(G,),
        in_specs=in_specs,
        out_specs=_block_rows(Fv),
        compiler_params=pltpu.CompilerParams(
            dimension_semantics=("parallel",),
            vmem_limit_bytes=32 * 1024 * 1024),
    )(nodes_flat, edges_flat, mask_small, mask_bd, R, w2e_t, *plist)

    return out_flat.reshape(B_p, V, Fv)[:B]


# ---------------------------------------------------------------------------
# Parameter init (deterministic, PyTorch-style uniform bounds), stored in the
# fused / head-packed layouts the kernel consumes.  Weights bf16, biases f32.
# ---------------------------------------------------------------------------
def init_params(key, node_size, edge_size, hidden_size, n_head, n_layer):
    Fv, Fe, H, L, Hd = node_size, edge_size, hidden_size, n_layer, n_head
    wdt = jnp.bfloat16

    b1_ = 1.0 / math.sqrt(Fv)             # linear1
    b2_ = 1.0 / math.sqrt(2 * Fv + Fe)    # linear2 (over concat width)
    bg_ = 1.0 / math.sqrt(Fv)             # GRUCell (hidden = node_size)
    bl_ = 1.0 / math.sqrt(Fv * Hd)        # head-combine linear

    def u(k, shape, bound):
        return jax.random.uniform(k, shape, jnp.float32, -bound, bound)

    keys = iter(jax.random.split(key, 20))

    # --- Pair_Message linear1, heads packed along lanes ---
    w1 = u(next(keys), (L, Hd, Fv, Fv), b1_)
    b1 = u(next(keys), (L, Hd, 1, Fv), b1_)
    w1_all = jnp.transpose(w1, (0, 2, 1, 3)).reshape(L, Fv, Hd * Fv).astype(wdt)
    b1_all = jnp.transpose(b1, (0, 2, 1, 3)).reshape(L, 1, Hd * Fv)

    # --- Pair_Message linear2 split: target (v) / neighbor (w) / edge parts ---
    w2v = u(next(keys), (L, Hd, Fv, H), b2_)
    w2w = u(next(keys), (L, Hd, Fv, H), b2_)
    w2e = u(next(keys), (L, Hd, Fe, H), b2_)
    b2 = u(next(keys), (L, Hd, 1, H), b2_)
    # Head-block-diagonal RHS producing [pv_0..pv_{Hd-1} | pw_0..pw_{Hd-1}].
    w2vw = jnp.zeros((L, Hd * Fv, 2 * Hd * H), jnp.float32)
    for h in range(Hd):
        w2vw = w2vw.at[:, h * Fv:(h + 1) * Fv, h * H:(h + 1) * H].set(w2v[:, h])
        w2vw = w2vw.at[:, h * Fv:(h + 1) * Fv,
                       Hd * H + h * H:Hd * H + (h + 1) * H].set(w2w[:, h])
    w2vw = w2vw.astype(wdt)
    b2_all = jnp.transpose(b2, (0, 2, 1, 3)).reshape(L, 1, Hd * H)
    # Edge weight packed across all layers/heads: (Fe, L*Hd*H).
    w2e_all = jnp.transpose(w2e, (2, 0, 1, 3)).reshape(Fe, L * Hd * H).astype(wdt)

    # --- GRUCell: input gates fused per head, hidden gates fused + head-packed ---
    wir = u(next(keys), (L, Hd, H, Fv), bg_)
    wiz = u(next(keys), (L, Hd, H, Fv), bg_)
    win = u(next(keys), (L, Hd, H, Fv), bg_)
    bir = u(next(keys), (L, Hd, 1, Fv), bg_)
    biz = u(next(keys), (L, Hd, 1, Fv), bg_)
    bin_ = u(next(keys), (L, Hd, 1, Fv), bg_)
    whr = u(next(keys), (L, Hd, Fv, Fv), bg_)
    whz = u(next(keys), (L, Hd, Fv, Fv), bg_)
    whn = u(next(keys), (L, Hd, Fv, Fv), bg_)
    bhr = u(next(keys), (L, Hd, 1, Fv), bg_)
    bhz = u(next(keys), (L, Hd, 1, Fv), bg_)
    bhn = u(next(keys), (L, Hd, 1, Fv), bg_)
    wi = jnp.concatenate([wir, wiz, win], axis=-1).astype(wdt)        # (L, Hd, H, 3*Fv)
    bi = jnp.concatenate([bir, biz, bin_], axis=-1)                   # (L, Hd, 1, 3*Fv)
    wh = jnp.concatenate([whr, whz, whn], axis=-1)                    # (L, Hd, Fv, 3*Fv)
    wh_all = jnp.transpose(wh, (0, 2, 1, 3)).reshape(L, Fv, Hd * 3 * Fv).astype(wdt)
    bh = jnp.concatenate([bhr, bhz, bhn], axis=-1)
    bh_all = jnp.transpose(bh, (0, 2, 1, 3)).reshape(L, 1, Hd * 3 * Fv)

    # --- head-combine linear (row-split per head) ---
    wc = u(next(keys), (L, Hd, Fv, Fv), bl_).astype(wdt)
    bc = u(next(keys), (L, 1, Fv), bl_)

    return {"w1": w1_all, "b1": b1_all, "w2vw": w2vw, "b2": b2_all, "w2e": w2e_all,
            "wi": wi, "bi": bi, "wh": wh_all, "bh": bh_all, "wc": wc, "bc": bc}


if __name__ == "__main__":
    # node_size=32, edge_size=16, hidden_size=32, n_head=2, n_layer=2, dropout=0.0
    # B=32 graphs of V=8 nodes -> Bblk=16 (M=128 rows per step), grid=(2,).
    B, V, Fv, Fe, H, n_head, n_layer = 32, 8, 32, 16, 32, 2, 2

    key = jax.random.PRNGKey(0)
    kn, ke, ka, kp = jax.random.split(key, 4)
    nodes = jax.random.normal(kn, (B, V, Fv), jnp.float32)
    edges = jax.random.normal(ke, (B, V, V, Fe), jnp.float32)
    adj = (jax.random.uniform(ka, (B, V, V)) > 0.5).astype(jnp.float32)

    params = init_params(kp, Fv, Fe, H, n_head, n_layer)

    out = mpnn_forward(nodes, edges, adj, params)
    out = jax.block_until_ready(out)
    assert out.shape == (B, V, Fv), out.shape
    assert bool(jnp.all(jnp.isfinite(out)))
    print("KERNEL_OK")
</pallas_src>

<mosaic_0001>
module attributes {stable_mosaic.version = 11 : i64} {
  func.func @mpnn_kernel(%arg0: i32, %arg1: memref<128x32xf32, #tpu.memory_space<vmem>>, %arg2: memref<128x128xbf16, #tpu.memory_space<vmem>>, %arg3: memref<128x8xbf16, #tpu.memory_space<vmem>>, %arg4: memref<1x128x128xbf16, #tpu.memory_space<vmem>>, %arg5: memref<8x128xbf16, #tpu.memory_space<vmem>>, %arg6: memref<128x128xbf16, #tpu.memory_space<vmem>>, %arg7: memref<2x32x64xbf16, #tpu.memory_space<vmem>>, %arg8: memref<2x1x64xf32, #tpu.memory_space<vmem>>, %arg9: memref<2x64x128xbf16, #tpu.memory_space<vmem>>, %arg10: memref<2x1x64xf32, #tpu.memory_space<vmem>>, %arg11: memref<2x2x32x96xbf16, #tpu.memory_space<vmem>>, %arg12: memref<2x2x1x96xf32, #tpu.memory_space<vmem>>, %arg13: memref<2x32x192xbf16, #tpu.memory_space<vmem>>, %arg14: memref<2x1x192xf32, #tpu.memory_space<vmem>>, %arg15: memref<2x2x32x32xbf16, #tpu.memory_space<vmem>>, %arg16: memref<2x1x32xf32, #tpu.memory_space<vmem>>, %arg17: memref<128x32xf32, #tpu.memory_space<vmem>>) attributes {dimension_semantics = [#tpu.dimension_semantics<parallel>], iteration_bounds = array<i64: 2>, scalar_prefetch = 0 : i64, scratch_operands = 0 : i64, tpu.core_type = #tpu.core_type<tc>, window_params = [{transform_indices = @transform_0, window_bounds = array<i64: 128, 32>}, {transform_indices = @transform_1, window_bounds = array<i64: 128, 128>}, {transform_indices = @transform_2, window_bounds = array<i64: 128, 8>}, {transform_indices = @transform_3, window_bounds = array<i64: 1, 128, 128>}, {pipeline_mode = #tpu.pipeline_mode<synchronous>, transform_indices = @transform_4, window_bounds = array<i64: 8, 128>}, {pipeline_mode = #tpu.pipeline_mode<synchronous>, transform_indices = @transform_5, window_bounds = array<i64: 128, 128>}, {pipeline_mode = #tpu.pipeline_mode<synchronous>, transform_indices = @transform_6, window_bounds = array<i64: 2, 32, 64>}, {pipeline_mode = #tpu.pipeline_mode<synchronous>, transform_indices = @transform_7, window_bounds = array<i64: 2, 1, 64>}, {pipeline_mode = #tpu.pipeline_mode<synchronous>, transform_indices = @transform_8, window_bounds = array<i64: 2, 64, 128>}, {pipeline_mode = #tpu.pipeline_mode<synchronous>, transform_indices = @transform_9, window_bounds = array<i64: 2, 1, 64>}, {pipeline_mode = #tpu.pipeline_mode<synchronous>, transform_indices = @transform_10, window_bounds = array<i64: 2, 2, 32, 96>}, {pipeline_mode = #tpu.pipeline_mode<synchronous>, transform_indices = @transform_11, window_bounds = array<i64: 2, 2, 1, 96>}, {pipeline_mode = #tpu.pipeline_mode<synchronous>, transform_indices = @transform_12, window_bounds = array<i64: 2, 32, 192>}, {pipeline_mode = #tpu.pipeline_mode<synchronous>, transform_indices = @transform_13, window_bounds = array<i64: 2, 1, 192>}, {pipeline_mode = #tpu.pipeline_mode<synchronous>, transform_indices = @transform_14, window_bounds = array<i64: 2, 2, 32, 32>}, {pipeline_mode = #tpu.pipeline_mode<synchronous>, transform_indices = @transform_15, window_bounds = array<i64: 2, 1, 32>}, {transform_indices = @transform_16, window_bounds = array<i64: 128, 32>}]} {
    %c0 = arith.constant 0 : index
    %c0_0 = arith.constant 0 : index
    %0 = vector.load %arg3[%c0, %c0_0] : memref<128x8xbf16, #tpu.memory_space<vmem>>, vector<128x8xbf16>
    %1 = arith.extf %0 : vector<128x8xbf16> to vector<128x8xf32>
    %cst = arith.constant dense<0.000000e+00> : vector<128xf32>
    %2 = vector.multi_reduction <add>, %1, %cst [1] : vector<128x8xf32> to vector<128xf32>
    %3 = vector.shape_cast %2 : vector<128xf32> to vector<128x1xf32>
    %c0_1 = arith.constant 0 : index
    %c0_2 = arith.constant 0 : index
    %4 = vector.load %arg5[%c0_1, %c0_2] : memref<8x128xbf16, #tpu.memory_space<vmem>>, vector<8x128xbf16>
    %cst_3 = arith.constant dense<0.000000e+00> : vector<128x128xf32>
    %5 = tpu.matmul %0, %4, %cst_3 {dimension_numbers = #tpu.dot_dimension_numbers<[1], [0], [0], [1], [0, 0, 1, 1], [], []>} : vector<128x8xbf16>, vector<8x128xbf16>, vector<128x128xf32> -> vector<128x128xf32>
    %6 = arith.truncf %5 : vector<128x128xf32> to vector<128x128xbf16>
    %c0_4 = arith.constant 0 : index
    %c0_5 = arith.constant 0 : index
    %7 = vector.load %arg2[%c0_4, %c0_5] : memref<128x128xbf16, #tpu.memory_space<vmem>>, vector<128x128xbf16>
    %8 = arith.mulf %6, %7 : vector<128x128xbf16>
    %c0_6 = arith.constant 0 : index
    %c0_7 = arith.constant 0 : index
    %9 = vector.load %arg6[%c0_6, %c0_7] : memref<128x128xbf16, #tpu.memory_space<vmem>>, vector<128x128xbf16>
    %cst_8 = arith.constant dense<0.000000e+00> : vector<128x128xf32>
    %10 = tpu.matmul %8, %9, %cst_8 {dimension_numbers = #tpu.dot_dimension_numbers<[1], [0], [0], [1], [0, 0, 1, 1], [], []>} : vector<128x128xbf16>, vector<128x128xbf16>, vector<128x128xf32> -> vector<128x128xf32>
    %c0_9 = arith.constant 0 : index
    %c0_10 = arith.constant 0 : index
    %c0_11 = arith.constant 0 : index
    %11 = vector.load %arg4[%c0_9, %c0_10, %c0_11] : memref<1x128x128xbf16, #tpu.memory_space<vmem>>, vector<1x128x128xbf16>
    %12 = vector.shape_cast %11 : vector<1x128x128xbf16> to vector<128x128xbf16>
    %c0_12 = arith.constant 0 : index
    %c0_13 = arith.constant 0 : index
    %13 = vector.load %arg1[%c0_12, %c0_13] : memref<128x32xf32, #tpu.memory_space<vmem>>, vector<128x32xf32>
    %14 = arith.truncf %13 : vector<128x32xf32> to vector<128x32xbf16>
    %c0_14 = arith.constant 0 : index
    %c0_15 = arith.constant 0 : index
    %c0_16 = arith.constant 0 : index
    %15 = vector.load %arg7[%c0_14, %c0_15, %c0_16] : memref<2x32x64xbf16, #tpu.memory_space<vmem>>, vector<1x32x64xbf16>
    %16 = vector.shape_cast %15 : vector<1x32x64xbf16> to vector<32x64xbf16>
    %cst_17 = arith.constant dense<0.000000e+00> : vector<128x64xf32>
    %17 = tpu.matmul %14, %16, %cst_17 {dimension_numbers = #tpu.dot_dimension_numbers<[1], [0], [0], [1], [0, 0, 1, 1], [], []>} : vector<128x32xbf16>, vector<32x64xbf16>, vector<128x64xf32> -> vector<128x64xf32>
    %c0_18 = arith.constant 0 : index
    %c0_19 = arith.constant 0 : index
    %c0_20 = arith.constant 0 : index
    %18 = vector.load %arg8[%c0_18, %c0_19, %c0_20] : memref<2x1x64xf32, #tpu.memory_space<vmem>>, vector<1x1x64xf32>
    %19 = vector.shape_cast %18 : vector<1x1x64xf32> to vector<1x64xf32>
    %20 = vector.broadcast %19 : vector<1x64xf32> to vector<128x64xf32>
    %21 = arith.addf %17, %20 : vector<128x64xf32>
    %22 = arith.truncf %21 : vector<128x64xf32> to vector<128x64xbf16>
    %c0_21 = arith.constant 0 : index
    %c0_22 = arith.constant 0 : index
    %c0_23 = arith.constant 0 : index
    %23 = vector.load %arg9[%c0_21, %c0_22, %c0_23] : memref<2x64x128xbf16, #tpu.memory_space<vmem>>, vector<1x64x128xbf16>
    %24 = vector.shape_cast %23 : vector<1x64x128xbf16> to vector<64x128xbf16>
    %cst_24 = arith.constant dense<0.000000e+00> : vector<128x128xf32>
    %25 = tpu.matmul %22, %24, %cst_24 {dimension_numbers = #tpu.dot_dimension_numbers<[1], [0], [0], [1], [0, 0, 1, 1], [], []>} : vector<128x64xbf16>, vector<64x128xbf16>, vector<128x128xf32> -> vector<128x128xf32>
    %26 = vector.extract_strided_slice %25 {offsets = [0, 64], sizes = [128, 64], strides = [1, 1]} : vector<128x128xf32> to vector<128x64xf32>
    %27 = arith.truncf %26 : vector<128x64xf32> to vector<128x64xbf16>
    %cst_25 = arith.constant dense<0.000000e+00> : vector<128x64xf32>
    %28 = tpu.matmul %12, %27, %cst_25 {dimension_numbers = #tpu.dot_dimension_numbers<[1], [0], [0], [1], [0, 0, 1, 1], [], []>} : vector<128x128xbf16>, vector<128x64xbf16>, vector<128x64xf32> -> vector<128x64xf32>
    %c0_26 = arith.constant 0 : index
    %c0_27 = arith.constant 0 : index
    %c0_28 = arith.constant 0 : index
    %29 = vector.load %arg13[%c0_26, %c0_27, %c0_28] : memref<2x32x192xbf16, #tpu.memory_space<vmem>>, vector<1x32x192xbf16>
    %30 = vector.shape_cast %29 : vector<1x32x192xbf16> to vector<32x192xbf16>
    %cst_29 = arith.constant dense<0.000000e+00> : vector<128x192xf32>
    %31 = tpu.matmul %14, %30, %cst_29 {dimension_numbers = #tpu.dot_dimension_numbers<[1], [0], [0], [1], [0, 0, 1, 1], [], []>} : vector<128x32xbf16>, vector<32x192xbf16>, vector<128x192xf32> -> vector<128x192xf32>
    %c0_30 = arith.constant 0 : index
    %c0_31 = arith.constant 0 : index
    %c0_32 = arith.constant 0 : index
    %32 = vector.load %arg14[%c0_30, %c0_31, %c0_32] : memref<2x1x192xf32, #tpu.memory_space<vmem>>, vector<1x1x192xf32>
    %33 = vector.shape_cast %32 : vector<1x1x192xf32> to vector<1x192xf32>
    %34 = vector.broadcast %33 : vector<1x192xf32> to vector<128x192xf32>
    %35 = arith.addf %31, %34 : vector<128x192xf32>
    %c0_33 = arith.constant 0 : index
    %c0_34 = arith.constant 0 : index
    %c0_35 = arith.constant 0 : index
    %36 = vector.load %arg10[%c0_33, %c0_34, %c0_35] : memref<2x1x64xf32, #tpu.memory_space<vmem>>, vector<1x1x64xf32>
    %37 = vector.shape_cast %36 : vector<1x1x64xf32> to vector<1x64xf32>
    %c0_36 = arith.constant 0 : index
    %c0_37 = arith.constant 0 : index
    %c0_38 = arith.constant 0 : index
    %38 = vector.load %arg16[%c0_36, %c0_37, %c0_38] : memref<2x1x32xf32, #tpu.memory_space<vmem>>, vector<1x1x32xf32>
    %39 = vector.shape_cast %38 : vector<1x1x32xf32> to vector<1x32xf32>
    %40 = vector.extract_strided_slice %25 {offsets = [0, 0], sizes = [128, 32], strides = [1, 1]} : vector<128x128xf32> to vector<128x32xf32>
    %41 = vector.extract_strided_slice %28 {offsets = [0, 0], sizes = [128, 32], strides = [1, 1]} : vector<128x64xf32> to vector<128x32xf32>
    %42 = vector.extract_strided_slice %10 {offsets = [0, 0], sizes = [128, 32], strides = [1, 1]} : vector<128x128xf32> to vector<128x32xf32>
    %43 = vector.extract_strided_slice %37 {offsets = [0, 0], sizes = [1, 32], strides = [1, 1]} : vector<1x64xf32> to vector<1x32xf32>
    %44 = vector.broadcast %43 : vector<1x32xf32> to vector<128x32xf32>
    %45 = arith.addf %40, %44 : vector<128x32xf32>
    %46 = vector.broadcast %3 : vector<128x1xf32> to vector<128x32xf32>
    %47 = arith.mulf %46, %45 : vector<128x32xf32>
    %48 = arith.addf %47, %41 : vector<128x32xf32>
    %49 = arith.addf %48, %42 : vector<128x32xf32>
    %cst_39 = arith.constant 0.000000e+00 : f32
    %50 = vector.broadcast %cst_39 : f32 to vector<128x32xf32>
    %51 = arith.maximumf %49, %50 : vector<128x32xf32>
    %52 = arith.truncf %51 : vector<128x32xf32> to vector<128x32xbf16>
    %c0_40 = arith.constant 0 : index
    %c0_41 = arith.constant 0 : index
    %c0_42 = arith.constant 0 : index
    %c0_43 = arith.constant 0 : index
    %53 = vector.load %arg11[%c0_40, %c0_41, %c0_42, %c0_43] : memref<2x2x32x96xbf16, #tpu.memory_space<vmem>>, vector<1x1x32x96xbf16>
    %54 = vector.shape_cast %53 : vector<1x1x32x96xbf16> to vector<32x96xbf16>
    %cst_44 = arith.constant dense<0.000000e+00> : vector<128x96xf32>
    %55 = tpu.matmul %52, %54, %cst_44 {dimension_numbers = #tpu.dot_dimension_numbers<[1], [0], [0], [1], [0, 0, 1, 1], [], []>} : vector<128x32xbf16>, vector<32x96xbf16>, vector<128x96xf32> -> vector<128x96xf32>
    %c0_45 = arith.constant 0 : index
    %c0_46 = arith.constant 0 : index
    %c0_47 = arith.constant 0 : index
    %c0_48 = arith.constant 0 : index
    %56 = vector.load %arg12[%c0_45, %c0_46, %c0_47, %c0_48] : memref<2x2x1x96xf32, #tpu.memory_space<vmem>>, vector<1x1x1x96xf32>
    %57 = vector.shape_cast %56 : vector<1x1x1x96xf32> to vector<1x96xf32>
    %58 = vector.broadcast %57 : vector<1x96xf32> to vector<128x96xf32>
    %59 = arith.addf %55, %58 : vector<128x96xf32>
    %60 = vector.extract_strided_slice %35 {offsets = [0, 0], sizes = [128, 96], strides = [1, 1]} : vector<128x192xf32> to vector<128x96xf32>
    %61 = vector.extract_strided_slice %59 {offsets = [0, 0], sizes = [128, 32], strides = [1, 1]} : vector<128x96xf32> to vector<128x32xf32>
    %62 = vector.extract_strided_slice %60 {offsets = [0, 0], sizes = [128, 32], strides = [1, 1]} : vector<128x96xf32> to vector<128x32xf32>
    %63 = arith.addf %61, %62 : vector<128x32xf32>
    %64 = arith.negf %63 : vector<128x32xf32>
    %65 = math.exp %64 : vector<128x32xf32>
    %cst_49 = arith.constant 1.000000e+00 : f32
    %66 = vector.broadcast %cst_49 : f32 to vector<128x32xf32>
    %67 = arith.addf %66, %65 : vector<128x32xf32>
    %68 = arith.divf %66, %67 : vector<128x32xf32>
    %69 = vector.extract_strided_slice %59 {offsets = [0, 32], sizes = [128, 32], strides = [1, 1]} : vector<128x96xf32> to vector<128x32xf32>
    %70 = vector.extract_strided_slice %60 {offsets = [0, 32], sizes = [128, 32], strides = [1, 1]} : vector<128x96xf32> to vector<128x32xf32>
    %71 = arith.addf %69, %70 : vector<128x32xf32>
    %72 = arith.negf %71 : vector<128x32xf32>
    %73 = math.exp %72 : vector<128x32xf32>
    %cst_50 = arith.constant 1.000000e+00 : f32
    %74 = vector.broadcast %cst_50 : f32 to vector<128x32xf32>
    %75 = arith.addf %74, %73 : vector<128x32xf32>
    %76 = arith.divf %74, %75 : vector<128x32xf32>
    %77 = vector.extract_strided_slice %59 {offsets = [0, 64], sizes = [128, 32], strides = [1, 1]} : vector<128x96xf32> to vector<128x32xf32>
    %78 = vector.extract_strided_slice %60 {offsets = [0, 64], sizes = [128, 32], strides = [1, 1]} : vector<128x96xf32> to vector<128x32xf32>
    %79 = arith.mulf %68, %78 : vector<128x32xf32>
    %80 = arith.addf %77, %79 : vector<128x32xf32>
    %81 = math.tanh %80 : vector<128x32xf32>
    %cst_51 = arith.constant 1.000000e+00 : f32
    %82 = vector.broadcast %cst_51 : f32 to vector<128x32xf32>
    %83 = arith.subf %82, %76 : vector<128x32xf32>
    %84 = arith.mulf %83, %81 : vector<128x32xf32>
    %85 = arith.mulf %76, %13 : vector<128x32xf32>
    %86 = arith.addf %84, %85 : vector<128x32xf32>
    %cst_52 = arith.constant 0.000000e+00 : f32
    %87 = vector.broadcast %cst_52 : f32 to vector<128x32xf32>
    %88 = arith.maximumf %86, %87 : vector<128x32xf32>
    %89 = arith.truncf %88 : vector<128x32xf32> to vector<128x32xbf16>
    %c0_53 = arith.constant 0 : index
    %c0_54 = arith.constant 0 : index
    %c0_55 = arith.constant 0 : index
    %c0_56 = arith.constant 0 : index
    %90 = vector.load %arg15[%c0_53, %c0_54, %c0_55, %c0_56] : memref<2x2x32x32xbf16, #tpu.memory_space<vmem>>, vector<1x1x32x32xbf16>
    %91 = vector.shape_cast %90 : vector<1x1x32x32xbf16> to vector<32x32xbf16>
    %cst_57 = arith.constant dense<0.000000e+00> : vector<128x32xf32>
    %92 = tpu.matmul %89, %91, %cst_57 {dimension_numbers = #tpu.dot_dimension_numbers<[1], [0], [0], [1], [0, 0, 1, 1], [], []>} : vector<128x32xbf16>, vector<32x32xbf16>, vector<128x32xf32> -> vector<128x32xf32>
    %93 = vector.broadcast %39 : vector<1x32xf32> to vector<128x32xf32>
    %94 = arith.addf %93, %92 : vector<128x32xf32>
    %95 = vector.extract_strided_slice %25 {offsets = [0, 32], sizes = [128, 32], strides = [1, 1]} : vector<128x128xf32> to vector<128x32xf32>
    %96 = vector.extract_strided_slice %28 {offsets = [0, 32], sizes = [128, 32], strides = [1, 1]} : vector<128x64xf32> to vector<128x32xf32>
    %97 = vector.extract_strided_slice %10 {offsets = [0, 32], sizes = [128, 32], strides = [1, 1]} : vector<128x128xf32> to vector<128x32xf32>
    %98 = vector.extract_strided_slice %37 {offsets = [0, 32], sizes = [1, 32], strides = [1, 1]} : vector<1x64xf32> to vector<1x32xf32>
    %99 = vector.broadcast %98 : vector<1x32xf32> to vector<128x32xf32>
    %100 = arith.addf %95, %99 : vector<128x32xf32>
    %101 = vector.broadcast %3 : vector<128x1xf32> to vector<128x32xf32>
    %102 = arith.mulf %101, %100 : vector<128x32xf32>
    %103 = arith.addf %102, %96 : vector<128x32xf32>
    %104 = arith.addf %103, %97 : vector<128x32xf32>
    %cst_58 = arith.constant 0.000000e+00 : f32
    %105 = vector.broadcast %cst_58 : f32 to vector<128x32xf32>
    %106 = arith.maximumf %104, %105 : vector<128x32xf32>
    %107 = arith.truncf %106 : vector<128x32xf32> to vector<128x32xbf16>
    %c0_59 = arith.constant 0 : index
    %c1 = arith.constant 1 : index
    %c0_60 = arith.constant 0 : index
    %c0_61 = arith.constant 0 : index
    %108 = vector.load %arg11[%c0_59, %c1, %c0_60, %c0_61] : memref<2x2x32x96xbf16, #tpu.memory_space<vmem>>, vector<1x1x32x96xbf16>
    %109 = vector.shape_cast %108 : vector<1x1x32x96xbf16> to vector<32x96xbf16>
    %cst_62 = arith.constant dense<0.000000e+00> : vector<128x96xf32>
    %110 = tpu.matmul %107, %109, %cst_62 {dimension_numbers = #tpu.dot_dimension_numbers<[1], [0], [0], [1], [0, 0, 1, 1], [], []>} : vector<128x32xbf16>, vector<32x96xbf16>, vector<128x96xf32> -> vector<128x96xf32>
    %c0_63 = arith.constant 0 : index
    %c1_64 = arith.constant 1 : index
    %c0_65 = arith.constant 0 : index
    %c0_66 = arith.constant 0 : index
    %111 = vector.load %arg12[%c0_63, %c1_64, %c0_65, %c0_66] : memref<2x2x1x96xf32, #tpu.memory_space<vmem>>, vector<1x1x1x96xf32>
    %112 = vector.shape_cast %111 : vector<1x1x1x96xf32> to vector<1x96xf32>
    %113 = vector.broadcast %112 : vector<1x96xf32> to vector<128x96xf32>
    %114 = arith.addf %110, %113 : vector<128x96xf32>
    %115 = vector.extract_strided_slice %35 {offsets = [0, 96], sizes = [128, 96], strides = [1, 1]} : vector<128x192xf32> to vector<128x96xf32>
    %116 = vector.extract_strided_slice %114 {offsets = [0, 0], sizes = [128, 32], strides = [1, 1]} : vector<128x96xf32> to vector<128x32xf32>
    %117 = vector.extract_strided_slice %115 {offsets = [0, 0], sizes = [128, 32], strides = [1, 1]} : vector<128x96xf32> to vector<128x32xf32>
    %118 = arith.addf %116, %117 : vector<128x32xf32>
    %119 = arith.negf %118 : vector<128x32xf32>
    %120 = math.exp %119 : vector<128x32xf32>
    %cst_67 = arith.constant 1.000000e+00 : f32
    %121 = vector.broadcast %cst_67 : f32 to vector<128x32xf32>
    %122 = arith.addf %121, %120 : vector<128x32xf32>
    %123 = arith.divf %121, %122 : vector<128x32xf32>
    %124 = vector.extract_strided_slice %114 {offsets = [0, 32], sizes = [128, 32], strides = [1, 1]} : vector<128x96xf32> to vector<128x32xf32>
    %125 = vector.extract_strided_slice %115 {offsets = [0, 32], sizes = [128, 32], strides = [1, 1]} : vector<128x96xf32> to vector<128x32xf32>
    %126 = arith.addf %124, %125 : vector<128x32xf32>
    %127 = arith.negf %126 : vector<128x32xf32>
    %128 = math.exp %127 : vector<128x32xf32>
    %cst_68 = arith.constant 1.000000e+00 : f32
    %129 = vector.broadcast %cst_68 : f32 to vector<128x32xf32>
    %130 = arith.addf %129, %128 : vector<128x32xf32>
    %131 = arith.divf %129, %130 : vector<128x32xf32>
    %132 = vector.extract_strided_slice %114 {offsets = [0, 64], sizes = [128, 32], strides = [1, 1]} : vector<128x96xf32> to vector<128x32xf32>
    %133 = vector.extract_strided_slice %115 {offsets = [0, 64], sizes = [128, 32], strides = [1, 1]} : vector<128x96xf32> to vector<128x32xf32>
    %134 = arith.mulf %123, %133 : vector<128x32xf32>
    %135 = arith.addf %132, %134 : vector<128x32xf32>
    %136 = math.tanh %135 : vector<128x32xf32>
    %cst_69 = arith.constant 1.000000e+00 : f32
    %137 = vector.broadcast %cst_69 : f32 to vector<128x32xf32>
    %138 = arith.subf %137, %131 : vector<128x32xf32>
    %139 = arith.mulf %138, %136 : vector<128x32xf32>
    %140 = arith.mulf %131, %13 : vector<128x32xf32>
    %141 = arith.addf %139, %140 : vector<128x32xf32>
    %cst_70 = arith.constant 0.000000e+00 : f32
    %142 = vector.broadcast %cst_70 : f32 to vector<128x32xf32>
    %143 = arith.maximumf %141, %142 : vector<128x32xf32>
    %144 = arith.truncf %143 : vector<128x32xf32> to vector<128x32xbf16>
    %c0_71 = arith.constant 0 : index
    %c1_72 = arith.constant 1 : index
    %c0_73 = arith.constant 0 : index
    %c0_74 = arith.constant 0 : index
    %145 = vector.load %arg15[%c0_71, %c1_72, %c0_73, %c0_74] : memref<2x2x32x32xbf16, #tpu.memory_space<vmem>>, vector<1x1x32x32xbf16>
    %146 = vector.shape_cast %145 : vector<1x1x32x32xbf16> to vector<32x32xbf16>
    %cst_75 = arith.constant dense<0.000000e+00> : vector<128x32xf32>
    %147 = tpu.matmul %144, %146, %cst_75 {dimension_numbers = #tpu.dot_dimension_numbers<[1], [0], [0], [1], [0, 0, 1, 1], [], []>} : vector<128x32xbf16>, vector<32x32xbf16>, vector<128x32xf32> -> vector<128x32xf32>
    %148 = arith.addf %94, %147 : vector<128x32xf32>
    %149 = arith.addf %13, %148 : vector<128x32xf32>
    %150 = arith.truncf %149 : vector<128x32xf32> to vector<128x32xbf16>
    %c1_76 = arith.constant 1 : index
    %c0_77 = arith.constant 0 : index
    %c0_78 = arith.constant 0 : index
    %151 = vector.load %arg7[%c1_76, %c0_77, %c0_78] : memref<2x32x64xbf16, #tpu.memory_space<vmem>>, vector<1x32x64xbf16>
    %152 = vector.shape_cast %151 : vector<1x32x64xbf16> to vector<32x64xbf16>
    %cst_79 = arith.constant dense<0.000000e+00> : vector<128x64xf32>
    %153 = tpu.matmul %150, %152, %cst_79 {dimension_numbers = #tpu.dot_dimension_numbers<[1], [0], [0], [1], [0, 0, 1, 1], [], []>} : vector<128x32xbf16>, vector<32x64xbf16>, vector<128x64xf32> -> vector<128x64xf32>
    %c1_80 = arith.constant 1 : index
    %c0_81 = arith.constant 0 : index
    %c0_82 = arith.constant 0 : index
    %154 = vector.load %arg8[%c1_80, %c0_81, %c0_82] : memref<2x1x64xf32, #tpu.memory_space<vmem>>, vector<1x1x64xf32>
    %155 = vector.shape_cast %154 : vector<1x1x64xf32> to vector<1x64xf32>
    %156 = vector.broadcast %155 : vector<1x64xf32> to vector<128x64xf32>
    %157 = arith.addf %153, %156 : vector<128x64xf32>
    %158 = arith.truncf %157 : vector<128x64xf32> to vector<128x64xbf16>
    %c1_83 = arith.constant 1 : index
    %c0_84 = arith.constant 0 : index
    %c0_85 = arith.constant 0 : index
    %159 = vector.load %arg9[%c1_83, %c0_84, %c0_85] : memref<2x64x128xbf16, #tpu.memory_space<vmem>>, vector<1x64x128xbf16>
    %160 = vector.shape_cast %159 : vector<1x64x128xbf16> to vector<64x128xbf16>
    %cst_86 = arith.constant dense<0.000000e+00> : vector<128x128xf32>
    %161 = tpu.matmul %158, %160, %cst_86 {dimension_numbers = #tpu.dot_dimension_numbers<[1], [0], [0], [1], [0, 0, 1, 1], [], []>} : vector<128x64xbf16>, vector<64x128xbf16>, vector<128x128xf32> -> vector<128x128xf32>
    %162 = vector.extract_strided_slice %161 {offsets = [0, 64], sizes = [128, 64], strides = [1, 1]} : vector<128x128xf32> to vector<128x64xf32>
    %163 = arith.truncf %162 : vector<128x64xf32> to vector<128x64xbf16>
    %cst_87 = arith.constant dense<0.000000e+00> : vector<128x64xf32>
    %164 = tpu.matmul %12, %163, %cst_87 {dimension_numbers = #tpu.dot_dimension_numbers<[1], [0], [0], [1], [0, 0, 1, 1], [], []>} : vector<128x128xbf16>, vector<128x64xbf16>, vector<128x64xf32> -> vector<128x64xf32>
    %c1_88 = arith.constant 1 : index
    %c0_89 = arith.constant 0 : index
    %c0_90 = arith.constant 0 : index
    %165 = vector.load %arg13[%c1_88, %c0_89, %c0_90] : memref<2x32x192xbf16, #tpu.memory_space<vmem>>, vector<1x32x192xbf16>
    %166 = vector.shape_cast %165 : vector<1x32x192xbf16> to vector<32x192xbf16>
    %cst_91 = arith.constant dense<0.000000e+00> : vector<128x192xf32>
    %167 = tpu.matmul %150, %166, %cst_91 {dimension_numbers = #tpu.dot_dimension_numbers<[1], [0], [0], [1], [0, 0, 1, 1], [], []>} : vector<128x32xbf16>, vector<32x192xbf16>, vector<128x192xf32> -> vector<128x192xf32>
    %c1_92 = arith.constant 1 : index
    %c0_93 = arith.constant 0 : index
    %c0_94 = arith.constant 0 : index
    %168 = vector.load %arg14[%c1_92, %c0_93, %c0_94] : memref<2x1x192xf32, #tpu.memory_space<vmem>>, vector<1x1x192xf32>
    %169 = vector.shape_cast %168 : vector<1x1x192xf32> to vector<1x192xf32>
    %170 = vector.broadcast %169 : vector<1x192xf32> to vector<128x192xf32>
    %171 = arith.addf %167, %170 : vector<128x192xf32>
    %c1_95 = arith.constant 1 : index
    %c0_96 = arith.constant 0 : index
    %c0_97 = arith.constant 0 : index
    %172 = vector.load %arg10[%c1_95, %c0_96, %c0_97] : memref<2x1x64xf32, #tpu.memory_space<vmem>>, vector<1x1x64xf32>
    %173 = vector.shape_cast %172 : vector<1x1x64xf32> to vector<1x64xf32>
    %c1_98 = arith.constant 1 : index
    %c0_99 = arith.constant 0 : index
    %c0_100 = arith.constant 0 : index
    %174 = vector.load %arg16[%c1_98, %c0_99, %c0_100] : memref<2x1x32xf32, #tpu.memory_space<vmem>>, vector<1x1x32xf32>
    %175 = vector.shape_cast %174 : vector<1x1x32xf32> to vector<1x32xf32>
    %176 = vector.extract_strided_slice %161 {offsets = [0, 0], sizes = [128, 32], strides = [1, 1]} : vector<128x128xf32> to vector<128x32xf32>
    %177 = vector.extract_strided_slice %164 {offsets = [0, 0], sizes = [128, 32], strides = [1, 1]} : vector<128x64xf32> to vector<128x32xf32>
    %178 = vector.extract_strided_slice %10 {offsets = [0, 64], sizes = [128, 32], strides = [1, 1]} : vector<128x128xf32> to vector<128x32xf32>
    %179 = vector.extract_strided_slice %173 {offsets = [0, 0], sizes = [1, 32], strides = [1, 1]} : vector<1x64xf32> to vector<1x32xf32>
    %180 = vector.broadcast %179 : vector<1x32xf32> to vector<128x32xf32>
    %181 = arith.addf %176, %180 : vector<128x32xf32>
    %182 = vector.broadcast %3 : vector<128x1xf32> to vector<128x32xf32>
    %183 = arith.mulf %182, %181 : vector<128x32xf32>
    %184 = arith.addf %183, %177 : vector<128x32xf32>
    %185 = arith.addf %184, %178 : vector<128x32xf32>
    %cst_101 = arith.constant 0.000000e+00 : f32
    %186 = vector.broadcast %cst_101 : f32 to vector<128x32xf32>
    %187 = arith.maximumf %185, %186 : vector<128x32xf32>
    %188 = arith.truncf %187 : vector<128x32xf32> to vector<128x32xbf16>
    %c1_102 = arith.constant 1 : index
    %c0_103 = arith.constant 0 : index
    %c0_104 = arith.constant 0 : index
    %c0_105 = arith.constant 0 : index
    %189 = vector.load %arg11[%c1_102, %c0_103, %c0_104, %c0_105] : memref<2x2x32x96xbf16, #tpu.memory_space<vmem>>, vector<1x1x32x96xbf16>
    %190 = vector.shape_cast %189 : vector<1x1x32x96xbf16> to vector<32x96xbf16>
    %cst_106 = arith.constant dense<0.000000e+00> : vector<128x96xf32>
    %191 = tpu.matmul %188, %190, %cst_106 {dimension_numbers = #tpu.dot_dimension_numbers<[1], [0], [0], [1], [0, 0, 1, 1], [], []>} : vector<128x32xbf16>, vector<32x96xbf16>, vector<128x96xf32> -> vector<128x96xf32>
    %c1_107 = arith.constant 1 : index
    %c0_108 = arith.constant 0 : index
    %c0_109 = arith.constant 0 : index
    %c0_110 = arith.constant 0 : index
    %192 = vector.load %arg12[%c1_107, %c0_108, %c0_109, %c0_110] : memref<2x2x1x96xf32, #tpu.memory_space<vmem>>, vector<1x1x1x96xf32>
    %193 = vector.shape_cast %192 : vector<1x1x1x96xf32> to vector<1x96xf32>
    %194 = vector.broadcast %193 : vector<1x96xf32> to vector<128x96xf32>
    %195 = arith.addf %191, %194 : vector<128x96xf32>
    %196 = vector.extract_strided_slice %171 {offsets = [0, 0], sizes = [128, 96], strides = [1, 1]} : vector<128x192xf32> to vector<128x96xf32>
    %197 = vector.extract_strided_slice %195 {offsets = [0, 0], sizes = [128, 32], strides = [1, 1]} : vector<128x96xf32> to vector<128x32xf32>
    %198 = vector.extract_strided_slice %196 {offsets = [0, 0], sizes = [128, 32], strides = [1, 1]} : vector<128x96xf32> to vector<128x32xf32>
    %199 = arith.addf %197, %198 : vector<128x32xf32>
    %200 = arith.negf %199 : vector<128x32xf32>
    %201 = math.exp %200 : vector<128x32xf32>
    %cst_111 = arith.constant 1.000000e+00 : f32
    %202 = vector.broadcast %cst_111 : f32 to vector<128x32xf32>
    %203 = arith.addf %202, %201 : vector<128x32xf32>
    %204 = arith.divf %202, %203 : vector<128x32xf32>
    %205 = vector.extract_strided_slice %195 {offsets = [0, 32], sizes = [128, 32], strides = [1, 1]} : vector<128x96xf32> to vector<128x32xf32>
    %206 = vector.extract_strided_slice %196 {offsets = [0, 32], sizes = [128, 32], strides = [1, 1]} : vector<128x96xf32> to vector<128x32xf32>
    %207 = arith.addf %205, %206 : vector<128x32xf32>
    %208 = arith.negf %207 : vector<128x32xf32>
    %209 = math.exp %208 : vector<128x32xf32>
    %cst_112 = arith.constant 1.000000e+00 : f32
    %210 = vector.broadcast %cst_112 : f32 to vector<128x32xf32>
    %211 = arith.addf %210, %209 : vector<128x32xf32>
    %212 = arith.divf %210, %211 : vector<128x32xf32>
    %213 = vector.extract_strided_slice %195 {offsets = [0, 64], sizes = [128, 32], strides = [1, 1]} : vector<128x96xf32> to vector<128x32xf32>
    %214 = vector.extract_strided_slice %196 {offsets = [0, 64], sizes = [128, 32], strides = [1, 1]} : vector<128x96xf32> to vector<128x32xf32>
    %215 = arith.mulf %204, %214 : vector<128x32xf32>
    %216 = arith.addf %213, %215 : vector<128x32xf32>
    %217 = math.tanh %216 : vector<128x32xf32>
    %cst_113 = arith.constant 1.000000e+00 : f32
    %218 = vector.broadcast %cst_113 : f32 to vector<128x32xf32>
    %219 = arith.subf %218, %212 : vector<128x32xf32>
    %220 = arith.mulf %219, %217 : vector<128x32xf32>
    %221 = arith.mulf %212, %149 : vector<128x32xf32>
    %222 = arith.addf %220, %221 : vector<128x32xf32>
    %cst_114 = arith.constant 0.000000e+00 : f32
    %223 = vector.broadcast %cst_114 : f32 to vector<128x32xf32>
    %224 = arith.maximumf %222, %223 : vector<128x32xf32>
    %225 = arith.truncf %224 : vector<128x32xf32> to vector<128x32xbf16>
    %c1_115 = arith.constant 1 : index
    %c0_116 = arith.constant 0 : index
    %c0_117 = arith.constant 0 : index
    %c0_118 = arith.constant 0 : index
    %226 = vector.load %arg15[%c1_115, %c0_116, %c0_117, %c0_118] : memref<2x2x32x32xbf16, #tpu.memory_space<vmem>>, vector<1x1x32x32xbf16>
    %227 = vector.shape_cast %226 : vector<1x1x32x32xbf16> to vector<32x32xbf16>
    %cst_119 = arith.constant dense<0.000000e+00> : vector<128x32xf32>
    %228 = tpu.matmul %225, %227, %cst_119 {dimension_numbers = #tpu.dot_dimension_numbers<[1], [0], [0], [1], [0, 0, 1, 1], [], []>} : vector<128x32xbf16>, vector<32x32xbf16>, vector<128x32xf32> -> vector<128x32xf32>
    %229 = vector.broadcast %175 : vector<1x32xf32> to vector<128x32xf32>
    %230 = arith.addf %229, %228 : vector<128x32xf32>
    %231 = vector.extract_strided_slice %161 {offsets = [0, 32], sizes = [128, 32], strides = [1, 1]} : vector<128x128xf32> to vector<128x32xf32>
    %232 = vector.extract_strided_slice %164 {offsets = [0, 32], sizes = [128, 32], strides = [1, 1]} : vector<128x64xf32> to vector<128x32xf32>
    %233 = vector.extract_strided_slice %10 {offsets = [0, 96], sizes = [128, 32], strides = [1, 1]} : vector<128x128xf32> to vector<128x32xf32>
    %234 = vector.extract_strided_slice %173 {offsets = [0, 32], sizes = [1, 32], strides = [1, 1]} : vector<1x64xf32> to vector<1x32xf32>
    %235 = vector.broadcast %234 : vector<1x32xf32> to vector<128x32xf32>
    %236 = arith.addf %231, %235 : vector<128x32xf32>
    %237 = vector.broadcast %3 : vector<128x1xf32> to vector<128x32xf32>
    %238 = arith.mulf %237, %236 : vector<128x32xf32>
    %239 = arith.addf %238, %232 : vector<128x32xf32>
    %240 = arith.addf %239, %233 : vector<128x32xf32>
    %cst_120 = arith.constant 0.000000e+00 : f32
    %241 = vector.broadcast %cst_120 : f32 to vector<128x32xf32>
    %242 = arith.maximumf %240, %241 : vector<128x32xf32>
    %243 = arith.truncf %242 : vector<128x32xf32> to vector<128x32xbf16>
    %c1_121 = arith.constant 1 : index
    %c1_122 = arith.constant 1 : index
    %c0_123 = arith.constant 0 : index
    %c0_124 = arith.constant 0 : index
    %244 = vector.load %arg11[%c1_121, %c1_122, %c0_123, %c0_124] : memref<2x2x32x96xbf16, #tpu.memory_space<vmem>>, vector<1x1x32x96xbf16>
    %245 = vector.shape_cast %244 : vector<1x1x32x96xbf16> to vector<32x96xbf16>
    %cst_125 = arith.constant dense<0.000000e+00> : vector<128x96xf32>
    %246 = tpu.matmul %243, %245, %cst_125 {dimension_numbers = #tpu.dot_dimension_numbers<[1], [0], [0], [1], [0, 0, 1, 1], [], []>} : vector<128x32xbf16>, vector<32x96xbf16>, vector<128x96xf32> -> vector<128x96xf32>
    %c1_126 = arith.constant 1 : index
    %c1_127 = arith.constant 1 : index
    %c0_128 = arith.constant 0 : index
    %c0_129 = arith.constant 0 : index
    %247 = vector.load %arg12[%c1_126, %c1_127, %c0_128, %c0_129] : memref<2x2x1x96xf32, #tpu.memory_space<vmem>>, vector<1x1x1x96xf32>
    %248 = vector.shape_cast %247 : vector<1x1x1x96xf32> to vector<1x96xf32>
    %249 = vector.broadcast %248 : vector<1x96xf32> to vector<128x96xf32>
    %250 = arith.addf %246, %249 : vector<128x96xf32>
    %251 = vector.extract_strided_slice %171 {offsets = [0, 96], sizes = [128, 96], strides = [1, 1]} : vector<128x192xf32> to vector<128x96xf32>
    %252 = vector.extract_strided_slice %250 {offsets = [0, 0], sizes = [128, 32], strides = [1, 1]} : vector<128x96xf32> to vector<128x32xf32>
    %253 = vector.extract_strided_slice %251 {offsets = [0, 0], sizes = [128, 32], strides = [1, 1]} : vector<128x96xf32> to vector<128x32xf32>
    %254 = arith.addf %252, %253 : vector<128x32xf32>
    %255 = arith.negf %254 : vector<128x32xf32>
    %256 = math.exp %255 : vector<128x32xf32>
    %cst_130 = arith.constant 1.000000e+00 : f32
    %257 = vector.broadcast %cst_130 : f32 to vector<128x32xf32>
    %258 = arith.addf %257, %256 : vector<128x32xf32>
    %259 = arith.divf %257, %258 : vector<128x32xf32>
    %260 = vector.extract_strided_slice %250 {offsets = [0, 32], sizes = [128, 32], strides = [1, 1]} : vector<128x96xf32> to vector<128x32xf32>
    %261 = vector.extract_strided_slice %251 {offsets = [0, 32], sizes = [128, 32], strides = [1, 1]} : vector<128x96xf32> to vector<128x32xf32>
    %262 = arith.addf %260, %261 : vector<128x32xf32>
    %263 = arith.negf %262 : vector<128x32xf32>
    %264 = math.exp %263 : vector<128x32xf32>
    %cst_131 = arith.constant 1.000000e+00 : f32
    %265 = vector.broadcast %cst_131 : f32 to vector<128x32xf32>
    %266 = arith.addf %265, %264 : vector<128x32xf32>
    %267 = arith.divf %265, %266 : vector<128x32xf32>
    %268 = vector.extract_strided_slice %250 {offsets = [0, 64], sizes = [128, 32], strides = [1, 1]} : vector<128x96xf32> to vector<128x32xf32>
    %269 = vector.extract_strided_slice %251 {offsets = [0, 64], sizes = [128, 32], strides = [1, 1]} : vector<128x96xf32> to vector<128x32xf32>
    %270 = arith.mulf %259, %269 : vector<128x32xf32>
    %271 = arith.addf %268, %270 : vector<128x32xf32>
    %272 = math.tanh %271 : vector<128x32xf32>
    %cst_132 = arith.constant 1.000000e+00 : f32
    %273 = vector.broadcast %cst_132 : f32 to vector<128x32xf32>
    %274 = arith.subf %273, %267 : vector<128x32xf32>
    %275 = arith.mulf %274, %272 : vector<128x32xf32>
    %276 = arith.mulf %267, %149 : vector<128x32xf32>
    %277 = arith.addf %275, %276 : vector<128x32xf32>
    %cst_133 = arith.constant 0.000000e+00 : f32
    %278 = vector.broadcast %cst_133 : f32 to vector<128x32xf32>
    %279 = arith.maximumf %277, %278 : vector<128x32xf32>
    %280 = arith.truncf %279 : vector<128x32xf32> to vector<128x32xbf16>
    %c1_134 = arith.constant 1 : index
    %c1_135 = arith.constant 1 : index
    %c0_136 = arith.constant 0 : index
    %c0_137 = arith.constant 0 : index
    %281 = vector.load %arg15[%c1_134, %c1_135, %c0_136, %c0_137] : memref<2x2x32x32xbf16, #tpu.memory_space<vmem>>, vector<1x1x32x32xbf16>
    %282 = vector.shape_cast %281 : vector<1x1x32x32xbf16> to vector<32x32xbf16>
    %cst_138 = arith.constant dense<0.000000e+00> : vector<128x32xf32>
    %283 = tpu.matmul %280, %282, %cst_138 {dimension_numbers = #tpu.dot_dimension_numbers<[1], [0], [0], [1], [0, 0, 1, 1], [], []>} : vector<128x32xbf16>, vector<32x32xbf16>, vector<128x32xf32> -> vector<128x32xf32>
    %284 = arith.addf %230, %283 : vector<128x32xf32>
    %285 = arith.addf %149, %284 : vector<128x32xf32>
    %c0_139 = arith.constant 0 : index
    %c0_140 = arith.constant 0 : index
    %286 = vector.load %arg17[%c0_139, %c0_140] : memref<128x32xf32, #tpu.memory_space<vmem>>, vector<128x32xf32>
    tpu.vector_store %arg17[%c0_139, %c0_140], %285 {strides = array<i32>} : memref<128x32xf32, #tpu.memory_space<vmem>>, vector<128x32xf32>,
    return
  }
  func.func @transform_0(%arg0: i32) -> (i32, i32) {
    %c0_i32 = arith.constant 0 : i32
    %c0_i32_0 = arith.constant 0 : i32
    return %arg0, %c0_i32 : i32, i32
  }
  func.func @transform_1(%arg0: i32) -> (i32, i32) {
    %c0_i32 = arith.constant 0 : i32
    %c0_i32_0 = arith.constant 0 : i32
    return %arg0, %c0_i32 : i32, i32
  }
  func.func @transform_2(%arg0: i32) -> (i32, i32) {
    %c0_i32 = arith.constant 0 : i32
    %c0_i32_0 = arith.constant 0 : i32
    return %arg0, %c0_i32 : i32, i32
  }
  func.func @transform_3(%arg0: i32) -> (i32, i32, i32) {
    %c0_i32 = arith.constant 0 : i32
    %c0_i32_0 = arith.constant 0 : i32
    %c0_i32_1 = arith.constant 0 : i32
    return %arg0, %c0_i32, %c0_i32_0 : i32, i32, i32
  }
  func.func @transform_4(%arg0: i32) -> (i32, i32) {
    %c0_i32 = arith.constant 0 : i32
    %c0_i32_0 = arith.constant 0 : i32
    %c0_i32_1 = arith.constant 0 : i32
    return %c0_i32, %c0_i32_0 : i32, i32
  }
  func.func @transform_5(%arg0: i32) -> (i32, i32) {
    %c0_i32 = arith.constant 0 : i32
    %c0_i32_0 = arith.constant 0 : i32
    %c0_i32_1 = arith.constant 0 : i32
    return %c0_i32, %c0_i32_0 : i32, i32
  }
  func.func @transform_6(%arg0: i32) -> (i32, i32, i32) {
    %c0_i32 = arith.constant 0 : i32
    %c0_i32_0 = arith.constant 0 : i32
    %c0_i32_1 = arith.constant 0 : i32
    %c0_i32_2 = arith.constant 0 : i32
    return %c0_i32, %c0_i32_0, %c0_i32_1 : i32, i32, i32
  }
  func.func @transform_7(%arg0: i32) -> (i32, i32, i32) {
    %c0_i32 = arith.constant 0 : i32
    %c0_i32_0 = arith.constant 0 : i32
    %c0_i32_1 = arith.constant 0 : i32
    %c0_i32_2 = arith.constant 0 : i32
    return %c0_i32, %c0_i32_0, %c0_i32_1 : i32, i32, i32
  }
  func.func @transform_8(%arg0: i32) -> (i32, i32, i32) {
    %c0_i32 = arith.constant 0 : i32
    %c0_i32_0 = arith.constant 0 : i32
    %c0_i32_1 = arith.constant 0 : i32
    %c0_i32_2 = arith.constant 0 : i32
    return %c0_i32, %c0_i32_0, %c0_i32_1 : i32, i32, i32
  }
  func.func @transform_9(%arg0: i32) -> (i32, i32, i32) {
    %c0_i32 = arith.constant 0 : i32
    %c0_i32_0 = arith.constant 0 : i32
    %c0_i32_1 = arith.constant 0 : i32
    %c0_i32_2 = arith.constant 0 : i32
    return %c0_i32, %c0_i32_0, %c0_i32_1 : i32, i32, i32
  }
  func.func @transform_10(%arg0: i32) -> (i32, i32, i32, i32) {
    %c0_i32 = arith.constant 0 : i32
    %c0_i32_0 = arith.constant 0 : i32
    %c0_i32_1 = arith.constant 0 : i32
    %c0_i32_2 = arith.constant 0 : i32
    %c0_i32_3 = arith.constant 0 : i32
    return %c0_i32, %c0_i32_0, %c0_i32_1, %c0_i32_2 : i32, i32, i32, i32
  }
  func.func @transform_11(%arg0: i32) -> (i32, i32, i32, i32) {
    %c0_i32 = arith.constant 0 : i32
    %c0_i32_0 = arith.constant 0 : i32
    %c0_i32_1 = arith.constant 0 : i32
    %c0_i32_2 = arith.constant 0 : i32
    %c0_i32_3 = arith.constant 0 : i32
    return %c0_i32, %c0_i32_0, %c0_i32_1, %c0_i32_2 : i32, i32, i32, i32
  }
  func.func @transform_12(%arg0: i32) -> (i32, i32, i32) {
    %c0_i32 = arith.constant 0 : i32
    %c0_i32_0 = arith.constant 0 : i32
    %c0_i32_1 = arith.constant 0 : i32
    %c0_i32_2 = arith.constant 0 : i32
    return %c0_i32, %c0_i32_0, %c0_i32_1 : i32, i32, i32
  }
  func.func @transform_13(%arg0: i32) -> (i32, i32, i32) {
    %c0_i32 = arith.constant 0 : i32
    %c0_i32_0 = arith.constant 0 : i32
    %c0_i32_1 = arith.constant 0 : i32
    %c0_i32_2 = arith.constant 0 : i32
    return %c0_i32, %c0_i32_0, %c0_i32_1 : i32, i32, i32
  }
  func.func @transform_14(%arg0: i32) -> (i32, i32, i32, i32) {
    %c0_i32 = arith.constant 0 : i32
    %c0_i32_0 = arith.constant 0 : i32
    %c0_i32_1 = arith.constant 0 : i32
    %c0_i32_2 = arith.constant 0 : i32
    %c0_i32_3 = arith.constant 0 : i32
    return %c0_i32, %c0_i32_0, %c0_i32_1, %c0_i32_2 : i32, i32, i32, i32
  }
  func.func @transform_15(%arg0: i32) -> (i32, i32, i32) {
    %c0_i32 = arith.constant 0 : i32
    %c0_i32_0 = arith.constant 0 : i32
    %c0_i32_1 = arith.constant 0 : i32
    %c0_i32_2 = arith.constant 0 : i32
    return %c0_i32, %c0_i32_0, %c0_i32_1 : i32, i32, i32
  }
  func.func @transform_16(%arg0: i32) -> (i32, i32) {
    %c0_i32 = arith.constant 0 : i32
    %c0_i32_0 = arith.constant 0 : i32
    return %arg0, %c0_i32 : i32, i32
  }
}

</mosaic_0001>

<bundles_post_ra>
// kernel: tpu_custom_call.1
= control target key start
LH: loop header
LB: loop body
LE: loop exit
PB: predicated region body
PF: predicated region fallthrough
CT: control target
= control target key end

     0   :  { %s11286_s0 = inlined_call_operand.vmem [shape: f32[256,32], index: 0, kind: input, shape index: {}]   ;;  %s11287_s1 = inlined_call_operand.vmem [shape: bf16[256,128], index: 1, kind: input, shape index: {}]   ;;  %s11288_s2 = inlined_call_operand.vmem [shape: bf16[256,8], index: 2, kind: input, shape index: {}]   ;;  %s11289_s3 = inlined_call_operand.vmem [shape: bf16[2,128,128], index: 3, kind: input, shape index: {}]   ;;  %s11290_s4 = inlined_call_operand.vmem [shape: bf16[8,128], index: 4, kind: input, shape index: {}]   ;;  %s11291_s5 = inlined_call_operand.vmem [shape: bf16[128,128], index: 5, kind: input, shape index: {}]   ;;  %s11292_s6 = inlined_call_operand.hbm [shape: bf16[2,32,64], index: 6, kind: input, shape index: {}]   ;;  %s11293_s7 = inlined_call_operand.vmem [shape: f32[2,1,64], index: 7, kind: input, shape index: {}]   ;;  %s11294_s8 = inlined_call_operand.vmem [shape: bf16[2,64,128], index: 8, kind: input, shape index: {}]   ;;  %s11295_s9 = inlined_call_operand.vmem [shape: f32[2,1,64], index: 9, kind: input, shape index: {}]   ;;  %s11296_s10 = inlined_call_operand.hbm [shape: bf16[2,2,32,96], index: 10, kind: input, shape index: {}]   ;;  %s11297_s11 = inlined_call_operand.vmem [shape: f32[2,2,1,96], index: 11, kind: input, shape index: {}]   ;;  %s11298_s12 = inlined_call_operand.hbm [shape: bf16[2,32,192], index: 12, kind: input, shape index: {}]   ;;  %s11299_s13 = inlined_call_operand.vmem [shape: f32[2,1,192], index: 13, kind: input, shape index: {}]   ;;  %s11300_s14 = inlined_call_operand.hbm [shape: bf16[2,2,32,32], index: 14, kind: input, shape index: {}]   ;;  %s11301_s15 = inlined_call_operand.vmem [shape: f32[2,1,32], index: 15, kind: input, shape index: {}]   ;;  %s11302_s16 = inlined_call_operand.vmem [shape: f32[256,32], index: 16, kind: output, shape index: {}]  }
   0x1   :  { %11523 = sst [smem:[#allocation91_spill]] %s11286_s0 }
   0x2   :  { %11524 = sst [smem:[#allocation92_spill]] %s11297_s11 }
   0x3   :  { %11525 = sst [smem:[#allocation93_spill]] %s11301_s15 }
   0x4   :  { %11526 = sst [smem:[#allocation94_spill]] %s11302_s16 }
   0x5   :  { %21 = vsyncpa [#allocation3], 0 }
   0x6   :  { %22 = vsyncpa [#allocation5], 0 }
   0x7   :  { %23 = vsyncpa [#allocation8], 0  ;;  %s8395_s21 = smov 0  }
   0x8 LB: > { %11527 = sst [smem:[#allocation12_spill]] %s8296_s21  ;;  %s8401_s22 = sadd.s32 4294967295, %s8296_s21   ;;  %s8296_s21 = sphi %s8395_s21, %s29_s21  }
   0x9   : > { %p6520_p0 = scmp.ge.s32.totalorder %s8296_s21, 1  ;;  %p416_p1 = scmp.lt.s32.totalorder %s8296_s21, 3 }
   0xa   : > { %p11308_p2 = scmp.eq.s32.totalorder %s8401_s22, 0  ;;  %s8298_s24 = smov [#allocation4]  }
   0xb   : > { %p8406_p3 = pnand %p6520_p0, %p416_p1  ;;  %s456_s25 = sshll.u32 %s8298_s24, 4  ;;  %s8410_s25 = int_to_ptr.vmem [resolvable:$true] %s456_s25 }
   0xc   : > { %s8299_s26 = smov [#allocation2]   ;;  %s8300_s29 = smov [#allocation6]  }
   0xd   : > { %s11528_s23 = scalar_select %p8406_p3, 1, 0 }
   0xe   : > { %p7493_p4 = pneg %p8406_p3  ;;  %s434_s27 = sshll.u32 %s8299_s26, 4  ;;  %s8414_s27 = int_to_ptr.vmem [resolvable:$true] %s434_s27 }
   0xf   : > { %s472_s30 = sshll.u32 %s8300_s29, 4  ;;  %s8166_s18 = scalar_lea.hbm %s11296_s10, 1024  ;;  %s8422_s30 = int_to_ptr.vmem [resolvable:$true] %s472_s30 }
  0x10   : > { %p8418_p5 = pnand %p11308_p2, %p7493_p4  ;;  %p8167_p6 = scmp.ne.s32.totalorder %s11296_s10, %s8166_s18 }
  0x11   : > { %p8173_p10 = scmp.lt.u32.totalorder %s8166_s18, %s11296_s10 }
  0x12   : > { %p8432_p7 = pneg %p8418_p5 }
  0x14   : > { %p8169_p8 = pnand %p8432_p7, %p8167_p6 }
  0x16   : > { %p8170_p9 = pneg %p8169_p8 }
  0x18   : > { %p8175_p11 = pnand %p8173_p10, %p8170_p9 }
  0x1a   : > { %8178 = shalt.err (!%p8175_p11)
}
  0x1b   : > { %s8179_s0 = scalar_lea.vmem %s8410_s25, 1024  ;;  %p8187_p1 = scmp.lt.s32.totalorder %s8410_s25, %s8410_s25 }
  0x1c   : > { %p8180_p12 = scmp.ne.s32.totalorder %s8410_s25, %s8179_s0  ;;  %p8188_p4 = scmp.lt.s32.totalorder %s8179_s0, %s8179_s0 }
  0x1e   : > { %p8182_p13 = pnand %p8180_p12, %p8432_p7  ;;  %p8189_p6 = por %p8188_p4, %p8187_p1 }
  0x20   : > { %p8183_p0 = pneg %p8182_p13 }
  0x22   : > { %p8190_p8 = pnand %p8189_p6, %p8183_p0 }
  0x24   : > { %8193 = shalt.err (!%p8190_p8)
}
  0x25   : > { %s11306_s17 = smov 64   ;;  %s11307_s18 = smov 4  }
  0x26   : > { %7499 = dma.hbm_to_vmem [thread:$0]  (!%p8418_p5), %s11296_s10, 1024, %s8410_s25, [#allocation5], %s11306_s17, %s11306_s17, %s11307_s18  }
  0x27   : > { %s8194_s0 = scalar_lea.hbm %s11292_s6, 512 }
  0x28   : > { %p8195_p9 = scmp.ne.s32.totalorder %s11292_s6, %s8194_s0  ;;  %p8201_p12 = scmp.lt.u32.totalorder %s8194_s0, %s11292_s6 }
  0x2a   : > { %p8197_p10 = pnand %p8195_p9, %p8432_p7 }
  0x2c   : > { %p8198_p11 = pneg %p8197_p10 }
  0x2e   : > { %p8203_p13 = pnand %p8201_p12, %p8198_p11 }
  0x30   : > { %8206 = shalt.err (!%p8203_p13)
}
  0x31   : > { %s8207_s25 = scalar_lea.vmem %s8414_s27, 512  ;;  %p8215_p6 = scmp.lt.s32.totalorder %s8414_s27, %s8414_s27 }
  0x32   : > { %p8208_p0 = scmp.ne.s32.totalorder %s8414_s27, %s8207_s25  ;;  %p8216_p8 = scmp.lt.s32.totalorder %s8207_s25, %s8207_s25 }
  0x34   : > { %p8210_p1 = pnand %p8208_p0, %p8432_p7  ;;  %p8217_p9 = por %p8216_p8, %p8215_p6 }
  0x36   : > { %p8211_p4 = pneg %p8210_p1 }
  0x38   : > { %p8218_p10 = pnand %p8217_p9, %p8211_p4 }
  0x3a   : > { %8221 = shalt.err (!%p8218_p10)
}
  0x3b   : > { %7496 = dma.hbm_to_vmem [thread:$0]  (!%p8418_p5), %s11292_s6, 512, %s8414_s27, [#allocation3], %s11306_s17, %s11306_s17, %s11307_s18  }
  0x3c   : > { %s8222_s19 = scalar_lea.hbm %s11298_s12, 1024 }
  0x3d   : > { %p8223_p11 = scmp.ne.s32.totalorder %s11298_s12, %s8222_s19  ;;  %p8229_p0 = scmp.lt.u32.totalorder %s8222_s19, %s11298_s12 }
  0x3f   : > { %p8225_p12 = pnand %p8223_p11, %p8432_p7 }
  0x41   : > { %p8226_p13 = pneg %p8225_p12 }
  0x43   : > { %p8231_p1 = pnand %p8229_p0, %p8226_p13 }
  0x45   : > { %8234 = shalt.err (!%p8231_p1)
}
  0x46   : > { %s8235_s27 = scalar_lea.vmem %s8422_s30, 1024  ;;  %p8243_p9 = scmp.lt.s32.totalorder %s8422_s30, %s8422_s30 }
  0x47   : > { %p8236_p4 = scmp.ne.s32.totalorder %s8422_s30, %s8235_s27  ;;  %p8244_p10 = scmp.lt.s32.totalorder %s8235_s27, %s8235_s27 }
  0x49   : > { %p8238_p6 = pnand %p8236_p4, %p8432_p7  ;;  %p8245_p11 = por %p8244_p10, %p8243_p9 }
  0x4b   : > { %p8239_p8 = pneg %p8238_p6 }
  0x4d   : > { %p8246_p12 = pnand %p8245_p11, %p8239_p8 }
  0x4f   : > { %8249 = shalt.err (!%p8246_p12)
}
  0x50   : > { %s8303_s25 = smov 128   ;;  %s8304_s11 = smov 8  }
  0x51   : > { %7502 = dma.hbm_to_vmem [thread:$0]  (!%p8418_p5), %s11298_s12, 1024, %s8422_s30, [#allocation5], %s8303_s25, %s8303_s25, %s8304_s11  }
  0x52   : > { %s8305_s21 = smov [#allocation7]   ;;  %s8250_s29 = scalar_lea.hbm %s11300_s14, 1024 }
  0x53   : > { %s488_s19 = sshll.u32 %s8305_s21, 4  ;;  %p8251_p13 = scmp.ne.s32.totalorder %s11300_s14, %s8250_s29  ;;  %s489_s19 = int_to_ptr.vmem [resolvable:$true] %s488_s19 }
  0x54   : > { %p8257_p4 = scmp.lt.u32.totalorder %s8250_s29, %s11300_s14 }
  0x55   : > { %p8253_p0 = pnand %p8251_p13, %p8432_p7 }
  0x57   : > { %p8254_p1 = pneg %p8253_p0 }
  0x59   : > { %p8259_p6 = pnand %p8257_p4, %p8254_p1 }
  0x5b   : > { %8262 = shalt.err (!%p8259_p6)
}
  0x5c   : > { %s8263_s30 = scalar_lea.vmem %s489_s19, 1024  ;;  %p8271_p11 = scmp.lt.s32.totalorder %s489_s19, %s489_s19 }
  0x5d   : > { %p8264_p8 = scmp.ne.s32.totalorder %s489_s19, %s8263_s30  ;;  %p8272_p12 = scmp.lt.s32.totalorder %s8263_s30, %s8263_s30 }
  0x5f   : > { %p8266_p9 = pnand %p8264_p8, %p8432_p7  ;;  %p8273_p2 = por %p8272_p12, %p8271_p11 }
  0x61   : > { %p8267_p10 = pneg %p8266_p9 }
  0x63   : > { %p8274_p3 = pnand %p8273_p2, %p8267_p10 }
  0x65   : > { %8277 = shalt.err (!%p8274_p3)
}
  0x66   : > { %s11531_s25 = smov 4   ;;  %s11532_s11 = smov 64  }
  0x67   : > { %7505 = dma.hbm_to_vmem [thread:$0]  (!%p8418_p5), %s11300_s14, 1024, %s489_s19, [#allocation8], %s11532_s11, %s11532_s11, %s11531_s25  }
  0x68   : > { %p11533_p13 = scmp.ne.s32.totalorder %s11528_s23, 0 }
  0x6a   : > { %542 = sbr.rel (%p11533_p13) target bundleno = 3972 (0xf84), region = 84 }
  0x71   : > { %p11534_p7 = scmp.eq.s32.totalorder %s8401_s22, 0 }
  0x73   : > { %8283 = dma.done.wait (%p11534_p7), [#allocation3], 512   ;;  %p11535_p0 = pmov %p11534_p7 }
  0x75   : > { %8285 = vsyncadd (%p11535_p0), [#allocation3], 4294966784  ;;  %p11536_p2 = pmov %p11535_p0 }
  0x76   : > { %p11537_p3 = pmov %p11535_p0 }
  0x77   : > { %8287 = dma.done.wait (%p11536_p2), [#allocation5], 2048  }
  0x78   : > { %8289 = vsyncadd (%p11537_p3), [#allocation5], 4294965248  ;;  %p11538_p1 = pmov %p11535_p0 }
  0x79   : > { %p11539_p5 = pmov %p11535_p0 }
  0x7a   : > { %8291 = dma.done.wait (%p11538_p1), [#allocation8], 1024  }
  0x7b   : > { %8293 = vsyncadd (%p11539_p5), [#allocation8], 4294966272  ;;  %s6531_s23 = sshll.u32 %s8401_s22, 4  ;;  %vm795_vm0 = vcmask 1043456   ;;  %v730_v0 = vld [vmem:[%s11290_s4] sm:$0xf] }
  0x7c   : > { %p620_p4 = scmp.lt.s32.totalorder %s6531_s23, 31  ;;  %7476 = vmatprep.subr.msk.bf16.mxu0 %vm795_vm0, %v730_v0  ;;  %v797_v1 = vsel %vm795_vm0, %v730_v0, 0  ;;  %vm681_vm1 = vcmask 64512   ;;  %v7538_v5 = vld [vmem:[%s11291_s5] sm:$0xff]   ;;  %v7539_v6 = vld [vmem:[%s11291_s5 + $0x8] sm:$0xff]   ;;  %v7541_v9 = vld [vmem:[%s11291_s5 + $0x10] sm:$0xff]  }
  0x7d   : > { %7035 = vmatpush3.bf16.msra.mxu0 %v797_v1  ;;  %7396 = vmatprep.subr.bf16.mxu1 %v7538_v5  ;;  %v7543_v10 = vld [vmem:[%s11291_s5 + $0x18] sm:$0xff]   ;;  %v7545_v13 = vld [vmem:[%s11291_s5 + $0x20] sm:$0xff]   ;;  %v7547_v14 = vld [vmem:[%s11291_s5 + $0x28] sm:$0xff]   ;;  %s11540_s25 = sld [smem:[#allocation91_spill]]  ;;  %vm1200_vm2 = vcmask 261120   ;;  %vm1362_vm3 = vcmask 523264  }
  0x7e   : > { %s11911_s23 = smov (!%p620_p4, %s6531_s23), 31  ;;  %7052 = vmatprep.subr.bf16.mxu0 %v7538_v5  ;;  %7404 = vmatpush3.bf16.msra.mxu1 %v7538_v5  ;;  %v7548_v16 = vld [vmem:[%s11291_s5 + $0x30] sm:$0xff]   ;;  %v7551_v17 = vld [vmem:[%s11291_s5 + $0x38] sm:$0xff]   ;;  %v7552_v18 = vld [vmem:[#allocation2] sm:$0xff]   ;;  %s8306_s29 = smov 64  }
  0x7f   : > { %s6534_s28 = sshll.u32 %s11911_s23, 2  ;;  %7397 = vmatprep.subr.bf16.mxu1 %v7539_v6  ;;  %s6532_s0 = sshll.u32 %s11911_s23, 3  ;;  %v7555_v29 = vld [vmem:[#allocation2 + $0x8] sm:$0xff]  }
  0x80   : > { %s8550_s19 = scalar_lea.vmem %s11288_s2, %s6534_s28  ;;  %s8585_s17 = scalar_lea.vmem %s11287_s1, %s6534_s28 }
  0x81   : > { %v8553_v2 = vld [vmem:[%s8550_s19] sm:$0xff]   ;;  %v8556_v3 = vld [vmem:[%s8550_s19 + $0x8] sm:$0xff]   ;;  %v8559_v4 = vld [vmem:[%s8550_s19 + $0x10] sm:$0xff]   ;;  %p637_p6 = scmp.lt.s32.totalorder %s8401_s22, 1  ;;  %s8308_s28 = smov 96  }
  0x82   : > { %7036 = vmatprep.mubr.msk.bf16.mxu0 %vm681_vm1, %v8553_v2  ;;  %v8574_v7 = vld [vmem:[%s8550_s19 + $0x18] sm:$0xff]   ;;  %v8577_v8 = vld [vmem:[%s8550_s19 + $0x20] sm:$0xff]   ;;  %7405 = vmatpush3.bf16.msra.mxu1 %v7539_v6  ;;  %v8591_v11 = vld [vmem:[%s8550_s19 + $0x28] sm:$0xff]   ;;  %s8309_s16 = smov 32   ;;  %s11625_s26 = sld [smem:[#allocation92_spill]] }
  0x83   : > { %7037 = vmatmul.mubr.msk.bf16.vlgmr.msra.gmra.mrb[0].mxu0 %vm681_vm1, %v8556_v3  ;;  %7398 = vmatprep.subr.bf16.mxu1 %v7541_v9  ;;  %v8596_v12 = vld [vmem:[%s8550_s19 + $0x30] sm:$0xff]   ;;  %v8607_v15 = vld [vmem:[%s8550_s19 + $0x38] sm:$0xff]   ;;  %v7550_v22 = vld [vmem:[%s8585_s17] sm:$0xff]   ;;  %s8629_s11 = scalar_lea.vmem %s11540_s25, %s6532_s0  ;;  %s11913_s22 = smov (!%p637_p6, %s8401_s22), 1 }
  0x84   : > { %7040 = vmatprep.mubr.msk.bf16.mxu0 %vm681_vm1, %v8559_v4  ;;  %7053 = vmatpush3.bf16.msra.mxu0 %v7538_v5  ;;  %v7549_v24 = vld [vmem:[%s8585_s17 + $0x8] sm:$0xff]   ;;  %v7554_v33 = vld [vmem:[%s8585_s17 + $0x10] sm:$0xff]   ;;  %v7553_v35 = vld [vmem:[%s8585_s17 + $0x18] sm:$0xff]   ;;  %s6852_s27 = sshll.u32 %s11913_s22, 6  ;;  %s11712_s21 = sld [smem:[#allocation93_spill]] }
  0x85   : > { %7054 = vmatprep.subr.bf16.mxu0 %v7539_v6  ;;  %v1153_v37 = vld [vmem:[%s8629_s11] sm:$0xff]  ;;  %v1154_v38 = vld [vmem:[%s8629_s11 + $0x8] sm:$0xff]  ;;  %v1155_v46 = vld [vmem:[%s8629_s11 + $0x10] sm:$0xff]  ;;  %s11896_s25 = sld [smem:[#allocation94_spill]] }
  0x86   : > { %7406 = vmatpush3.bf16.msra.mxu1 %v7541_v9  ;;  %v8635_v41 = vpack.c.bf16 %v1154_v38, %v1153_v37  ;;  %v7556_v45 = vld [vmem:[%s8585_s17 + $0x28] sm:$0xff]   ;;  %v1156_v47 = vld [vmem:[%s8629_s11 + $0x18] sm:$0xff]  ;;  %v7557_v49 = vld [vmem:[%s8585_s17 + $0x20] sm:$0xff]  }
  0x87   : > { %7399 = vmatprep.subr.bf16.mxu1 %v7543_v10  ;;  %v1157_v50 = vld [vmem:[%s8629_s11 + $0x20] sm:$0xff]  ;;  %v1158_v51 = vld [vmem:[%s8629_s11 + $0x28] sm:$0xff]  ;;  %v8645_v55 = vpack.c.bf16 %v1156_v47, %v1155_v46  ;;  %v7558_v61 = vld [vmem:[%s8585_s17 + $0x38] sm:$0xff]  }
  0x88   : > { %7055 = vmatpush3.bf16.msra.mxu0 %v7539_v6  ;;  %v8647_v57 = vpack.c.bf16 %v1158_v51, %v1157_v50  ;;  %v1159_v62 = vld [vmem:[%s8629_s11 + $0x30] sm:$0xff]  ;;  %v1160_v63 = vld [vmem:[%s8629_s11 + $0x38] sm:$0xff]  ;;  %v1161_v5 = vld [vmem:[%s8629_s11 + $0x40] sm:$0xff] }
  0x89   : > { %7056 = vmatprep.subr.bf16.mxu0 %v7541_v9  ;;  %v7559_v1 = vld [vmem:[%s8585_s17 + $0x30] sm:$0xff]   ;;  %v1162_v6 = vld [vmem:[%s8629_s11 + $0x48] sm:$0xff]  ;;  %s8785_s17 = scalar_lea.vmem %s11289_s3, %s6852_s27 }
  0x8a   : > { %7407 = vmatpush3.bf16.msra.mxu1 %v7543_v10  ;;  %s11713_s20 = smov %s11712_s21 }
  0x8b   : > { %7041 = vmatmul.mubr.msk.bf16.gmra.mrb[4].mxu0 %vm681_vm1, %v8574_v7  ;;  %7400 = vmatprep.subr.bf16.mxu1 %v7545_v13  ;;  %s11233_s22 = scalar_lea.vmem %s11896_s25, %s6532_s0 }
  0x8c   : > { %7044 = vmatprep.mubr.msk.bf16.mxu0 %vm681_vm1, %v8577_v8  ;;  %7057 = vmatpush3.bf16.msra.mxu0 %v7541_v9 }
  0x8d   : > { %7058 = vmatprep.subr.bf16.mxu0 %v7543_v10 }
  0x8e   : > { %7408 = vmatpush3.bf16.msra.mxu1 %v7545_v13 }
  0x8f   : > { %7401 = vmatprep.subr.bf16.mxu1 %v7547_v14 }
  0x90   : > { %7059 = vmatpush3.bf16.msra.mxu0 %v7543_v10 }
  0x91   : > { %7060 = vmatprep.subr.bf16.mxu0 %v7545_v13 }
  0x92   : > { %7409 = vmatpush3.bf16.msra.mxu1 %v7547_v14 }
  0x93   : > { %7045 = vmatmul.mubr.msk.bf16.gmra.mrb[8].mxu0 %vm681_vm1, %v8591_v11  ;;  %7402 = vmatprep.subr.bf16.mxu1 %v7548_v16 }
  0x94   : > { %7048 = vmatprep.mubr.msk.bf16.mxu0 %vm681_vm1, %v8596_v12  ;;  %7061 = vmatpush3.bf16.msra.mxu0 %v7545_v13 }
  0x95   : > { %7062 = vmatprep.subr.bf16.mxu0 %v7547_v14 }
  0x96   : > { %7410 = vmatpush3.bf16.msra.mxu1 %v7548_v16 }
  0x97   : > { %7403 = vmatprep.subr.bf16.mxu1 %v7551_v17 }
  0x98   : > { %7063 = vmatpush3.bf16.msra.mxu0 %v7547_v14  ;;  %v8659_v14 = vpack.c.bf16 %v1160_v63, %v1159_v62 }
  0x99   : > { %7064 = vmatprep.subr.bf16.mxu0 %v7548_v16 }
  0x9a   : > { %7411 = vmatpush3.bf16.msra.mxu1 %v7551_v17 }
  0x9b   : > { %7049 = vmatmul.mubr.msk.bf16.gmra.mrb[12].mxu0 %vm681_vm1, %v8607_v15 }
  0x9c   : > { %7065 = vmatpush3.bf16.msra.mxu0 %v7548_v16 }
  0x9d   : > { %7066 = vmatprep.subr.bf16.mxu0 %v7551_v17 }
  0xa0   : > { %7067 = vmatpush3.bf16.msra.mxu0 %v7551_v17  ;;  %v8661_v17 = vpack.c.bf16 %v1162_v6, %v1161_v5 }
  0xa1   : > { %7084 = vmatprep.subr.bf16.mxu0 %v7552_v18 }
 0x156   : > { %v7038_v19 = vpop.f32.mrb[0].mxu0 }
 0x157   : > { %v833_v20 = vpop.f32.mrb[1].mxu0 }
 0x158   : > { %v7039_v21 = vpop.f32.mrb[2].mxu0 }
 0x159   : > { %v897_v23 = vpack.c.bf16 %v7039_v21, %v7038_v19  ;;  %v836_v25 = vpop.f32.mrb[3].mxu0  ;;  %v1163_v19 = vld [vmem:[%s8629_s11 + $0x50] sm:$0xff]  ;;  %v1165_v21 = vld [vmem:[%s8629_s11 + $0x60] sm:$0xff] }
 0x15a   : > { %v896_v26 = vpack.c.bf16 %v836_v25, %v833_v20  ;;  %v1164_v20 = vld [vmem:[%s8629_s11 + $0x58] sm:$0xff]  ;;  %v1167_v25 = vld [vmem:[%s8629_s11 + $0x70] sm:$0xff] }
 0x15b   : > { %v969_v28 = vmul.bf16 %v7549_v24, %v897_v23  ;;  %v8671_v23 = vpack.c.bf16 %v1164_v20, %v1163_v19 }
 0x15c   : > { %v968_v27 = vmul.bf16 %v7550_v22, %v896_v26  ;;  %v1166_v22 = vld [vmem:[%s8629_s11 + $0x68] sm:$0xff]  ;;  %v1168_v26 = vld [vmem:[%s8629_s11 + $0x78] sm:$0xff] }
 0x15d   : > { %v8673_v24 = vpack.c.bf16 %v1166_v22, %v1165_v21 }
 0x15e   : > { %v7042_v30 = vpop.f32.mrb[4].mxu0  ;;  %7068 = vmatprep.mubr.bf16.mxu0 %v968_v27  ;;  %v8681_v27 = vpack.c.bf16 %v1168_v26, %v1167_v25 }
 0x15f   : > { %v849_v31 = vpop.f32.mrb[5].mxu0  ;;  %7069 = vmatmul.mubr.bf16.vlgmr.msra.gmra.mrb[16].mxu0 %v969_v28  ;;  %v7560_v28 = vld [vmem:[%s11294_s8] sm:$0xff]  }
 0x160   : > { %v7043_v32 = vpop.f32.mrb[6].mxu0  ;;  %7085 = vmatpush3.bf16.msra.mxu0 %v7552_v18  ;;  %7104 = vmatprep.subr.bf16.mxu1 %v7560_v28 }
 0x161   : > { %v899_v34 = vpack.c.bf16 %v7043_v32, %v7042_v30  ;;  %v852_v36 = vpop.f32.mrb[7].mxu0  ;;  %7086 = vmatprep.subr.bf16.mxu0 %v7555_v29  ;;  %v7562_v30 = vld [vmem:[%s11294_s8 + $0x10] sm:$0xff]  }
 0x162   : > { %v898_v39 = vpack.c.bf16 %v852_v36, %v849_v31  ;;  %v7563_v31 = vld [vmem:[%s11294_s8 + $0x18] sm:$0xff]  }
 0x163   : > { %v971_v42 = vmul.bf16 %v7553_v35, %v899_v34 }
 0x164   : > { %v970_v40 = vmul.bf16 %v7554_v33, %v898_v39  ;;  %7087 = vmatpush3.bf16.msra.mxu0 %v7555_v29  ;;  %v7561_v29 = vld [vmem:[%s11294_s8 + $0x8] sm:$0xff]  }
 0x166   : > { %7072 = vmatprep.mubr.bf16.mxu0 %v970_v40  ;;  %v7046_v43 = vpop.f32.mrb[8].mxu0 }
 0x167   : > { %7073 = vmatmul.mubr.bf16.gmra.mrb[20].mxu0 %v971_v42  ;;  %v865_v44 = vpop.f32.mrb[9].mxu0  ;;  %v6573_v42 = vld [vmem:[%s11293_s7] ss:$0 sm:$0xff] }
 0x168   : > { %7088 = vmatprep.mubr.msk.bf16.mxu0 %vm1200_vm2, %v8635_v41  ;;  %v7047_v48 = vpop.f32.mrb[10].mxu0 }
 0x169   : > { %v901_v52 = vpack.c.bf16 %v7047_v48, %v7046_v43  ;;  %v868_v53 = vpop.f32.mrb[11].mxu0 }
 0x16a   : > { %v900_v54 = vpack.c.bf16 %v868_v53, %v865_v44 }
 0x16b   : > { %v973_v56 = vmul.bf16 %v7556_v45, %v901_v52 }
 0x16c   : > { %v972_v58 = vmul.bf16 %v7557_v49, %v900_v54 }
 0x16e   : > { %v7050_v59 = vpop.f32.mrb[12].mxu0  ;;  %7076 = vmatprep.mubr.bf16.mxu1 %v972_v58 }
 0x16f   : > { %7089 = vmatmul.mubr.msk.bf16.vlgmr.msra.gmra.mrb[24].mxu0 %vm1200_vm2, %v8645_v55  ;;  %v881_v60 = vpop.f32.mrb[13].mxu0  ;;  %7077 = vmatmul.mubr.bf16.vlgmr.msra.gmra.mrb[0].mxu1 %v973_v56 }
 0x170   : > { %7092 = vmatprep.mubr.msk.bf16.mxu0 %vm1200_vm2, %v8647_v57  ;;  %v7051_v0 = vpop.f32.mrb[14].mxu0  ;;  %7105 = vmatpush3.bf16.msra.mxu1 %v7560_v28 }
 0x171   : > { %v903_v9 = vpack.c.bf16 %v7051_v0, %v7050_v59  ;;  %v884_v10 = vpop.f32.mrb[15].mxu0  ;;  %7106 = vmatprep.subr.bf16.mxu1 %v7561_v29 }
 0x172   : > { %v902_v13 = vpack.c.bf16 %v884_v10, %v881_v60 }
 0x173   : > { %v975_v16 = vmul.bf16 %v7558_v61, %v903_v9 }
 0x174   : > { %v974_v18 = vmul.bf16 %v7559_v1, %v902_v13  ;;  %7107 = vmatpush3.bf16.msra.mxu1 %v7561_v29 }
 0x175   : > { %7108 = vmatprep.subr.bf16.mxu1 %v7562_v30 }
 0x176   : > { %7080 = vmatprep.mubr.bf16.mxu1 %v974_v18 }
 0x177   : > { %7093 = vmatmul.mubr.msk.bf16.gmra.mrb[28].mxu0 %vm1200_vm2, %v8659_v14  ;;  %7081 = vmatmul.mubr.bf16.gmra.mrb[4].mxu1 %v975_v16 }
 0x178   : > { %7096 = vmatprep.mubr.msk.bf16.mxu0 %vm1200_vm2, %v8661_v17  ;;  %7109 = vmatpush3.bf16.msra.mxu1 %v7562_v30 }
 0x179   : > { %7110 = vmatprep.subr.bf16.mxu1 %v7563_v31 }
 0x17c   : > { %7111 = vmatpush3.bf16.msra.mxu1 %v7563_v31 }
 0x17f   : > { %7097 = vmatmul.mubr.msk.bf16.gmra.mrb[32].mxu0 %vm1200_vm2, %v8671_v23 }
 0x180   : > { %7100 = vmatprep.mubr.msk.bf16.mxu0 %vm1200_vm2, %v8673_v24 }
 0x187   : > { %7101 = vmatmul.mubr.msk.bf16.gmra.mrb[36].mxu0 %vm1200_vm2, %v8681_v27 }
 0x232   : > { %v8697_v32 = vpop.f32.mrb[16].mxu0 }
 0x233   : > { %11541 = vst [vmem:[#allocation13_spill] sm:$0xff] %v8697_v32  ;;  %v8699_v33 = vpop.f32.mrb[17].mxu0 }
 0x234   : > { %11542 = vst [vmem:[#allocation14_spill] sm:$0xff] %v8699_v33  ;;  %v8701_v34 = vpop.f32.mrb[18].mxu0 }
 0x235   : > { %11543 = vst [vmem:[#allocation15_spill] sm:$0xff] %v8701_v34  ;;  %v8703_v35 = vpop.f32.mrb[19].mxu0 }
 0x236   : > { %11544 = vst [vmem:[#allocation16_spill] sm:$0xff] %v8703_v35 }
 0x23a   : > { %v8705_v36 = vpop.f32.mrb[20].mxu0 }
 0x23b   : > { %11545 = vst [vmem:[#allocation17_spill] sm:$0xff] %v8705_v36  ;;  %v8707_v37 = vpop.f32.mrb[21].mxu0 }
 0x23c   : > { %11546 = vst [vmem:[#allocation18_spill] sm:$0xff] %v8707_v37  ;;  %v8709_v38 = vpop.f32.mrb[22].mxu0 }
 0x23d   : > { %11547 = vst [vmem:[#allocation19_spill] sm:$0xff] %v8709_v38  ;;  %v8711_v39 = vpop.f32.mrb[23].mxu0 }
 0x23e   : > { %11548 = vst [vmem:[#allocation20_spill] sm:$0xff] %v8711_v39 }
 0x242   : > { %v7090_v40 = vpop.f32.mrb[24].mxu0  ;;  %v8716_v43 = vpop.f32.mrb[0].mxu1 }
 0x243   : > { %11549 = vst [vmem:[#allocation21_spill] sm:$0xff] %v8716_v43  ;;  %v1259_v44 = vpop.f32.mrb[25].mxu0  ;;  %v8718_v45 = vpop.f32.mrb[1].mxu1  ;;  %v1268_v48 = vadd.f32 %v7090_v40, %v6573_v42 }
 0x244   : > { %11550 = vst [vmem:[#allocation22_spill] sm:$0xff] %v8718_v45  ;;  %v7091_v46 = vpop.f32.mrb[26].mxu0  ;;  %v8720_v47 = vpop.f32.mrb[2].mxu1  ;;  %v1260_v52 = vadd.f32 %v6573_v42, %v1259_v44 }
 0x245   : > { %11551 = vst [vmem:[#allocation23_spill] sm:$0xff] %v8720_v47  ;;  %v1271_v49 = vadd.f32 %v7091_v46, %v6573_v42  ;;  %v1262_v50 = vpop.f32.mrb[27].mxu0  ;;  %v8722_v51 = vpop.f32.mrb[3].mxu1 }
 0x246   : > { %11552 = vst [vmem:[#allocation24_spill] sm:$0xff] %v8722_v51  ;;  %v1263_v53 = vadd.f32 %v6573_v42, %v1262_v50 }
 0x247   : > { %v1323_v54 = vpack.c.bf16 %v1271_v49, %v1268_v48 }
 0x248   : > { %v1322_v56 = vpack.c.bf16 %v1263_v53, %v1260_v52 }
 0x24a   : > { %v7094_v58 = vpop.f32.mrb[28].mxu0  ;;  %7112 = vmatprep.mubr.msk.bf16.mxu1 %vm1362_vm3, %v1322_v56  ;;  %v8725_v59 = vpop.f32.mrb[4].mxu1 }
 0x24b   : > { %11553 = vst [vmem:[#allocation25_spill] sm:$0xff] %v8725_v59  ;;  %v1275_v60 = vpop.f32.mrb[29].mxu0  ;;  %7113 = vmatmul.mubr.msk.bf16.vlgmr.msra.gmra.mrb[8].mxu1 %vm1362_vm3, %v1323_v54  ;;  %v8728_v61 = vpop.f32.mrb[5].mxu1  ;;  %v1284_v0 = vadd.f32 %v7094_v58, %v6573_v42 }
 0x24c   : > { %11554 = vst [vmem:[#allocation26_spill] sm:$0xff] %v8728_v61  ;;  %v7095_v62 = vpop.f32.mrb[30].mxu0  ;;  %v8730_v63 = vpop.f32.mrb[6].mxu1  ;;  %v1276_v9 = vadd.f32 %v6573_v42, %v1275_v60 }
 0x24d   : > { %11555 = vst [vmem:[#allocation27_spill] sm:$0xff] %v8730_v63  ;;  %v1287_v1 = vadd.f32 %v7095_v62, %v6573_v42  ;;  %v1278_v5 = vpop.f32.mrb[31].mxu0  ;;  %v8732_v6 = vpop.f32.mrb[7].mxu1 }
 0x24e   : > { %11556 = vst [vmem:[#allocation28_spill] sm:$0xff] %v8732_v6  ;;  %v1279_v10 = vadd.f32 %v6573_v42, %v1278_v5 }
 0x24f   : > { %v1325_v13 = vpack.c.bf16 %v1287_v1, %v1284_v0 }
 0x250   : > { %v1324_v16 = vpack.c.bf16 %v1279_v10, %v1276_v9 }
 0x252   : > { %v7098_v18 = vpop.f32.mrb[32].mxu0  ;;  %7116 = vmatprep.mubr.msk.bf16.mxu1 %vm1362_vm3, %v1324_v16 }
 0x253   : > { %v1291_v19 = vpop.f32.mrb[33].mxu0  ;;  %7117 = vmatmul.mubr.msk.bf16.gmra.mrb[12].mxu1 %vm1362_vm3, %v1325_v13  ;;  %v1300_v21 = vadd.f32 %v7098_v18, %v6573_v42 }
 0x254   : > { %v7099_v20 = vpop.f32.mrb[34].mxu0  ;;  %v1292_v26 = vadd.f32 %v6573_v42, %v1291_v19 }
 0x255   : > { %v1303_v22 = vadd.f32 %v7099_v20, %v6573_v42  ;;  %v1294_v25 = vpop.f32.mrb[35].mxu0 }
 0x256   : > { %v1295_v28 = vadd.f32 %v6573_v42, %v1294_v25 }
 0x257   : > { %v1327_v29 = vpack.c.bf16 %v1303_v22, %v1300_v21 }
 0x258   : > { %v1326_v30 = vpack.c.bf16 %v1295_v28, %v1292_v26  ;;  %v7564_v26 = vld [vmem:[%s8785_s17] sm:$0xff]  }
 0x259   : > { %7144 = vmatprep.mubr.bf16.mxu0 %v7564_v26  ;;  %v671_v26 = vunpack.c.l.bf16 %v8574_v7 }
 0x25a   : > { %v7102_v31 = vpop.f32.mrb[36].mxu0  ;;  %7120 = vmatprep.mubr.msk.bf16.mxu1 %vm1362_vm3, %v1326_v30 }
 0x25b   : > { %v1307_v40 = vpop.f32.mrb[37].mxu0  ;;  %7121 = vmatmul.mubr.msk.bf16.gmra.mrb[16].mxu1 %vm1362_vm3, %v1327_v29  ;;  %v1316_v46 = vadd.f32 %v7102_v31, %v6573_v42 }
 0x25c   : > { %v7103_v44 = vpop.f32.mrb[38].mxu0  ;;  %v1308_v50 = vadd.f32 %v6573_v42, %v1307_v40 }
 0x25d   : > { %v1319_v48 = vadd.f32 %v7103_v44, %v6573_v42  ;;  %v1310_v49 = vpop.f32.mrb[39].mxu0 }
 0x25e   : > { %v1311_v52 = vadd.f32 %v6573_v42, %v1310_v49  ;;  %v7575_v49 = vld [vmem:[#allocation6 + $0x10] ss:$8 sps:$4 sm:$0xff]  }
 0x25f   : > { %v1329_v53 = vpack.c.bf16 %v1319_v48, %v1316_v46  ;;  %v7570_v46 = vld [vmem:[#allocation6] ss:$8 sps:$4 sm:$0xff]   ;;  %v7572_v48 = vld [vmem:[#allocation6 + $0x4] ss:$8 sps:$4 sm:$0xff]  }
 0x260   : > { %v1328_v54 = vpack.c.bf16 %v1311_v52, %v1308_v50  ;;  %1705 = vmatprep.subr.bf16.mxu1 %v7572_v48  ;;  %v7577_v50 = vld [vmem:[#allocation6 + $0x14] ss:$8 sps:$4 sm:$0xff]   ;;  %v11311_v52 = vmov 0  }
 0x261   : > { %1706 = vmatpush1.bf16.msra.mxu1 %v7570_v46  ;;  %v672_v46 = vunpack.c.h.bf16 %v8574_v7 }
 0x262   : > { %7124 = vmatprep.mubr.msk.bf16.mxu1 %vm1362_vm3, %v1328_v54  ;;  %1707 = vmatprep.subr.bf16.mxu1 %v7577_v50  ;;  %v674_v50 = vunpack.c.h.bf16 %v8577_v8 }
 0x263   : > { %7125 = vmatmul.mubr.msk.bf16.gmra.mrb[20].mxu1 %vm1362_vm3, %v1329_v53  ;;  %v665_v53 = vunpack.c.l.bf16 %v8553_v2 }
 0x264   : > { %1737 = vmatprep.mubr.bf16.mxu1 %v11311_v52  ;;  %v709_v7 = vsel %vm681_vm1, %v674_v50, 0.0 }
 0x265   : > { %1708 = vmatpush1.bf16.msra.mxu1 %v7575_v49  ;;  %v682_v54 = vsel %vm681_vm1, %v665_v53, 0.0  ;;  %v675_v49 = vunpack.c.l.bf16 %v8591_v11 }
 0x267   : > { %v712_v53 = vsel %vm681_vm1, %v675_v49, 0.0  ;;  %v1675_v49 = vlaneseq }
 0x269   : > { %v8867_v50 = vshrl.u32 %v1675_v49, 7 }
 0x26b   : > { %6608 = vmatmul.mubr.msk.bf16.vlgmr.msra.gmra.mrb[24].mxu1 %vm1200_vm2, %v8635_v41  ;;  %11557 = vst [vmem:[#allocation29_spill] sm:$0xff] %v8867_v50 }
 0x26c   : > { %1747 = vmatprep.mubr.bf16.mxu1 %v11311_v52 }
 0x273   : > { %6609 = vmatmul.mubr.msk.bf16.gmra.mrb[28].mxu1 %vm1200_vm2, %v8645_v55  ;;  %v673_v55 = vunpack.c.l.bf16 %v8577_v8 }
 0x274   : > { %1757 = vmatprep.mubr.bf16.mxu1 %v11311_v52 }
 0x275   : > { %v706_v48 = vsel %vm681_vm1, %v673_v55, 0.0  ;;  %v7569_v55 = vld [vmem:[%s8785_s17 + $0x28] sm:$0xff]  }
 0x27b   : > { %6610 = vmatmul.mubr.msk.bf16.gmra.mrb[32].mxu1 %vm1200_vm2, %v8647_v57  ;;  %v677_v57 = vunpack.c.l.bf16 %v8596_v12 }
 0x27c   : > { %1767 = vmatprep.mubr.bf16.mxu1 %v11311_v52 }
 0x283   : > { %6611 = vmatmul.mubr.msk.bf16.gmra.mrb[36].mxu1 %vm1200_vm2, %v8659_v14  ;;  %v680_v14 = vunpack.c.h.bf16 %v8607_v15 }
 0x284   : > { %1777 = vmatprep.mubr.bf16.mxu1 %v11311_v52 }
 0x28b   : > { %6612 = vmatmul.mubr.msk.bf16.gmra.mrb[40].mxu1 %vm1200_vm2, %v8661_v17 }
 0x28c   : > { %1787 = vmatprep.mubr.bf16.mxu1 %v11311_v52 }
 0x293   : > { %6613 = vmatmul.mubr.msk.bf16.gmra.mrb[44].mxu1 %vm1200_vm2, %v8671_v23 }
 0x294   : > { %1797 = vmatprep.mubr.bf16.mxu1 %v11311_v52 }
 0x29b   : > { %6614 = vmatmul.mubr.msk.bf16.gmra.mrb[48].mxu1 %vm1200_vm2, %v8673_v24 }
 0x29c   : > { %1807 = vmatprep.mubr.bf16.mxu1 %v11311_v52 }
 0x2a3   : > { %6615 = vmatmul.mubr.msk.bf16.gmra.mrb[52].mxu1 %vm1200_vm2, %v8681_v27 }
 0x31e   : > { %v8740_v56 = vpop.f32.mrb[8].mxu1 }
 0x31f   : > { %v8742_v58 = vpop.f32.mrb[9].mxu1 }
 0x320   : > { %v8744_v60 = vpop.f32.mrb[10].mxu1 }
 0x321   : > { %v1485_v62 = vpack.c.bf16 %v8744_v60, %v8740_v56  ;;  %v8748_v0 = vpop.f32.mrb[11].mxu1 }
 0x322   : > { %v1484_v42 = vpack.c.bf16 %v8748_v0, %v8742_v58 }
 0x324   : > { %1548 = vrot.lane.b32.xlu0 %v1484_v42, %s8306_s29  ;;  %v667_v42 = vunpack.c.l.bf16 %v8556_v3 }
 0x326   : > { %v8753_v1 = vpop.f32.mrb[12].mxu1 }
 0x327   : > { %v8755_v5 = vpop.f32.mrb[13].mxu1 }
 0x328   : > { %1550 = vrot.lane.b32.xlu0 %v1485_v62, %s8306_s29  ;;  %v8758_v9 = vpop.f32.mrb[14].mxu1  ;;  %v666_v62 = vunpack.c.h.bf16 %v8553_v2 }
 0x329   : > { %v1487_v10 = vpack.c.bf16 %v8758_v9, %v8753_v1  ;;  %v8762_v13 = vpop.f32.mrb[15].mxu1 }
 0x32a   : > { %v1486_v16 = vpack.c.bf16 %v8762_v13, %v8755_v5 }
 0x32c   : > { %1552 = vrot.lane.b32.xlu1 %v1486_v16, %s8306_s29  ;;  %v688_v16 = vsel %vm681_vm1, %v667_v42, 0.0  ;;  %v679_v42 = vunpack.c.l.bf16 %v8607_v15 }
 0x32e   : > { %v8767_v18 = vpop.f32.mrb[16].mxu1 }
 0x32f   : > { %v8770_v19 = vpop.f32.mrb[17].mxu1 }
 0x330   : > { %1554 = vrot.lane.b32.xlu1 %v1487_v10, %s8306_s29  ;;  %v8773_v20 = vpop.f32.mrb[18].mxu1  ;;  %v685_v10 = vsel %vm681_vm1, %v666_v62, 0.0  ;;  %v718_v62 = vsel %vm681_vm1, %v677_v57, 0.0  ;;  %v11310_v57 = vsub.s32 1, %v8867_v50 }
 0x331   : > { %v1489_v21 = vpack.c.bf16 %v8773_v20, %v8767_v18  ;;  %v8778_v22 = vpop.f32.mrb[19].mxu1 }
 0x332   : > { %v1488_v25 = vpack.c.bf16 %v8778_v22, %v8770_v19 }
 0x334   : > { %1558 = vrot.lane.b32.xlu1 %v1489_v21, %s8306_s29  ;;  %1556 = vrot.lane.b32.xlu0 %v1488_v25, %s8306_s29  ;;  %v669_v21 = vunpack.c.l.bf16 %v8559_v4  ;;  %v668_v25 = vunpack.c.h.bf16 %v8556_v3 }
 0x336   : > { %v8790_v28 = vpop.f32.mrb[20].mxu1  ;;  %v694_v2 = vsel %vm681_vm1, %v669_v21, 0.0  ;;  %v691_v41 = vsel %vm681_vm1, %v668_v25, 0.0  ;;  %v727_v21 = vsel %vm681_vm1, %v680_v14, 0.0 }
 0x337   : > { %v8792_v29 = vpop.f32.mrb[21].mxu1 }
 0x338   : > { %v8794_v30 = vpop.f32.mrb[22].mxu1 }
 0x339   : > { %v1491_v31 = vpack.c.bf16 %v8794_v30, %v8790_v28  ;;  %v8798_v40 = vpop.f32.mrb[23].mxu1 }
 0x33a   : > { %v1490_v44 = vpack.c.bf16 %v8798_v40, %v8792_v29 }
 0x33b   : > { %1562 = vrot.lane.b32.xlu1 %v1491_v31, %s8306_s29  ;;  %v670_v31 = vunpack.c.h.bf16 %v8559_v4  ;;  %v703_v4 = vsel %vm681_vm1, %v672_v46, 0.0  ;;  %v7573_v46 = vld [vmem:[%s8785_s17 + $0x30] sm:$0xff]  }
 0x33c   : > { %1560 = vrot.lane.b32.xlu0 %v1490_v44, %s8306_s29  ;;  %v700_v44 = vsel %vm681_vm1, %v671_v26, 0.0  ;;  %v7565_v26 = vld [vmem:[%s8785_s17 + $0x8] sm:$0xff]  }
 0x33d   : > { %v697_v3 = vsel %vm681_vm1, %v670_v31, 0.0  ;;  %v7566_v31 = vld [vmem:[%s8785_s17 + $0x10] sm:$0xff]  }
 0x35b   : > { %683 = vadd.xlane.f32.xlu0 %v682_v54  ;;  %v676_v54 = vunpack.c.h.bf16 %v8591_v11 }
 0x35d   : > { %v715_v8 = vsel %vm681_vm1, %v676_v54, 0.0  ;;  %v8875_v54 = vld [vmem:[%s11299_s13] sm:$0x3] }
 0x35f   : > { %686 = vadd.xlane.f32.xlu1 %v685_v10  ;;  %689 = vadd.xlane.f32.xlu0 %v688_v16  ;;  %v678_v10 = vunpack.c.h.bf16 %v8596_v12  ;;  %v724_v16 = vsel %vm681_vm1, %v679_v42, 0.0 }
 0x361   : > { %v721_v11 = vsel %vm681_vm1, %v678_v10, 0.0 }
 0x363   : > { %695 = vadd.xlane.f32.xlu1 %v694_v2  ;;  %692 = vadd.xlane.f32.xlu0 %v691_v41  ;;  %v7578_v41 = vld [vmem:[#allocation4] sm:$0xff]  }
 0x367   : > { %701 = vadd.xlane.f32.xlu1 %v700_v44  ;;  %698 = vadd.xlane.f32.xlu0 %v697_v3  ;;  %v7567_v44 = vld [vmem:[%s8785_s17 + $0x18] sm:$0xff]   ;;  %v7568_v3 = vld [vmem:[%s8785_s17 + $0x20] sm:$0xff]  }
 0x36b   : > { %707 = vadd.xlane.f32.xlu1 %v706_v48  ;;  %704 = vadd.xlane.f32.xlu0 %v703_v4  ;;  %v7574_v48 = vld [vmem:[%s8785_s17 + $0x38] sm:$0xff]   ;;  %v7579_v4 = vld [vmem:[#allocation4 + $0x8] sm:$0xff]  }
 0x36f   : > { %713 = vadd.xlane.f32.xlu1 %v712_v53  ;;  %710 = vadd.xlane.f32.xlu0 %v709_v7  ;;  %v8869_v53 = vpop.f32.mrb[24].mxu1 }
 0x370   : > { %v1741_v7 = vpop.f32.mrb[25].mxu1 }
 0x373   : > { %719 = vadd.xlane.f32.xlu1 %v718_v62  ;;  %716 = vadd.xlane.f32.xlu0 %v715_v8  ;;  %v8877_v62 = vpop.f32.mrb[26].mxu1  ;;  %v8882_v8 = vrot.slane %v8875_v54, %v11310_v57 }
 0x374   : > { %v1745_v42 = vpop.f32.mrb[27].mxu1 }
 0x375   : > { %v8885_v10 = vadd.f32 %v1741_v7, %v8882_v8 }
 0x377   : > { %725 = vadd.xlane.f32.xlu1 %v724_v16  ;;  %722 = vadd.xlane.f32.xlu0 %v721_v11  ;;  %11558 = vst [vmem:[#allocation30_spill] sm:$0xff] %v8885_v10  ;;  %v8888_v16 = vadd.f32 %v1745_v42, %v8882_v8  ;;  %v8890_v11 = vpop.f32.mrb[28].mxu1 }
 0x378   : > { %v1751_v14 = vpop.f32.mrb[29].mxu1 }
 0x379   : > { %11559 = vst [vmem:[#allocation31_spill] sm:$0xff] %v8888_v16 }
 0x37b   : > { %728 = vadd.xlane.f32.xlu0 %v727_v21  ;;  %v8893_v21 = vadd.f32 %v1751_v14, %v8882_v8 }
 0x37d   : > { %11560 = vst [vmem:[#allocation32_spill] sm:$0xff] %v8893_v21 }
 0x396   : > { %v1549_v12 = vpop.permute.xlu0 %1548 }
 0x397   : > { %7128 = vmatprep.subr.bf16.mxu0 %v1549_v12 }
 0x398   : > { %7129 = vmatpush3.bf16.msra.mxu0 %v1549_v12  ;;  %v8895_v12 = vpop.f32.mrb[30].mxu1 }
 0x39a   : > { %v1551_v15 = vpop.permute.xlu0 %1550 }
 0x39b   : > { %7130 = vmatprep.subr.bf16.mxu0 %v1551_v15 }
 0x39c   : > { %7131 = vmatpush3.bf16.msra.mxu0 %v1551_v15  ;;  %v1755_v15 = vpop.f32.mrb[31].mxu1 }
 0x39e   : > { %v1553_v17 = vpop.permute.xlu1 %1552 }
 0x39f   : > { %7132 = vmatprep.subr.bf16.mxu0 %v1553_v17 }
 0x3a0   : > { %7133 = vmatpush3.bf16.msra.mxu0 %v1553_v17  ;;  %v8898_v17 = vadd.f32 %v1755_v15, %v8882_v8 }
 0x3a2   : > { %v1555_v23 = vpop.permute.xlu1 %1554  ;;  %11561 = vst [vmem:[#allocation33_spill] sm:$0xff] %v8898_v17 }
 0x3a3   : > { %7134 = vmatprep.subr.bf16.mxu0 %v1555_v23 }
 0x3a4   : > { %7135 = vmatpush3.bf16.msra.mxu0 %v1555_v23  ;;  %v8900_v23 = vpop.f32.mrb[32].mxu1 }
 0x3a6   : > { %v1557_v24 = vpop.permute.xlu0 %1556  ;;  %v1559_v25 = vpop.permute.xlu1 %1558 }
 0x3a7   : > { %7136 = vmatprep.subr.bf16.mxu0 %v1557_v24 }
 0x3a8   : > { %7137 = vmatpush3.bf16.msra.mxu0 %v1557_v24  ;;  %v1761_v24 = vpop.f32.mrb[33].mxu1 }
 0x3a9   : > { %7138 = vmatprep.subr.bf16.mxu0 %v1559_v25 }
 0x3ac   : > { %7139 = vmatpush3.bf16.msra.mxu0 %v1559_v25  ;;  %v8903_v25 = vadd.f32 %v1761_v24, %v8882_v8 }
 0x3ad   : > { %v1563_v2 = vpop.permute.xlu1 %1562 }
 0x3ae   : > { %v1561_v27 = vpop.permute.xlu0 %1560  ;;  %11562 = vst [vmem:[#allocation34_spill] sm:$0xff] %v8903_v25 }
 0x3af   : > { %7140 = vmatprep.subr.bf16.mxu0 %v1561_v27 }
 0x3b0   : > { %7141 = vmatpush3.bf16.msra.mxu0 %v1561_v27  ;;  %v8905_v27 = vpop.f32.mrb[34].mxu1 }
 0x3b1   : > { %7142 = vmatprep.subr.bf16.mxu0 %v1563_v2 }
 0x3b4   : > { %7143 = vmatpush3.bf16.msra.mxu0 %v1563_v2  ;;  %v1765_v2 = vpop.f32.mrb[35].mxu1 }
 0x3b5   : > { %7160 = vmatprep.subr.bf16.mxu0 %v7578_v41 }
 0x3b7   : > { %7145 = vmatmul.mubr.bf16.vlgmr.msra.gmra.mrb[40].mxu0 %v7565_v26  ;;  %v8910_v26 = vpop.f32.mrb[36].mxu1 }
 0x3b8   : > { %7148 = vmatprep.mubr.bf16.mxu0 %v7566_v31  ;;  %7161 = vmatpush3.bf16.msra.mxu0 %v7578_v41  ;;  %v8908_v41 = vadd.f32 %v1765_v2, %v8882_v8  ;;  %11564 = vst [vmem:[#allocation36_spill] sm:$0xff] %v8910_v26  ;;  %v1771_v31 = vpop.f32.mrb[37].mxu1 }
 0x3b9   : > { %7162 = vmatprep.subr.bf16.mxu0 %v7579_v4 }
 0x3ba   : > { %11563 = vst [vmem:[#allocation35_spill] sm:$0xff] %v8908_v41 }
 0x3bc   : > { %7163 = vmatpush3.bf16.msra.mxu0 %v7579_v4 }
 0x3bf   : > { %7149 = vmatmul.mubr.bf16.gmra.mrb[44].mxu0 %v7567_v44  ;;  %v8913_v44 = vadd.f32 %v1771_v31, %v8882_v8 }
 0x3c0   : > { %7152 = vmatprep.mubr.bf16.mxu0 %v7568_v3  ;;  %v8915_v3 = vpop.f32.mrb[38].mxu1 }
 0x3c1   : > { %11565 = vst [vmem:[#allocation37_spill] sm:$0xff] %v8913_v44  ;;  %11566 = vst [vmem:[#allocation38_spill] sm:$0xff] %v8915_v3 }
 0x3c7   : > { %7153 = vmatmul.mubr.bf16.gmra.mrb[48].mxu0 %v7569_v55  ;;  %v1775_v55 = vpop.f32.mrb[39].mxu1 }
 0x3c8   : > { %7156 = vmatprep.mubr.bf16.mxu0 %v7573_v46  ;;  %v7580_v46 = vld [vmem:[#allocation4 + $0x10] sm:$0xff]   ;;  %v8920_v4 = vpop.f32.mrb[40].mxu1 }
 0x3c9   : > { %11568 = vst [vmem:[#allocation40_spill] sm:$0xff] %v8920_v4  ;;  %v1781_v49 = vpop.f32.mrb[41].mxu1  ;;  %7200 = vmatprep.subr.bf16.mxu1 %v7580_v46 }
 0x3ca   : > { %v8923_v7 = vadd.f32 %v1781_v49, %v8882_v8  ;;  %v8925_v42 = vpop.f32.mrb[42].mxu1  ;;  %7201 = vmatpush3.bf16.msra.mxu1 %v7580_v46 }
 0x3cb   : > { %11570 = vst [vmem:[#allocation42_spill] sm:$0xff] %v8925_v42  ;;  %v1785_v14 = vpop.f32.mrb[43].mxu1 }
 0x3cc   : > { %11569 = vst [vmem:[#allocation41_spill] sm:$0xff] %v8923_v7  ;;  %v8928_v15 = vadd.f32 %v1785_v14, %v8882_v8  ;;  %v8930_v24 = vpop.f32.mrb[44].mxu1 }
 0x3cd   : > { %11572 = vst [vmem:[#allocation44_spill] sm:$0xff] %v8930_v24  ;;  %v1791_v2 = vpop.f32.mrb[45].mxu1 }
 0x3ce   : > { %11571 = vst [vmem:[#allocation43_spill] sm:$0xff] %v8928_v15  ;;  %v8933_v31 = vadd.f32 %v1791_v2, %v8882_v8 }
 0x3cf   : > { %7157 = vmatmul.mubr.bf16.gmra.mrb[52].mxu0 %v7574_v48  ;;  %v8918_v48 = vadd.f32 %v1775_v55, %v8882_v8  ;;  %v8935_v55 = vpop.f32.mrb[46].mxu1 }
 0x3d0   : > { %11573 = vst [vmem:[#allocation45_spill] sm:$0xff] %v8933_v31  ;;  %11574 = vst [vmem:[#allocation46_spill] sm:$0xff] %v8935_v55  ;;  %v1795_v57 = vpop.f32.mrb[47].mxu1 }
 0x3d1   : > { %11567 = vst [vmem:[#allocation39_spill] sm:$0xff] %v8918_v48  ;;  %v8938_v52 = vadd.f32 %v1795_v57, %v8882_v8  ;;  %v8940_v49 = vpop.f32.mrb[48].mxu1 }
 0x3d2   : > { %11576 = vst [vmem:[#allocation48_spill] sm:$0xff] %v8940_v49  ;;  %v1801_v7 = vpop.f32.mrb[49].mxu1 }
 0x3d3   : > { %11575 = vst [vmem:[#allocation47_spill] sm:$0xff] %v8938_v52  ;;  %v8943_v46 = vadd.f32 %v1801_v7, %v8882_v8  ;;  %v8945_v14 = vpop.f32.mrb[50].mxu1  ;;  %v7581_v52 = vld [vmem:[#allocation4 + $0x18] sm:$0xff]  }
 0x3d4   : > { %11578 = vst [vmem:[#allocation50_spill] sm:$0xff] %v8945_v14  ;;  %v1805_v15 = vpop.f32.mrb[51].mxu1  ;;  %7202 = vmatprep.subr.bf16.mxu1 %v7581_v52 }
 0x3d5   : > { %11577 = vst [vmem:[#allocation49_spill] sm:$0xff] %v8943_v46  ;;  %v8948_v44 = vadd.f32 %v1805_v15, %v8882_v8  ;;  %v8950_v2 = vpop.f32.mrb[52].mxu1  ;;  %7203 = vmatpush3.bf16.msra.mxu1 %v7581_v52 }
 0x3d6   : > { %11580 = vst [vmem:[#allocation52_spill] sm:$0xff] %v8950_v2  ;;  %v1811_v31 = vpop.f32.mrb[53].mxu1 }
 0x3d7   : > { %11579 = vst [vmem:[#allocation51_spill] sm:$0xff] %v8948_v44  ;;  %v8953_v48 = vadd.f32 %v1811_v31, %v8882_v8  ;;  %v8955_v57 = vpop.f32.mrb[54].mxu1  ;;  %v8972_v31 = vld [vmem:[%s11295_s9] ss:$0 sm:$0xff] }
 0x3d8   : > { %11582 = vst [vmem:[#allocation54_spill] sm:$0xff] %v8955_v57  ;;  %v1828_v52 = vadd.f32 %v8740_v56, %v8972_v31  ;;  %v1826_v21 = vadd.f32 %v8972_v31, %v8742_v58  ;;  %v1829_v10 = vadd.f32 %v8744_v60, %v8972_v31  ;;  %v1815_v2 = vpop.f32.mrb[55].mxu1  ;;  %v1827_v57 = vadd.f32 %v8972_v31, %v8748_v0 }
 0x3d9   : > { %11581 = vst [vmem:[#allocation53_spill] sm:$0xff] %v8953_v48  ;;  %v8989_v24 = vadd.f32 %v1815_v2, %v8882_v8 }
 0x3db   : > { %11591 = vst [vmem:[#allocation63_spill] sm:$0xff] %v8989_v24 }
 0x3e8   : > { %v8957_v25 = vpop.xlane.xlu0 %683 }
 0x3e9   : > { %11583 = vst [vmem:[#allocation55_spill] sm:$0xff] %v8957_v25  ;;  %v1842_v14 = vmul.f32 %v1826_v21, %v8957_v25 }
 0x3ec   : > { %v8959_v7 = vpop.xlane.xlu0 %689  ;;  %v8961_v46 = vpop.xlane.xlu1 %686 }
 0x3ed   : > { %11584 = vst [vmem:[#allocation56_spill] sm:$0xff] %v8959_v7  ;;  %11585 = vst [vmem:[#allocation57_spill] sm:$0xff] %v8961_v46  ;;  %v1844_v16 = vmul.f32 %v1828_v52, %v8959_v7  ;;  %v1843_v52 = vmul.f32 %v1827_v57, %v8961_v46 }
 0x3f0   : > { %v8963_v41 = vpop.xlane.xlu0 %692  ;;  %v8965_v15 = vpop.xlane.xlu1 %695 }
 0x3f1   : > { %11586 = vst [vmem:[#allocation58_spill] sm:$0xff] %v8963_v41  ;;  %11587 = vst [vmem:[#allocation59_spill] sm:$0xff] %v8965_v15  ;;  %v1845_v58 = vmul.f32 %v1829_v10, %v8963_v41 }
 0x3f4   : > { %v8967_v44 = vpop.xlane.xlu0 %698  ;;  %v8974_v48 = vpop.xlane.xlu1 %701 }
 0x3f5   : > { %11588 = vst [vmem:[#allocation60_spill] sm:$0xff] %v8967_v44  ;;  %11589 = vst [vmem:[#allocation61_spill] sm:$0xff] %v8974_v48 }
 0x3f8   : > { %v8980_v17 = vpop.xlane.xlu0 %704  ;;  %v8992_v4 = vpop.xlane.xlu1 %707 }
 0x3f9   : > { %11590 = vst [vmem:[#allocation62_spill] sm:$0xff] %v8980_v17  ;;  %11592 = vst [vmem:[#allocation64_spill] sm:$0xff] %v8992_v4 }
 0x3fc   : > { %v8996_v3 = vpop.xlane.xlu0 %710 }
 0x3fd   : > { %11593 = vst [vmem:[#allocation65_spill] sm:$0xff] %v8996_v3 }
 0x48a   : > { %v7146_v49 = vpop.f32.mrb[40].mxu0 }
 0x48b   : > { %v1860_v56 = vadd.f32 %v7146_v49, %v1844_v16  ;;  %v1606_v55 = vpop.f32.mrb[41].mxu0  ;;  %v1832_v16 = vadd.f32 %v8753_v1, %v8972_v31 }
 0x48c   : > { %v1858_v42 = vadd.f32 %v1842_v14, %v1606_v55  ;;  %v7147_v60 = vpop.f32.mrb[42].mxu0  ;;  %v1830_v55 = vadd.f32 %v8972_v31, %v8755_v5  ;;  %v1833_v14 = vadd.f32 %v8758_v9, %v8972_v31  ;;  %v9014_v9 = vpop.xlane.xlu0 %716 }
 0x48d   : > { %v1876_v7 = vadd.f32 %v8697_v32, %v1860_v56  ;;  %v1861_v26 = vadd.f32 %v7147_v60, %v1845_v58  ;;  %v1609_v0 = vpop.f32.mrb[43].mxu0  ;;  %v1848_v56 = vmul.f32 %v1832_v16, %v8974_v48  ;;  %v9010_v58 = vpop.xlane.xlu1 %713  ;;  %11595 = vst [vmem:[#allocation67_spill] sm:$0xff] %v9014_v9 }
 0x48e   : > { %v1874_v21 = vadd.f32 %v1858_v42, %v8699_v33  ;;  %v1859_v8 = vadd.f32 %v1843_v52, %v1609_v0  ;;  %v1831_v42 = vadd.f32 %v8972_v31, %v8762_v13  ;;  %11594 = vst [vmem:[#allocation66_spill] sm:$0xff] %v9010_v58  ;;  %v1846_v52 = vmul.f32 %v1830_v55, %v8965_v15 }
 0x48f   : > { %v1877_v10 = vadd.f32 %v8701_v34, %v1861_v26  ;;  %v1892_v2 = vmax.f32 %v1876_v7, 0.0 }
 0x490   : > { %v1875_v49 = vadd.f32 %v1859_v8, %v8703_v35  ;;  %v1890_v1 = vmax.f32 %v1874_v21, 0.0  ;;  %v1849_v8 = vmul.f32 %v1833_v14, %v8980_v17  ;;  %v1847_v16 = vmul.f32 %v1831_v42, %v8967_v44 }
 0x491   : > { %v1893_v57 = vmax.f32 %v1877_v10, 0.0  ;;  %v1836_v14 = vadd.f32 %v8767_v18, %v8972_v31  ;;  %v1835_v18 = vadd.f32 %v8972_v31, %v8778_v22 }
 0x492   : > { %v1891_v60 = vmax.f32 %v1875_v49, 0.0  ;;  %v7150_v26 = vpop.f32.mrb[44].mxu0 }
 0x493   : > { %v1864_v5 = vadd.f32 %v7150_v26, %v1848_v56  ;;  %v1622_v0 = vpop.f32.mrb[45].mxu0  ;;  %v1907_v46 = vpack.c.bf16 %v1893_v57, %v1892_v2  ;;  %v1834_v57 = vadd.f32 %v8972_v31, %v8770_v19  ;;  %v9028_v56 = vpop.xlane.xlu1 %719 }
 0x494   : > { %v1862_v7 = vadd.f32 %v1846_v52, %v1622_v0  ;;  %v7151_v10 = vpop.f32.mrb[46].mxu0  ;;  %v1906_v48 = vpack.c.bf16 %v1891_v60, %v1890_v1  ;;  %11596 = vst [vmem:[#allocation68_spill] sm:$0xff] %v9028_v56  ;;  %v1837_v1 = vadd.f32 %v8773_v20, %v8972_v31 }
 0x495   : > { %v1880_v13 = vadd.f32 %v8705_v36, %v1864_v5  ;;  %v1865_v41 = vadd.f32 %v7151_v10, %v1849_v8  ;;  %v1625_v21 = vpop.f32.mrb[47].mxu0  ;;  %2768 = vrot.lane.b32.xlu0 %v1907_v46, %s8308_s28  ;;  %v1850_v19 = vmul.f32 %v1834_v57, %v8992_v4  ;;  %v1840_v57 = vadd.f32 %v8790_v28, %v8972_v31 }
 0x496   : > { %v1878_v55 = vadd.f32 %v1862_v7, %v8707_v37  ;;  %v1863_v49 = vadd.f32 %v1847_v16, %v1625_v21  ;;  %2766 = vrot.lane.b32.xlu1 %v1906_v48, %s8308_s28  ;;  %7164 = vmatprep.mubr.msk.bf16.mxu0 %vm1200_vm2, %v1906_v48  ;;  %v1852_v48 = vmul.f32 %v1836_v14, %v9010_v58 }
 0x497   : > { %v1881_v2 = vadd.f32 %v8709_v38, %v1865_v41  ;;  %7165 = vmatmul.mubr.msk.bf16.vlgmr.msra.gmra.mrb[56].mxu0 %vm1200_vm2, %v1907_v46  ;;  %v1896_v60 = vmax.f32 %v1880_v13, 0.0  ;;  %v9036_v41 = vpop.xlane.xlu0 %722  ;;  %v1853_v10 = vmul.f32 %v1837_v1, %v9014_v9  ;;  %v1851_v13 = vmul.f32 %v1835_v18, %v8996_v3 }
 0x498   : > { %v1879_v42 = vadd.f32 %v1863_v49, %v8711_v39  ;;  %11597 = vst [vmem:[#allocation69_spill] sm:$0xff] %v9036_v41  ;;  %v1894_v46 = vmax.f32 %v1878_v55, 0.0  ;;  %v1841_v18 = vadd.f32 %v8794_v30, %v8972_v31  ;;  %v1839_v28 = vadd.f32 %v8972_v31, %v8798_v40 }
 0x499   : > { %v1897_v26 = vmax.f32 %v1881_v2, 0.0  ;;  %v9042_v2 = vpop.xlane.xlu1 %725 }
 0x49a   : > { %v1895_v52 = vmax.f32 %v1879_v42, 0.0  ;;  %v7154_v5 = vpop.f32.mrb[48].mxu0  ;;  %11598 = vst [vmem:[#allocation70_spill] sm:$0xff] %v9042_v2 }
 0x49b   : > { %v1909_v0 = vpack.c.bf16 %v1897_v26, %v1896_v60  ;;  %v1868_v8 = vadd.f32 %v7154_v5, %v1852_v48  ;;  %v1638_v7 = vpop.f32.mrb[49].mxu0  ;;  %v1838_v60 = vadd.f32 %v8972_v31, %v8792_v29  ;;  %v9053_v26 = vpop.xlane.xlu0 %728  ;;  %v1856_v5 = vmul.f32 %v1840_v57, %v9042_v2 }
 0x49c   : > { %v1866_v20 = vadd.f32 %v1850_v19, %v1638_v7  ;;  %v7155_v16 = vpop.f32.mrb[50].mxu0  ;;  %v1908_v21 = vpack.c.bf16 %v1895_v52, %v1894_v46  ;;  %11599 = vst [vmem:[#allocation71_spill] sm:$0xff] %v9053_v26 }
 0x49d   : > { %v1884_v49 = vadd.f32 %v8716_v43, %v1868_v8  ;;  %v1869_v22 = vadd.f32 %v7155_v16, %v1853_v10  ;;  %v1641_v14 = vpop.f32.mrb[51].mxu0  ;;  %v1854_v29 = vmul.f32 %v1838_v60, %v9028_v56  ;;  %v1857_v16 = vmul.f32 %v1841_v18, %v9053_v26  ;;  %v8128_v56 = vld [vmem:[%s8629_s11 + $0x18] sm:$0xff] }
 0x49e   : > { %v1882_v55 = vadd.f32 %v1866_v20, %v8718_v45  ;;  %v1867_v42 = vadd.f32 %v1851_v13, %v1641_v14  ;;  %2770 = vrot.lane.b32.xlu1 %v1908_v21, %s8308_s28  ;;  %7168 = vmatprep.mubr.msk.bf16.mxu0 %vm1200_vm2, %v1908_v21 }
 0x49f   : > { %v1885_v1 = vadd.f32 %v8720_v47, %v1869_v22  ;;  %7169 = vmatmul.mubr.msk.bf16.gmra.mrb[60].mxu0 %vm1200_vm2, %v1909_v0  ;;  %v1900_v46 = vmax.f32 %v1884_v49, 0.0  ;;  %v1855_v49 = vmul.f32 %v1839_v28, %v9036_v41  ;;  %v8126_v41 = vld [vmem:[%s8629_s11 + $0x8] sm:$0xff] }
 0x4a0   : > { %v1883_v48 = vadd.f32 %v1867_v42, %v8722_v51  ;;  %v1898_v19 = vmax.f32 %v1882_v55, 0.0  ;;  %v11332_v55 = vsub.s32 0, %v8867_v50 }
 0x4a1   : > { %v1901_v52 = vmax.f32 %v1885_v1, 0.0 }
 0x4a2   : > { %v1899_v8 = vmax.f32 %v1883_v48, 0.0  ;;  %v7158_v7 = vpop.f32.mrb[52].mxu0  ;;  %2772 = vrot.lane.b32.xlu1 %v1909_v0, %s8308_s28  ;;  %v1678_v18 = vrot.slane %v8875_v54, %v11332_v55 }
 0x4a3   : > { %v1872_v10 = vadd.f32 %v7158_v7, %v1856_v5  ;;  %v1654_v20 = vpop.f32.mrb[53].mxu0  ;;  %v1911_v13 = vpack.c.bf16 %v1901_v52, %v1900_v46 }
 0x4a4   : > { %v1870_v30 = vadd.f32 %v1854_v29, %v1654_v20  ;;  %v7159_v21 = vpop.f32.mrb[54].mxu0  ;;  %v1910_v22 = vpack.c.bf16 %v1899_v8, %v1898_v19  ;;  %v9079_v19 = vadd.f32 %v8877_v62, %v1678_v18  ;;  %v9082_v8 = vadd.f32 %v8869_v53, %v1678_v18  ;;  %v11601_v29 = vld [vmem:[#allocation36_spill] sm:$0xff] }
 0x4a5   : > { %v1888_v14 = vadd.f32 %v8725_v59, %v1872_v10  ;;  %v1873_v40 = vadd.f32 %v7159_v21, %v1857_v16  ;;  %v1657_v31 = vpop.f32.mrb[55].mxu0  ;;  %v9090_v54 = vadd.f32 %v8895_v12, %v1678_v18  ;;  %v9093_v7 = vadd.f32 %v8890_v11, %v1678_v18  ;;  %v11600_v11 = vld [vmem:[#allocation38_spill] sm:$0xff]  ;;  %v11603_v20 = vld [vmem:[#allocation40_spill] sm:$0xff] }
 0x4a6   : > { %v1886_v0 = vadd.f32 %v1870_v30, %v8728_v61  ;;  %v1871_v42 = vadd.f32 %v1855_v49, %v1657_v31  ;;  %2774 = vrot.lane.b32.xlu0 %v1910_v22, %s8308_s28  ;;  %7172 = vmatprep.mubr.msk.bf16.mxu0 %vm1200_vm2, %v1910_v22  ;;  %v9108_v53 = vadd.f32 %v8905_v27, %v1678_v18  ;;  %v11605_v21 = vld [vmem:[#allocation44_spill] sm:$0xff]  ;;  %v11606_v22 = vld [vmem:[#allocation50_spill] sm:$0xff] }
 0x4a7   : > { %v1889_v57 = vadd.f32 %v8730_v63, %v1873_v40  ;;  %2776 = vrot.lane.b32.xlu1 %v1911_v13, %s8308_s28  ;;  %7173 = vmatmul.mubr.msk.bf16.gmra.mrb[64].mxu0 %vm1200_vm2, %v1911_v13  ;;  %v1904_v60 = vmax.f32 %v1888_v14, 0.0  ;;  %v9111_v62 = vadd.f32 %v8900_v23, %v1678_v18  ;;  %v9118_v12 = vadd.f32 %v11600_v11, %v1678_v18  ;;  %v11602_v23 = vld [vmem:[#allocation42_spill] sm:$0xff]  ;;  %v11607_v40 = vld [vmem:[#allocation48_spill] sm:$0xff]  ;;  %v11617_v11 = vld [vmem:[#allocation37_spill] sm:$0xff] }
 0x4a8   : > { %v1887_v1 = vadd.f32 %v1871_v42, %v8732_v6  ;;  %v1902_v46 = vmax.f32 %v1886_v0, 0.0  ;;  %v9121_v10 = vadd.f32 %v11601_v29, %v1678_v18  ;;  %v9136_v27 = vadd.f32 %v11602_v23, %v1678_v18  ;;  %v11604_v13 = vld [vmem:[#allocation46_spill] sm:$0xff]  ;;  %v11618_v29 = vld [vmem:[#allocation43_spill] sm:$0xff]  ;;  %v11619_v23 = vld [vmem:[#allocation41_spill] sm:$0xff] }
 0x4a9   : > { %v1905_v48 = vmax.f32 %v1889_v57, 0.0  ;;  %v9139_v16 = vadd.f32 %v11603_v20, %v1678_v18  ;;  %v9146_v30 = vadd.f32 %v11604_v13, %v1678_v18  ;;  %v9149_v49 = vadd.f32 %v11605_v21, %v1678_v18  ;;  %v11608_v0 = vld [vmem:[#allocation54_spill] sm:$0xff]  ;;  %v11609_v57 = vld [vmem:[#allocation52_spill] sm:$0xff]  ;;  %v11620_v20 = vld [vmem:[#allocation47_spill] sm:$0xff] }
 0x4aa   : > { %v1903_v52 = vmax.f32 %v1887_v1, 0.0  ;;  %v9164_v14 = vadd.f32 %v11606_v22, %v1678_v18  ;;  %v9167_v31 = vadd.f32 %v11607_v40, %v1678_v18  ;;  %v9174_v42 = vadd.f32 %v11608_v0, %v1678_v18  ;;  %v11621_v13 = vld [vmem:[#allocation45_spill] sm:$0xff]  ;;  %v11622_v40 = vld [vmem:[#allocation51_spill] sm:$0xff] }
 0x4ab   : > { %v1913_v5 = vpack.c.bf16 %v1905_v48, %v1904_v60  ;;  %v9177_v1 = vadd.f32 %v11609_v57, %v1678_v18  ;;  %v11610_v60 = vld [vmem:[#allocation31_spill] sm:$0xff]  ;;  %v11611_v48 = vld [vmem:[#allocation30_spill] sm:$0xff]  ;;  %v11612_v18 = vld [vmem:[#allocation33_spill] sm:$0xff] }
 0x4ac   : > { %v1912_v28 = vpack.c.bf16 %v1903_v52, %v1902_v46  ;;  %v11613_v46 = vld [vmem:[#allocation32_spill] sm:$0xff]  ;;  %v11614_v52 = vld [vmem:[#allocation35_spill] sm:$0xff]  ;;  %v11623_v0 = vld [vmem:[#allocation49_spill] sm:$0xff] }
 0x4ad   : > { %2780 = vrot.lane.b32.xlu1 %v1913_v5, %s8308_s28  ;;  %v11624_v57 = vld [vmem:[#allocation53_spill] sm:$0xff] }
 0x4ae   : > { %2778 = vrot.lane.b32.xlu0 %v1912_v28, %s8308_s28  ;;  %7176 = vmatprep.mubr.msk.bf16.mxu0 %vm1200_vm2, %v1912_v28  ;;  %v11616_v28 = vld [vmem:[#allocation39_spill] sm:$0xff] }
 0x4af   : > { %7177 = vmatmul.mubr.msk.bf16.gmra.mrb[68].mxu0 %vm1200_vm2, %v1913_v5  ;;  %v11615_v5 = vld [vmem:[#allocation34_spill] sm:$0xff] }
 0x4b1   : > { %2188 = vrot.lane.b32.xlu1 %v9079_v19, %s8306_s29 }
 0x4b2   : > { %2186 = vrot.lane.b32.xlu0 %v9082_v8, %s8306_s29 }
 0x4b5   : > { %2192 = vrot.lane.b32.xlu1 %v9090_v54, %s8306_s29 }
 0x4b6   : > { %2190 = vrot.lane.b32.xlu0 %v9093_v7, %s8306_s29 }
 0x4b9   : > { %2917 = vrot.lane.b32.xlu1 %v9079_v19, %s8309_s16 }
 0x4ba   : > { %2915 = vrot.lane.b32.xlu0 %v9082_v8, %s8309_s16 }
 0x4bd   : > { %2921 = vrot.lane.b32.xlu1 %v9090_v54, %s8309_s16 }
 0x4be   : > { %2919 = vrot.lane.b32.xlu0 %v9093_v7, %s8309_s16 }
 0x4c1   : > { %2196 = vrot.lane.b32.xlu1 %v9108_v53, %s8306_s29 }
 0x4c2   : > { %2194 = vrot.lane.b32.xlu0 %v9111_v62, %s8306_s29 }
 0x4c5   : > { %2200 = vrot.lane.b32.xlu1 %v9118_v12, %s8306_s29 }
 0x4c6   : > { %2198 = vrot.lane.b32.xlu0 %v9121_v10, %s8306_s29 }
 0x4c9   : > { %2925 = vrot.lane.b32.xlu1 %v9108_v53, %s8309_s16 }
 0x4ca   : > { %2923 = vrot.lane.b32.xlu0 %v9111_v62, %s8309_s16 }
 0x4cd   : > { %2929 = vrot.lane.b32.xlu1 %v9118_v12, %s8309_s16 }
 0x4ce   : > { %2927 = vrot.lane.b32.xlu0 %v9121_v10, %s8309_s16 }
 0x4d1   : > { %2204 = vrot.lane.b32.xlu1 %v9136_v27, %s8306_s29 }
 0x4d2   : > { %2202 = vrot.lane.b32.xlu0 %v9139_v16, %s8306_s29 }
 0x4d5   : > { %2208 = vrot.lane.b32.xlu1 %v9146_v30, %s8306_s29 }
 0x4d6   : > { %2206 = vrot.lane.b32.xlu0 %v9149_v49, %s8306_s29 }
 0x4d9   : > { %2933 = vrot.lane.b32.xlu1 %v9136_v27, %s8309_s16 }
 0x4da   : > { %2931 = vrot.lane.b32.xlu0 %v9139_v16, %s8309_s16 }
 0x4dd   : > { %2937 = vrot.lane.b32.xlu1 %v9146_v30, %s8309_s16 }
 0x4de   : > { %2935 = vrot.lane.b32.xlu0 %v9149_v49, %s8309_s16 }
 0x4e1   : > { %2212 = vrot.lane.b32.xlu1 %v9164_v14, %s8306_s29 }
 0x4e2   : > { %2210 = vrot.lane.b32.xlu0 %v9167_v31, %s8306_s29 }
 0x4e5   : > { %2216 = vrot.lane.b32.xlu1 %v9174_v42, %s8306_s29 }
 0x4e6   : > { %2214 = vrot.lane.b32.xlu0 %v9177_v1, %s8306_s29 }
 0x4e9   : > { %2941 = vrot.lane.b32.xlu1 %v9164_v14, %s8309_s16 }
 0x4ea   : > { %2939 = vrot.lane.b32.xlu0 %v9167_v31, %s8309_s16 }
 0x4ed   : > { %2945 = vrot.lane.b32.xlu1 %v9174_v42, %s8309_s16 }
 0x4ee   : > { %2943 = vrot.lane.b32.xlu0 %v9177_v1, %s8309_s16 }
 0x4f1   : > { %3253 = vrot.lane.b32.xlu1 %v11610_v60, %s8308_s28 }
 0x4f2   : > { %3251 = vrot.lane.b32.xlu0 %v11611_v48, %s8308_s28 }
 0x4f5   : > { %3257 = vrot.lane.b32.xlu1 %v11612_v18, %s8308_s28 }
 0x4f6   : > { %3255 = vrot.lane.b32.xlu0 %v11613_v46, %s8308_s28 }
 0x4f9   : > { %3261 = vrot.lane.b32.xlu1 %v11614_v52, %s8308_s28 }
 0x4fa   : > { %3259 = vrot.lane.b32.xlu0 %v11615_v5, %s8308_s28 }
 0x4fd   : > { %3265 = vrot.lane.b32.xlu1 %v11616_v28, %s8308_s28 }
 0x4fe   : > { %3263 = vrot.lane.b32.xlu0 %v11617_v11, %s8308_s28 }
 0x501   : > { %3269 = vrot.lane.b32.xlu1 %v11618_v29, %s8308_s28 }
 0x502   : > { %3267 = vrot.lane.b32.xlu0 %v11619_v23, %s8308_s28 }
 0x505   : > { %3273 = vrot.lane.b32.xlu1 %v11620_v20, %s8308_s28 }
 0x506   : > { %3271 = vrot.lane.b32.xlu0 %v11621_v13, %s8308_s28 }
 0x507   : > { %v2769_v22 = vpop.permute.xlu0 %2768 }
 0x508   : > { %v2767_v21 = vpop.permute.xlu1 %2766 }
 0x509   : > { %7204 = vmatprep.mubr.msk.bf16.mxu1 %vm1200_vm2, %v2767_v21  ;;  %3277 = vrot.lane.b32.xlu1 %v11622_v40, %s8308_s28  ;;  %v8127_v21 = vld [vmem:[%s8629_s11] sm:$0xff] }
 0x50a   : > { %3275 = vrot.lane.b32.xlu0 %v11623_v0, %s8308_s28  ;;  %7205 = vmatmul.mubr.msk.bf16.vlgmr.msra.gmra.mrb[56].mxu1 %vm1200_vm2, %v2769_v22  ;;  %v8129_v22 = vld [vmem:[%s8629_s11 + $0x10] sm:$0xff] }
 0x50d   : > { %3281 = vrot.lane.b32.xlu1 %v8989_v24, %s8308_s28 }
 0x50e   : > { %3279 = vrot.lane.b32.xlu0 %v11624_v57, %s8308_s28 }
 0x510   : > { %v2771_v55 = vpop.permute.xlu1 %2770 }
 0x511   : > { %2460 = vrot.lane.b32.xlu1 %v8126_v41, %s8309_s16  ;;  %7208 = vmatprep.mubr.msk.bf16.mxu1 %vm1200_vm2, %v2771_v55 }
 0x512   : > { %2458 = vrot.lane.b32.xlu0 %v8127_v21, %s8309_s16  ;;  %v8136_v21 = vld [vmem:[%s8629_s11 + $0x58] sm:$0xff] }
 0x514   : > { %v2773_v26 = vpop.permute.xlu1 %2772 }
 0x515   : > { %2464 = vrot.lane.b32.xlu1 %v8128_v56, %s8309_s16  ;;  %7209 = vmatmul.mubr.msk.bf16.gmra.mrb[60].mxu1 %vm1200_vm2, %v2773_v26  ;;  %v8130_v26 = vld [vmem:[%s8629_s11 + $0x28] sm:$0xff] }
 0x516   : > { %2462 = vrot.lane.b32.xlu0 %v8129_v22, %s8309_s16  ;;  %v8137_v22 = vld [vmem:[%s8629_s11 + $0x50] sm:$0xff] }
 0x518   : > { %v2775_v2 = vpop.permute.xlu0 %2774 }
 0x519   : > { %3093 = vrot.lane.b32.xlu1 %v11610_v60, %s8309_s16  ;;  %7212 = vmatprep.mubr.msk.bf16.mxu1 %vm1200_vm2, %v2775_v2  ;;  %v2777_v41 = vpop.permute.xlu1 %2776  ;;  %v8131_v2 = vld [vmem:[%s8629_s11 + $0x20] sm:$0xff]  ;;  %v8132_v60 = vld [vmem:[%s8629_s11 + $0x38] sm:$0xff] }
 0x51a   : > { %3091 = vrot.lane.b32.xlu0 %v11611_v48, %s8309_s16  ;;  %v8133_v48 = vld [vmem:[%s8629_s11 + $0x30] sm:$0xff] }
 0x51d   : > { %3097 = vrot.lane.b32.xlu1 %v11612_v18, %s8309_s16  ;;  %7213 = vmatmul.mubr.msk.bf16.gmra.mrb[64].mxu1 %vm1200_vm2, %v2777_v41  ;;  %v8134_v18 = vld [vmem:[%s8629_s11 + $0x48] sm:$0xff] }
 0x51e   : > { %3095 = vrot.lane.b32.xlu0 %v11613_v46, %s8309_s16  ;;  %v8135_v46 = vld [vmem:[%s8629_s11 + $0x40] sm:$0xff] }
 0x51f   : > { %v2781_v55 = vpop.permute.xlu1 %2780 }
 0x520   : > { %v2779_v56 = vpop.permute.xlu0 %2778 }
 0x521   : > { %2468 = vrot.lane.b32.xlu1 %v8130_v26, %s8309_s16  ;;  %7216 = vmatprep.mubr.msk.bf16.mxu1 %vm1200_vm2, %v2779_v56 }
 0x522   : > { %2466 = vrot.lane.b32.xlu0 %v8131_v2, %s8309_s16 }
 0x525   : > { %2472 = vrot.lane.b32.xlu1 %v8132_v60, %s8309_s16  ;;  %7217 = vmatmul.mubr.msk.bf16.gmra.mrb[68].mxu1 %vm1200_vm2, %v2781_v55 }
 0x526   : > { %2470 = vrot.lane.b32.xlu0 %v8133_v48, %s8309_s16 }
 0x529   : > { %3101 = vrot.lane.b32.xlu1 %v11614_v52, %s8309_s16  ;;  %v9273_v52 = vpop.permute.xlu0 %2186 }
 0x52a   : > { %3099 = vrot.lane.b32.xlu0 %v11615_v5, %s8309_s16  ;;  %v9275_v5 = vpop.permute.xlu1 %2188 }
 0x52d   : > { %3105 = vrot.lane.b32.xlu1 %v11616_v28, %s8309_s16  ;;  %v9277_v28 = vpop.permute.xlu0 %2190 }
 0x52e   : > { %3103 = vrot.lane.b32.xlu0 %v11617_v11, %s8309_s16  ;;  %v9279_v41 = vpop.permute.xlu1 %2192 }
 0x531   : > { %2476 = vrot.lane.b32.xlu1 %v8134_v18, %s8309_s16  ;;  %v9281_v11 = vpop.permute.xlu0 %2915 }
 0x532   : > { %2474 = vrot.lane.b32.xlu0 %v8135_v46, %s8309_s16  ;;  %v9283_v56 = vpop.permute.xlu1 %2917 }
 0x535   : > { %2480 = vrot.lane.b32.xlu1 %v8136_v21, %s8309_s16  ;;  %v9285_v26 = vpop.permute.xlu0 %2919 }
 0x536   : > { %2478 = vrot.lane.b32.xlu0 %v8137_v22, %s8309_s16  ;;  %v9287_v2 = vpop.permute.xlu1 %2921  ;;  %v9304_v22 = vld [vmem:[%s11625_s26] ss:$0 sm:$0xff] }
 0x539   : > { %v9289_v55 = vpop.permute.xlu0 %2194 }
 0x53a   : > { %v9291_v60 = vpop.permute.xlu1 %2196 }
 0x53d   : > { %v9293_v48 = vpop.permute.xlu0 %2198 }
 0x53e   : > { %v9295_v18 = vpop.permute.xlu1 %2200 }
 0x541   : > { %v9297_v46 = vpop.permute.xlu0 %2923 }
 0x542   : > { %v9299_v21 = vpop.permute.xlu1 %2925 }
 0x545   : > { %v9306_v9 = vpop.permute.xlu0 %2927 }
 0x546   : > { %v9311_v44 = vpop.permute.xlu1 %2929 }
 0x549   : > { %v9330_v45 = vpop.permute.xlu0 %2202 }
 0x56a   : > { %v7166_v3 = vpop.f32.mrb[56].mxu0 }
 0x56b   : > { %v9309_v4 = vadd.f32 %v7166_v3, %v9304_v22  ;;  %v1995_v58 = vpop.f32.mrb[57].mxu0 }
 0x56c   : > { %v9314_v17 = vadd.f32 %v9304_v22, %v1995_v58  ;;  %v7167_v15 = vpop.f32.mrb[58].mxu0 }
 0x56d   : > { %v2060_v25 = vadd.f32 %v9309_v4, %v9093_v7  ;;  %v9319_v59 = vadd.f32 %v7167_v15, %v9304_v22  ;;  %v1998_v63 = vpop.f32.mrb[59].mxu0  ;;  %v9332_v7 = vpop.permute.xlu1 %2204 }
 0x56e   : > { %v2058_v61 = vadd.f32 %v9314_v17, %v9082_v8  ;;  %v9324_v3 = vadd.f32 %v9304_v22, %v1998_v63 }
 0x56f   : > { %v6630_v6 = vmul.f32 -1.442695, %v2060_v25  ;;  %v2061_v43 = vadd.f32 %v9319_v59, %v9090_v54 }
 0x570   : > { %v6628_v58 = vmul.f32 -1.442695, %v2058_v61  ;;  %v2059_v47 = vadd.f32 %v9324_v3, %v9079_v19 }
 0x571   : > { %7614 = vpow2.f32 %v6630_v6  ;;  %v6631_v15 = vmul.f32 -1.442695, %v2061_v43 }
 0x572   : > { %7616 = vpow2.f32 %v6628_v58  ;;  %v6629_v51 = vmul.f32 -1.442695, %v2059_v47  ;;  %v7170_v8 = vpop.f32.mrb[60].mxu0 }
 0x573   : > { %7618 = vpow2.f32 %v6631_v15  ;;  %v9335_v63 = vadd.f32 %v7170_v8, %v9304_v22  ;;  %v2011_v25 = vpop.f32.mrb[61].mxu0  ;;  %v9350_v15 = vpop.permute.xlu0 %2206 }
 0x574   : > { %7620 = vpow2.f32 %v6629_v51  ;;  %v9338_v61 = vadd.f32 %v9304_v22, %v2011_v25  ;;  %v7171_v54 = vpop.f32.mrb[62].mxu0  ;;  %v9354_v25 = vpop.permute.xlu1 %2208 }
 0x575   : > { %v2064_v19 = vadd.f32 %v9335_v63, %v9121_v10  ;;  %v9343_v43 = vadd.f32 %v7171_v54, %v9304_v22  ;;  %v2014_v6 = vpop.f32.mrb[63].mxu0 }
 0x576   : > { %v2062_v47 = vadd.f32 %v9338_v61, %v9111_v62  ;;  %v9348_v58 = vadd.f32 %v9304_v22, %v2014_v6 }
 0x577   : > { %v6634_v51 = vmul.f32 -1.442695, %v2064_v19  ;;  %v2065_v8 = vadd.f32 %v9343_v43, %v9118_v12 }
 0x578   : > { %v6632_v36 = vmul.f32 -1.442695, %v2062_v47  ;;  %v2063_v10 = vadd.f32 %v9348_v58, %v9108_v53  ;;  %v9364_v53 = vpop.permute.xlu0 %2931 }
 0x579   : > { %7622 = vpow2.f32 %v6634_v51  ;;  %v6635_v54 = vmul.f32 -1.442695, %v2065_v8 }
 0x57a   : > { %7624 = vpow2.f32 %v6632_v36  ;;  %v6633_v38 = vmul.f32 -1.442695, %v2063_v10  ;;  %v7174_v62 = vpop.f32.mrb[64].mxu0 }
 0x57b   : > { %v7615_v37 = vpop.eup %7614  ;;  %7626 = vpow2.f32 %v6635_v54  ;;  %v9359_v6 = vadd.f32 %v7174_v62, %v9304_v22  ;;  %v2027_v19 = vpop.f32.mrb[65].mxu0 }
 0x57c   : > { %v7617_v39 = vpop.eup %7616  ;;  %v2124_v32 = vadd.f32 1.0, %v7615_v37  ;;  %7628 = vpow2.f32 %v6633_v38  ;;  %v9362_v12 = vadd.f32 %v9304_v22, %v2027_v19  ;;  %v7175_v47 = vpop.f32.mrb[66].mxu0 }
 0x57d   : > { %v7619_v34 = vpop.eup %7618  ;;  %v2122_v51 = vadd.f32 1.0, %v7617_v39  ;;  %v2068_v36 = vadd.f32 %v9359_v6, %v9149_v49  ;;  %v9369_v8 = vadd.f32 %v7175_v47, %v9304_v22  ;;  %v2030_v10 = vpop.f32.mrb[67].mxu0 }
 0x57e   : > { %v7621_v54 = vpop.eup %7620  ;;  %v9371_v62 = vpop.permute.xlu1 %2933  ;;  %7630 = vrcp.f32 %v2124_v32  ;;  %v2125_v37 = vadd.f32 1.0, %v7619_v34  ;;  %v2066_v38 = vadd.f32 %v9362_v12, %v9139_v16  ;;  %v9376_v19 = vadd.f32 %v9304_v22, %v2030_v10 }
 0x57f   : > { %7632 = vrcp.f32 %v2122_v51  ;;  %v2123_v39 = vadd.f32 1.0, %v7621_v54  ;;  %v6638_v33 = vmul.f32 -1.442695, %v2068_v36  ;;  %v2069_v49 = vadd.f32 %v9369_v8, %v9146_v30  ;;  %v9382_v24 = vpop.permute.xlu0 %2935 }
 0x580   : > { %7634 = vrcp.f32 %v2125_v37  ;;  %v6636_v47 = vmul.f32 -1.442695, %v2066_v38  ;;  %v2067_v35 = vadd.f32 %v9376_v19, %v9136_v27 }
 0x581   : > { %7636 = vrcp.f32 %v2123_v39  ;;  %v6639_v32 = vmul.f32 -1.442695, %v2069_v49 }
 0x582   : > { %7638 = vpow2.f32 %v6638_v33  ;;  %v6637_v34 = vmul.f32 -1.442695, %v2067_v35  ;;  %v7178_v50 = vpop.f32.mrb[68].mxu0  ;;  %v9387_v30 = vpop.permute.xlu1 %2937 }
 0x583   : > { %v7623_v16 = vpop.eup %7622  ;;  %7640 = vpow2.f32 %v6636_v47  ;;  %v9385_v51 = vadd.f32 %v7178_v50, %v9304_v22  ;;  %v2043_v36 = vpop.f32.mrb[69].mxu0 }
 0x584   : > { %v7625_v10 = vpop.eup %7624  ;;  %v2128_v54 = vadd.f32 1.0, %v7623_v16  ;;  %7642 = vpow2.f32 %v6639_v32  ;;  %v9390_v27 = vadd.f32 %v9304_v22, %v2043_v36  ;;  %v7179_v37 = vpop.f32.mrb[70].mxu0 }
 0x585   : > { %v7627_v33 = vpop.eup %7626  ;;  %v2126_v35 = vadd.f32 1.0, %v7625_v10  ;;  %7644 = vpow2.f32 %v6637_v34  ;;  %v2072_v38 = vadd.f32 %v9385_v51, %v9177_v1  ;;  %v9395_v39 = vadd.f32 %v7179_v37, %v9304_v22  ;;  %v2046_v50 = vpop.f32.mrb[71].mxu0 }
 0x586   : > { %11626 = vst [vmem:[#allocation38_spill] sm:$0xff] %v9390_v27  ;;  %v7629_v49 = vpop.eup %7628  ;;  %7646 = vrcp.f32 %v2128_v54  ;;  %v2129_v47 = vadd.f32 1.0, %v7627_v33  ;;  %v2070_v32 = vadd.f32 %v9390_v27, %v9167_v31  ;;  %v9400_v16 = vadd.f32 %v9304_v22, %v2046_v50  ;;  %v9410_v57 = vpop.permute.xlu0 %2210 }
 0x587   : > { %7648 = vrcp.f32 %v2126_v35  ;;  %v2127_v36 = vadd.f32 1.0, %v7629_v49  ;;  %v6642_v10 = vmul.f32 -1.442695, %v2072_v38  ;;  %v2073_v34 = vadd.f32 %v9395_v39, %v9174_v42  ;;  %v9416_v38 = vpop.permute.xlu1 %2212 }
 0x588   : > { %11627 = vst [vmem:[#allocation36_spill] sm:$0xff] %v9400_v16  ;;  %v9404_v1 = vpop.eup %7630  ;;  %7650 = vrcp.f32 %v2129_v47  ;;  %v6640_v37 = vmul.f32 -1.442695, %v2070_v32  ;;  %v2071_v54 = vadd.f32 %v9400_v16, %v9164_v14 }
 0x589   : > { %11628 = vst [vmem:[#allocation42_spill] sm:$0xff] %v9404_v1  ;;  %v9408_v33 = vpop.eup %7632  ;;  %7652 = vrcp.f32 %v2127_v36  ;;  %v6643_v31 = vmul.f32 -1.442695, %v2073_v34  ;;  %v2236_v22 = vmul.f32 %v9404_v1, %v9277_v28 }
 0x58a   : > { %11629 = vst [vmem:[#allocation40_spill] sm:$0xff] %v9408_v33  ;;  %v9414_v35 = vpop.eup %7634  ;;  %7654 = vpow2.f32 %v6642_v10  ;;  %v6641_v42 = vmul.f32 -1.442695, %v2071_v54  ;;  %v2234_v28 = vmul.f32 %v9408_v33, %v9273_v52  ;;  %v2215_v54 = vpop.permute.xlu0 %2214 }
 0x58b   : > { %11630 = vst [vmem:[#allocation46_spill] sm:$0xff] %v9414_v35  ;;  %v9418_v50 = vpop.eup %7636  ;;  %7656 = vpow2.f32 %v6640_v37  ;;  %2270 = vrot.lane.b32.xlu0 %v2236_v22, %s8306_s29  ;;  %v2237_v14 = vmul.f32 %v9414_v35, %v9279_v41  ;;  %v2217_v22 = vpop.permute.xlu1 %2216 }
 0x58c   : > { %11631 = vst [vmem:[#allocation44_spill] sm:$0xff] %v9418_v50  ;;  %v7639_v49 = vpop.eup %7638  ;;  %7658 = vpow2.f32 %v6643_v31  ;;  %v2235_v41 = vmul.f32 %v9418_v50, %v9275_v5 }
 0x58d   : > { %v7641_v47 = vpop.eup %7640  ;;  %v2132_v32 = vadd.f32 1.0, %v7639_v49  ;;  %7660 = vpow2.f32 %v6641_v42  ;;  %2272 = vrot.lane.b32.xlu1 %v2237_v14, %s8306_s29 }
 0x58e   : > { %v7643_v36 = vpop.eup %7642  ;;  %v2130_v10 = vadd.f32 1.0, %v7641_v47 }
 0x58f   : > { %v7645_v34 = vpop.eup %7644  ;;  %7662 = vrcp.f32 %v2132_v32  ;;  %v2133_v37 = vadd.f32 1.0, %v7643_v36  ;;  %2266 = vrot.lane.b32.xlu0 %v2234_v28, %s8306_s29  ;;  %v9443_v36 = vpop.permute.xlu0 %2939 }
 0x590   : > { %v9429_v31 = vpop.eup %7646  ;;  %7664 = vrcp.f32 %v2130_v10  ;;  %v2131_v42 = vadd.f32 1.0, %v7645_v34 }
 0x591   : > { %11632 = vst [vmem:[#allocation50_spill] sm:$0xff] %v9429_v31  ;;  %v9431_v14 = vpop.eup %7648  ;;  %7666 = vrcp.f32 %v2133_v37  ;;  %2268 = vrot.lane.b32.xlu1 %v2235_v41, %s8306_s29  ;;  %v2240_v52 = vmul.f32 %v9429_v31, %v9293_v48  ;;  %v9448_v37 = vpop.permute.xlu1 %2941 }
 0x592   : > { %11633 = vst [vmem:[#allocation48_spill] sm:$0xff] %v9431_v14  ;;  %v9436_v49 = vpop.eup %7650  ;;  %7668 = vrcp.f32 %v2131_v42  ;;  %v2238_v48 = vmul.f32 %v9431_v14, %v9289_v55  ;;  %v9539_v14 = vld [vmem:[%s11625_s26 + $0x1] ss:$0 sm:$0xff] }
 0x593   : > { %11634 = vst [vmem:[#allocation54_spill] sm:$0xff] %v9436_v49  ;;  %v9438_v47 = vpop.eup %7652  ;;  %2278 = vrot.lane.b32.xlu0 %v2240_v52, %s8306_s29  ;;  %v2241_v5 = vmul.f32 %v9436_v49, %v9295_v18 }
 0x594   : > { %11635 = vst [vmem:[#allocation52_spill] sm:$0xff] %v9438_v47  ;;  %v7655_v32 = vpop.eup %7654  ;;  %v2239_v18 = vmul.f32 %v9438_v47, %v9291_v60 }
 0x595   : > { %v7657_v28 = vpop.eup %7656  ;;  %v2136_v10 = vadd.f32 1.0, %v7655_v32  ;;  %2280 = vrot.lane.b32.xlu1 %v2241_v5, %s8306_s29 }
 0x596   : > { %v7659_v34 = vpop.eup %7658  ;;  %v2134_v41 = vadd.f32 1.0, %v7657_v28 }
 0x597   : > { %v7661_v42 = vpop.eup %7660  ;;  %7670 = vrcp.f32 %v2136_v10  ;;  %v2137_v52 = vadd.f32 1.0, %v7659_v34  ;;  %2274 = vrot.lane.b32.xlu0 %v2238_v48, %s8306_s29  ;;  %v9462_v10 = vpop.permute.xlu0 %2943 }
 0x598   : > { %7672 = vrcp.f32 %v2134_v41  ;;  %v2135_v49 = vadd.f32 1.0, %v7661_v42  ;;  %v9464_v48 = vpop.permute.xlu1 %2945 }
 0x599   : > { %v9453_v32 = vpop.eup %7662  ;;  %7674 = vrcp.f32 %v2137_v52  ;;  %2276 = vrot.lane.b32.xlu1 %v2239_v18, %s8306_s29 }
 0x59a   : > { %11636 = vst [vmem:[#allocation31_spill] sm:$0xff] %v9453_v32  ;;  %v9456_v55 = vpop.eup %7664  ;;  %v2244_v5 = vmul.f32 %v9453_v32, %v9350_v15  ;;  %7676 = vrcp.f32 %v2135_v49 }
 0x59b   : > { %11637 = vst [vmem:[#allocation30_spill] sm:$0xff] %v9456_v55  ;;  %v9460_v28 = vpop.eup %7666  ;;  %v2242_v41 = vmul.f32 %v9456_v55, %v9330_v45  ;;  %v9479_v42 = vpop.permute.xlu0 %3251 }
 0x59c   : > { %11638 = vst [vmem:[#allocation33_spill] sm:$0xff] %v9460_v28  ;;  %2286 = vrot.lane.b32.xlu0 %v2244_v5, %s8306_s29  ;;  %v2245_v60 = vmul.f32 %v9460_v28, %v9354_v25  ;;  %v9469_v34 = vpop.eup %7668  ;;  %v9483_v18 = vpop.permute.xlu1 %3253 }
 0x59d   : > { %11639 = vst [vmem:[#allocation32_spill] sm:$0xff] %v9469_v34  ;;  %v2243_v15 = vmul.f32 %v9469_v34, %v9332_v7 }
 0x59e   : > { %2288 = vrot.lane.b32.xlu1 %v2245_v60, %s8306_s29 }
 0x5a0   : > { %2282 = vrot.lane.b32.xlu0 %v2242_v41, %s8306_s29  ;;  %v9496_v41 = vpop.permute.xlu0 %3255  ;;  %v9498_v34 = vpop.permute.xlu1 %3257 }
 0x5a1   : > { %v9477_v49 = vpop.eup %7670 }
 0x5a2   : > { %11640 = vst [vmem:[#allocation35_spill] sm:$0xff] %v9477_v49  ;;  %v9481_v52 = vpop.eup %7672  ;;  %2284 = vrot.lane.b32.xlu1 %v2243_v15, %s8306_s29  ;;  %v2248_v25 = vmul.f32 %v9477_v49, %v2215_v54 }
 0x5a3   : > { %11641 = vst [vmem:[#allocation34_spill] sm:$0xff] %v9481_v52  ;;  %v9487_v5 = vpop.eup %7674  ;;  %v2246_v7 = vmul.f32 %v9481_v52, %v9410_v57 }
 0x5a4   : > { %11642 = vst [vmem:[#allocation39_spill] sm:$0xff] %v9487_v5  ;;  %2294 = vrot.lane.b32.xlu0 %v2248_v25, %s8306_s29  ;;  %v2249_v45 = vmul.f32 %v9487_v5, %v2217_v22  ;;  %v9491_v60 = vpop.eup %7676  ;;  %v9504_v15 = vpop.permute.xlu0 %3259 }
 0x5a5   : > { %11643 = vst [vmem:[#allocation37_spill] sm:$0xff] %v9491_v60  ;;  %v2247_v54 = vmul.f32 %v9491_v60, %v9416_v38  ;;  %v9506_v22 = vpop.permute.xlu1 %3261 }
 0x5a6   : > { %2296 = vrot.lane.b32.xlu1 %v2249_v45, %s8306_s29 }
 0x5a8   : > { %2290 = vrot.lane.b32.xlu0 %v2246_v7, %s8306_s29  ;;  %v9508_v25 = vpop.permute.xlu0 %3263 }
 0x5a9   : > { %v9510_v45 = vpop.permute.xlu1 %3265 }
 0x5aa   : > { %2292 = vrot.lane.b32.xlu1 %v2247_v54, %s8306_s29 }
 0x5ac   : > { %v9512_v57 = vpop.permute.xlu0 %3267 }
 0x5ad   : > { %v9514_v52 = vpop.permute.xlu1 %3269 }
 0x5b0   : > { %v9516_v5 = vpop.permute.xlu0 %3271 }
 0x5b1   : > { %v9518_v7 = vpop.permute.xlu1 %3273 }
 0x5b4   : > { %v9520_v49 = vpop.permute.xlu0 %3275 }
 0x5b5   : > { %v9522_v38 = vpop.permute.xlu1 %3277 }
 0x5b8   : > { %v9524_v54 = vpop.permute.xlu0 %3279 }
 0x5b9   : > { %v9526_v60 = vpop.permute.xlu1 %3281 }
 0x5bc   : > { %v9528_v55 = vpop.permute.xlu0 %2458 }
 0x5bd   : > { %11644 = vst [vmem:[#allocation43_spill] sm:$0xff] %v9528_v55  ;;  %v9530_v28 = vpop.permute.xlu1 %2460 }
 0x5be   : > { %11645 = vst [vmem:[#allocation41_spill] sm:$0xff] %v9530_v28 }
 0x5c0   : > { %v9532_v32 = vpop.permute.xlu0 %2462 }
 0x5c1   : > { %11646 = vst [vmem:[#allocation47_spill] sm:$0xff] %v9532_v32  ;;  %v9534_v47 = vpop.permute.xlu1 %2464 }
 0x5c2   : > { %11647 = vst [vmem:[#allocation45_spill] sm:$0xff] %v9534_v47 }
 0x5c4   : > { %v9541_v31 = vpop.permute.xlu0 %3091 }
 0x5c5   : > { %11648 = vst [vmem:[#allocation72_spill] sm:$0xff] %v9541_v31  ;;  %v9543_v33 = vpop.permute.xlu1 %3093 }
 0x5c6   : > { %11649 = vst [vmem:[#allocation73_spill] sm:$0xff] %v9543_v33 }
 0x5dd   : > { %v7206_v50 = vpop.f32.mrb[56].mxu1 }
 0x5de   : > { %v9546_v35 = vadd.f32 %v7206_v50, %v9539_v14  ;;  %v2852_v55 = vpop.f32.mrb[57].mxu1 }
 0x5df   : > { %v9549_v28 = vadd.f32 %v9539_v14, %v2852_v55  ;;  %v7207_v32 = vpop.f32.mrb[58].mxu1  ;;  %v9563_v55 = vpop.permute.xlu0 %3095 }
 0x5e0   : > { %11650 = vst [vmem:[#allocation74_spill] sm:$0xff] %v9546_v35  ;;  %v2965_v47 = vadd.f32 %v9285_v26, %v9546_v35  ;;  %v9554_v1 = vadd.f32 %v7207_v32, %v9539_v14  ;;  %v2855_v16 = vpop.f32.mrb[59].mxu1  ;;  %11654 = vst [vmem:[#allocation78_spill] sm:$0xff] %v9563_v55  ;;  %v9567_v35 = vpop.permute.xlu1 %3097 }
 0x5e1   : > { %11651 = vst [vmem:[#allocation75_spill] sm:$0xff] %v9549_v28  ;;  %v2963_v31 = vadd.f32 %v9281_v11, %v9549_v28  ;;  %v9559_v33 = vadd.f32 %v9539_v14, %v2855_v16  ;;  %11655 = vst [vmem:[#allocation79_spill] sm:$0xff] %v9567_v35 }
 0x5e2   : > { %11652 = vst [vmem:[#allocation76_spill] sm:$0xff] %v9554_v1  ;;  %v6669_v50 = vmul.f32 -1.442695, %v2965_v47  ;;  %v2966_v40 = vadd.f32 %v9287_v2, %v9554_v1 }
 0x5e3   : > { %11653 = vst [vmem:[#allocation77_spill] sm:$0xff] %v9559_v33  ;;  %v6667_v27 = vmul.f32 -1.442695, %v2963_v31  ;;  %v2964_v26 = vadd.f32 %v9283_v56, %v9559_v33  ;;  %v9569_v16 = vpop.permute.xlu0 %2466 }
 0x5e4   : > { %7678 = vpow2.f32 %v6669_v50  ;;  %v6670_v32 = vmul.f32 -1.442695, %v2966_v40  ;;  %11656 = vst [vmem:[#allocation80_spill] sm:$0xff] %v9569_v16  ;;  %v9574_v1 = vpop.permute.xlu1 %2468 }
 0x5e5   : > { %7680 = vpow2.f32 %v6667_v27  ;;  %v6668_v0 = vmul.f32 -1.442695, %v2964_v26  ;;  %11658 = vst [vmem:[#allocation82_spill] sm:$0xff] %v9574_v1 }
 0x5e6   : > { %7682 = vpow2.f32 %v6670_v32 }
 0x5e7   : > { %7684 = vpow2.f32 %v6668_v0  ;;  %v9581_v26 = vpop.permute.xlu0 %2470 }
 0x5e8   : > { %v7210_v11 = vpop.f32.mrb[60].mxu1  ;;  %11660 = vst [vmem:[#allocation84_spill] sm:$0xff] %v9581_v26  ;;  %v9586_v1 = vpop.permute.xlu1 %2472 }
 0x5e9   : > { %v9572_v47 = vadd.f32 %v7210_v11, %v9539_v14  ;;  %v2868_v2 = vpop.f32.mrb[61].mxu1  ;;  %11662 = vst [vmem:[#allocation86_spill] sm:$0xff] %v9586_v1 }
 0x5ea   : > { %v7211_v31 = vpop.f32.mrb[62].mxu1  ;;  %v9579_v40 = vadd.f32 %v9539_v14, %v2868_v2 }
 0x5eb   : > { %11657 = vst [vmem:[#allocation81_spill] sm:$0xff] %v9572_v47  ;;  %v2969_v56 = vadd.f32 %v9306_v9, %v9572_v47  ;;  %v2871_v35 = vpop.f32.mrb[63].mxu1  ;;  %v9584_v11 = vadd.f32 %v7211_v31, %v9539_v14  ;;  %v9595_v1 = vpop.permute.xlu0 %3099 }
 0x5ec   : > { %11659 = vst [vmem:[#allocation83_spill] sm:$0xff] %v9579_v40  ;;  %v2967_v9 = vadd.f32 %v9297_v46, %v9579_v40  ;;  %v9593_v31 = vadd.f32 %v9539_v14, %v2871_v35  ;;  %11663 = vst [vmem:[#allocation87_spill] sm:$0xff] %v9595_v1  ;;  %v9597_v28 = vpop.permute.xlu1 %3101 }
 0x5ed   : > { %v6673_v50 = vmul.f32 -1.442695, %v2969_v56  ;;  %11661 = vst [vmem:[#allocation85_spill] sm:$0xff] %v9584_v11  ;;  %11664 = vst [vmem:[#allocation88_spill] sm:$0xff] %v9597_v28 }
 0x5ee   : > { %v7679_v27 = vpop.eup %7678 }
 0x5ef   : > { %v3029_v32 = vadd.f32 1.0, %v7679_v27  ;;  %7686 = vpow2.f32 %v6673_v50  ;;  %v7681_v55 = vpop.eup %7680  ;;  %v2970_v50 = vadd.f32 %v9311_v44, %v9584_v11  ;;  %v9607_v40 = vpop.permute.xlu0 %3103 }
 0x5f0   : > { %v7214_v0 = vpop.f32.mrb[64].mxu1  ;;  %v3027_v16 = vadd.f32 1.0, %v7681_v55  ;;  %v7683_v2 = vpop.eup %7682  ;;  %11665 = vst [vmem:[#allocation89_spill] sm:$0xff] %v9607_v40 }
 0x5f1   : > { %7688 = vrcp.f32 %v3029_v32  ;;  %v2884_v56 = vpop.f32.mrb[65].mxu1  ;;  %v3030_v33 = vadd.f32 1.0, %v7683_v2  ;;  %v7685_v26 = vpop.eup %7684  ;;  %v6671_v32 = vmul.f32 -1.442695, %v2967_v9  ;;  %v6674_v46 = vmul.f32 -1.442695, %v2970_v50 }
 0x5f2   : > { %v7215_v47 = vpop.f32.mrb[66].mxu1  ;;  %7690 = vrcp.f32 %v3027_v16  ;;  %v3028_v55 = vadd.f32 1.0, %v7685_v26  ;;  %v2968_v16 = vadd.f32 %v9299_v21, %v9593_v31  ;;  %v9602_v2 = vadd.f32 %v7214_v0, %v9539_v14  ;;  %v9609_v28 = vpop.permute.xlu1 %3105 }
 0x5f3   : > { %v2887_v27 = vpop.f32.mrb[67].mxu1  ;;  %7692 = vrcp.f32 %v3030_v33  ;;  %v9605_v11 = vadd.f32 %v7215_v47, %v9539_v14  ;;  %11666 = vst [vmem:[#allocation90_spill] sm:$0xff] %v9609_v28 }
 0x5f4   : > { %7694 = vrcp.f32 %v3028_v55  ;;  %v6672_v50 = vmul.f32 -1.442695, %v2968_v16  ;;  %v2973_v21 = vadd.f32 %v9382_v24, %v9602_v2  ;;  %v9621_v16 = vadd.f32 %v9539_v14, %v2887_v27 }
 0x5f5   : > { %7696 = vpow2.f32 %v6671_v32  ;;  %v2974_v47 = vadd.f32 %v9387_v30, %v9605_v11 }
 0x5f6   : > { %7698 = vpow2.f32 %v6674_v46  ;;  %v9627_v30 = vpop.permute.xlu1 %2476 }
 0x5f7   : > { %v6678_v40 = vmul.f32 -1.442695, %v2974_v47 }
 0x5f8   : > { %v7218_v44 = vpop.f32.mrb[68].mxu1 }
 0x5f9   : > { %v7687_v35 = vpop.eup %7686  ;;  %v2900_v1 = vpop.f32.mrb[69].mxu1 }
 0x5fa   : > { %v3033_v33 = vadd.f32 1.0, %v7687_v35  ;;  %v7219_v26 = vpop.f32.mrb[70].mxu1  ;;  %v9617_v35 = vadd.f32 %v9539_v14, %v2884_v56 }
 0x5fb   : > { %v7689_v9 = vpop.eup %7688  ;;  %v2903_v55 = vpop.f32.mrb[71].mxu1 }
 0x5fc   : > { %7700 = vrcp.f32 %v3033_v33  ;;  %v3301_v0 = vmul.f32 %v7689_v9, %v9496_v41  ;;  %v7691_v32 = vpop.eup %7690  ;;  %v6677_v33 = vmul.f32 -1.442695, %v2973_v21  ;;  %v9625_v9 = vpop.permute.xlu0 %2474  ;;  %v2971_v56 = vadd.f32 %v9364_v53, %v9617_v35 }
 0x5fd   : > { %v7693_v46 = vpop.eup %7692  ;;  %7702 = vpow2.f32 %v6672_v50  ;;  %v3299_v24 = vmul.f32 %v7691_v32, %v9479_v42  ;;  %v2972_v50 = vadd.f32 %v9371_v62, %v9621_v16  ;;  %v9637_v53 = vadd.f32 %v7218_v44, %v9539_v14 }
 0x5fe   : > { %3335 = vrot.lane.b32.xlu0 %v3301_v0, %s8306_s29  ;;  %v3302_v28 = vmul.f32 %v7693_v46, %v9498_v34  ;;  %v7695_v41 = vpop.eup %7694  ;;  %7704 = vpow2.f32 %v6677_v33  ;;  %v6675_v47 = vmul.f32 -1.442695, %v2971_v56  ;;  %v9643_v62 = vadd.f32 %v7219_v26, %v9539_v14 }
 0x5ff   : > { %v7697_v27 = vpop.eup %7696  ;;  %v3300_v42 = vmul.f32 %v7695_v41, %v9483_v18  ;;  %7706 = vpow2.f32 %v6678_v40  ;;  %v6676_v46 = vmul.f32 -1.442695, %v2972_v50  ;;  %v9646_v18 = vpop.permute.xlu1 %2480  ;;  %v2977_v44 = vadd.f32 %v9462_v10, %v9637_v53 }
 0x600   : > { %3337 = vrot.lane.b32.xlu1 %v3302_v28, %s8306_s29  ;;  %v3031_v34 = vadd.f32 1.0, %v7697_v27  ;;  %v7699_v21 = vpop.eup %7698  ;;  %v9640_v28 = vpop.permute.xlu0 %2478  ;;  %v2978_v41 = vadd.f32 %v9464_v48, %v9643_v62  ;;  %v9654_v50 = vadd.f32 %v9539_v14, %v2900_v1 }
 0x601   : > { %v3034_v32 = vadd.f32 1.0, %v7699_v21 }
 0x602   : > { %3331 = vrot.lane.b32.xlu0 %v3299_v24, %s8306_s29  ;;  %7708 = vrcp.f32 %v3031_v34  ;;  %v2975_v1 = vadd.f32 %v9443_v36, %v9654_v50 }
 0x603   : > { %7710 = vrcp.f32 %v3034_v32  ;;  %v2273_v26 = vpop.permute.xlu1 %2272 }
 0x604   : > { %3333 = vrot.lane.b32.xlu1 %v3300_v42, %s8306_s29  ;;  %7712 = vpow2.f32 %v6675_v47  ;;  %v2271_v56 = vpop.permute.xlu0 %2270  ;;  %v6682_v42 = vmul.f32 -1.442695, %v2978_v41  ;;  %v2317_v32 = vadd.f32 %v2273_v26, %v9319_v59  ;;  %v6679_v41 = vmul.f32 -1.442695, %v2975_v1 }
 0x605   : > { %7714 = vpow2.f32 %v6676_v46  ;;  %v2316_v10 = vadd.f32 %v2271_v56, %v9309_v4 }
 0x606   : > { %v7701_v0 = vpop.eup %7700 }
 0x607   : > { %v3305_v33 = vmul.f32 %v7701_v0, %v9508_v25  ;;  %v7703_v40 = vpop.eup %7702  ;;  %v6681_v25 = vmul.f32 -1.442695, %v2977_v44  ;;  %v9657_v0 = vadd.f32 %v9539_v14, %v2903_v55 }
 0x608   : > { %v3032_v24 = vadd.f32 1.0, %v7703_v40  ;;  %v7705_v27 = vpop.eup %7704  ;;  %v2267_v47 = vpop.permute.xlu0 %2266 }
 0x609   : > { %3343 = vrot.lane.b32.xlu0 %v3305_v33, %s8306_s29  ;;  %v7707_v34 = vpop.eup %7706  ;;  %v3037_v33 = vadd.f32 1.0, %v7705_v27  ;;  %v2269_v40 = vpop.permute.xlu1 %2268  ;;  %v2976_v59 = vadd.f32 %v9448_v37, %v9657_v0  ;;  %v2314_v4 = vadd.f32 %v2267_v47, %v9314_v17 }
 0x60a   : > { %7716 = vrcp.f32 %v3032_v24  ;;  %v3038_v24 = vadd.f32 1.0, %v7707_v34  ;;  %v2315_v55 = vadd.f32 %v2269_v40, %v9324_v3 }
 0x60b   : > { %7718 = vpow2.f32 %v6681_v25  ;;  %v6680_v26 = vmul.f32 -1.442695, %v2976_v59 }
 0x60c   : > { %v7709_v21 = vpop.eup %7708  ;;  %7720 = vpow2.f32 %v6682_v42  ;;  %v2279_v17 = vpop.permute.xlu0 %2278 }
 0x60d   : > { %v3303_v48 = vmul.f32 %v7709_v21, %v9504_v15  ;;  %v7711_v46 = vpop.eup %7710  ;;  %7722 = vtanh.f32 %v2316_v10  ;;  %v2281_v3 = vpop.permute.xlu1 %2280 }
 0x60e   : > { %v3306_v44 = vmul.f32 %v7711_v46, %v9510_v45  ;;  %v7713_v14 = vpop.eup %7712  ;;  %7724 = vtanh.f32 %v2317_v32  ;;  %v2321_v32 = vadd.f32 %v2281_v3, %v9343_v43 }
 0x60f   : > { %3339 = vrot.lane.b32.xlu0 %v3303_v48, %s8306_s29  ;;  %v7715_v15 = vpop.eup %7714  ;;  %7726 = vrcp.f32 %v3037_v33  ;;  %v3035_v56 = vadd.f32 1.0, %v7713_v14 }
 0x610   : > { %3345 = vrot.lane.b32.xlu1 %v3306_v44, %s8306_s29  ;;  %7728 = vrcp.f32 %v3038_v24  ;;  %v3036_v27 = vadd.f32 1.0, %v7715_v15  ;;  %v2275_v47 = vpop.permute.xlu0 %2274 }
 0x611   : > { %7730 = vtanh.f32 %v2314_v4  ;;  %v2277_v33 = vpop.permute.xlu1 %2276  ;;  %v2318_v44 = vadd.f32 %v2275_v47, %v9338_v61  ;;  %v11667_v47 = vld [vmem:[#allocation49_spill] sm:$0xff] }
 0x612   : > { %7732 = vtanh.f32 %v2315_v55  ;;  %v2319_v14 = vadd.f32 %v2277_v33, %v9348_v58  ;;  %v11670_v33 = vld [vmem:[#allocation36_spill] sm:$0xff] }
 0x613   : > { %7734 = vpow2.f32 %v6679_v41 }
 0x614   : > { %v7717_v36 = vpop.eup %7716  ;;  %7736 = vrcp.f32 %v3035_v56 }
 0x615   : > { %v3304_v45 = vmul.f32 %v7717_v36, %v9506_v22  ;;  %v7719_v37 = vpop.eup %7718  ;;  %7738 = vpow2.f32 %v6680_v26  ;;  %v2320_v22 = vadd.f32 %v2279_v17, %v9335_v63 }
 0x616   : > { %v7721_v25 = vpop.eup %7720  ;;  %7740 = vrcp.f32 %v3036_v27  ;;  %v3041_v46 = vadd.f32 1.0, %v7719_v37 }
 0x617   : > { %3341 = vrot.lane.b32.xlu1 %v3304_v45, %s8306_s29  ;;  %v7723_v34 = vpop.eup %7722  ;;  %v3042_v40 = vadd.f32 1.0, %v7721_v25  ;;  %7742 = vtanh.f32 %v2320_v22  ;;  %v2287_v25 = vpop.permute.xlu0 %2286  ;;  %v8139_v22 = vld [vmem:[%s8629_s11 + $0x68] sm:$0xff] }
 0x618   : > { %v7725_v42 = vpop.eup %7724  ;;  %2382 = vrot.lane.b32.xlu0 %v7723_v34, %s8308_s28  ;;  %7744 = vtanh.f32 %v2321_v32  ;;  %v2289_v34 = vpop.permute.xlu1 %2288 }
 0x619   : > { %v7727_v21 = vpop.eup %7726  ;;  %7746 = vrcp.f32 %v3041_v46  ;;  %v11669_v46 = vld [vmem:[#allocation51_spill] sm:$0xff] }
 0x61a   : > { %v7729_v10 = vpop.eup %7728  ;;  %v3309_v43 = vmul.f32 %v7727_v21, %v9516_v5  ;;  %7748 = vrcp.f32 %v3042_v40  ;;  %v8138_v21 = vld [vmem:[%s8629_s11 + $0x60] sm:$0xff] }
 0x61b   : > { %2384 = vrot.lane.b32.xlu1 %v7725_v42, %s8308_s28  ;;  %v7731_v48 = vpop.eup %7730  ;;  %v3310_v4 = vmul.f32 %v7729_v10, %v9518_v7  ;;  %7750 = vtanh.f32 %v2318_v44 }
 0x61c   : > { %v7733_v1 = vpop.eup %7732  ;;  %2378 = vrot.lane.b32.xlu0 %v7731_v48, %s8308_s28  ;;  %7752 = vtanh.f32 %v2319_v14  ;;  %v11668_v48 = vld [vmem:[#allocation38_spill] sm:$0xff] }
 0x61d   : > { %v7735_v24 = vpop.eup %7734 }
 0x61e   : > { %v7737_v63 = vpop.eup %7736  ;;  %v3039_v55 = vadd.f32 1.0, %v7735_v24 }
 0x61f   : > { %2380 = vrot.lane.b32.xlu1 %v7733_v1, %s8308_s28  ;;  %v7739_v59 = vpop.eup %7738  ;;  %v3307_v36 = vmul.f32 %v7737_v63, %v9512_v57 }
 0x620   : > { %v7741_v15 = vpop.eup %7740  ;;  %3351 = vrot.lane.b32.xlu0 %v3309_v43, %s8306_s29  ;;  %v3040_v61 = vadd.f32 1.0, %v7739_v59  ;;  %7754 = vrcp.f32 %v3039_v55  ;;  %v11671_v59 = vld [vmem:[#allocation53_spill] sm:$0xff] }
 0x621   : > { %v3308_v58 = vmul.f32 %v7741_v15, %v9514_v52  ;;  %v7743_v5 = vpop.eup %7742 }
 0x622   : > { %7756 = vrcp.f32 %v3040_v61  ;;  %v7745_v7 = vpop.eup %7744 }
 0x623   : > { %3353 = vrot.lane.b32.xlu1 %v3310_v4, %s8306_s29  ;;  %v7747_v41 = vpop.eup %7746  ;;  %v11672_v4 = vld [vmem:[#allocation63_spill] sm:$0xff] }
 0x624   : > { %3347 = vrot.lane.b32.xlu0 %v3307_v36, %s8306_s29  ;;  %v7749_v56 = vpop.eup %7748  ;;  %v3313_v52 = vmul.f32 %v7747_v41, %v9524_v54  ;;  %v2285_v54 = vpop.permute.xlu1 %2284  ;;  %v11673_v36 = vld [vmem:[#allocation75_spill] sm:$0xff] }
 0x625   : > { %v7751_v45 = vpop.eup %7750  ;;  %v3314_v27 = vmul.f32 %v7749_v56, %v9526_v60  ;;  %v2283_v60 = vpop.permute.xlu0 %2282  ;;  %v11675_v56 = vld [vmem:[#allocation77_spill] sm:$0xff] }
 0x626   : > { %v7753_v26 = vpop.eup %7752 }
 0x627   : > { %3349 = vrot.lane.b32.xlu1 %v3308_v58, %s8306_s29 }
 0x628   : > { %2390 = vrot.lane.b32.xlu0 %v7743_v5, %s8308_s28  ;;  %v11674_v5 = vld [vmem:[#allocation74_spill] sm:$0xff] }
 0x629   : > { %v2295_v42 = vpop.permute.xlu0 %2294 }
 0x62a   : > { %v7755_v57 = vpop.eup %7754 }
 0x62b   : > { %2392 = vrot.lane.b32.xlu1 %v7745_v7, %s8308_s28  ;;  %v3311_v37 = vmul.f32 %v7755_v57, %v9520_v49  ;;  %v2324_v49 = vadd.f32 %v2287_v25, %v9359_v6  ;;  %v8140_v6 = vld [vmem:[%s8629_s11 + $0x70] sm:$0xff] }
 0x62c   : > { %2386 = vrot.lane.b32.xlu0 %v7751_v45, %s8308_s28  ;;  %v7757_v17 = vpop.eup %7756  ;;  %v11677_v25 = vld [vmem:[#allocation83_spill] sm:$0xff] }
 0x62d   : > { %v3312_v3 = vmul.f32 %v7757_v17, %v9522_v38  ;;  %v2325_v38 = vadd.f32 %v2289_v34, %v9369_v8  ;;  %7758 = vtanh.f32 %v2324_v49  ;;  %v8141_v8 = vld [vmem:[%s8629_s11 + $0x78] sm:$0xff] }
 0x62f   : > { %2388 = vrot.lane.b32.xlu1 %v7753_v26, %s8308_s28  ;;  %7760 = vtanh.f32 %v2325_v38  ;;  %v11676_v26 = vld [vmem:[#allocation76_spill] sm:$0xff] }
 0x630   : > { %3359 = vrot.lane.b32.xlu0 %v3313_v52, %s8306_s29 }
 0x633   : > { %3361 = vrot.lane.b32.xlu1 %v3314_v27, %s8306_s29 }
 0x634   : > { %3355 = vrot.lane.b32.xlu0 %v3311_v37, %s8306_s29 }
 0x637   : > { %3357 = vrot.lane.b32.xlu1 %v3312_v3, %s8306_s29  ;;  %v7759_v1 = vpop.eup %7758 }
 0x638   : > { %3107 = vrot.lane.b32.xlu0 %v11619_v23, %s8309_s16  ;;  %v2297_v23 = vpop.permute.xlu1 %2296 }
 0x639   : > { %v2329_v10 = vadd.f32 %v2297_v23, %v9395_v39  ;;  %v7761_v40 = vpop.eup %7760 }
 0x63b   : > { %3109 = vrot.lane.b32.xlu1 %v11618_v29, %s8309_s16  ;;  %v2322_v29 = vadd.f32 %v2283_v60, %v9362_v12  ;;  %v2291_v12 = vpop.permute.xlu0 %2290 }
 0x63c   : > { %3111 = vrot.lane.b32.xlu0 %v11621_v13, %s8309_s16  ;;  %v2323_v13 = vadd.f32 %v2285_v54, %v9376_v19  ;;  %v2293_v32 = vpop.permute.xlu1 %2292  ;;  %v2326_v19 = vadd.f32 %v2291_v12, %v11668_v48  ;;  %v11678_v54 = vld [vmem:[#allocation81_spill] sm:$0xff]  ;;  %v11682_v12 = vld [vmem:[#allocation47_spill] sm:$0xff] }
 0x63d   : > { %7762 = vtanh.f32 %v2322_v29  ;;  %v11679_v29 = vld [vmem:[#allocation85_spill] sm:$0xff] }
 0x63e   : > { %7764 = vtanh.f32 %v2323_v13 }
 0x63f   : > { %3113 = vrot.lane.b32.xlu1 %v11620_v20, %s8309_s16  ;;  %v2328_v20 = vadd.f32 %v2295_v42, %v9385_v51  ;;  %v2327_v51 = vadd.f32 %v2293_v32, %v11670_v33 }
 0x640   : > { %2482 = vrot.lane.b32.xlu0 %v8138_v21, %s8309_s16 }
 0x641   : > { %7766 = vtanh.f32 %v2328_v20  ;;  %v11681_v20 = vld [vmem:[#allocation46_spill] sm:$0xff] }
 0x642   : > { %7768 = vtanh.f32 %v2329_v10 }
 0x643   : > { %2484 = vrot.lane.b32.xlu1 %v8139_v22, %s8309_s16  ;;  %7770 = vtanh.f32 %v2326_v19  ;;  %v11680_v22 = vld [vmem:[#allocation42_spill] sm:$0xff]  ;;  %v11683_v19 = vld [vmem:[#allocation45_spill] sm:$0xff] }
 0x644   : > { %2486 = vrot.lane.b32.xlu0 %v8140_v6, %s8309_s16  ;;  %7772 = vtanh.f32 %v2327_v51  ;;  %v2348_v13 = vsub.f32 1.0, %v11680_v22  ;;  %v2508_v32 = vmul.f32 %v11680_v22, %v11682_v12 }
 0x647   : > { %2488 = vrot.lane.b32.xlu1 %v8141_v8, %s8309_s16  ;;  %v7763_v39 = vpop.eup %7762  ;;  %v2349_v8 = vsub.f32 1.0, %v11681_v20 }
 0x648   : > { %3115 = vrot.lane.b32.xlu0 %v11667_v47, %s8309_s16  ;;  %v7765_v24 = vpop.eup %7764 }
 0x64b   : > { %3117 = vrot.lane.b32.xlu1 %v11669_v46, %s8309_s16  ;;  %v7767_v44 = vpop.eup %7766  ;;  %v2509_v46 = vmul.f32 %v11681_v20, %v11683_v19 }
 0x64c   : > { %2398 = vrot.lane.b32.xlu0 %v7759_v1, %s8308_s28  ;;  %v7769_v63 = vpop.eup %7768  ;;  %v11684_v1 = vld [vmem:[#allocation40_spill] sm:$0xff] }
 0x64d   : > { %v7771_v14 = vpop.eup %7770 }
 0x64e   : > { %v7773_v43 = vpop.eup %7772 }
 0x64f   : > { %2400 = vrot.lane.b32.xlu1 %v7761_v40, %s8308_s28  ;;  %v2346_v40 = vsub.f32 1.0, %v11684_v1 }
 0x650   : > { %2394 = vrot.lane.b32.xlu0 %v7763_v39, %s8308_s28 }
 0x653   : > { %2396 = vrot.lane.b32.xlu1 %v7765_v24, %s8308_s28 }
 0x654   : > { %2406 = vrot.lane.b32.xlu0 %v7767_v44, %s8308_s28  ;;  %v11685_v44 = vld [vmem:[#allocation44_spill] sm:$0xff] }
 0x657   : > { %2408 = vrot.lane.b32.xlu1 %v7769_v63, %s8308_s28  ;;  %v2347_v63 = vsub.f32 1.0, %v11685_v44 }
 0x658   : > { %2402 = vrot.lane.b32.xlu0 %v7771_v14, %s8308_s28 }
 0x65b   : > { %2404 = vrot.lane.b32.xlu1 %v7773_v43, %s8308_s28  ;;  %v11686_v43 = vld [vmem:[#allocation43_spill] sm:$0xff] }
 0x65c   : > { %3119 = vrot.lane.b32.xlu0 %v11671_v59, %s8309_s16  ;;  %v2506_v59 = vmul.f32 %v11684_v1, %v11686_v43 }
 0x65f   : > { %3121 = vrot.lane.b32.xlu1 %v11672_v4, %s8309_s16 }
 0x670   : > { %v3336_v15 = vpop.permute.xlu0 %3335 }
 0x671   : > { %v3381_v7 = vadd.f32 %v3336_v15, %v11674_v5 }
 0x672   : > { %v3338_v55 = vpop.permute.xlu1 %3337 }
 0x673   : > { %v3382_v52 = vadd.f32 %v3338_v55, %v11676_v26  ;;  %v11687_v55 = vld [vmem:[#allocation41_spill] sm:$0xff] }
 0x674   : > { %v3332_v61 = vpop.permute.xlu0 %3331 }
 0x675   : > { %v3379_v58 = vadd.f32 %v3332_v61, %v11673_v36  ;;  %v2507_v61 = vmul.f32 %v11685_v44, %v11687_v55 }
 0x676   : > { %v3334_v41 = vpop.permute.xlu1 %3333 }
 0x677   : > { %7774 = vtanh.f32 %v3379_v58  ;;  %v3380_v45 = vadd.f32 %v3334_v41, %v11675_v56 }
 0x679   : > { %7776 = vtanh.f32 %v3380_v45 }
 0x67a   : > { %7778 = vtanh.f32 %v3381_v7 }
 0x67b   : > { %7780 = vtanh.f32 %v3382_v52  ;;  %v3344_v57 = vpop.permute.xlu0 %3343 }
 0x67c   : > { %v3385_v49 = vadd.f32 %v3344_v57, %v11678_v54 }
 0x681   : > { %v7775_v27 = vpop.eup %7774  ;;  %v3340_v37 = vpop.permute.xlu0 %3339 }
 0x682   : > { %3443 = vrot.lane.b32.xlu0 %v7775_v27, %s8308_s28  ;;  %v3383_v34 = vadd.f32 %v3340_v37, %v11677_v25  ;;  %v3346_v60 = vpop.permute.xlu1 %3345 }
 0x683   : > { %v7777_v17 = vpop.eup %7776  ;;  %v3386_v23 = vadd.f32 %v3346_v60, %v11679_v29 }
 0x684   : > { %v7779_v3 = vpop.eup %7778  ;;  %3445 = vrot.lane.b32.xlu1 %v7777_v17, %s8308_s28  ;;  %7782 = vtanh.f32 %v3383_v34 }
 0x685   : > { %v7781_v38 = vpop.eup %7780  ;;  %7784 = vtanh.f32 %v3385_v49 }
 0x686   : > { %3447 = vrot.lane.b32.xlu0 %v7779_v3, %s8308_s28 }
 0x688   : > { %3449 = vrot.lane.b32.xlu1 %v7781_v38, %s8308_s28 }
 0x689   : > { %v3342_v42 = vpop.permute.xlu1 %3341 }
 0x68a   : > { %v3384_v21 = vadd.f32 %v3342_v42, %v9593_v31  ;;  %v2383_v6 = vpop.permute.xlu0 %2382 }
 0x68b   : > { %v2428_v47 = vmul.f32 %v2383_v6, %v2348_v13  ;;  %v11688_v13 = vld [vmem:[#allocation50_spill] sm:$0xff] }
 0x68c   : > { %7786 = vtanh.f32 %v3384_v21  ;;  %v2352_v6 = vsub.f32 1.0, %v11688_v13 }
 0x68d   : > { %7788 = vtanh.f32 %v3386_v23  ;;  %v2385_v48 = vpop.permute.xlu1 %2384  ;;  %v2524_v51 = vadd.f32 %v2508_v32, %v2428_v47  ;;  %v11690_v47 = vld [vmem:[#allocation84_spill] sm:$0xff] }
 0x68e   : > { %v7783_v10 = vpop.eup %7782  ;;  %v2429_v33 = vmul.f32 %v2385_v48, %v2349_v8  ;;  %v2379_v24 = vpop.permute.xlu0 %2378  ;;  %v2512_v48 = vmul.f32 %v11688_v13, %v11690_v47 }
 0x68f   : > { %3451 = vrot.lane.b32.xlu0 %v7783_v10, %s8308_s28  ;;  %v7785_v14 = vpop.eup %7784  ;;  %v2426_v4 = vmul.f32 %v2379_v24, %v2346_v40  ;;  %v2540_v58 = vmax.f32 %v2524_v51, 0.0  ;;  %v11689_v10 = vld [vmem:[#allocation54_spill] sm:$0xff]  ;;  %v11692_v24 = vld [vmem:[#allocation48_spill] sm:$0xff] }
 0x690   : > { %v2525_v39 = vadd.f32 %v2509_v46, %v2429_v33  ;;  %v2353_v32 = vsub.f32 1.0, %v11689_v10  ;;  %v11691_v51 = vld [vmem:[#allocation86_spill] sm:$0xff]  ;;  %v2350_v44 = vsub.f32 1.0, %v11692_v24 }
 0x691   : > { %v2381_v15 = vpop.permute.xlu1 %2380  ;;  %v2522_v52 = vadd.f32 %v2506_v59, %v2426_v4  ;;  %v2513_v1 = vmul.f32 %v11689_v10, %v11691_v51  ;;  %v11693_v59 = vld [vmem:[#allocation52_spill] sm:$0xff] }
 0x692   : > { %v2541_v7 = vmax.f32 %v2525_v39, 0.0  ;;  %v2427_v41 = vmul.f32 %v2381_v15, %v2347_v63  ;;  %v3352_v17 = vpop.permute.xlu0 %3351  ;;  %v2351_v4 = vsub.f32 1.0, %v11693_v59  ;;  %v11694_v15 = vld [vmem:[#allocation80_spill] sm:$0xff] }
 0x693   : > { %3455 = vrot.lane.b32.xlu0 %v7785_v14, %s8308_s28  ;;  %v2538_v3 = vmax.f32 %v2522_v52, 0.0  ;;  %v3389_v22 = vadd.f32 %v3352_v17, %v9602_v2 }
 0x694   : > { %v9767_v57 = vpack.c.bf16 %v2541_v7, %v2540_v58  ;;  %v2523_v27 = vadd.f32 %v2507_v61, %v2427_v41  ;;  %v2510_v61 = vmul.f32 %v11692_v24, %v11694_v15  ;;  %v11695_v41 = vld [vmem:[#allocation82_spill] sm:$0xff] }
 0x695   : > { %v3354_v37 = vpop.permute.xlu1 %3353 }
 0x696   : > { %v7787_v45 = vpop.eup %7786  ;;  %v2539_v34 = vmax.f32 %v2523_v27, 0.0  ;;  %v3348_v38 = vpop.permute.xlu0 %3347  ;;  %v3390_v20 = vadd.f32 %v3354_v37, %v9605_v11 }
 0x697   : > { %3453 = vrot.lane.b32.xlu1 %v7787_v45, %s8308_s28  ;;  %v7789_v60 = vpop.eup %7788  ;;  %v3387_v42 = vadd.f32 %v3348_v38, %v9617_v35  ;;  %v2511_v45 = vmul.f32 %v11693_v59, %v11695_v41 }
 0x698   : > { %v9770_v49 = vpack.c.bf16 %v2539_v34, %v2538_v3 }
 0x699   : > { %v3350_v21 = vpop.permute.xlu1 %3349  ;;  %7790 = vtanh.f32 %v3387_v42 }
 0x69a   : > { %v3388_v23 = vadd.f32 %v3350_v21, %v9621_v16  ;;  %v2391_v8 = vpop.permute.xlu0 %2390 }
 0x69b   : > { %3457 = vrot.lane.b32.xlu1 %v7789_v60, %s8308_s28  ;;  %v2432_v46 = vmul.f32 %v2391_v8, %v2352_v6 }
 0x69c   : > { %7792 = vtanh.f32 %v3388_v23 }
 0x69d   : > { %v2393_v33 = vpop.permute.xlu1 %2392  ;;  %7794 = vtanh.f32 %v3389_v22  ;;  %v2528_v39 = vadd.f32 %v2512_v48, %v2432_v46 }
 0x69e   : > { %v2433_v40 = vmul.f32 %v2393_v33, %v2353_v32  ;;  %7796 = vtanh.f32 %v3390_v20  ;;  %v2387_v14 = vpop.permute.xlu0 %2386 }
 0x69f   : > { %v2430_v58 = vmul.f32 %v2387_v14, %v2350_v44  ;;  %v2544_v52 = vmax.f32 %v2528_v39, 0.0  ;;  %v7582_v39 = vld [vmem:[#allocation7] sm:$0xff]  }
 0x6a0   : > { %v2529_v63 = vadd.f32 %v2513_v1, %v2433_v40  ;;  %7180 = vmatprep.subr.bf16.mxu0 %v7582_v39 }
 0x6a1   : > { %v2389_v7 = vpop.permute.xlu1 %2388  ;;  %v2526_v37 = vadd.f32 %v2510_v61, %v2430_v58  ;;  %7181 = vmatpush3.bf16.msra.mxu0 %v7582_v39 }
 0x6a2   : > { %v2545_v27 = vmax.f32 %v2529_v63, 0.0  ;;  %v2431_v17 = vmul.f32 %v2389_v7, %v2351_v4  ;;  %v3360_v60 = vpop.permute.xlu0 %3359  ;;  %v7583_v63 = vld [vmem:[#allocation7 + $0x8] sm:$0xff]  }
 0x6a3   : > { %v7791_v38 = vpop.eup %7790  ;;  %v2542_v23 = vmax.f32 %v2526_v37, 0.0  ;;  %v3393_v46 = vadd.f32 %v3360_v60, %v9637_v53  ;;  %7182 = vmatprep.subr.bf16.mxu0 %v7583_v63  ;;  %v11696_v37 = vld [vmem:[#allocation31_spill] sm:$0xff] }
 0x6a4   : > { %v2557_v3 = vpack.c.bf16 %v2545_v27, %v2544_v52  ;;  %v2527_v34 = vadd.f32 %v2511_v45, %v2431_v17  ;;  %3459 = vrot.lane.b32.xlu0 %v7791_v38, %s8308_s28  ;;  %v11697_v38 = vld [vmem:[#allocation33_spill] sm:$0xff] }
 0x6a5   : > { %v3362_v42 = vpop.permute.xlu1 %3361  ;;  %7183 = vmatpush3.bf16.msra.mxu0 %v7583_v63 }
 0x6a6   : > { %v7793_v21 = vpop.eup %7792  ;;  %v2543_v22 = vmax.f32 %v2527_v34, 0.0  ;;  %v3356_v6 = vpop.permute.xlu0 %3355  ;;  %v3394_v33 = vadd.f32 %v3362_v42, %v9643_v62  ;;  %v2356_v34 = vsub.f32 1.0, %v11696_v37  ;;  %v2357_v42 = vsub.f32 1.0, %v11697_v38 }
 0x6a7   : > { %3461 = vrot.lane.b32.xlu1 %v7793_v21, %s8308_s28  ;;  %v7795_v20 = vpop.eup %7794  ;;  %v3391_v8 = vadd.f32 %v3356_v6, %v9654_v50  ;;  %v2516_v21 = vmul.f32 %v11696_v37, %v9640_v28  ;;  %v2517_v6 = vmul.f32 %v11697_v38, %v9646_v18  ;;  %v11700_v37 = vld [vmem:[#allocation35_spill] sm:$0xff] }
 0x6a8   : > { %v2556_v13 = vpack.c.bf16 %v2543_v22, %v2542_v23  ;;  %v7797_v32 = vpop.eup %7796  ;;  %3463 = vrot.lane.b32.xlu0 %v7795_v20, %s8308_s28 }
 0x6a9   : > { %v3358_v10 = vpop.permute.xlu1 %3357  ;;  %7798 = vtanh.f32 %v3391_v8 }
 0x6aa   : > { %v3392_v48 = vadd.f32 %v3358_v10, %v9657_v0  ;;  %v9797_v1 = vpop.permute.xlu0 %3107 }
 0x6ab   : > { %3465 = vrot.lane.b32.xlu1 %v7797_v32, %s8308_s28 }
 0x6ac   : > { %7800 = vtanh.f32 %v3392_v48  ;;  %v11699_v48 = vld [vmem:[#allocation32_spill] sm:$0xff] }
 0x6ad   : > { %v9799_v40 = vpop.permute.xlu1 %3109  ;;  %7802 = vtanh.f32 %v3393_v46  ;;  %v2355_v46 = vsub.f32 1.0, %v11699_v48 }
 0x6ae   : > { %7804 = vtanh.f32 %v3394_v33  ;;  %v9801_v24 = vpop.permute.xlu0 %3111 }
 0x6b1   : > { %v9803_v44 = vpop.permute.xlu1 %3113 }
 0x6b2   : > { %v9805_v14 = vpop.permute.xlu0 %2482 }
 0x6b3   : > { %v7799_v59 = vpop.eup %7798 }
 0x6b4   : > { %3467 = vrot.lane.b32.xlu0 %v7799_v59, %s8308_s28  ;;  %v2515_v59 = vmul.f32 %v11699_v48, %v9627_v30  ;;  %v9848_v48 = vld [vmem:[#allocation7 + $0x10] sm:$0xff]  }
 0x6b5   : > { %v9807_v4 = vpop.permute.xlu1 %2484  ;;  %7220 = vmatprep.subr.bf16.mxu0 %v9848_v48 }
 0x6b6   : > { %v7801_v61 = vpop.eup %7800  ;;  %v9811_v58 = vpop.permute.xlu0 %2486 }
 0x6b7   : > { %3469 = vrot.lane.b32.xlu1 %v7801_v61, %s8308_s28  ;;  %v7803_v7 = vpop.eup %7802 }
 0x6b8   : > { %v7805_v52 = vpop.eup %7804  ;;  %3471 = vrot.lane.b32.xlu0 %v7803_v7, %s8308_s28 }
 0x6b9   : > { %v9813_v45 = vpop.permute.xlu1 %2488 }
 0x6ba   : > { %v9817_v27 = vpop.permute.xlu0 %3115 }
 0x6bb   : > { %3473 = vrot.lane.b32.xlu1 %v7805_v52, %s8308_s28 }
 0x6bc   : > { %2574 = vrot.lane.b32.xlu0 %v9770_v49, %s8308_s28 }
 0x6bd   : > { %v9819_v17 = vpop.permute.xlu1 %3117 }
 0x6be   : > { %v2399_v60 = vpop.permute.xlu0 %2398 }
 0x6bf   : > { %2576 = vrot.lane.b32.xlu1 %v9767_v57, %s8308_s28  ;;  %v2436_v23 = vmul.f32 %v2399_v60, %v2356_v34  ;;  %v11698_v57 = vld [vmem:[#allocation30_spill] sm:$0xff] }
 0x6c0   : > { %2578 = vrot.lane.b32.xlu0 %v2556_v13, %s8308_s28  ;;  %v2354_v8 = vsub.f32 1.0, %v11698_v57  ;;  %v2514_v33 = vmul.f32 %v11698_v57, %v9625_v9 }
 0x6c1   : > { %v2401_v22 = vpop.permute.xlu1 %2400  ;;  %v2532_v49 = vadd.f32 %v2516_v21, %v2436_v23  ;;  %v11702_v23 = vld [vmem:[#allocation72_spill] sm:$0xff] }
 0x6c2   : > { %v2437_v20 = vmul.f32 %v2401_v22, %v2357_v42  ;;  %v2395_v32 = vpop.permute.xlu0 %2394  ;;  %v11701_v42 = vld [vmem:[#allocation39_spill] sm:$0xff]  ;;  %v3139_v22 = vadd.f32 %v11702_v23, %v11673_v36  ;;  %v11704_v36 = vld [vmem:[#allocation73_spill] sm:$0xff] }
 0x6c3   : > { %2580 = vrot.lane.b32.xlu1 %v2557_v3, %s8308_s28  ;;  %v2434_v39 = vmul.f32 %v2395_v32, %v2354_v8  ;;  %v2548_v61 = vmax.f32 %v2532_v49, 0.0  ;;  %v2360_v3 = vsub.f32 1.0, %v11700_v37  ;;  %v2361_v21 = vsub.f32 1.0, %v11701_v42 }
 0x6c4   : > { %v2533_v10 = vadd.f32 %v2517_v6, %v2437_v20  ;;  %v2520_v6 = vmul.f32 %v11700_v37, %v9811_v58  ;;  %v2521_v49 = vmul.f32 %v11701_v42, %v9813_v45 }
 0x6c5   : > { %v2397_v63 = vpop.permute.xlu1 %2396  ;;  %v2530_v52 = vadd.f32 %v2514_v33, %v2434_v39  ;;  %v11703_v33 = vld [vmem:[#allocation34_spill] sm:$0xff] }
 0x6c6   : > { %v2549_v7 = vmax.f32 %v2533_v10, 0.0  ;;  %v2435_v13 = vmul.f32 %v2397_v63, %v2355_v46  ;;  %v2407_v38 = vpop.permute.xlu0 %2406  ;;  %v2358_v39 = vsub.f32 1.0, %v11703_v33  ;;  %v3140_v63 = vadd.f32 %v11704_v36, %v11675_v56  ;;  %v11708_v36 = vld [vmem:[#allocation89_spill] sm:$0xff] }
 0x6c7   : > { %v2440_v20 = vmul.f32 %v2407_v38, %v2360_v3  ;;  %v2546_v8 = vmax.f32 %v2530_v52, 0.0  ;;  %v11706_v52 = vld [vmem:[#allocation78_spill] sm:$0xff] }
 0x6c8   : > { %v2559_v34 = vpack.c.bf16 %v2549_v7, %v2548_v61  ;;  %v2531_v60 = vadd.f32 %v2515_v59, %v2435_v13  ;;  %v11705_v13 = vld [vmem:[#allocation37_spill] sm:$0xff]  ;;  %v3141_v3 = vadd.f32 %v11706_v52, %v11674_v5 }
 0x6c9   : > { %v2409_v57 = vpop.permute.xlu1 %2408  ;;  %v2536_v46 = vadd.f32 %v2520_v6, %v2440_v20  ;;  %v2359_v37 = vsub.f32 1.0, %v11705_v13 }
 0x6ca   : > { %v2547_v10 = vmax.f32 %v2531_v60, 0.0  ;;  %v2441_v32 = vmul.f32 %v2409_v57, %v2361_v21  ;;  %2584 = vrot.lane.b32.xlu1 %v2559_v34, %s8308_s28  ;;  %v2403_v7 = vpop.permute.xlu0 %2402  ;;  %v6683_v60 = vmul.f32 -1.442695, %v3139_v22  ;;  %v2518_v34 = vmul.f32 %v11703_v33, %v9805_v14  ;;  %v11707_v57 = vld [vmem:[#allocation79_spill] sm:$0xff] }
 0x6cb   : > { %v2438_v38 = vmul.f32 %v2403_v7, %v2358_v39  ;;  %v2519_v21 = vmul.f32 %v11705_v13, %v9807_v4  ;;  %v2552_v56 = vmax.f32 %v2536_v46, 0.0  ;;  %v11710_v7 = vld [vmem:[#allocation88_spill] sm:$0xff] }
 0x6cc   : > { %v2558_v59 = vpack.c.bf16 %v2547_v10, %v2546_v8  ;;  %v2537_v61 = vadd.f32 %v2521_v49, %v2441_v32  ;;  %v3142_v49 = vadd.f32 %v11707_v57, %v11676_v26  ;;  %v6684_v8 = vmul.f32 -1.442695, %v3140_v63  ;;  %v11709_v63 = vld [vmem:[#allocation87_spill] sm:$0xff] }
 0x6cd   : > { %v2405_v42 = vpop.permute.xlu1 %2404  ;;  %v2534_v20 = vadd.f32 %v2518_v34, %v2438_v38  ;;  %v6685_v10 = vmul.f32 -1.442695, %v3141_v3  ;;  %7806 = vpow2.f32 %v6683_v60  ;;  %v3144_v13 = vadd.f32 %v11710_v7, %v9593_v31 }
 0x6ce   : > { %v2553_v23 = vmax.f32 %v2537_v61, 0.0  ;;  %v2439_v6 = vmul.f32 %v2405_v42, %v2359_v37  ;;  %2582 = vrot.lane.b32.xlu0 %v2558_v59, %s8308_s28  ;;  %v6686_v39 = vmul.f32 -1.442695, %v3142_v49  ;;  %7808 = vpow2.f32 %v6684_v8  ;;  %v9874_v57 = vpop.permute.xlu0 %3119 }
 0x6cf   : > { %v2550_v32 = vmax.f32 %v2534_v20, 0.0  ;;  %7810 = vpow2.f32 %v6685_v10  ;;  %v3145_v59 = vadd.f32 %v11708_v36, %v11678_v54  ;;  %v3143_v61 = vadd.f32 %v11709_v63, %v11677_v25  ;;  %v11711_v54 = vld [vmem:[#allocation90_spill] sm:$0xff] }
 0x6d0   : > { %v2561_v5 = vpack.c.bf16 %v2553_v23, %v2552_v56  ;;  %v2535_v22 = vadd.f32 %v2519_v21, %v2439_v6  ;;  %7812 = vpow2.f32 %v6686_v39  ;;  %v6688_v38 = vmul.f32 -1.442695, %v3144_v13 }
 0x6d1   : > { %v6689_v37 = vmul.f32 -1.442695, %v3145_v59  ;;  %v6687_v34 = vmul.f32 -1.442695, %v3143_v61  ;;  %v3146_v23 = vadd.f32 %v11711_v54, %v11679_v29  ;;  %v3148_v29 = vadd.f32 %v9799_v40, %v9621_v16 }
 0x6d2   : > { %v2551_v33 = vmax.f32 %v2535_v22, 0.0  ;;  %2588 = vrot.lane.b32.xlu1 %v2561_v5, %s8308_s28  ;;  %v3147_v5 = vadd.f32 %v9797_v1, %v9617_v35  ;;  %v3149_v1 = vadd.f32 %v9801_v24, %v9602_v2 }
 0x6d3   : > { %7814 = vpow2.f32 %v6689_v37  ;;  %v6690_v31 = vmul.f32 -1.442695, %v3146_v23  ;;  %v6692_v35 = vmul.f32 -1.442695, %v3148_v29 }
 0x6d4   : > { %v2560_v46 = vpack.c.bf16 %v2551_v33, %v2550_v32  ;;  %v9880_v32 = vpop.permute.xlu1 %3121  ;;  %v6691_v63 = vmul.f32 -1.442695, %v3147_v5  ;;  %v6693_v24 = vmul.f32 -1.442695, %v3149_v1  ;;  %v3153_v1 = vadd.f32 %v9874_v57, %v9637_v53 }
 0x6d6   : > { %2586 = vrot.lane.b32.xlu0 %v2560_v46, %s8308_s28 }
 0x6d7   : > { %v7807_v26 = vpop.eup %7806 }
 0x6d8   : > { %v7809_v52 = vpop.eup %7808  ;;  %v3203_v3 = vadd.f32 1.0, %v7807_v26 }
 0x6d9   : > { %v7811_v60 = vpop.eup %7810  ;;  %v3204_v42 = vadd.f32 1.0, %v7809_v52 }
 0x6da   : > { %v7813_v21 = vpop.eup %7812  ;;  %v3205_v56 = vadd.f32 1.0, %v7811_v60  ;;  %7816 = vrcp.f32 %v3203_v3 }
 0x6db   : > { %7818 = vpow2.f32 %v6687_v34  ;;  %v3206_v25 = vadd.f32 1.0, %v7813_v21 }
 0x6dc   : > { %7820 = vpow2.f32 %v6688_v38 }
 0x6dd   : > { %7822 = vrcp.f32 %v3204_v42  ;;  %v7815_v6 = vpop.eup %7814 }
 0x6de   : > { %7824 = vrcp.f32 %v3205_v56  ;;  %v3209_v10 = vadd.f32 1.0, %v7815_v6 }
 0x6df   : > { %7826 = vrcp.f32 %v3206_v25 }
 0x6e0   : > { %7828 = vpow2.f32 %v6690_v31 }
 0x6e1   : > { %7830 = vrcp.f32 %v3209_v10 }
 0x6e4   : > { %v7817_v20 = vpop.eup %7816 }
 0x6e5   : > { %v7819_v49 = vpop.eup %7818  ;;  %v3411_v33 = vsub.f32 1.0, %v7817_v20  ;;  %v3507_v61 = vmul.f32 %v7817_v20, %v11686_v43  ;;  %v3150_v43 = vadd.f32 %v9803_v44, %v9605_v11 }
 0x6e6   : > { %v7821_v8 = vpop.eup %7820  ;;  %v3207_v46 = vadd.f32 1.0, %v7819_v49 }
 0x6e7   : > { %v7823_v22 = vpop.eup %7822  ;;  %v3208_v59 = vadd.f32 1.0, %v7821_v8  ;;  %v6694_v20 = vmul.f32 -1.442695, %v3150_v43 }
 0x6e8   : > { %v7825_v39 = vpop.eup %7824  ;;  %v3412_v7 = vsub.f32 1.0, %v7823_v22  ;;  %7832 = vrcp.f32 %v3207_v46  ;;  %v3508_v3 = vmul.f32 %v7823_v22, %v11687_v55 }
 0x6e9   : > { %v7827_v13 = vpop.eup %7826  ;;  %v3413_v16 = vsub.f32 1.0, %v7825_v39  ;;  %7834 = vrcp.f32 %v3208_v59  ;;  %v3509_v21 = vmul.f32 %v7825_v39, %v11682_v12  ;;  %v3151_v39 = vadd.f32 %v9817_v27, %v9654_v50 }
 0x6ea   : > { %v7829_v40 = vpop.eup %7828  ;;  %7836 = vpow2.f32 %v6691_v63  ;;  %v3414_v56 = vsub.f32 1.0, %v7827_v13  ;;  %v3510_v54 = vmul.f32 %v7827_v13, %v11683_v19  ;;  %v3154_v50 = vadd.f32 %v9880_v32, %v9643_v62 }
 0x6eb   : > { %v3210_v2 = vadd.f32 1.0, %v7829_v40  ;;  %7838 = vpow2.f32 %v6692_v35  ;;  %v7831_v12 = vpop.eup %7830  ;;  %v6695_v35 = vmul.f32 -1.442695, %v3151_v39 }
 0x6ec   : > { %7840 = vpow2.f32 %v6693_v24  ;;  %v3513_v53 = vmul.f32 %v7831_v12, %v11690_v47 }
 0x6ed   : > { %7842 = vrcp.f32 %v3210_v2 }
 0x6ee   : > { %7844 = vpow2.f32 %v6694_v20 }
 0x6f2   : > { %v7833_v5 = vpop.eup %7832 }
 0x6f3   : > { %v7835_v10 = vpop.eup %7834  ;;  %v3415_v46 = vsub.f32 1.0, %v7833_v5 }
 0x6f4   : > { %v3444_v36 = vpop.permute.xlu0 %3443  ;;  %v7837_v19 = vpop.eup %7836 }
 0x6f5   : > { %v3491_v26 = vmul.f32 %v3444_v36, %v3411_v33  ;;  %v7839_v33 = vpop.eup %7838  ;;  %v3152_v36 = vadd.f32 %v9819_v17, %v9657_v0  ;;  %v3211_v59 = vadd.f32 1.0, %v7837_v19  ;;  %v3512_v0 = vmul.f32 %v7835_v10, %v11695_v41 }
 0x6f6   : > { %v3446_v37 = vpop.permute.xlu1 %3445  ;;  %v3212_v63 = vadd.f32 1.0, %v7839_v33  ;;  %v7841_v13 = vpop.eup %7840 }
 0x6f7   : > { %v3523_v52 = vadd.f32 %v3507_v61, %v3491_v26  ;;  %v3492_v60 = vmul.f32 %v3446_v37, %v3412_v7  ;;  %v3417_v61 = vsub.f32 1.0, %v7831_v12  ;;  %v3511_v37 = vmul.f32 %v7833_v5, %v11694_v15  ;;  %v7843_v40 = vpop.eup %7842 }
 0x6f8   : > { %v3448_v34 = vpop.permute.xlu0 %3447  ;;  %v7845_v17 = vpop.eup %7844  ;;  %7846 = vrcp.f32 %v3211_v59  ;;  %v3213_v43 = vadd.f32 1.0, %v7841_v13  ;;  %v6697_v15 = vmul.f32 -1.442695, %v3153_v1  ;;  %v3514_v62 = vmul.f32 %v7843_v40, %v11691_v51 }
 0x6f9   : > { %v3493_v38 = vmul.f32 %v3448_v34, %v3413_v16  ;;  %v3524_v42 = vadd.f32 %v3508_v3, %v3492_v60  ;;  %v3539_v25 = vmax.f32 %v3523_v52, 0.0  ;;  %v3416_v16 = vsub.f32 1.0, %v7835_v10 }
 0x6fa   : > { %v3450_v23 = vpop.permute.xlu1 %3449  ;;  %v6696_v52 = vmul.f32 -1.442695, %v3152_v36  ;;  %7848 = vrcp.f32 %v3212_v63 }
 0x6fb   : > { %v3540_v55 = vmax.f32 %v3524_v42, 0.0  ;;  %v3525_v31 = vadd.f32 %v3509_v21, %v3493_v38  ;;  %v3494_v6 = vmul.f32 %v3450_v23, %v3414_v56  ;;  %7850 = vpow2.f32 %v6695_v35 }
 0x6fc   : > { %v3418_v38 = vsub.f32 1.0, %v7843_v40  ;;  %v3214_v42 = vadd.f32 1.0, %v7845_v17  ;;  %7852 = vpow2.f32 %v6696_v52  ;;  %v6698_v21 = vmul.f32 -1.442695, %v3154_v50 }
 0x6fd   : > { %v3555_v49 = vpack.c.bf16 %v3540_v55, %v3539_v25  ;;  %v3526_v8 = vadd.f32 %v3510_v54, %v3494_v6  ;;  %v3541_v11 = vmax.f32 %v3525_v31, 0.0  ;;  %7854 = vrcp.f32 %v3213_v43 }
 0x6fe   : > { %7856 = vpow2.f32 %v6697_v15 }
 0x6ff   : > { %v3542_v44 = vmax.f32 %v3526_v8, 0.0  ;;  %3576 = vrot.lane.b32.xlu0 %v3555_v49, %s8308_s28  ;;  %7858 = vpow2.f32 %v6698_v21 }
 0x700   : > { %7860 = vrcp.f32 %v3214_v42 }
 0x701   : > { %v3556_v22 = vpack.c.bf16 %v3542_v44, %v3541_v11  ;;  %v3452_v29 = vpop.permute.xlu0 %3451 }
 0x702   : > { %v3495_v26 = vmul.f32 %v3452_v29, %v3415_v46  ;;  %v7847_v55 = vpop.eup %7846 }
 0x703   : > { %3578 = vrot.lane.b32.xlu1 %v3556_v22, %s8308_s28  ;;  %v3419_v12 = vsub.f32 1.0, %v7847_v55  ;;  %v3515_v29 = vmul.f32 %v7847_v55, %v9625_v9 }
 0x704   : > { %v3527_v3 = vadd.f32 %v3511_v37, %v3495_v26  ;;  %v7849_v6 = vpop.eup %7848 }
 0x705   : > { %v3456_v7 = vpop.permute.xlu0 %3455  ;;  %v7851_v20 = vpop.eup %7850  ;;  %v3420_v10 = vsub.f32 1.0, %v7849_v6  ;;  %v3516_v36 = vmul.f32 %v7849_v6, %v9627_v30 }
 0x706   : > { %v3497_v34 = vmul.f32 %v3456_v7, %v3417_v61  ;;  %v3543_v32 = vmax.f32 %v3527_v3, 0.0  ;;  %v7853_v51 = vpop.eup %7852  ;;  %v3215_v8 = vadd.f32 1.0, %v7851_v20 }
 0x707   : > { %v7855_v49 = vpop.eup %7854  ;;  %v3216_v44 = vadd.f32 1.0, %v7853_v51 }
 0x708   : > { %v3529_v2 = vadd.f32 %v3513_v53, %v3497_v34  ;;  %v7857_v11 = vpop.eup %7856  ;;  %7862 = vrcp.f32 %v3215_v8  ;;  %v3421_v61 = vsub.f32 1.0, %v7855_v49  ;;  %v3517_v1 = vmul.f32 %v7855_v49, %v9640_v28 }
 0x709   : > { %v3454_v27 = vpop.permute.xlu1 %3453  ;;  %v7859_v5 = vpop.eup %7858  ;;  %v3217_v46 = vadd.f32 1.0, %v7857_v11  ;;  %7864 = vrcp.f32 %v3216_v44  ;;  %v7585_v11 = vld [vmem:[#allocation7 + $0x18] sm:$0xff]  }
 0x70a   : > { %v3496_v60 = vmul.f32 %v3454_v27, %v3416_v16  ;;  %v3545_v47 = vmax.f32 %v3529_v2, 0.0  ;;  %v7861_v19 = vpop.eup %7860  ;;  %v3218_v26 = vadd.f32 1.0, %v7859_v5 }
 0x70b   : > { %v3422_v35 = vsub.f32 1.0, %v7861_v19  ;;  %v3518_v16 = vmul.f32 %v7861_v19, %v9646_v18  ;;  %7866 = vrcp.f32 %v3217_v46 }
 0x70c   : > { %v3528_v57 = vadd.f32 %v3512_v0, %v3496_v60  ;;  %7868 = vrcp.f32 %v3218_v26 }
 0x70d   : > { %v3458_v41 = vpop.permute.xlu1 %3457 }
 0x70e   : > { %v3544_v56 = vmax.f32 %v3528_v57, 0.0  ;;  %v3498_v24 = vmul.f32 %v3458_v41, %v3418_v38 }
 0x710   : > { %v3557_v54 = vpack.c.bf16 %v3544_v56, %v3543_v32  ;;  %v3530_v23 = vadd.f32 %v3514_v62, %v3498_v24  ;;  %v7586_v62 = vld [vmem:[#allocation2 + $0x10] sm:$0xff]  }
 0x711   : > { %7240 = vmatprep.subr.bf16.mxu1 %v7586_v62 }
 0x712   : > { %v3546_v25 = vmax.f32 %v3530_v23, 0.0  ;;  %3580 = vrot.lane.b32.xlu0 %v3557_v54, %s8308_s28  ;;  %v7863_v60 = vpop.eup %7862  ;;  %7241 = vmatpush3.bf16.msra.mxu1 %v7586_v62 }
 0x713   : > { %v7865_v43 = vpop.eup %7864  ;;  %v3423_v28 = vsub.f32 1.0, %v7863_v60  ;;  %v3519_v38 = vmul.f32 %v7863_v60, %v9805_v14 }
 0x714   : > { %v3558_v31 = vpack.c.bf16 %v3546_v25, %v3545_v47  ;;  %v3424_v15 = vsub.f32 1.0, %v7865_v43  ;;  %v3520_v41 = vmul.f32 %v7865_v43, %v9807_v4 }
 0x715   : > { %v7867_v18 = vpop.eup %7866 }
 0x716   : > { %3582 = vrot.lane.b32.xlu1 %v3558_v31, %s8308_s28  ;;  %v3460_v22 = vpop.permute.xlu0 %3459  ;;  %v7869_v57 = vpop.eup %7868  ;;  %v3425_v2 = vsub.f32 1.0, %v7867_v18  ;;  %v3521_v47 = vmul.f32 %v7867_v18, %v9811_v58 }
 0x717   : > { %v3499_v33 = vmul.f32 %v3460_v22, %v3419_v12  ;;  %v3426_v23 = vsub.f32 1.0, %v7869_v57  ;;  %v3522_v14 = vmul.f32 %v7869_v57, %v9813_v45 }
 0x719   : > { %v3462_v39 = vpop.permute.xlu1 %3461  ;;  %v3531_v63 = vadd.f32 %v3515_v29, %v3499_v33 }
 0x71a   : > { %v3500_v59 = vmul.f32 %v3462_v39, %v3420_v10  ;;  %v3464_v13 = vpop.permute.xlu0 %3463 }
 0x71b   : > { %v3501_v37 = vmul.f32 %v3464_v13, %v3421_v61  ;;  %v3547_v40 = vmax.f32 %v3531_v63, 0.0  ;;  %v7588_v13 = vld [vmem:[%s11294_s8 + $0x20] sm:$0xff]  }
 0x71c   : > { %v3532_v7 = vadd.f32 %v3516_v36, %v3500_v59 }
 0x71d   : > { %v3466_v9 = vpop.permute.xlu1 %3465  ;;  %v3533_v30 = vadd.f32 %v3517_v1, %v3501_v37  ;;  %v9944_v1 = vld [vmem:[%s11712_s21] ss:$0 sm:$0xff] }
 0x71e   : > { %v3548_v52 = vmax.f32 %v3532_v7, 0.0  ;;  %v3502_v50 = vmul.f32 %v3466_v9, %v3422_v35  ;;  %v7587_v7 = vld [vmem:[#allocation2 + $0x18] sm:$0xff]   ;;  %v7589_v35 = vld [vmem:[%s11294_s8 + $0x28] sm:$0xff]  }
 0x71f   : > { %v3549_v17 = vmax.f32 %v3533_v30, 0.0  ;;  %7242 = vmatprep.subr.bf16.mxu1 %v7587_v7 }
 0x720   : > { %v3559_v0 = vpack.c.bf16 %v3548_v52, %v3547_v40  ;;  %v3534_v27 = vadd.f32 %v3518_v16, %v3502_v50  ;;  %7243 = vmatpush3.bf16.msra.mxu1 %v7587_v7 }
 0x722   : > { %v3550_v3 = vmax.f32 %v3534_v27, 0.0  ;;  %3584 = vrot.lane.b32.xlu0 %v3559_v0, %s8308_s28  ;;  %v8142_v27 = vld [vmem:[%s8629_s11 + $0x18] sm:$0xff] }
 0x724   : > { %v3560_v34 = vpack.c.bf16 %v3550_v3, %v3549_v17  ;;  %v8143_v3 = vld [vmem:[%s8629_s11] sm:$0xff] }
 0x726   : > { %3586 = vrot.lane.b32.xlu1 %v3560_v34, %s8308_s28  ;;  %v3468_v53 = vpop.permute.xlu0 %3467  ;;  %v8144_v34 = vld [vmem:[%s8629_s11 + $0x8] sm:$0xff] }
 0x727   : > { %v3503_v42 = vmul.f32 %v3468_v53, %v3423_v28  ;;  %v8145_v28 = vld [vmem:[%s8629_s11 + $0x10] sm:$0xff] }
 0x729   : > { %v3470_v21 = vpop.permute.xlu1 %3469  ;;  %v3535_v56 = vadd.f32 %v3519_v38, %v3503_v42 }
 0x72a   : > { %v3504_v32 = vmul.f32 %v3470_v21, %v3424_v15  ;;  %v3472_v54 = vpop.permute.xlu0 %3471 }
 0x72b   : > { %v3505_v25 = vmul.f32 %v3472_v54, %v3425_v2  ;;  %v3551_v31 = vmax.f32 %v3535_v56, 0.0  ;;  %v8146_v2 = vld [vmem:[%s8629_s11 + $0x38] sm:$0xff]  ;;  %v8147_v54 = vld [vmem:[%s8629_s11 + $0x20] sm:$0xff] }
 0x72c   : > { %v3536_v24 = vadd.f32 %v3520_v41, %v3504_v32 }
 0x72d   : > { %v3474_v55 = vpop.permute.xlu1 %3473  ;;  %v3537_v51 = vadd.f32 %v3521_v47, %v3505_v25  ;;  %v8148_v47 = vld [vmem:[%s8629_s11 + $0x28] sm:$0xff] }
 0x72e   : > { %v3552_v6 = vmax.f32 %v3536_v24, 0.0  ;;  %v3506_v20 = vmul.f32 %v3474_v55, %v3426_v23  ;;  %v2575_v8 = vpop.permute.xlu0 %2574  ;;  %v8149_v55 = vld [vmem:[%s8629_s11 + $0x30] sm:$0xff] }
 0x72f   : > { %7184 = vmatprep.mubr.msk.bf16.mxu0 %vm1200_vm2, %v2575_v8  ;;  %v3553_v12 = vmax.f32 %v3537_v51, 0.0 }
 0x730   : > { %v3561_v49 = vpack.c.bf16 %v3552_v6, %v3551_v31  ;;  %v3538_v4 = vadd.f32 %v3522_v14, %v3506_v20 }
 0x731   : > { %v2577_v44 = vpop.permute.xlu1 %2576 }
 0x732   : > { %v3554_v5 = vmax.f32 %v3538_v4, 0.0  ;;  %3588 = vrot.lane.b32.xlu0 %v3561_v49, %s8308_s28  ;;  %7185 = vmatmul.mubr.msk.bf16.vlgmr.msra.gmra.mrb[72].mxu0 %vm1200_vm2, %v2577_v44  ;;  %v2579_v22 = vpop.permute.xlu0 %2578 }
 0x733   : > { %7221 = vmatpush3.bf16.msra.mxu0 %v9848_v48  ;;  %7188 = vmatprep.mubr.msk.bf16.mxu0 %vm1200_vm2, %v2579_v22  ;;  %v8151_v22 = vld [vmem:[%s8629_s11 + $0x40] sm:$0xff] }
 0x734   : > { %v3562_v58 = vpack.c.bf16 %v3554_v5, %v3553_v12  ;;  %7222 = vmatprep.subr.bf16.mxu0 %v7585_v11  ;;  %v8150_v5 = vld [vmem:[%s8629_s11 + $0x58] sm:$0xff] }
 0x735   : > { %v2581_v45 = vpop.permute.xlu1 %2580 }
 0x736   : > { %3590 = vrot.lane.b32.xlu1 %v3562_v58, %s8308_s28 }
 0x737   : > { %7223 = vmatpush3.bf16.msra.mxu0 %v7585_v11 }
 0x738   : > { %7260 = vmatprep.subr.bf16.mxu0 %v7588_v13 }
 0x73a   : > { %7189 = vmatmul.mubr.msk.bf16.gmra.mrb[76].mxu0 %vm1200_vm2, %v2581_v45 }
 0x73c   : > { %v2585_v19 = vpop.permute.xlu1 %2584 }
 0x740   : > { %v2583_v10 = vpop.permute.xlu0 %2582 }
 0x741   : > { %7192 = vmatprep.mubr.msk.bf16.mxu0 %vm1200_vm2, %v2583_v10  ;;  %v8152_v10 = vld [vmem:[%s8629_s11 + $0x48] sm:$0xff] }
 0x742   : > { %7193 = vmatmul.mubr.msk.bf16.gmra.mrb[80].mxu0 %vm1200_vm2, %v2585_v19 }
 0x744   : > { %v2589_v33 = vpop.permute.xlu1 %2588 }
 0x748   : > { %v2587_v29 = vpop.permute.xlu0 %2586 }
 0x749   : > { %7196 = vmatprep.mubr.msk.bf16.mxu0 %vm1200_vm2, %v2587_v29  ;;  %v8153_v29 = vld [vmem:[%s8629_s11 + $0x50] sm:$0xff] }
 0x74a   : > { %7197 = vmatmul.mubr.msk.bf16.gmra.mrb[84].mxu0 %vm1200_vm2, %v2589_v33 }
 0x771   : > { %v3577_v48 = vpop.permute.xlu0 %3576 }
 0x772   : > { %7224 = vmatprep.mubr.msk.bf16.mxu0 %vm1200_vm2, %v3577_v48 }
 0x775   : > { %v3579_v39 = vpop.permute.xlu1 %3578 }
 0x776   : > { %7225 = vmatmul.mubr.msk.bf16.vlgmr.msra.gmra.mrb[72].mxu0 %vm1200_vm2, %v3579_v39 }
 0x777   : > { %7261 = vmatpush3.bf16.msra.mxu0 %v7588_v13 }
 0x778   : > { %7262 = vmatprep.subr.bf16.mxu0 %v7589_v35 }
 0x77b   : > { %7263 = vmatpush3.bf16.msra.mxu0 %v7589_v35  ;;  %v8154_v35 = vld [vmem:[%s8629_s11 + $0x78] sm:$0xff] }
 0x784   : > { %v3581_v46 = vpop.permute.xlu0 %3580 }
 0x785   : > { %7228 = vmatprep.mubr.msk.bf16.mxu0 %vm1200_vm2, %v3581_v46 }
 0x788   : > { %v3583_v36 = vpop.permute.xlu1 %3582 }
 0x789   : > { %7229 = vmatmul.mubr.msk.bf16.gmra.mrb[76].mxu0 %vm1200_vm2, %v3583_v36 }
 0x794   : > { %v3585_v59 = vpop.permute.xlu0 %3584 }
 0x795   : > { %7232 = vmatprep.mubr.msk.bf16.mxu0 %vm1200_vm2, %v3585_v59 }
 0x798   : > { %v3587_v26 = vpop.permute.xlu1 %3586 }
 0x799   : > { %7233 = vmatmul.mubr.msk.bf16.gmra.mrb[80].mxu0 %vm1200_vm2, %v3587_v26 }
 0x7a4   : > { %v3589_v63 = vpop.permute.xlu0 %3588 }
 0x7a5   : > { %7236 = vmatprep.mubr.msk.bf16.mxu0 %vm1200_vm2, %v3589_v63 }
 0x7a8   : > { %v3591_v61 = vpop.permute.xlu1 %3590 }
 0x7a9   : > { %7237 = vmatmul.mubr.msk.bf16.gmra.mrb[84].mxu0 %vm1200_vm2, %v3591_v61 }
 0x849   : > { %v7226_v37 = vpop.f32.mrb[72].mxu0 }
 0x84a   : > { %v3662_v16 = vpop.f32.mrb[73].mxu0  ;;  %v7412_v52 = vadd.f32 %v7226_v37, %v9944_v1 }
 0x84b   : > { %v7413_v9 = vadd.f32 %v9944_v1, %v3662_v16  ;;  %v7227_v40 = vpop.f32.mrb[74].mxu0  ;;  %v8155_v16 = vld [vmem:[%s8629_s11 + $0x60] sm:$0xff] }
 0x84c   : > { %v7414_v50 = vadd.f32 %v7227_v40, %v9944_v1  ;;  %v3665_v30 = vpop.f32.mrb[75].mxu0  ;;  %v9960_v18 = vadd.f32 %v8145_v28, %v7412_v52  ;;  %v8156_v40 = vld [vmem:[%s8629_s11 + $0x68] sm:$0xff] }
 0x84d   : > { %v7415_v0 = vadd.f32 %v9944_v1, %v3665_v30  ;;  %v9954_v60 = vadd.f32 %v8143_v3, %v7413_v9  ;;  %v7590_v3 = vld [vmem:[%s11294_s8 + $0x30] sm:$0xff]   ;;  %v7594_v28 = vld [vmem:[#allocation6 + $0x24] ss:$8 sps:$4 sm:$0xff]  }
 0x84e   : > { %v9951_v17 = vadd.f32 %v8142_v27, %v7414_v50  ;;  %11717 = vst [vmem:[#allocation36_spill] sm:$0xff] %v9960_v18  ;;  %v8157_v50 = vld [vmem:[%s8629_s11 + $0x70] sm:$0xff]  ;;  %7264 = vmatprep.subr.bf16.mxu0 %v7590_v3 }
 0x84f   : > { %11715 = vst [vmem:[#allocation38_spill] sm:$0xff] %v9954_v60  ;;  %v9957_v43 = vadd.f32 %v8144_v34, %v7415_v0  ;;  %7265 = vmatpush3.bf16.msra.mxu0 %v7590_v3  ;;  %v7591_v34 = vld [vmem:[%s11294_s8 + $0x38] sm:$0xff]  }
 0x850   : > { %11714 = vst [vmem:[#allocation49_spill] sm:$0xff] %v9951_v17  ;;  %v9968_v15 = vpack.c.bf16 %v9951_v17, %v9960_v18  ;;  %7266 = vmatprep.subr.bf16.mxu0 %v7591_v34  ;;  %v11761_v17 = vld [vmem:[#allocation56_spill] sm:$0xff] }
 0x851   : > { %11716 = vst [vmem:[#allocation51_spill] sm:$0xff] %v9957_v43  ;;  %v9964_v53 = vpack.c.bf16 %v9957_v43, %v9954_v60 }
 0x853   : > { %7244 = vmatprep.mubr.msk.bf16.mxu1 %vm1200_vm2, %v9964_v53  ;;  %7267 = vmatpush3.bf16.msra.mxu0 %v7591_v34 }
 0x854   : > { %7245 = vmatmul.mubr.msk.bf16.vlgmr.msra.gmra.mrb[72].mxu1 %vm1200_vm2, %v9968_v15  ;;  %4248 = vmatprep.subr.bf16.mxu0 %v7594_v28 }
 0x85c   : > { %v7230_v57 = vpop.f32.mrb[76].mxu0 }
 0x85d   : > { %v3678_v38 = vpop.f32.mrb[77].mxu0  ;;  %v7416_v62 = vadd.f32 %v7230_v57, %v9944_v1 }
 0x85e   : > { %v7417_v42 = vadd.f32 %v9944_v1, %v3678_v38  ;;  %v7231_v21 = vpop.f32.mrb[78].mxu0  ;;  %v6710_v38 = vld [vmem:[%s11293_s7 + $0x1] ss:$0 sm:$0xff] }
 0x85f   : > { %v7418_v41 = vadd.f32 %v7231_v21, %v9944_v1  ;;  %v3681_v32 = vpop.f32.mrb[79].mxu0  ;;  %v9988_v31 = vadd.f32 %v8149_v55, %v7416_v62  ;;  %v7592_v55 = vld [vmem:[#allocation6 + $0x20] ss:$8 sps:$4 sm:$0xff]  }
 0x860   : > { %v7419_v56 = vadd.f32 %v9944_v1, %v3681_v32  ;;  %v9982_v23 = vadd.f32 %v8147_v54, %v7417_v42 }
 0x861   : > { %v9979_v24 = vadd.f32 %v8146_v2, %v7418_v41  ;;  %11721 = vst [vmem:[#allocation74_spill] sm:$0xff] %v9988_v31 }
 0x862   : > { %11719 = vst [vmem:[#allocation63_spill] sm:$0xff] %v9982_v23  ;;  %v9985_v25 = vadd.f32 %v8148_v47, %v7419_v56 }
 0x863   : > { %11718 = vst [vmem:[#allocation53_spill] sm:$0xff] %v9979_v24  ;;  %v9996_v14 = vpack.c.bf16 %v9979_v24, %v9988_v31 }
 0x864   : > { %11720 = vst [vmem:[#allocation75_spill] sm:$0xff] %v9985_v25  ;;  %v9992_v6 = vpack.c.bf16 %v9985_v25, %v9982_v23  ;;  %v8164_v23 = vld [vmem:[%s8785_s17 + $0x30] sm:$0xff]   ;;  %v7599_v25 = vld [vmem:[#allocation4 + $0x28] sm:$0xff]  }
 0x866   : > { %7248 = vmatprep.mubr.msk.bf16.mxu1 %vm1200_vm2, %v9992_v6 }
 0x867   : > { %7249 = vmatmul.mubr.msk.bf16.gmra.mrb[76].mxu1 %vm1200_vm2, %v9996_v14 }
 0x86c   : > { %v7234_v20 = vpop.f32.mrb[80].mxu0 }
 0x86d   : > { %v3694_v51 = vpop.f32.mrb[81].mxu0  ;;  %v7420_v8 = vadd.f32 %v7234_v20, %v9944_v1  ;;  %v7597_v20 = vld [vmem:[#allocation6 + $0x34] ss:$8 sps:$4 sm:$0xff]  }
 0x86e   : > { %v7421_v49 = vadd.f32 %v9944_v1, %v3694_v51  ;;  %v7235_v4 = vpop.f32.mrb[82].mxu0  ;;  %v7595_v51 = vld [vmem:[#allocation6 + $0x30] ss:$8 sps:$4 sm:$0xff]  }
 0x86f   : > { %v7422_v11 = vadd.f32 %v7235_v4, %v9944_v1  ;;  %v3697_v44 = vpop.f32.mrb[83].mxu0  ;;  %v10016_v33 = vadd.f32 %v8153_v29, %v7420_v8 }
 0x870   : > { %v7423_v12 = vadd.f32 %v9944_v1, %v3697_v44  ;;  %v10010_v45 = vadd.f32 %v8151_v22, %v7421_v49 }
 0x871   : > { %v10007_v58 = vadd.f32 %v8150_v5, %v7422_v11  ;;  %11725 = vst [vmem:[#allocation81_spill] sm:$0xff] %v10016_v33 }
 0x872   : > { %11723 = vst [vmem:[#allocation76_spill] sm:$0xff] %v10010_v45  ;;  %v10013_v19 = vadd.f32 %v8152_v10, %v7423_v12 }
 0x873   : > { %11722 = vst [vmem:[#allocation77_spill] sm:$0xff] %v10007_v58  ;;  %v10024_v39 = vpack.c.bf16 %v10007_v58, %v10016_v33 }
 0x874   : > { %11724 = vst [vmem:[#allocation83_spill] sm:$0xff] %v10013_v19  ;;  %v10020_v48 = vpack.c.bf16 %v10013_v19, %v10010_v45 }
 0x876   : > { %7252 = vmatprep.mubr.msk.bf16.mxu1 %vm1200_vm2, %v10020_v48 }
 0x877   : > { %7253 = vmatmul.mubr.msk.bf16.gmra.mrb[80].mxu1 %vm1200_vm2, %v10024_v39 }
 0x87c   : > { %v7238_v46 = vpop.f32.mrb[84].mxu0 }
 0x87d   : > { %v3710_v36 = vpop.f32.mrb[85].mxu0  ;;  %v7424_v63 = vadd.f32 %v7238_v46, %v9944_v1 }
 0x87e   : > { %v7425_v59 = vadd.f32 %v9944_v1, %v3710_v36  ;;  %v7239_v26 = vpop.f32.mrb[86].mxu0 }
 0x87f   : > { %v7426_v61 = vadd.f32 %v7239_v26, %v9944_v1  ;;  %v3713_v7 = vpop.f32.mrb[87].mxu0  ;;  %v10044_v30 = vadd.f32 %v8157_v50, %v7424_v63 }
 0x880   : > { %v7427_v13 = vadd.f32 %v9944_v1, %v3713_v7  ;;  %v10038_v9 = vadd.f32 %v8155_v16, %v7425_v59  ;;  %v8158_v1 = vld [vmem:[%s8785_s17] sm:$0xff]  }
 0x881   : > { %v10035_v37 = vadd.f32 %v8154_v35, %v7426_v61  ;;  %11729 = vst [vmem:[#allocation47_spill] sm:$0xff] %v10044_v30 }
 0x882   : > { %11727 = vst [vmem:[#allocation42_spill] sm:$0xff] %v10038_v9  ;;  %v10041_v52 = vadd.f32 %v8156_v40, %v7427_v13 }
 0x883   : > { %11726 = vst [vmem:[#allocation85_spill] sm:$0xff] %v10035_v37  ;;  %v10052_v27 = vpack.c.bf16 %v10035_v37, %v10044_v30 }
 0x884   : > { %11728 = vst [vmem:[#allocation46_spill] sm:$0xff] %v10041_v52  ;;  %v10048_v0 = vpack.c.bf16 %v10041_v52, %v10038_v9 }
 0x886   : > { %7256 = vmatprep.mubr.msk.bf16.mxu1 %vm1200_vm2, %v10048_v0 }
 0x887   : > { %7257 = vmatmul.mubr.msk.bf16.gmra.mrb[84].mxu1 %vm1200_vm2, %v10052_v27 }
 0x888   : > { %7300 = vmatprep.mubr.bf16.mxu1 %v8158_v1 }
 0x927   : > { %v7246_v57 = vpop.f32.mrb[72].mxu1 }
 0x928   : > { %v3848_v42 = vpop.f32.mrb[73].mxu1  ;;  %v3857_v62 = vadd.f32 %v7246_v57, %v6710_v38 }
 0x929   : > { %v7247_v21 = vpop.f32.mrb[74].mxu1  ;;  %v3849_v56 = vadd.f32 %v6710_v38, %v3848_v42 }
 0x92a   : > { %v3860_v41 = vadd.f32 %v7247_v21, %v6710_v38  ;;  %v3851_v32 = vpop.f32.mrb[75].mxu1 }
 0x92b   : > { %v3852_v2 = vadd.f32 %v6710_v38, %v3851_v32 }
 0x92c   : > { %v3912_v54 = vpack.c.bf16 %v3860_v41, %v3857_v62  ;;  %v11730_v41 = vmov 0  }
 0x92d   : > { %v3911_v47 = vpack.c.bf16 %v3852_v2, %v3849_v56 }
 0x92f   : > { %7268 = vmatprep.mubr.msk.bf16.mxu0 %vm1362_vm3, %v3911_v47 }
 0x930   : > { %7269 = vmatmul.mubr.msk.bf16.vlgmr.msra.gmra.mrb[88].mxu0 %vm1362_vm3, %v3912_v54 }
 0x931   : > { %4249 = vmatpush1.bf16.msra.mxu0 %v7592_v55 }
 0x932   : > { %4250 = vmatprep.subr.bf16.mxu0 %v7597_v20 }
 0x935   : > { %4251 = vmatpush1.bf16.msra.mxu0 %v7595_v51 }
 0x93a   : > { %v7250_v49 = vpop.f32.mrb[76].mxu1 }
 0x93b   : > { %v3864_v4 = vpop.f32.mrb[77].mxu1  ;;  %v3873_v11 = vadd.f32 %v7250_v49, %v6710_v38 }
 0x93c   : > { %v7251_v8 = vpop.f32.mrb[78].mxu1  ;;  %v3865_v5 = vadd.f32 %v6710_v38, %v3864_v4 }
 0x93d   : > { %v3876_v44 = vadd.f32 %v7251_v8, %v6710_v38  ;;  %v3867_v12 = vpop.f32.mrb[79].mxu1 }
 0x93e   : > { %v3868_v22 = vadd.f32 %v6710_v38, %v3867_v12 }
 0x93f   : > { %v3914_v10 = vpack.c.bf16 %v3876_v44, %v3873_v11 }
 0x940   : > { %v3913_v29 = vpack.c.bf16 %v3868_v22, %v3865_v5  ;;  %v10155_v5 = vld [vmem:[%s11299_s13 + $0x2] sm:$0x3] }
 0x942   : > { %7272 = vmatprep.mubr.msk.bf16.mxu0 %vm1362_vm3, %v3913_v29 }
 0x943   : > { %7273 = vmatmul.mubr.msk.bf16.gmra.mrb[92].mxu0 %vm1362_vm3, %v3914_v10  ;;  %v11731_v10 = vld [vmem:[#allocation29_spill] sm:$0xff] }
 0x944   : > { %v11732_v29 = vsub.s32 1, %v11731_v10 }
 0x94a   : > { %v7254_v46 = vpop.f32.mrb[80].mxu1 }
 0x94b   : > { %v3880_v36 = vpop.f32.mrb[81].mxu1  ;;  %v3889_v26 = vadd.f32 %v7254_v46, %v6710_v38  ;;  %v10164_v46 = vrot.slane %v10155_v5, %v11732_v29  ;;  %v11745_v29 = vld [vmem:[#allocation23_spill] sm:$0xff] }
 0x94c   : > { %v7255_v59 = vpop.f32.mrb[82].mxu1  ;;  %v3881_v7 = vadd.f32 %v6710_v38, %v3880_v36 }
 0x94d   : > { %v3892_v63 = vadd.f32 %v7255_v59, %v6710_v38  ;;  %v3883_v61 = vpop.f32.mrb[83].mxu1  ;;  %v11733_v59 = vld [vmem:[#allocation16_spill] sm:$0xff] }
 0x94e   : > { %v3884_v13 = vadd.f32 %v6710_v38, %v3883_v61 }
 0x94f   : > { %v3916_v35 = vpack.c.bf16 %v3892_v63, %v3889_v26 }
 0x950   : > { %v3915_v16 = vpack.c.bf16 %v3884_v13, %v3881_v7  ;;  %v11734_v7 = vld [vmem:[#allocation14_spill] sm:$0xff] }
 0x952   : > { %7276 = vmatprep.mubr.msk.bf16.mxu0 %vm1362_vm3, %v3915_v16  ;;  %v11735_v16 = vld [vmem:[#allocation15_spill] sm:$0xff] }
 0x953   : > { %7277 = vmatmul.mubr.msk.bf16.gmra.mrb[96].mxu0 %vm1362_vm3, %v3916_v35 }
 0x95a   : > { %v7258_v40 = vpop.f32.mrb[84].mxu1 }
 0x95b   : > { %v3896_v50 = vpop.f32.mrb[85].mxu1  ;;  %v3905_v3 = vadd.f32 %v7258_v40, %v6710_v38  ;;  %v11736_v40 = vld [vmem:[#allocation13_spill] sm:$0xff] }
 0x95c   : > { %v7259_v1 = vpop.f32.mrb[86].mxu1  ;;  %v3897_v57 = vadd.f32 %v6710_v38, %v3896_v50 }
 0x95d   : > { %v3908_v34 = vadd.f32 %v7259_v1, %v6710_v38  ;;  %v3899_v28 = vpop.f32.mrb[87].mxu1  ;;  %v11737_v1 = vld [vmem:[#allocation20_spill] sm:$0xff] }
 0x95e   : > { %v3900_v42 = vadd.f32 %v6710_v38, %v3899_v28 }
 0x95f   : > { %v3918_v21 = vpack.c.bf16 %v3908_v34, %v3905_v3 }
 0x960   : > { %v3917_v62 = vpack.c.bf16 %v3900_v42, %v3897_v57  ;;  %v11738_v57 = vld [vmem:[#allocation18_spill] sm:$0xff] }
 0x962   : > { %7280 = vmatprep.mubr.msk.bf16.mxu0 %vm1362_vm3, %v3917_v62  ;;  %v11739_v62 = vld [vmem:[#allocation19_spill] sm:$0xff] }
 0x963   : > { %7281 = vmatmul.mubr.msk.bf16.gmra.mrb[100].mxu0 %vm1362_vm3, %v3918_v21 }
 0x964   : > { %4280 = vmatprep.mubr.bf16.mxu0 %v11730_v41 }
 0x96b   : > { %6746 = vmatmul.mubr.msk.bf16.vlgmr.msra.gmra.mrb[104].mxu0 %vm1200_vm2, %v9964_v53 }
 0x96c   : > { %4290 = vmatprep.mubr.bf16.mxu0 %v11730_v41 }
 0x973   : > { %6747 = vmatmul.mubr.msk.bf16.gmra.mrb[108].mxu0 %vm1200_vm2, %v9968_v15 }
 0x974   : > { %4300 = vmatprep.mubr.bf16.mxu0 %v11730_v41 }
 0x97b   : > { %6748 = vmatmul.mubr.msk.bf16.gmra.mrb[112].mxu0 %vm1200_vm2, %v9992_v6 }
 0x97c   : > { %4310 = vmatprep.mubr.bf16.mxu0 %v11730_v41 }
 0x983   : > { %6749 = vmatmul.mubr.msk.bf16.gmra.mrb[116].mxu0 %vm1200_vm2, %v9996_v14 }
 0x984   : > { %4320 = vmatprep.mubr.bf16.mxu0 %v11730_v41 }
 0x98b   : > { %6750 = vmatmul.mubr.msk.bf16.gmra.mrb[120].mxu0 %vm1200_vm2, %v10020_v48 }
 0x98c   : > { %4330 = vmatprep.mubr.bf16.mxu0 %v11730_v41 }
 0x993   : > { %6751 = vmatmul.mubr.msk.bf16.gmra.mrb[124].mxu0 %vm1200_vm2, %v10024_v39 }
 0x994   : > { %4340 = vmatprep.mubr.bf16.mxu0 %v11730_v41 }
 0x99b   : > { %6752 = vmatmul.mubr.msk.bf16.gmra.mrb[128].mxu0 %vm1200_vm2, %v10048_v0 }
 0x99c   : > { %4350 = vmatprep.mubr.bf16.mxu0 %v11730_v41  ;;  %v11740_v41 = vld [vmem:[#allocation17_spill] sm:$0xff] }
 0x9a3   : > { %6753 = vmatmul.mubr.msk.bf16.gmra.mrb[132].mxu0 %vm1200_vm2, %v10052_v27 }
 0xa03   : > { %v10100_v53 = vpop.f32.mrb[88].mxu0 }
 0xa04   : > { %v10102_v15 = vpop.f32.mrb[89].mxu0 }
 0xa05   : > { %v10104_v6 = vpop.f32.mrb[90].mxu0 }
 0xa06   : > { %v4074_v14 = vpack.c.bf16 %v10104_v6, %v10100_v53  ;;  %v10108_v48 = vpop.f32.mrb[91].mxu0 }
 0xa07   : > { %v4073_v39 = vpack.c.bf16 %v10108_v48, %v10102_v15 }
 0xa08   : > { %4091 = vrot.lane.b32.xlu1 %v4074_v14, %s8306_s29 }
 0xa09   : > { %4089 = vrot.lane.b32.xlu0 %v4073_v39, %s8306_s29  ;;  %v11741_v39 = vld [vmem:[#allocation24_spill] sm:$0xff] }
 0xa16   : > { %v10114_v0 = vpop.f32.mrb[92].mxu0 }
 0xa17   : > { %v10116_v27 = vpop.f32.mrb[93].mxu0 }
 0xa18   : > { %v10118_v38 = vpop.f32.mrb[94].mxu0 }
 0xa19   : > { %v4076_v32 = vpack.c.bf16 %v10118_v38, %v10114_v0  ;;  %v10122_v56 = vpop.f32.mrb[95].mxu0 }
 0xa1a   : > { %v4075_v2 = vpack.c.bf16 %v10122_v56, %v10116_v27 }
 0xa1b   : > { %4095 = vrot.lane.b32.xlu1 %v4076_v32, %s8306_s29 }
 0xa1c   : > { %4093 = vrot.lane.b32.xlu0 %v4075_v2, %s8306_s29 }
 0xa26   : > { %v10128_v54 = vpop.f32.mrb[96].mxu0 }
 0xa27   : > { %v10130_v47 = vpop.f32.mrb[97].mxu0 }
 0xa28   : > { %v10132_v55 = vpop.f32.mrb[98].mxu0 }
 0xa29   : > { %v4078_v20 = vpack.c.bf16 %v10132_v55, %v10128_v54  ;;  %v10136_v51 = vpop.f32.mrb[99].mxu0 }
 0xa2a   : > { %v4077_v49 = vpack.c.bf16 %v10136_v51, %v10130_v47 }
 0xa2b   : > { %4099 = vrot.lane.b32.xlu1 %v4078_v20, %s8306_s29 }
 0xa2c   : > { %4097 = vrot.lane.b32.xlu0 %v4077_v49, %s8306_s29  ;;  %v11743_v49 = vld [vmem:[#allocation22_spill] sm:$0xff] }
 0xa36   : > { %v10142_v4 = vpop.f32.mrb[100].mxu0 }
 0xa37   : > { %v10144_v8 = vpop.f32.mrb[101].mxu0 }
 0xa38   : > { %v10146_v11 = vpop.f32.mrb[102].mxu0 }
 0xa39   : > { %v4080_v44 = vpack.c.bf16 %v10146_v11, %v10142_v4  ;;  %v10150_v12 = vpop.f32.mrb[103].mxu0 }
 0xa3a   : > { %v4079_v22 = vpack.c.bf16 %v10150_v12, %v10144_v8 }
 0xa3b   : > { %4103 = vrot.lane.b32.xlu1 %v4080_v44, %s8306_s29 }
 0xa3c   : > { %4101 = vrot.lane.b32.xlu0 %v4079_v22, %s8306_s29 }
 0xa3e   : > { %v10166_v36 = vpop.f32.mrb[104].mxu0 }
 0xa3f   : > { %4437 = vrot.lane.b32.xlu1 %v11733_v59, %s8306_s29  ;;  %v4284_v26 = vpop.f32.mrb[105].mxu0  ;;  %v11746_v59 = vld [vmem:[#allocation21_spill] sm:$0xff] }
 0xa40   : > { %v10171_v63 = vadd.f32 %v4284_v26, %v10164_v46  ;;  %v10173_v61 = vpop.f32.mrb[106].mxu0  ;;  %4435 = vrot.lane.b32.xlu0 %v11734_v7, %s8306_s29  ;;  %v11747_v7 = vld [vmem:[#allocation28_spill] sm:$0xff] }
 0xa41   : > { %v4288_v13 = vpop.f32.mrb[107].mxu0 }
 0xa42   : > { %v10178_v35 = vadd.f32 %v4288_v13, %v10164_v46 }
 0xa43   : > { %4441 = vrot.lane.b32.xlu1 %v11735_v16, %s8306_s29 }
 0xa44   : > { %4439 = vrot.lane.b32.xlu0 %v11736_v40, %s8306_s29 }
 0xa46   : > { %v10184_v50 = vpop.f32.mrb[108].mxu0 }
 0xa47   : > { %4445 = vrot.lane.b32.xlu1 %v11737_v1, %s8306_s29  ;;  %v4294_v3 = vpop.f32.mrb[109].mxu0  ;;  %v11749_v1 = vld [vmem:[#allocation26_spill] sm:$0xff] }
 0xa48   : > { %v10189_v34 = vadd.f32 %v4294_v3, %v10164_v46  ;;  %v10191_v28 = vpop.f32.mrb[110].mxu0  ;;  %4443 = vrot.lane.b32.xlu0 %v11738_v57, %s8306_s29 }
 0xa49   : > { %v4298_v42 = vpop.f32.mrb[111].mxu0 }
 0xa4a   : > { %v10196_v21 = vadd.f32 %v4298_v42, %v10164_v46  ;;  %v11751_v42 = vld [vmem:[#allocation27_spill] sm:$0xff] }
 0xa4b   : > { %4449 = vrot.lane.b32.xlu1 %v11739_v62, %s8306_s29  ;;  %v11752_v62 = vld [vmem:[#allocation25_spill] sm:$0xff] }
 0xa4c   : > { %4447 = vrot.lane.b32.xlu0 %v11740_v41, %s8306_s29 }
 0xa4e   : > { %v10202_v14 = vpop.f32.mrb[112].mxu0 }
 0xa4f   : > { %4453 = vrot.lane.b32.xlu1 %v11741_v39, %s8306_s29  ;;  %v4304_v32 = vpop.f32.mrb[113].mxu0 }
 0xa50   : > { %v10207_v2 = vadd.f32 %v4304_v32, %v10164_v46  ;;  %v10209_v20 = vpop.f32.mrb[114].mxu0  ;;  %4451 = vrot.lane.b32.xlu0 %v11743_v49, %s8306_s29 }
 0xa51   : > { %v4308_v44 = vpop.f32.mrb[115].mxu0 }
 0xa52   : > { %11742 = vst [vmem:[#allocation45_spill] sm:$0xff] %v10207_v2  ;;  %v10214_v22 = vadd.f32 %v4308_v44, %v10164_v46 }
 0xa53   : > { %4457 = vrot.lane.b32.xlu1 %v11745_v29, %s8306_s29 }
 0xa54   : > { %11744 = vst [vmem:[#allocation40_spill] sm:$0xff] %v10214_v22  ;;  %4455 = vrot.lane.b32.xlu0 %v11746_v59, %s8306_s29 }
 0xa56   : > { %v10220_v26 = vpop.f32.mrb[116].mxu0 }
 0xa57   : > { %4461 = vrot.lane.b32.xlu1 %v11747_v7, %s8306_s29  ;;  %v4314_v13 = vpop.f32.mrb[117].mxu0 }
 0xa58   : > { %v10225_v16 = vadd.f32 %v4314_v13, %v10164_v46  ;;  %v10227_v40 = vpop.f32.mrb[118].mxu0  ;;  %4459 = vrot.lane.b32.xlu0 %v11749_v1, %s8306_s29 }
 0xa59   : > { %v4318_v3 = vpop.f32.mrb[119].mxu0 }
 0xa5a   : > { %11748 = vst [vmem:[#allocation44_spill] sm:$0xff] %v10225_v16  ;;  %v10232_v57 = vadd.f32 %v4318_v3, %v10164_v46 }
 0xa5b   : > { %4465 = vrot.lane.b32.xlu1 %v11751_v42, %s8306_s29 }
 0xa5c   : > { %11750 = vst [vmem:[#allocation43_spill] sm:$0xff] %v10232_v57  ;;  %4463 = vrot.lane.b32.xlu0 %v11752_v62, %s8306_s29 }
 0xa5e   : > { %v10238_v41 = vpop.f32.mrb[120].mxu0 }
 0xa5f   : > { %v4324_v39 = vpop.f32.mrb[121].mxu0 }
 0xa60   : > { %v10241_v32 = vadd.f32 %v4324_v39, %v10164_v46  ;;  %v10243_v49 = vpop.f32.mrb[122].mxu0 }
 0xa61   : > { %v4328_v44 = vpop.f32.mrb[123].mxu0 }
 0xa62   : > { %11753 = vst [vmem:[#allocation41_spill] sm:$0xff] %v10241_v32  ;;  %v10246_v29 = vadd.f32 %v4328_v44, %v10164_v46 }
 0xa64   : > { %11754 = vst [vmem:[#allocation50_spill] sm:$0xff] %v10246_v29  ;;  %v11764_v29 = vld [vmem:[#allocation57_spill] sm:$0xff] }
 0xa66   : > { %v10248_v59 = vpop.f32.mrb[124].mxu0 }
 0xa67   : > { %v4334_v7 = vpop.f32.mrb[125].mxu0 }
 0xa68   : > { %v10251_v13 = vadd.f32 %v4334_v7, %v10164_v46  ;;  %v10253_v1 = vpop.f32.mrb[126].mxu0 }
 0xa69   : > { %v4338_v3 = vpop.f32.mrb[127].mxu0 }
 0xa6a   : > { %11755 = vst [vmem:[#allocation54_spill] sm:$0xff] %v10251_v13  ;;  %v10256_v42 = vadd.f32 %v4338_v3, %v10164_v46  ;;  %v11763_v13 = vld [vmem:[#allocation58_spill] sm:$0xff] }
 0xa6c   : > { %11756 = vst [vmem:[#allocation84_spill] sm:$0xff] %v10256_v42 }
 0xa6e   : > { %v10258_v62 = vpop.f32.mrb[128].mxu0 }
 0xa6f   : > { %v4344_v39 = vpop.f32.mrb[129].mxu0 }
 0xa70   : > { %v10261_v37 = vadd.f32 %v4344_v39, %v10164_v46  ;;  %v10263_v44 = vpop.f32.mrb[130].mxu0 }
 0xa71   : > { %v4348_v30 = vpop.f32.mrb[131].mxu0 }
 0xa72   : > { %11757 = vst [vmem:[#allocation86_spill] sm:$0xff] %v10261_v37  ;;  %v10266_v52 = vadd.f32 %v4348_v30, %v10164_v46 }
 0xa74   : > { %11758 = vst [vmem:[#allocation48_spill] sm:$0xff] %v10266_v52 }
 0xa76   : > { %v10268_v7 = vpop.f32.mrb[132].mxu0 }
 0xa77   : > { %v4354_v9 = vpop.f32.mrb[133].mxu0 }
 0xa78   : > { %v10271_v33 = vadd.f32 %v4354_v9, %v10164_v46  ;;  %v10273_v3 = vpop.f32.mrb[134].mxu0 }
 0xa79   : > { %v4358_v45 = vpop.f32.mrb[135].mxu0 }
 0xa7a   : > { %11759 = vst [vmem:[#allocation52_spill] sm:$0xff] %v10271_v33  ;;  %v10276_v39 = vadd.f32 %v4358_v45, %v10164_v46  ;;  %v4092_v19 = vpop.permute.xlu1 %4091  ;;  %v8160_v46 = vld [vmem:[%s8785_s17 + $0x10] sm:$0xff]  }
 0xa7b   : > { %v4090_v58 = vpop.permute.xlu0 %4089  ;;  %v11762_v33 = vld [vmem:[#allocation55_spill] sm:$0xff] }
 0xa7c   : > { %7284 = vmatprep.subr.bf16.mxu1 %v4090_v58  ;;  %11760 = vst [vmem:[#allocation80_spill] sm:$0xff] %v10276_v39 }
 0xa7d   : > { %7285 = vmatpush3.bf16.msra.mxu1 %v4090_v58 }
 0xa7e   : > { %7286 = vmatprep.subr.bf16.mxu1 %v4092_v19 }
 0xa81   : > { %7287 = vmatpush3.bf16.msra.mxu1 %v4092_v19  ;;  %v7598_v19 = vld [vmem:[#allocation4 + $0x20] sm:$0xff]  }
 0xa8d   : > { %v4096_v31 = vpop.permute.xlu1 %4095 }
 0xa8e   : > { %v4094_v30 = vpop.permute.xlu0 %4093 }
 0xa8f   : > { %7288 = vmatprep.subr.bf16.mxu1 %v4094_v30 }
 0xa90   : > { %7289 = vmatpush3.bf16.msra.mxu1 %v4094_v30  ;;  %v8161_v30 = vld [vmem:[%s8785_s17 + $0x18] sm:$0xff]  }
 0xa91   : > { %7290 = vmatprep.subr.bf16.mxu1 %v4096_v31 }
 0xa94   : > { %7291 = vmatpush3.bf16.msra.mxu1 %v4096_v31  ;;  %v8159_v31 = vld [vmem:[%s8785_s17 + $0x8] sm:$0xff]  }
 0xa9d   : > { %v4100_v24 = vpop.permute.xlu1 %4099 }
 0xa9e   : > { %v4098_v9 = vpop.permute.xlu0 %4097 }
 0xa9f   : > { %7292 = vmatprep.subr.bf16.mxu1 %v4098_v9 }
 0xaa0   : > { %7293 = vmatpush3.bf16.msra.mxu1 %v4098_v9  ;;  %v8163_v9 = vld [vmem:[%s8785_s17 + $0x28] sm:$0xff]  }
 0xaa1   : > { %7294 = vmatprep.subr.bf16.mxu1 %v4100_v24 }
 0xaa4   : > { %7295 = vmatpush3.bf16.msra.mxu1 %v4100_v24  ;;  %v8162_v24 = vld [vmem:[%s8785_s17 + $0x20] sm:$0xff]  }
 0xaad   : > { %v4104_v58 = vpop.permute.xlu1 %4103 }
 0xaae   : > { %v4102_v45 = vpop.permute.xlu0 %4101 }
 0xaaf   : > { %7296 = vmatprep.subr.bf16.mxu1 %v4102_v45 }
 0xab0   : > { %7297 = vmatpush3.bf16.msra.mxu1 %v4102_v45  ;;  %v8165_v45 = vld [vmem:[%s8785_s17 + $0x38] sm:$0xff]  }
 0xab1   : > { %7298 = vmatprep.subr.bf16.mxu1 %v4104_v58 }
 0xab4   : > { %7299 = vmatpush3.bf16.msra.mxu1 %v4104_v58  ;;  %v7600_v58 = vld [vmem:[#allocation4 + $0x30] sm:$0xff]  }
 0xab5   : > { %7316 = vmatprep.subr.bf16.mxu1 %v7598_v19  ;;  %7356 = vmatprep.subr.bf16.mxu0 %v7600_v58 }
 0xab6   : > { %7357 = vmatpush3.bf16.msra.mxu0 %v7600_v58 }
 0xab7   : > { %7301 = vmatmul.mubr.bf16.vlgmr.msra.gmra.mrb[88].mxu1 %v8159_v31  ;;  %v7601_v31 = vld [vmem:[#allocation4 + $0x38] sm:$0xff]  }
 0xab8   : > { %7304 = vmatprep.mubr.bf16.mxu1 %v8160_v46  ;;  %7317 = vmatpush3.bf16.msra.mxu1 %v7598_v19  ;;  %v4436_v19 = vpop.permute.xlu0 %4435  ;;  %v4438_v46 = vpop.permute.xlu1 %4437 }
 0xab9   : > { %7318 = vmatprep.subr.bf16.mxu1 %v7599_v25  ;;  %7358 = vmatprep.subr.bf16.mxu0 %v7601_v31 }
 0xaba   : > { %7359 = vmatpush3.bf16.msra.mxu0 %v7601_v31 }
 0xabc   : > { %7319 = vmatpush3.bf16.msra.mxu1 %v7599_v25 }
 0xabf   : > { %7305 = vmatmul.mubr.bf16.gmra.mrb[92].mxu1 %v8161_v30  ;;  %v4440_v30 = vpop.permute.xlu0 %4439 }
 0xac0   : > { %7308 = vmatprep.mubr.bf16.mxu1 %v8162_v24  ;;  %v10288_v24 = vld [vmem:[%s11295_s9 + $0x1] ss:$0 sm:$0xff] }
 0xac1   : > { %v4371_v25 = vadd.f32 %v10288_v24, %v10102_v15  ;;  %v4374_v58 = vadd.f32 %v10104_v6, %v10288_v24  ;;  %v4372_v31 = vadd.f32 %v10288_v24, %v10108_v48  ;;  %v4377_v6 = vadd.f32 %v10114_v0, %v10288_v24  ;;  %v11765_v0 = vld [vmem:[#allocation61_spill] sm:$0xff] }
 0xac3   : > { %v4387_v39 = vmul.f32 %v4371_v25, %v11762_v33  ;;  %v4388_v16 = vmul.f32 %v4372_v31, %v11764_v29 }
 0xac7   : > { %7309 = vmatmul.mubr.bf16.gmra.mrb[96].mxu1 %v8163_v9  ;;  %v4373_v9 = vadd.f32 %v10100_v53, %v10288_v24  ;;  %v4390_v53 = vmul.f32 %v4374_v58, %v11763_v13 }
 0xac8   : > { %7312 = vmatprep.mubr.bf16.mxu1 %v8164_v23  ;;  %v4442_v23 = vpop.permute.xlu1 %4441 }
 0xac9   : > { %v4389_v60 = vmul.f32 %v4373_v9, %v11761_v17  ;;  %v4375_v17 = vadd.f32 %v10288_v24, %v10116_v27  ;;  %v11766_v27 = vld [vmem:[#allocation59_spill] sm:$0xff] }
 0xacc   : > { %v4446_v18 = vpop.permute.xlu1 %4445 }
 0xacf   : > { %7313 = vmatmul.mubr.bf16.gmra.mrb[100].mxu1 %v8165_v45  ;;  %v4444_v45 = vpop.permute.xlu0 %4443 }
 0xad0   : > { %v4450_v9 = vpop.permute.xlu1 %4449 }
 0xad3   : > { %v4448_v42 = vpop.permute.xlu0 %4447 }
 0xb8a   : > { %v7302_v43 = vpop.f32.mrb[88].mxu1 }
 0xb8b   : > { %v4405_v37 = vadd.f32 %v7302_v43, %v4389_v60  ;;  %v4147_v52 = vpop.f32.mrb[89].mxu1  ;;  %v4378_v43 = vadd.f32 %v10118_v38, %v10288_v24 }
 0xb8c   : > { %v4403_v32 = vadd.f32 %v4387_v39, %v4147_v52  ;;  %v7303_v15 = vpop.f32.mrb[90].mxu1  ;;  %v4376_v52 = vadd.f32 %v10288_v24, %v10122_v56 }
 0xb8d   : > { %v4485_v57 = vadd.f32 %v4440_v30, %v4405_v37  ;;  %v4406_v48 = vadd.f32 %v7303_v15, %v4390_v53  ;;  %v4150_v2 = vpop.f32.mrb[91].mxu1  ;;  %v4393_v37 = vmul.f32 %v4377_v6, %v11765_v0  ;;  %v4452_v30 = vpop.permute.xlu0 %4451  ;;  %v4391_v15 = vmul.f32 %v4375_v17, %v11766_v27  ;;  %v11770_v27 = vld [vmem:[#allocation64_spill] sm:$0xff] }
 0xb8e   : > { %v4483_v33 = vadd.f32 %v4436_v19, %v4403_v32  ;;  %v4404_v60 = vadd.f32 %v4388_v16, %v4150_v2  ;;  %v11767_v19 = vld [vmem:[#allocation62_spill] sm:$0xff]  ;;  %v4381_v6 = vadd.f32 %v10128_v54, %v10288_v24  ;;  %v4379_v17 = vadd.f32 %v10288_v24, %v10130_v47 }
 0xb8f   : > { %v4486_v13 = vadd.f32 %v4442_v23, %v4406_v48  ;;  %v4501_v39 = vmax.f32 %v4485_v57, 0.0  ;;  %v4394_v38 = vmul.f32 %v4378_v43, %v11767_v19  ;;  %v4454_v23 = vpop.permute.xlu1 %4453  ;;  %v4382_v43 = vadd.f32 %v10132_v55, %v10288_v24  ;;  %v11769_v47 = vld [vmem:[#allocation66_spill] sm:$0xff] }
 0xb90   : > { %v4484_v29 = vadd.f32 %v4438_v46, %v4404_v60  ;;  %v4499_v58 = vmax.f32 %v4483_v33, 0.0  ;;  %v11768_v46 = vld [vmem:[#allocation60_spill] sm:$0xff]  ;;  %v4380_v54 = vadd.f32 %v10288_v24, %v10136_v51 }
 0xb91   : > { %v4502_v25 = vmax.f32 %v4486_v13, 0.0  ;;  %v4392_v57 = vmul.f32 %v4376_v52, %v11768_v46 }
 0xb92   : > { %v4500_v31 = vmax.f32 %v4484_v29, 0.0  ;;  %v7306_v53 = vpop.f32.mrb[92].mxu1 }
 0xb93   : > { %v4516_v32 = vpack.c.bf16 %v4502_v25, %v4501_v39  ;;  %v4409_v2 = vadd.f32 %v7306_v53, %v4393_v37  ;;  %v4163_v16 = vpop.f32.mrb[93].mxu1 }
 0xb94   : > { %v4515_v48 = vpack.c.bf16 %v4500_v31, %v4499_v58  ;;  %v4407_v22 = vadd.f32 %v4391_v15, %v4163_v16  ;;  %v7307_v56 = vpop.f32.mrb[94].mxu1  ;;  %v4395_v15 = vmul.f32 %v4379_v17, %v11770_v27  ;;  %v11771_v16 = vld [vmem:[#allocation67_spill] sm:$0xff] }
 0xb95   : > { %v4489_v60 = vadd.f32 %v4448_v42, %v4409_v2  ;;  %v4410_v33 = vadd.f32 %v7307_v56, %v4394_v38  ;;  %v4166_v13 = vpop.f32.mrb[95].mxu1  ;;  %5380 = vrot.lane.b32.xlu1 %v4516_v32, %s8308_s28  ;;  %v4456_v42 = vpop.permute.xlu0 %4455  ;;  %v4385_v56 = vadd.f32 %v10142_v4, %v10288_v24  ;;  %v4384_v4 = vadd.f32 %v10288_v24, %v10150_v12 }
 0xb96   : > { %v4487_v29 = vadd.f32 %v4444_v45, %v4407_v22  ;;  %v4408_v39 = vadd.f32 %v4392_v57, %v4166_v13  ;;  %5378 = vrot.lane.b32.xlu0 %v4515_v48, %s8308_s28  ;;  %7320 = vmatprep.mubr.msk.bf16.mxu1 %vm1200_vm2, %v4515_v48  ;;  %v4397_v22 = vmul.f32 %v4381_v6, %v11769_v47  ;;  %v4458_v45 = vpop.permute.xlu1 %4457  ;;  %v11772_v48 = vld [vmem:[#allocation65_spill] sm:$0xff]  ;;  %v11774_v47 = vld [vmem:[#allocation68_spill] sm:$0xff] }
 0xb97   : > { %v4490_v52 = vadd.f32 %v4450_v9, %v4410_v33  ;;  %7321 = vmatmul.mubr.msk.bf16.vlgmr.msra.gmra.mrb[104].mxu1 %vm1200_vm2, %v4516_v32  ;;  %v4505_v0 = vmax.f32 %v4489_v60, 0.0  ;;  %v4398_v32 = vmul.f32 %v4382_v43, %v11771_v16  ;;  %v4383_v60 = vadd.f32 %v10288_v24, %v10144_v8 }
 0xb98   : > { %v4488_v25 = vadd.f32 %v4446_v18, %v4408_v39  ;;  %v4503_v58 = vmax.f32 %v4487_v29, 0.0  ;;  %v4396_v18 = vmul.f32 %v4380_v54, %v11772_v48  ;;  %v4386_v29 = vadd.f32 %v10146_v11, %v10288_v24  ;;  %v11776_v24 = vld [vmem:[#allocation69_spill] sm:$0xff] }
 0xb99   : > { %v4506_v37 = vmax.f32 %v4490_v52, 0.0  ;;  %v4460_v33 = vpop.permute.xlu0 %4459 }
 0xb9a   : > { %v4504_v31 = vmax.f32 %v4488_v25, 0.0  ;;  %v7310_v53 = vpop.f32.mrb[96].mxu1  ;;  %v4462_v43 = vpop.permute.xlu1 %4461 }
 0xb9b   : > { %v4518_v2 = vpack.c.bf16 %v4506_v37, %v4505_v0  ;;  %v4413_v55 = vadd.f32 %v7310_v53, %v4397_v22  ;;  %v4179_v9 = vpop.f32.mrb[97].mxu1  ;;  %v4399_v22 = vmul.f32 %v4383_v60, %v11774_v47  ;;  %v11777_v60 = vsub.s32 0, %v11731_v10 }
 0xb9c   : > { %v4517_v19 = vpack.c.bf16 %v4504_v31, %v4503_v58  ;;  %v4411_v38 = vadd.f32 %v4395_v15, %v4179_v9  ;;  %v7311_v51 = vpop.f32.mrb[98].mxu1 }
 0xb9d   : > { %v4493_v46 = vadd.f32 %v4456_v42, %v4413_v55  ;;  %v4414_v57 = vadd.f32 %v7311_v51, %v4398_v32  ;;  %v4182_v6 = vpop.f32.mrb[99].mxu1  ;;  %5384 = vrot.lane.b32.xlu1 %v4518_v2, %s8308_s28  ;;  %v11773_v42 = vld [vmem:[#allocation70_spill] sm:$0xff]  ;;  %v4464_v27 = vpop.permute.xlu0 %4463 }
 0xb9e   : > { %v4491_v13 = vadd.f32 %v4452_v30, %v4411_v38  ;;  %v4412_v17 = vadd.f32 %v4396_v18, %v4182_v6  ;;  %5382 = vrot.lane.b32.xlu0 %v4517_v19, %s8308_s28  ;;  %7324 = vmatprep.mubr.msk.bf16.mxu1 %vm1200_vm2, %v4517_v19  ;;  %v4401_v30 = vmul.f32 %v4385_v56, %v11773_v42  ;;  %v4466_v32 = vpop.permute.xlu1 %4465  ;;  %v11786_v42 = vld [vmem:[#allocation48_spill] sm:$0xff] }
 0xb9f   : > { %v4494_v39 = vadd.f32 %v4458_v45, %v4414_v57  ;;  %7325 = vmatmul.mubr.msk.bf16.gmra.mrb[108].mxu1 %vm1200_vm2, %v4518_v2  ;;  %v4509_v54 = vmax.f32 %v4493_v46, 0.0  ;;  %v11775_v45 = vld [vmem:[#allocation71_spill] sm:$0xff] }
 0xba0   : > { %v4492_v52 = vadd.f32 %v4454_v23, %v4412_v17  ;;  %v4507_v25 = vmax.f32 %v4491_v13, 0.0  ;;  %v4402_v53 = vmul.f32 %v4386_v29, %v11775_v45  ;;  %v4400_v23 = vmul.f32 %v4384_v4, %v11776_v24  ;;  %v11783_v4 = vld [vmem:[#allocation41_spill] sm:$0xff] }
 0xba1   : > { %v4510_v8 = vmax.f32 %v4494_v39, 0.0  ;;  %v4221_v13 = vrot.slane %v10155_v5, %v11777_v60  ;;  %v11782_v39 = vld [vmem:[#allocation50_spill] sm:$0xff]  ;;  %v11800_v24 = vld [vmem:[#allocation77_spill] sm:$0xff] }
 0xba2   : > { %v4508_v0 = vmax.f32 %v4492_v52, 0.0  ;;  %v7314_v37 = vpop.f32.mrb[100].mxu1  ;;  %v11785_v52 = vld [vmem:[#allocation54_spill] sm:$0xff] }
 0xba3   : > { %v4520_v58 = vpack.c.bf16 %v4510_v8, %v4509_v54  ;;  %v4417_v31 = vadd.f32 %v7314_v37, %v4401_v30  ;;  %v4195_v11 = vpop.f32.mrb[101].mxu1  ;;  %v10361_v29 = vadd.f32 %v10166_v36, %v4221_v13  ;;  %v10368_v5 = vadd.f32 %v10191_v28, %v4221_v13  ;;  %v11787_v30 = vld [vmem:[#allocation86_spill] sm:$0xff] }
 0xba4   : > { %v4519_v15 = vpack.c.bf16 %v4508_v0, %v4507_v25  ;;  %v4415_v2 = vadd.f32 %v4399_v22, %v4195_v11  ;;  %v7315_v12 = vpop.f32.mrb[102].mxu1  ;;  %v10371_v10 = vadd.f32 %v10184_v50, %v4221_v13  ;;  %v10386_v36 = vadd.f32 %v10209_v20, %v4221_v13  ;;  %v11788_v25 = vld [vmem:[#allocation80_spill] sm:$0xff]  ;;  %v11790_v22 = vld [vmem:[#allocation51_spill] sm:$0xff] }
 0xba5   : > { %v4497_v55 = vadd.f32 %v4464_v27, %v4417_v31  ;;  %v4418_v9 = vadd.f32 %v7315_v12, %v4402_v53  ;;  %v4198_v16 = vpop.f32.mrb[103].mxu1  ;;  %5388 = vrot.lane.b32.xlu1 %v4520_v58, %s8308_s28  ;;  %v10396_v50 = vadd.f32 %v10227_v40, %v4221_v13  ;;  %v10399_v28 = vadd.f32 %v10220_v26, %v4221_v13  ;;  %v11789_v0 = vld [vmem:[#allocation52_spill] sm:$0xff]  ;;  %v11792_v31 = vld [vmem:[#allocation49_spill] sm:$0xff] }
 0xba6   : > { %v4495_v19 = vadd.f32 %v4460_v33, %v4415_v2  ;;  %v4416_v38 = vadd.f32 %v4400_v23, %v4198_v16  ;;  %5386 = vrot.lane.b32.xlu0 %v4519_v15, %s8308_s28  ;;  %7328 = vmatprep.mubr.msk.bf16.mxu1 %vm1200_vm2, %v4519_v15  ;;  %v10357_v33 = vadd.f32 %v10173_v61, %v4221_v13  ;;  %v11793_v11 = vld [vmem:[#allocation36_spill] sm:$0xff]  ;;  %v11794_v2 = vld [vmem:[#allocation75_spill] sm:$0xff]  ;;  %v11801_v23 = vld [vmem:[#allocation81_spill] sm:$0xff] }
 0xba7   : > { %v4498_v51 = vadd.f32 %v4466_v32, %v4418_v9  ;;  %7329 = vmatmul.mubr.msk.bf16.gmra.mrb[112].mxu1 %vm1200_vm2, %v4520_v58  ;;  %v4513_v18 = vmax.f32 %v4497_v55, 0.0  ;;  %v10389_v61 = vadd.f32 %v10202_v14, %v4221_v13  ;;  %v10414_v14 = vadd.f32 %v10243_v49, %v4221_v13  ;;  %v11791_v58 = vld [vmem:[#allocation38_spill] sm:$0xff]  ;;  %v11799_v12 = vld [vmem:[#allocation76_spill] sm:$0xff] }
 0xba8   : > { %v4496_v48 = vadd.f32 %v4462_v43, %v4416_v38  ;;  %v4511_v46 = vmax.f32 %v4495_v19, 0.0  ;;  %v10417_v20 = vadd.f32 %v10238_v41, %v4221_v13  ;;  %v10424_v26 = vadd.f32 %v10253_v1, %v4221_v13  ;;  %v11784_v43 = vld [vmem:[#allocation84_spill] sm:$0xff] }
 0xba9   : > { %v4514_v56 = vmax.f32 %v4498_v51, 0.0  ;;  %v10427_v40 = vadd.f32 %v10248_v59, %v4221_v13  ;;  %v10442_v41 = vadd.f32 %v10263_v44, %v4221_v13  ;;  %v10445_v49 = vadd.f32 %v10258_v62, %v4221_v13  ;;  %v11778_v62 = vld [vmem:[#allocation40_spill] sm:$0xff]  ;;  %v11779_v44 = vld [vmem:[#allocation45_spill] sm:$0xff] }
 0xbaa   : > { %v4512_v57 = vmax.f32 %v4496_v48, 0.0  ;;  %v10452_v59 = vadd.f32 %v10273_v3, %v4221_v13  ;;  %v10455_v1 = vadd.f32 %v10268_v7, %v4221_v13  ;;  %v11780_v7 = vld [vmem:[#allocation43_spill] sm:$0xff]  ;;  %v11781_v3 = vld [vmem:[#allocation44_spill] sm:$0xff] }
 0xbab   : > { %v4522_v6 = vpack.c.bf16 %v4514_v56, %v4513_v18 }
 0xbac   : > { %v4521_v17 = vpack.c.bf16 %v4512_v57, %v4511_v46 }
 0xbad   : > { %5392 = vrot.lane.b32.xlu1 %v4522_v6, %s8308_s28 }
 0xbae   : > { %5390 = vrot.lane.b32.xlu0 %v4521_v17, %s8308_s28  ;;  %7332 = vmatprep.mubr.msk.bf16.mxu1 %vm1200_vm2, %v4521_v17 }
 0xbaf   : > { %7333 = vmatmul.mubr.msk.bf16.gmra.mrb[116].mxu1 %vm1200_vm2, %v4522_v6 }
 0xbb1   : > { %4799 = vrot.lane.b32.xlu1 %v10357_v33, %s8306_s29 }
 0xbb2   : > { %4797 = vrot.lane.b32.xlu0 %v10361_v29, %s8306_s29 }
 0xbb5   : > { %4803 = vrot.lane.b32.xlu1 %v10368_v5, %s8306_s29 }
 0xbb6   : > { %4801 = vrot.lane.b32.xlu0 %v10371_v10, %s8306_s29 }
 0xbb9   : > { %5529 = vrot.lane.b32.xlu1 %v10357_v33, %s8309_s16 }
 0xbba   : > { %5527 = vrot.lane.b32.xlu0 %v10361_v29, %s8309_s16 }
 0xbbd   : > { %5533 = vrot.lane.b32.xlu1 %v10368_v5, %s8309_s16 }
 0xbbe   : > { %5531 = vrot.lane.b32.xlu0 %v10371_v10, %s8309_s16 }
 0xbc1   : > { %4807 = vrot.lane.b32.xlu1 %v10386_v36, %s8306_s29 }
 0xbc2   : > { %4805 = vrot.lane.b32.xlu0 %v10389_v61, %s8306_s29 }
 0xbc5   : > { %4811 = vrot.lane.b32.xlu1 %v10396_v50, %s8306_s29 }
 0xbc6   : > { %4809 = vrot.lane.b32.xlu0 %v10399_v28, %s8306_s29 }
 0xbc9   : > { %5537 = vrot.lane.b32.xlu1 %v10386_v36, %s8309_s16 }
 0xbca   : > { %5535 = vrot.lane.b32.xlu0 %v10389_v61, %s8309_s16 }
 0xbcd   : > { %5541 = vrot.lane.b32.xlu1 %v10396_v50, %s8309_s16 }
 0xbce   : > { %5539 = vrot.lane.b32.xlu0 %v10399_v28, %s8309_s16 }
 0xbd1   : > { %4815 = vrot.lane.b32.xlu1 %v10414_v14, %s8306_s29 }
 0xbd2   : > { %4813 = vrot.lane.b32.xlu0 %v10417_v20, %s8306_s29 }
 0xbd5   : > { %4819 = vrot.lane.b32.xlu1 %v10424_v26, %s8306_s29 }
 0xbd6   : > { %4817 = vrot.lane.b32.xlu0 %v10427_v40, %s8306_s29 }
 0xbd9   : > { %5545 = vrot.lane.b32.xlu1 %v10414_v14, %s8309_s16 }
 0xbda   : > { %5543 = vrot.lane.b32.xlu0 %v10417_v20, %s8309_s16 }
 0xbdd   : > { %5549 = vrot.lane.b32.xlu1 %v10424_v26, %s8309_s16 }
 0xbde   : > { %5547 = vrot.lane.b32.xlu0 %v10427_v40, %s8309_s16 }
 0xbe1   : > { %4823 = vrot.lane.b32.xlu1 %v10442_v41, %s8306_s29 }
 0xbe2   : > { %4821 = vrot.lane.b32.xlu0 %v10445_v49, %s8306_s29 }
 0xbe5   : > { %4827 = vrot.lane.b32.xlu1 %v10452_v59, %s8306_s29 }
 0xbe6   : > { %4825 = vrot.lane.b32.xlu0 %v10455_v1, %s8306_s29 }
 0xbe9   : > { %5553 = vrot.lane.b32.xlu1 %v10442_v41, %s8309_s16 }
 0xbea   : > { %5551 = vrot.lane.b32.xlu0 %v10445_v49, %s8309_s16 }
 0xbed   : > { %5557 = vrot.lane.b32.xlu1 %v10452_v59, %s8309_s16 }
 0xbee   : > { %5555 = vrot.lane.b32.xlu0 %v10455_v1, %s8309_s16 }
 0xbf1   : > { %5865 = vrot.lane.b32.xlu1 %v10178_v35, %s8308_s28 }
 0xbf2   : > { %5863 = vrot.lane.b32.xlu0 %v10171_v63, %s8308_s28 }
 0xbf5   : > { %5869 = vrot.lane.b32.xlu1 %v10196_v21, %s8308_s28 }
 0xbf6   : > { %5867 = vrot.lane.b32.xlu0 %v10189_v34, %s8308_s28 }
 0xbf9   : > { %5873 = vrot.lane.b32.xlu1 %v11778_v62, %s8308_s28 }
 0xbfa   : > { %5871 = vrot.lane.b32.xlu0 %v11779_v44, %s8308_s28 }
 0xbfd   : > { %5877 = vrot.lane.b32.xlu1 %v11780_v7, %s8308_s28 }
 0xbfe   : > { %5875 = vrot.lane.b32.xlu0 %v11781_v3, %s8308_s28 }
 0xc01   : > { %5881 = vrot.lane.b32.xlu1 %v11782_v39, %s8308_s28 }
 0xc02   : > { %5879 = vrot.lane.b32.xlu0 %v11783_v4, %s8308_s28 }
 0xc05   : > { %5885 = vrot.lane.b32.xlu1 %v11784_v43, %s8308_s28 }
 0xc06   : > { %5883 = vrot.lane.b32.xlu0 %v11785_v52, %s8308_s28 }
 0xc07   : > { %v5381_v8 = vpop.permute.xlu1 %5380 }
 0xc08   : > { %v5379_v54 = vpop.permute.xlu0 %5378 }
 0xc09   : > { %5889 = vrot.lane.b32.xlu1 %v11786_v42, %s8308_s28  ;;  %7360 = vmatprep.mubr.msk.bf16.mxu0 %vm1200_vm2, %v5379_v54 }
 0xc0a   : > { %5887 = vrot.lane.b32.xlu0 %v11787_v30, %s8308_s28  ;;  %7361 = vmatmul.mubr.msk.bf16.vlgmr.msra.gmra.mrb[136].mxu0 %vm1200_vm2, %v5381_v8 }
 0xc0d   : > { %5893 = vrot.lane.b32.xlu1 %v11788_v25, %s8308_s28 }
 0xc0e   : > { %5891 = vrot.lane.b32.xlu0 %v11789_v0, %s8308_s28 }
 0xc0f   : > { %v5385_v47 = vpop.permute.xlu1 %5384 }
 0xc10   : > { %v5383_v37 = vpop.permute.xlu0 %5382 }
 0xc11   : > { %5071 = vrot.lane.b32.xlu1 %v11790_v22, %s8309_s16  ;;  %7364 = vmatprep.mubr.msk.bf16.mxu0 %vm1200_vm2, %v5383_v37 }
 0xc12   : > { %5069 = vrot.lane.b32.xlu0 %v11791_v58, %s8309_s16  ;;  %7365 = vmatmul.mubr.msk.bf16.gmra.mrb[140].mxu0 %vm1200_vm2, %v5385_v47 }
 0xc15   : > { %5075 = vrot.lane.b32.xlu1 %v11792_v31, %s8309_s16 }
 0xc16   : > { %5073 = vrot.lane.b32.xlu0 %v11793_v11, %s8309_s16 }
 0xc17   : > { %v5389_v53 = vpop.permute.xlu1 %5388 }
 0xc18   : > { %v5387_v45 = vpop.permute.xlu0 %5386 }
 0xc19   : > { %5705 = vrot.lane.b32.xlu1 %v10178_v35, %s8309_s16  ;;  %7368 = vmatprep.mubr.msk.bf16.mxu0 %vm1200_vm2, %v5387_v45  ;;  %v11795_v35 = vld [vmem:[#allocation63_spill] sm:$0xff] }
 0xc1a   : > { %5703 = vrot.lane.b32.xlu0 %v10171_v63, %s8309_s16  ;;  %7369 = vmatmul.mubr.msk.bf16.gmra.mrb[144].mxu0 %vm1200_vm2, %v5389_v53  ;;  %v11796_v63 = vld [vmem:[#allocation53_spill] sm:$0xff] }
 0xc1d   : > { %5709 = vrot.lane.b32.xlu1 %v10196_v21, %s8309_s16  ;;  %v11797_v21 = vld [vmem:[#allocation74_spill] sm:$0xff] }
 0xc1e   : > { %5707 = vrot.lane.b32.xlu0 %v10189_v34, %s8309_s16  ;;  %v11798_v34 = vld [vmem:[#allocation83_spill] sm:$0xff] }
 0xc1f   : > { %v5393_v15 = vpop.permute.xlu1 %5392 }
 0xc20   : > { %v5391_v27 = vpop.permute.xlu0 %5390 }
 0xc21   : > { %5079 = vrot.lane.b32.xlu1 %v11794_v2, %s8309_s16  ;;  %7372 = vmatprep.mubr.msk.bf16.mxu0 %vm1200_vm2, %v5391_v27 }
 0xc22   : > { %5077 = vrot.lane.b32.xlu0 %v11795_v35, %s8309_s16  ;;  %7373 = vmatmul.mubr.msk.bf16.gmra.mrb[148].mxu0 %vm1200_vm2, %v5393_v15 }
 0xc23   : > { %v10553_v16 = vpop.permute.xlu1 %4799 }
 0xc24   : > { %v10549_v55 = vpop.permute.xlu0 %4797 }
 0xc25   : > { %5083 = vrot.lane.b32.xlu1 %v11796_v63, %s8309_s16 }
 0xc26   : > { %5081 = vrot.lane.b32.xlu0 %v11797_v21, %s8309_s16 }
 0xc27   : > { %v10557_v19 = vpop.permute.xlu1 %4803 }
 0xc28   : > { %v10551_v9 = vpop.permute.xlu0 %4801 }
 0xc29   : > { %5713 = vrot.lane.b32.xlu1 %v11778_v62, %s8309_s16  ;;  %v10584_v62 = vld [vmem:[%s11625_s26 + $0x2] ss:$0 sm:$0xff] }
 0xc2a   : > { %5711 = vrot.lane.b32.xlu0 %v11779_v44, %s8309_s16 }
 0xc2b   : > { %v10561_v51 = vpop.permute.xlu1 %5529 }
 0xc2c   : > { %v10555_v32 = vpop.permute.xlu0 %5527 }
 0xc2d   : > { %5717 = vrot.lane.b32.xlu1 %v11780_v7, %s8309_s16 }
 0xc2e   : > { %5715 = vrot.lane.b32.xlu0 %v11781_v3, %s8309_s16 }
 0xc2f   : > { %v10565_v18 = vpop.permute.xlu1 %5533 }
 0xc30   : > { %v10559_v38 = vpop.permute.xlu0 %5531 }
 0xc31   : > { %5087 = vrot.lane.b32.xlu1 %v11798_v34, %s8309_s16 }
 0xc32   : > { %5085 = vrot.lane.b32.xlu0 %v11799_v12, %s8309_s16 }
 0xc33   : > { %v10569_v46 = vpop.permute.xlu1 %4807 }
 0xc34   : > { %v10563_v48 = vpop.permute.xlu0 %4805 }
 0xc35   : > { %5091 = vrot.lane.b32.xlu1 %v11800_v24, %s8309_s16 }
 0xc36   : > { %5089 = vrot.lane.b32.xlu0 %v11801_v23, %s8309_s16 }
 0xc37   : > { %v10573_v6 = vpop.permute.xlu1 %4811 }
 0xc38   : > { %v10567_v56 = vpop.permute.xlu0 %4809 }
 0xc3b   : > { %v10577_v13 = vpop.permute.xlu1 %5537 }
 0xc3c   : > { %v10571_v57 = vpop.permute.xlu0 %5535 }
 0xc3f   : > { %v10586_v44 = vpop.permute.xlu1 %5541 }
 0xc40   : > { %v10575_v60 = vpop.permute.xlu0 %5539 }
 0xc43   : > { %v10608_v24 = vpop.permute.xlu1 %4815 }
 0xc44   : > { %v10579_v17 = vpop.permute.xlu0 %4813 }
 0xc48   : > { %v10599_v27 = vpop.permute.xlu0 %4817 }
 0xc6a   : > { %v7322_v7 = vpop.f32.mrb[104].mxu1 }
 0xc6b   : > { %v10589_v3 = vadd.f32 %v7322_v7, %v10584_v62  ;;  %v4606_v54 = vpop.f32.mrb[105].mxu1 }
 0xc6c   : > { %v10592_v8 = vadd.f32 %v10584_v62, %v4606_v54  ;;  %v7323_v37 = vpop.f32.mrb[106].mxu1 }
 0xc6d   : > { %v4671_v47 = vadd.f32 %v10589_v3, %v10371_v10  ;;  %v10597_v45 = vadd.f32 %v7323_v37, %v10584_v62  ;;  %v4609_v53 = vpop.f32.mrb[107].mxu1 }
 0xc6e   : > { %v4669_v15 = vadd.f32 %v10592_v8, %v10361_v29  ;;  %v10604_v7 = vadd.f32 %v10584_v62, %v4609_v53 }
 0xc6f   : > { %v6771_v34 = vmul.f32 -1.442695, %v4671_v47  ;;  %v4672_v54 = vadd.f32 %v10597_v45, %v10368_v5  ;;  %v10615_v47 = vpop.permute.xlu0 %5543 }
 0xc70   : > { %v6769_v12 = vmul.f32 -1.442695, %v4669_v15  ;;  %v4670_v10 = vadd.f32 %v10604_v7, %v10357_v33 }
 0xc71   : > { %7870 = vpow2.f32 %v6771_v34  ;;  %v6772_v37 = vmul.f32 -1.442695, %v4672_v54  ;;  %v10625_v54 = vpop.permute.xlu1 %4819 }
 0xc72   : > { %7872 = vpow2.f32 %v6769_v12  ;;  %v6770_v23 = vmul.f32 -1.442695, %v4670_v10  ;;  %v7326_v2 = vpop.f32.mrb[108].mxu1 }
 0xc73   : > { %7874 = vpow2.f32 %v6772_v37  ;;  %v10613_v29 = vadd.f32 %v7326_v2, %v10584_v62  ;;  %v4622_v53 = vpop.f32.mrb[109].mxu1  ;;  %v10636_v63 = vpop.permute.xlu0 %5547 }
 0xc74   : > { %7876 = vpow2.f32 %v6770_v23  ;;  %v10618_v5 = vadd.f32 %v10584_v62, %v4622_v53  ;;  %v7327_v15 = vpop.f32.mrb[110].mxu1 }
 0xc75   : > { %v4675_v33 = vadd.f32 %v10613_v29, %v10399_v28  ;;  %v10623_v34 = vadd.f32 %v7327_v15, %v10584_v62  ;;  %v4625_v12 = vpop.f32.mrb[111].mxu1  ;;  %v10641_v31 = vpop.permute.xlu1 %5545 }
 0xc76   : > { %v4673_v2 = vadd.f32 %v10618_v5, %v10389_v61  ;;  %v10630_v10 = vadd.f32 %v10584_v62, %v4625_v12 }
 0xc77   : > { %v6775_v23 = vmul.f32 -1.442695, %v4675_v33  ;;  %v4676_v37 = vadd.f32 %v10623_v34, %v10396_v50 }
 0xc78   : > { %v6773_v53 = vmul.f32 -1.442695, %v4673_v2  ;;  %v4674_v28 = vadd.f32 %v10630_v10, %v10386_v36 }
 0xc79   : > { %7878 = vpow2.f32 %v6775_v23  ;;  %v6776_v15 = vmul.f32 -1.442695, %v4676_v37  ;;  %v10662_v25 = vpop.permute.xlu1 %5549 }
 0xc7a   : > { %7880 = vpow2.f32 %v6773_v53  ;;  %v6774_v35 = vmul.f32 -1.442695, %v4674_v28  ;;  %v7330_v21 = vpop.f32.mrb[112].mxu1 }
 0xc7b   : > { %v7871_v22 = vpop.eup %7870  ;;  %7882 = vpow2.f32 %v6776_v15  ;;  %v10639_v61 = vadd.f32 %v7330_v21, %v10584_v62  ;;  %v4638_v33 = vpop.f32.mrb[113].mxu1 }
 0xc7c   : > { %v7873_v12 = vpop.eup %7872  ;;  %v4735_v50 = vadd.f32 1.0, %v7871_v22  ;;  %7884 = vpow2.f32 %v6774_v35  ;;  %v10644_v36 = vadd.f32 %v10584_v62, %v4638_v33  ;;  %v7331_v2 = vpop.f32.mrb[114].mxu1 }
 0xc7d   : > { %v7875_v23 = vpop.eup %7874  ;;  %v4733_v37 = vadd.f32 1.0, %v7873_v12  ;;  %v4679_v53 = vadd.f32 %v10639_v61, %v10427_v40  ;;  %v10649_v28 = vadd.f32 %v7331_v2, %v10584_v62  ;;  %v4641_v21 = vpop.f32.mrb[115].mxu1 }
 0xc7e   : > { %v7877_v15 = vpop.eup %7876  ;;  %7886 = vrcp.f32 %v4735_v50  ;;  %v4736_v58 = vadd.f32 1.0, %v7875_v23  ;;  %v4677_v22 = vadd.f32 %v10644_v36, %v10417_v20  ;;  %v10654_v35 = vadd.f32 %v10584_v62, %v4641_v21  ;;  %v10658_v40 = vpop.permute.xlu0 %4821 }
 0xc7f   : > { %7888 = vrcp.f32 %v4733_v37  ;;  %v4734_v33 = vadd.f32 1.0, %v7877_v15  ;;  %v6779_v11 = vmul.f32 -1.442695, %v4679_v53  ;;  %v4680_v12 = vadd.f32 %v10649_v28, %v10424_v26  ;;  %v10686_v42 = vpop.permute.xlu1 %4823 }
 0xc80   : > { %7890 = vrcp.f32 %v4736_v58  ;;  %v6777_v2 = vmul.f32 -1.442695, %v4677_v22  ;;  %v4678_v50 = vadd.f32 %v10654_v35, %v10414_v14 }
 0xc81   : > { %7892 = vrcp.f32 %v4734_v33  ;;  %v6780_v23 = vmul.f32 -1.442695, %v4680_v12 }
 0xc82   : > { %7894 = vpow2.f32 %v6779_v11  ;;  %v6778_v20 = vmul.f32 -1.442695, %v4678_v50  ;;  %v7334_v21 = vpop.f32.mrb[116].mxu1 }
 0xc83   : > { %v7879_v37 = vpop.eup %7878  ;;  %7896 = vpow2.f32 %v6777_v2  ;;  %v10665_v53 = vadd.f32 %v7334_v21, %v10584_v62  ;;  %v4654_v26 = vpop.f32.mrb[117].mxu1 }
 0xc84   : > { %v7881_v15 = vpop.eup %7880  ;;  %v4739_v0 = vadd.f32 1.0, %v7879_v37  ;;  %7898 = vpow2.f32 %v6780_v23  ;;  %v10668_v58 = vadd.f32 %v10584_v62, %v4654_v26  ;;  %v7335_v14 = vpop.f32.mrb[118].mxu1 }
 0xc85   : > { %v7883_v22 = vpop.eup %7882  ;;  %v4737_v33 = vadd.f32 1.0, %v7881_v15  ;;  %7900 = vpow2.f32 %v6778_v20  ;;  %v4683_v11 = vadd.f32 %v10665_v53, %v10455_v1  ;;  %v10673_v12 = vadd.f32 %v7335_v14, %v10584_v62  ;;  %v4657_v2 = vpop.f32.mrb[119].mxu1 }
 0xc86   : > { %11802 = vst [vmem:[#allocation82_spill] sm:$0xff] %v10668_v58  ;;  %v7885_v50 = vpop.eup %7884  ;;  %v10675_v21 = vpop.permute.xlu0 %4825  ;;  %7902 = vrcp.f32 %v4739_v0  ;;  %v4740_v37 = vadd.f32 1.0, %v7883_v22  ;;  %v4681_v23 = vadd.f32 %v10668_v58, %v10445_v49  ;;  %v10680_v26 = vadd.f32 %v10584_v62, %v4657_v2 }
 0xc87   : > { %7904 = vrcp.f32 %v4737_v33  ;;  %v4738_v20 = vadd.f32 1.0, %v7885_v50  ;;  %v6783_v15 = vmul.f32 -1.442695, %v4683_v11  ;;  %v4684_v1 = vadd.f32 %v10673_v12, %v10452_v59 }
 0xc88   : > { %11803 = vst [vmem:[#allocation31_spill] sm:$0xff] %v10680_v26  ;;  %v10684_v14 = vpop.eup %7886  ;;  %7906 = vrcp.f32 %v4740_v37  ;;  %v6781_v30 = vmul.f32 -1.442695, %v4681_v23  ;;  %v4682_v0 = vadd.f32 %v10680_v26, %v10442_v41 }
 0xc89   : > { %11804 = vst [vmem:[#allocation33_spill] sm:$0xff] %v10684_v14  ;;  %v10690_v22 = vpop.eup %7888  ;;  %7908 = vrcp.f32 %v4738_v20  ;;  %v6784_v49 = vmul.f32 -1.442695, %v4684_v1  ;;  %v4847_v62 = vmul.f32 %v10684_v14, %v10551_v9 }
 0xc8a   : > { %11805 = vst [vmem:[#allocation30_spill] sm:$0xff] %v10690_v22  ;;  %v10694_v33 = vpop.eup %7890  ;;  %7910 = vpow2.f32 %v6783_v15  ;;  %v6782_v59 = vmul.f32 -1.442695, %v4682_v0  ;;  %v10701_v50 = vpop.permute.xlu0 %5551  ;;  %v4845_v9 = vmul.f32 %v10690_v22, %v10549_v55 }
 0xc8b   : > { %11806 = vst [vmem:[#allocation32_spill] sm:$0xff] %v10694_v33  ;;  %v10696_v11 = vpop.eup %7892  ;;  %7912 = vpow2.f32 %v6781_v30  ;;  %4881 = vrot.lane.b32.xlu0 %v4847_v62, %s8306_s29  ;;  %v4848_v2 = vmul.f32 %v10694_v33, %v10557_v19  ;;  %v4828_v15 = vpop.permute.xlu1 %4827 }
 0xc8c   : > { %11807 = vst [vmem:[#allocation35_spill] sm:$0xff] %v10696_v11  ;;  %v7895_v41 = vpop.eup %7894  ;;  %7914 = vpow2.f32 %v6784_v49  ;;  %v4846_v19 = vmul.f32 %v10696_v11, %v10553_v16 }
 0xc8d   : > { %v7897_v37 = vpop.eup %7896  ;;  %v4743_v23 = vadd.f32 1.0, %v7895_v41  ;;  %7916 = vpow2.f32 %v6782_v59  ;;  %4883 = vrot.lane.b32.xlu1 %v4848_v2, %s8306_s29 }
 0xc8e   : > { %v7899_v20 = vpop.eup %7898  ;;  %v4741_v30 = vadd.f32 1.0, %v7897_v37  ;;  %v10718_v41 = vpop.permute.xlu0 %5555 }
 0xc8f   : > { %v7901_v1 = vpop.eup %7900  ;;  %7918 = vrcp.f32 %v4743_v23  ;;  %v4744_v0 = vadd.f32 1.0, %v7899_v20  ;;  %4877 = vrot.lane.b32.xlu0 %v4845_v9, %s8306_s29  ;;  %v10725_v9 = vpop.permute.xlu1 %5553 }
 0xc90   : > { %v10709_v49 = vpop.eup %7902  ;;  %7920 = vrcp.f32 %v4741_v30  ;;  %v4742_v62 = vadd.f32 1.0, %v7901_v1 }
 0xc91   : > { %11808 = vst [vmem:[#allocation39_spill] sm:$0xff] %v10709_v49  ;;  %v10711_v59 = vpop.eup %7904  ;;  %7922 = vrcp.f32 %v4744_v0  ;;  %4879 = vrot.lane.b32.xlu1 %v4846_v19, %s8306_s29  ;;  %v4851_v55 = vmul.f32 %v10709_v49, %v10567_v56 }
 0xc92   : > { %11809 = vst [vmem:[#allocation72_spill] sm:$0xff] %v10711_v59  ;;  %v10716_v2 = vpop.eup %7906  ;;  %7924 = vrcp.f32 %v4742_v62  ;;  %v4849_v56 = vmul.f32 %v10711_v59, %v10563_v48  ;;  %v10822_v59 = vld [vmem:[%s11625_s26 + $0x3] ss:$0 sm:$0xff] }
 0xc93   : > { %11810 = vst [vmem:[#allocation34_spill] sm:$0xff] %v10716_v2  ;;  %v10720_v37 = vpop.eup %7908  ;;  %4889 = vrot.lane.b32.xlu0 %v4851_v55, %s8306_s29  ;;  %v4852_v16 = vmul.f32 %v10716_v2, %v10573_v6  ;;  %v10733_v55 = vpop.permute.xlu0 %5863 }
 0xc94   : > { %11811 = vst [vmem:[#allocation73_spill] sm:$0xff] %v10720_v37  ;;  %v7911_v23 = vpop.eup %7910  ;;  %v4850_v6 = vmul.f32 %v10720_v37, %v10569_v46 }
 0xc95   : > { %v7913_v20 = vpop.eup %7912  ;;  %v4747_v30 = vadd.f32 1.0, %v7911_v23  ;;  %4891 = vrot.lane.b32.xlu1 %v4852_v16, %s8306_s29  ;;  %v10740_v16 = vpop.permute.xlu1 %5557 }
 0xc96   : > { %v7915_v1 = vpop.eup %7914  ;;  %v4745_v0 = vadd.f32 1.0, %v7913_v20 }
 0xc97   : > { %v7917_v19 = vpop.eup %7916  ;;  %7926 = vrcp.f32 %v4747_v30  ;;  %v4748_v62 = vadd.f32 1.0, %v7915_v1  ;;  %4885 = vrot.lane.b32.xlu0 %v4849_v56, %s8306_s29  ;;  %v10751_v1 = vpop.permute.xlu0 %5867 }
 0xc98   : > { %7928 = vrcp.f32 %v4745_v0  ;;  %v4746_v2 = vadd.f32 1.0, %v7917_v19 }
 0xc99   : > { %v10735_v23 = vpop.eup %7918  ;;  %7930 = vrcp.f32 %v4748_v62  ;;  %4887 = vrot.lane.b32.xlu1 %v4850_v6, %s8306_s29  ;;  %v10756_v19 = vpop.permute.xlu1 %5865 }
 0xc9a   : > { %11812 = vst [vmem:[#allocation37_spill] sm:$0xff] %v10735_v23  ;;  %v10738_v48 = vpop.eup %7920  ;;  %v4855_v20 = vmul.f32 %v10735_v23, %v10599_v27  ;;  %7932 = vrcp.f32 %v4746_v2 }
 0xc9b   : > { %11813 = vst [vmem:[#allocation78_spill] sm:$0xff] %v10738_v48  ;;  %v10744_v30 = vpop.eup %7922  ;;  %v4853_v0 = vmul.f32 %v10738_v48, %v10579_v17 }
 0xc9c   : > { %11814 = vst [vmem:[#allocation79_spill] sm:$0xff] %v10744_v30  ;;  %4897 = vrot.lane.b32.xlu0 %v4855_v20, %s8306_s29  ;;  %v4856_v46 = vmul.f32 %v10744_v30, %v10625_v54  ;;  %v10749_v56 = vpop.eup %7924  ;;  %v10770_v20 = vpop.permute.xlu0 %5871 }
 0xc9d   : > { %11815 = vst [vmem:[#allocation89_spill] sm:$0xff] %v10749_v56  ;;  %v4854_v27 = vmul.f32 %v10749_v56, %v10608_v24  ;;  %v10776_v24 = vpop.permute.xlu1 %5869 }
 0xc9e   : > { %4899 = vrot.lane.b32.xlu1 %v4856_v46, %s8306_s29 }
 0xca0   : > { %4893 = vrot.lane.b32.xlu0 %v4853_v0, %s8306_s29 }
 0xca1   : > { %v10761_v2 = vpop.eup %7926 }
 0xca2   : > { %11816 = vst [vmem:[#allocation87_spill] sm:$0xff] %v10761_v2  ;;  %v10763_v62 = vpop.eup %7928  ;;  %4895 = vrot.lane.b32.xlu1 %v4854_v27, %s8306_s29  ;;  %v4859_v54 = vmul.f32 %v10761_v2, %v10675_v21  ;;  %v10784_v27 = vpop.permute.xlu0 %5875 }
 0xca3   : > { %11817 = vst [vmem:[#allocation88_spill] sm:$0xff] %v10763_v62  ;;  %v10768_v6 = vpop.eup %7930  ;;  %v4857_v0 = vmul.f32 %v10763_v62, %v10658_v40 }
 0xca4   : > { %11818 = vst [vmem:[#allocation90_spill] sm:$0xff] %v10768_v6  ;;  %4905 = vrot.lane.b32.xlu0 %v4859_v54, %s8306_s29  ;;  %v4860_v17 = vmul.f32 %v10768_v6, %v4828_v15  ;;  %v10774_v46 = vpop.eup %7932  ;;  %v10787_v54 = vpop.permute.xlu1 %5873 }
 0xca5   : > { %11819 = vst [vmem:[#allocation29_spill] sm:$0xff] %v10774_v46  ;;  %v4858_v21 = vmul.f32 %v10774_v46, %v10686_v42 }
 0xca6   : > { %4907 = vrot.lane.b32.xlu1 %v4860_v17, %s8306_s29  ;;  %v10789_v15 = vpop.permute.xlu0 %5879 }
 0xca8   : > { %4901 = vrot.lane.b32.xlu0 %v4857_v0, %s8306_s29  ;;  %v10791_v6 = vpop.permute.xlu1 %5877 }
 0xcaa   : > { %4903 = vrot.lane.b32.xlu1 %v4858_v21, %s8306_s29  ;;  %v10793_v2 = vpop.permute.xlu0 %5883 }
 0xcac   : > { %v10795_v17 = vpop.permute.xlu1 %5881 }
 0xcae   : > { %v10797_v40 = vpop.permute.xlu0 %5887 }
 0xcb0   : > { %v10799_v0 = vpop.permute.xlu1 %5885 }
 0xcb2   : > { %v10801_v62 = vpop.permute.xlu0 %5891 }
 0xcb4   : > { %v10803_v42 = vpop.permute.xlu1 %5889 }
 0xcb6   : > { %v10805_v46 = vpop.permute.xlu0 %5069 }
 0xcb7   : > { %11820 = vst [vmem:[#allocation16_spill] sm:$0xff] %v10805_v46 }
 0xcb8   : > { %v10807_v21 = vpop.permute.xlu1 %5893 }
 0xcba   : > { %v10809_v56 = vpop.permute.xlu0 %5073 }
 0xcbb   : > { %11821 = vst [vmem:[#allocation14_spill] sm:$0xff] %v10809_v56 }
 0xcbc   : > { %v10811_v48 = vpop.permute.xlu1 %5071 }
 0xcbd   : > { %11822 = vst [vmem:[#allocation15_spill] sm:$0xff] %v10811_v48 }
 0xcbe   : > { %v10813_v30 = vpop.permute.xlu0 %5703 }
 0xcbf   : > { %11823 = vst [vmem:[#allocation13_spill] sm:$0xff] %v10813_v30 }
 0xcc0   : > { %v10815_v23 = vpop.permute.xlu1 %5075 }
 0xcc1   : > { %11824 = vst [vmem:[#allocation20_spill] sm:$0xff] %v10815_v23 }
 0xcc2   : > { %v10817_v37 = vpop.permute.xlu0 %5707 }
 0xcc3   : > { %11825 = vst [vmem:[#allocation18_spill] sm:$0xff] %v10817_v37 }
 0xcc4   : > { %v10824_v49 = vpop.permute.xlu1 %5705 }
 0xcc5   : > { %11826 = vst [vmem:[#allocation19_spill] sm:$0xff] %v10824_v49 }
 0xcc6   : > { %v10832_v33 = vpop.permute.xlu0 %5077 }
 0xcc7   : > { %11829 = vst [vmem:[#allocation22_spill] sm:$0xff] %v10832_v33 }
 0xcc8   : > { %v10844_v14 = vpop.permute.xlu1 %5709 }
 0xcc9   : > { %11832 = vst [vmem:[#allocation28_spill] sm:$0xff] %v10844_v14 }
 0xcca   : > { %v10850_v58 = vpop.permute.xlu0 %5081 }
 0xccb   : > { %11833 = vst [vmem:[#allocation26_spill] sm:$0xff] %v10850_v58 }
 0xcdd   : > { %v7362_v46 = vpop.f32.mrb[136].mxu0 }
 0xcde   : > { %v10827_v11 = vadd.f32 %v7362_v46, %v10822_v59  ;;  %v5464_v22 = vpop.f32.mrb[137].mxu0 }
 0xcdf   : > { %v10830_v48 = vadd.f32 %v10822_v59, %v5464_v22  ;;  %v7363_v30 = vpop.f32.mrb[138].mxu0 }
 0xce0   : > { %11827 = vst [vmem:[#allocation17_spill] sm:$0xff] %v10827_v11  ;;  %v5577_v37 = vadd.f32 %v10559_v38, %v10827_v11  ;;  %v10837_v23 = vadd.f32 %v7363_v30, %v10822_v59  ;;  %v5467_v56 = vpop.f32.mrb[139].mxu0 }
 0xce1   : > { %11828 = vst [vmem:[#allocation24_spill] sm:$0xff] %v10830_v48  ;;  %v5575_v49 = vadd.f32 %v10555_v32, %v10830_v48  ;;  %v10842_v46 = vadd.f32 %v10822_v59, %v5467_v56 }
 0xce2   : > { %11830 = vst [vmem:[#allocation23_spill] sm:$0xff] %v10837_v23  ;;  %v6810_v22 = vmul.f32 -1.442695, %v5577_v37  ;;  %v5578_v26 = vadd.f32 %v10565_v18, %v10837_v23  ;;  %v10858_v18 = vpop.permute.xlu1 %5079 }
 0xce3   : > { %11831 = vst [vmem:[#allocation21_spill] sm:$0xff] %v10842_v46  ;;  %v6808_v33 = vmul.f32 -1.442695, %v5575_v49  ;;  %v5576_v38 = vadd.f32 %v10561_v51, %v10842_v46  ;;  %11836 = vst [vmem:[#allocation56_spill] sm:$0xff] %v10858_v18 }
 0xce4   : > { %7934 = vpow2.f32 %v6810_v22  ;;  %v6811_v30 = vmul.f32 -1.442695, %v5578_v26 }
 0xce5   : > { %v7366_v11 = vpop.f32.mrb[140].mxu0  ;;  %7936 = vpow2.f32 %v6808_v33  ;;  %v6809_v32 = vmul.f32 -1.442695, %v5576_v38  ;;  %v10869_v38 = vpop.permute.xlu0 %5711 }
 0xce6   : > { %v10853_v56 = vadd.f32 %v7366_v11, %v10822_v59  ;;  %v5480_v48 = vpop.f32.mrb[141].mxu0  ;;  %7938 = vpow2.f32 %v6811_v30  ;;  %11838 = vst [vmem:[#allocation58_spill] sm:$0xff] %v10869_v38 }
 0xce7   : > { %v10856_v37 = vadd.f32 %v10822_v59, %v5480_v48  ;;  %v7367_v14 = vpop.f32.mrb[142].mxu0  ;;  %7940 = vpow2.f32 %v6809_v32 }
 0xce8   : > { %11834 = vst [vmem:[#allocation27_spill] sm:$0xff] %v10853_v56  ;;  %v5581_v51 = vadd.f32 %v10575_v60, %v10853_v56  ;;  %v10863_v26 = vadd.f32 %v7367_v14, %v10822_v59  ;;  %v5483_v49 = vpop.f32.mrb[143].mxu0  ;;  %v10871_v60 = vpop.permute.xlu1 %5083 }
 0xce9   : > { %11835 = vst [vmem:[#allocation25_spill] sm:$0xff] %v10856_v37  ;;  %v5579_v33 = vadd.f32 %v10571_v57, %v10856_v37  ;;  %11839 = vst [vmem:[#allocation57_spill] sm:$0xff] %v10871_v60 }
 0xcea   : > { %11837 = vst [vmem:[#allocation55_spill] sm:$0xff] %v10863_v26  ;;  %v6814_v11 = vmul.f32 -1.442695, %v5581_v51  ;;  %v5582_v48 = vadd.f32 %v10586_v44, %v10863_v26  ;;  %v10873_v44 = vpop.permute.xlu0 %5715 }
 0xceb   : > { %v6812_v22 = vmul.f32 -1.442695, %v5579_v33  ;;  %11840 = vst [vmem:[#allocation61_spill] sm:$0xff] %v10873_v44 }
 0xcec   : > { %7942 = vpow2.f32 %v6814_v11  ;;  %v6815_v30 = vmul.f32 -1.442695, %v5582_v48  ;;  %v10876_v11 = vadd.f32 %v10822_v59, %v5483_v49  ;;  %v10878_v38 = vpop.permute.xlu1 %5713 }
 0xced   : > { %v7370_v18 = vpop.f32.mrb[144].mxu0  ;;  %7944 = vpow2.f32 %v6812_v22  ;;  %11842 = vst [vmem:[#allocation62_spill] sm:$0xff] %v10878_v38 }
 0xcee   : > { %v7935_v58 = vpop.eup %7934  ;;  %v5496_v14 = vpop.f32.mrb[145].mxu0  ;;  %7946 = vpow2.f32 %v6815_v30  ;;  %11841 = vst [vmem:[#allocation59_spill] sm:$0xff] %v10876_v11  ;;  %v10885_v30 = vadd.f32 %v7370_v18, %v10822_v59 }
 0xcef   : > { %v5641_v56 = vadd.f32 1.0, %v7935_v58  ;;  %v7371_v23 = vpop.f32.mrb[146].mxu0  ;;  %v7937_v46 = vpop.eup %7936 }
 0xcf0   : > { %v5499_v57 = vpop.f32.mrb[147].mxu0  ;;  %v5639_v32 = vadd.f32 1.0, %v7937_v46  ;;  %v7939_v51 = vpop.eup %7938  ;;  %v5580_v46 = vadd.f32 %v10577_v13, %v10876_v11  ;;  %v10890_v38 = vadd.f32 %v7371_v23, %v10822_v59  ;;  %v5585_v18 = vadd.f32 %v10636_v63, %v10885_v30 }
 0xcf1   : > { %7948 = vrcp.f32 %v5641_v56  ;;  %v5642_v33 = vadd.f32 1.0, %v7939_v51  ;;  %v7941_v48 = vpop.eup %7940  ;;  %v10887_v51 = vpop.permute.xlu0 %5085  ;;  %v10897_v11 = vadd.f32 %v10822_v59, %v5496_v14 }
 0xcf2   : > { %7950 = vrcp.f32 %v5639_v32  ;;  %v5640_v22 = vadd.f32 1.0, %v7941_v48  ;;  %11843 = vst [vmem:[#allocation60_spill] sm:$0xff] %v10887_v51  ;;  %v10892_v37 = vpop.permute.xlu1 %5717  ;;  %v6813_v13 = vmul.f32 -1.442695, %v5580_v46  ;;  %v5586_v23 = vadd.f32 %v10662_v25, %v10890_v38 }
 0xcf3   : > { %7952 = vrcp.f32 %v5642_v33  ;;  %11844 = vst [vmem:[#allocation66_spill] sm:$0xff] %v10892_v37  ;;  %v10905_v37 = vadd.f32 %v10822_v59, %v5499_v57  ;;  %v6818_v63 = vmul.f32 -1.442695, %v5585_v18  ;;  %v5583_v14 = vadd.f32 %v10615_v47, %v10897_v11 }
 0xcf4   : > { %7954 = vrcp.f32 %v5640_v22  ;;  %v6819_v25 = vmul.f32 -1.442695, %v5586_v23 }
 0xcf5   : > { %v7374_v58 = vpop.f32.mrb[148].mxu0  ;;  %v5584_v57 = vadd.f32 %v10641_v31, %v10905_v37 }
 0xcf6   : > { %v7943_v60 = vpop.eup %7942  ;;  %v10880_v26 = vpop.f32.mrb[149].mxu0 }
 0xcf7   : > { %v5645_v56 = vadd.f32 1.0, %v7943_v60  ;;  %v7375_v32 = vpop.f32.mrb[150].mxu0  ;;  %v7945_v49 = vpop.eup %7944 }
 0xcf8   : > { %v5515_v33 = vpop.f32.mrb[151].mxu0  ;;  %v5643_v48 = vadd.f32 1.0, %v7945_v49  ;;  %v7947_v44 = vpop.eup %7946 }
 0xcf9   : > { %7956 = vrcp.f32 %v5645_v56  ;;  %v5646_v22 = vadd.f32 1.0, %v7947_v44  ;;  %v10902_v49 = vpop.permute.xlu0 %5089  ;;  %v10908_v46 = vpop.permute.xlu1 %5087 }
 0xcfa   : > { %7958 = vrcp.f32 %v5643_v48 }
 0xcfb   : > { %v7949_v60 = vpop.eup %7948  ;;  %7960 = vrcp.f32 %v5646_v22 }
 0xcfc   : > { %v5913_v51 = vmul.f32 %v7949_v60, %v10751_v1  ;;  %v7951_v56 = vpop.eup %7950  ;;  %7962 = vpow2.f32 %v6813_v13  ;;  %v6816_v13 = vmul.f32 -1.442695, %v5583_v14 }
 0xcfd   : > { %v7953_v44 = vpop.eup %7952  ;;  %v5911_v48 = vmul.f32 %v7951_v56, %v10733_v55  ;;  %v4882_v22 = vpop.permute.xlu0 %4881  ;;  %7964 = vpow2.f32 %v6818_v63  ;;  %v10921_v55 = vadd.f32 %v7374_v58, %v10822_v59  ;;  %v6817_v56 = vmul.f32 -1.442695, %v5584_v57 }
 0xcfe   : > { %5947 = vrot.lane.b32.xlu0 %v5913_v51, %s8306_s29  ;;  %v5914_v1 = vmul.f32 %v7953_v44, %v10776_v24  ;;  %v7955_v60 = vpop.eup %7954  ;;  %7966 = vpow2.f32 %v6819_v25  ;;  %v4927_v23 = vadd.f32 %v4882_v22, %v10589_v3  ;;  %v10924_v31 = vpop.permute.xlu1 %5091  ;;  %v10929_v63 = vadd.f32 %v7375_v32, %v10822_v59 }
 0xcff   : > { %v5912_v47 = vmul.f32 %v7955_v60, %v10756_v19  ;;  %7968 = vpow2.f32 %v6816_v13  ;;  %v5589_v3 = vadd.f32 %v10718_v41, %v10921_v55  ;;  %v10944_v41 = vadd.f32 %v10822_v59, %v5515_v33 }
 0xd00   : > { %5949 = vrot.lane.b32.xlu1 %v5914_v1, %s8306_s29  ;;  %7970 = vtanh.f32 %v4927_v23  ;;  %v5590_v32 = vadd.f32 %v10740_v16, %v10929_v63 }
 0xd01   : > { %7972 = vpow2.f32 %v6817_v56  ;;  %v6822_v1 = vmul.f32 -1.442695, %v5589_v3  ;;  %v4878_v22 = vpop.permute.xlu0 %4877 }
 0xd02   : > { %5943 = vrot.lane.b32.xlu0 %v5911_v48, %s8306_s29  ;;  %v4884_v25 = vpop.permute.xlu1 %4883  ;;  %v6823_v57 = vmul.f32 -1.442695, %v5590_v32 }
 0xd03   : > { %v7957_v51 = vpop.eup %7956  ;;  %v4928_v60 = vadd.f32 %v4884_v25, %v10597_v45 }
 0xd04   : > { %v5917_v18 = vmul.f32 %v7957_v51, %v10784_v27  ;;  %v7959_v24 = vpop.eup %7958  ;;  %5945 = vrot.lane.b32.xlu1 %v5912_v47, %s8306_s29 }
 0xd05   : > { %v7961_v44 = vpop.eup %7960  ;;  %v5915_v27 = vmul.f32 %v7959_v24, %v10770_v20 }
 0xd06   : > { %5955 = vrot.lane.b32.xlu0 %v5917_v18, %s8306_s29  ;;  %v5918_v19 = vmul.f32 %v7961_v44, %v10791_v6  ;;  %v7963_v58 = vpop.eup %7962  ;;  %v10941_v6 = vadd.f32 %v10822_v59, %v10880_v26  ;;  %v4880_v16 = vpop.permute.xlu1 %4879  ;;  %v5588_v26 = vadd.f32 %v10725_v9, %v10944_v41  ;;  %v4925_v59 = vadd.f32 %v4878_v22, %v10592_v8 }
 0xd07   : > { %v5644_v14 = vadd.f32 1.0, %v7963_v58  ;;  %v7965_v20 = vpop.eup %7964  ;;  %v4926_v45 = vadd.f32 %v4880_v16, %v10604_v7  ;;  %v4890_v8 = vpop.permute.xlu0 %4889 }
 0xd08   : > { %5957 = vrot.lane.b32.xlu1 %v5918_v19, %s8306_s29  ;;  %v7967_v48 = vpop.eup %7966  ;;  %v5649_v51 = vadd.f32 1.0, %v7965_v20  ;;  %v5587_v13 = vadd.f32 %v10701_v50, %v10941_v6  ;;  %v6821_v50 = vmul.f32 -1.442695, %v5588_v26  ;;  %v4931_v25 = vadd.f32 %v4890_v8, %v10613_v29 }
 0xd09   : > { %7974 = vrcp.f32 %v5644_v14  ;;  %v5650_v47 = vadd.f32 1.0, %v7967_v48  ;;  %v7969_v18 = vpop.eup %7968 }
 0xd0a   : > { %5951 = vrot.lane.b32.xlu0 %v5915_v27, %s8306_s29  ;;  %7976 = vpow2.f32 %v6822_v1  ;;  %v7971_v33 = vpop.eup %7970  ;;  %v6820_v23 = vmul.f32 -1.442695, %v5587_v13  ;;  %v5647_v44 = vadd.f32 1.0, %v7969_v18  ;;  %v4892_v7 = vpop.permute.xlu1 %4891 }
 0xd0b   : > { %7978 = vtanh.f32 %v4928_v60  ;;  %v7973_v24 = vpop.eup %7972  ;;  %v4932_v20 = vadd.f32 %v4892_v7, %v10623_v34 }
 0xd0c   : > { %7980 = vpow2.f32 %v6823_v57  ;;  %v5648_v19 = vadd.f32 1.0, %v7973_v24 }
 0xd0d   : > { %7982 = vrcp.f32 %v5649_v51 }
 0xd0e   : > { %4993 = vrot.lane.b32.xlu0 %v7971_v33, %s8308_s28  ;;  %7984 = vrcp.f32 %v5650_v47  ;;  %v4888_v60 = vpop.permute.xlu1 %4887 }
 0xd0f   : > { %7986 = vtanh.f32 %v4925_v59  ;;  %v4930_v29 = vadd.f32 %v4888_v60, %v10630_v10 }
 0xd10   : > { %7988 = vtanh.f32 %v4926_v45 }
 0xd11   : > { %7990 = vpow2.f32 %v6820_v23 }
 0xd12   : > { %7992 = vpow2.f32 %v6821_v50  ;;  %v4900_v7 = vpop.permute.xlu1 %4899 }
 0xd13   : > { %v7975_v56 = vpop.eup %7974  ;;  %7994 = vrcp.f32 %v5647_v44 }
 0xd14   : > { %v5916_v9 = vmul.f32 %v7975_v56, %v10787_v54  ;;  %v7977_v27 = vpop.eup %7976  ;;  %7996 = vrcp.f32 %v5648_v19  ;;  %v4886_v54 = vpop.permute.xlu0 %4885 }
 0xd15   : > { %v7979_v58 = vpop.eup %7978  ;;  %v5653_v48 = vadd.f32 1.0, %v7977_v27  ;;  %7998 = vtanh.f32 %v4931_v25  ;;  %v4929_v13 = vadd.f32 %v4886_v54, %v10618_v5  ;;  %v11851_v54 = vld [vmem:[#allocation48_spill] sm:$0xff] }
 0xd16   : > { %5953 = vrot.lane.b32.xlu1 %v5916_v9, %s8306_s29  ;;  %v7981_v3 = vpop.eup %7980  ;;  %8000 = vtanh.f32 %v4932_v20  ;;  %v11850_v20 = vld [vmem:[#allocation82_spill] sm:$0xff] }
 0xd17   : > { %v7983_v14 = vpop.eup %7982  ;;  %v5654_v22 = vadd.f32 1.0, %v7981_v3  ;;  %8002 = vrcp.f32 %v5653_v48  ;;  %v11846_v3 = vld [vmem:[#allocation46_spill] sm:$0xff] }
 0xd18   : > { %v7985_v32 = vpop.eup %7984  ;;  %v5921_v34 = vmul.f32 %v7983_v14, %v10793_v2  ;;  %v4898_v8 = vpop.permute.xlu0 %4897 }
 0xd19   : > { %v7987_v1 = vpop.eup %7986  ;;  %v5922_v26 = vmul.f32 %v7985_v32, %v10799_v0  ;;  %8004 = vrcp.f32 %v5654_v22  ;;  %v11849_v32 = vld [vmem:[#allocation86_spill] sm:$0xff] }
 0xd1a   : > { %4995 = vrot.lane.b32.xlu1 %v7979_v58, %s8308_s28  ;;  %v7989_v57 = vpop.eup %7988  ;;  %4989 = vrot.lane.b32.xlu0 %v7987_v1, %s8308_s28  ;;  %8006 = vtanh.f32 %v4929_v13  ;;  %v11845_v58 = vld [vmem:[#allocation42_spill] sm:$0xff]  ;;  %v11852_v1 = vld [vmem:[#allocation31_spill] sm:$0xff] }
 0xd1b   : > { %v7991_v51 = vpop.eup %7990  ;;  %8008 = vtanh.f32 %v4930_v29  ;;  %v11853_v29 = vld [vmem:[#allocation52_spill] sm:$0xff] }
 0xd1c   : > { %v7993_v16 = vpop.eup %7992  ;;  %v5651_v59 = vadd.f32 1.0, %v7991_v51 }
 0xd1d   : > { %v7995_v47 = vpop.eup %7994  ;;  %v5652_v5 = vadd.f32 1.0, %v7993_v16 }
 0xd1e   : > { %4991 = vrot.lane.b32.xlu1 %v7989_v57, %s8308_s28  ;;  %v7997_v18 = vpop.eup %7996  ;;  %5963 = vrot.lane.b32.xlu0 %v5921_v34, %s8306_s29  ;;  %v5919_v33 = vmul.f32 %v7995_v47, %v10789_v15  ;;  %8010 = vrcp.f32 %v5651_v59  ;;  %v11854_v34 = vld [vmem:[#allocation80_spill] sm:$0xff] }
 0xd1f   : > { %v5920_v10 = vmul.f32 %v7997_v18, %v10795_v17  ;;  %8012 = vrcp.f32 %v5652_v5  ;;  %v7999_v2 = vpop.eup %7998  ;;  %v11855_v59 = vld [vmem:[#allocation24_spill] sm:$0xff] }
 0xd20   : > { %v8001_v0 = vpop.eup %8000 }
 0xd21   : > { %v8003_v45 = vpop.eup %8002 }
 0xd22   : > { %5965 = vrot.lane.b32.xlu1 %v5922_v26, %s8306_s29  ;;  %5959 = vrot.lane.b32.xlu0 %v5919_v33, %s8306_s29  ;;  %v5925_v15 = vmul.f32 %v8003_v45, %v10801_v62  ;;  %v4894_v62 = vpop.permute.xlu0 %4893  ;;  %v11856_v33 = vld [vmem:[#allocation17_spill] sm:$0xff] }
 0xd23   : > { %v8005_v24 = vpop.eup %8004  ;;  %v11857_v45 = vld [vmem:[#allocation21_spill] sm:$0xff] }
 0xd24   : > { %v8007_v23 = vpop.eup %8006  ;;  %v5926_v56 = vmul.f32 %v8005_v24, %v10807_v21  ;;  %v4896_v21 = vpop.permute.xlu1 %4895 }
 0xd25   : > { %v8009_v50 = vpop.eup %8008 }
 0xd26   : > { %5961 = vrot.lane.b32.xlu1 %v5920_v10, %s8306_s29  ;;  %5001 = vrot.lane.b32.xlu0 %v7999_v2, %s8308_s28  ;;  %v4906_v27 = vpop.permute.xlu0 %4905 }
 0xd28   : > { %v8011_v17 = vpop.eup %8010 }
 0xd29   : > { %v8013_v44 = vpop.eup %8012  ;;  %v5923_v19 = vmul.f32 %v8011_v17, %v10797_v40  ;;  %v4935_v40 = vadd.f32 %v4898_v8, %v10639_v61  ;;  %v11847_v61 = vld [vmem:[#allocation47_spill] sm:$0xff]  ;;  %v11859_v17 = vld [vmem:[#allocation25_spill] sm:$0xff] }
 0xd2a   : > { %5003 = vrot.lane.b32.xlu1 %v8001_v0, %s8308_s28  ;;  %4997 = vrot.lane.b32.xlu0 %v8007_v23, %s8308_s28  ;;  %v5924_v9 = vmul.f32 %v8013_v44, %v10803_v42  ;;  %v4936_v42 = vadd.f32 %v4900_v7, %v10649_v28  ;;  %v11848_v28 = vld [vmem:[#allocation85_spill] sm:$0xff]  ;;  %v11858_v23 = vld [vmem:[#allocation23_spill] sm:$0xff] }
 0xd2b   : > { %8014 = vtanh.f32 %v4935_v40  ;;  %v11860_v44 = vld [vmem:[#allocation27_spill] sm:$0xff] }
 0xd2c   : > { %8016 = vtanh.f32 %v4936_v42 }
 0xd2e   : > { %4999 = vrot.lane.b32.xlu1 %v8009_v50, %s8308_s28  ;;  %5971 = vrot.lane.b32.xlu0 %v5925_v15, %s8306_s29 }
 0xd32   : > { %5973 = vrot.lane.b32.xlu1 %v5926_v56, %s8306_s29  ;;  %5967 = vrot.lane.b32.xlu0 %v5923_v19, %s8306_s29 }
 0xd35   : > { %v8015_v48 = vpop.eup %8014 }
 0xd36   : > { %5969 = vrot.lane.b32.xlu1 %v5924_v9, %s8306_s29  ;;  %5719 = vrot.lane.b32.xlu0 %v11783_v4, %s8309_s16  ;;  %v4933_v4 = vadd.f32 %v4894_v62, %v10644_v36  ;;  %v4902_v36 = vpop.permute.xlu0 %4901  ;;  %v8017_v60 = vpop.eup %8016 }
 0xd38   : > { %8018 = vtanh.f32 %v4933_v4 }
 0xd3a   : > { %5721 = vrot.lane.b32.xlu1 %v11782_v39, %s8309_s16  ;;  %5723 = vrot.lane.b32.xlu0 %v11785_v52, %s8309_s16  ;;  %v4908_v39 = vpop.permute.xlu1 %4907  ;;  %v4934_v52 = vadd.f32 %v4896_v21, %v10654_v35  ;;  %v4937_v35 = vadd.f32 %v4902_v36, %v11850_v20  ;;  %v11864_v20 = vld [vmem:[#allocation55_spill] sm:$0xff] }
 0xd3b   : > { %v4940_v14 = vadd.f32 %v4908_v39, %v10673_v12 }
 0xd3c   : > { %8020 = vtanh.f32 %v4934_v52  ;;  %v11862_v52 = vld [vmem:[#allocation59_spill] sm:$0xff] }
 0xd3e   : > { %5725 = vrot.lane.b32.xlu1 %v11784_v43, %s8309_s16  ;;  %5093 = vrot.lane.b32.xlu0 %v11845_v58, %s8309_s16  ;;  %v4939_v43 = vadd.f32 %v4906_v27, %v10665_v53  ;;  %v4904_v25 = vpop.permute.xlu1 %4903  ;;  %v11861_v27 = vld [vmem:[#allocation33_spill] sm:$0xff] }
 0xd3f   : > { %v4938_v53 = vadd.f32 %v4904_v25, %v11852_v1  ;;  %v4959_v4 = vsub.f32 1.0, %v11861_v27  ;;  %v11863_v25 = vld [vmem:[#allocation14_spill] sm:$0xff] }
 0xd40   : > { %8022 = vtanh.f32 %v4939_v43 }
 0xd41   : > { %8024 = vtanh.f32 %v4940_v14 }
 0xd42   : > { %5095 = vrot.lane.b32.xlu1 %v11846_v3, %s8309_s16  ;;  %5097 = vrot.lane.b32.xlu0 %v11847_v61, %s8309_s16  ;;  %8026 = vtanh.f32 %v4937_v35  ;;  %v8019_v12 = vpop.eup %8018 }
 0xd43   : > { %8028 = vtanh.f32 %v4938_v53 }
 0xd46   : > { %5099 = vrot.lane.b32.xlu1 %v11848_v28, %s8309_s16  ;;  %5727 = vrot.lane.b32.xlu0 %v11849_v32, %s8309_s16  ;;  %v8021_v57 = vpop.eup %8020  ;;  %v5119_v32 = vmul.f32 %v11861_v27, %v11863_v25 }
 0xd4a   : > { %5729 = vrot.lane.b32.xlu1 %v11851_v54, %s8309_s16  ;;  %5009 = vrot.lane.b32.xlu0 %v8015_v48, %s8308_s28  ;;  %v8023_v22 = vpop.eup %8022  ;;  %v11865_v54 = vld [vmem:[#allocation32_spill] sm:$0xff] }
 0xd4b   : > { %v8025_v51 = vpop.eup %8024  ;;  %v4960_v1 = vsub.f32 1.0, %v11865_v54  ;;  %v11866_v48 = vld [vmem:[#allocation20_spill] sm:$0xff] }
 0xd4c   : > { %v8027_v13 = vpop.eup %8026 }
 0xd4d   : > { %v8029_v16 = vpop.eup %8028 }
 0xd4e   : > { %5011 = vrot.lane.b32.xlu1 %v8017_v60, %s8308_s28  ;;  %5005 = vrot.lane.b32.xlu0 %v8019_v12, %s8308_s28  ;;  %v5120_v60 = vmul.f32 %v11865_v54, %v11866_v48 }
 0xd52   : > { %5007 = vrot.lane.b32.xlu1 %v8021_v57, %s8308_s28  ;;  %5017 = vrot.lane.b32.xlu0 %v8023_v22, %s8308_s28 }
 0xd56   : > { %5019 = vrot.lane.b32.xlu1 %v8025_v51, %s8308_s28  ;;  %5013 = vrot.lane.b32.xlu0 %v8027_v13, %s8308_s28  ;;  %v11867_v51 = vld [vmem:[#allocation30_spill] sm:$0xff] }
 0xd57   : > { %v4957_v13 = vsub.f32 1.0, %v11867_v51 }
 0xd5a   : > { %5015 = vrot.lane.b32.xlu1 %v8029_v16, %s8308_s28  ;;  %5731 = vrot.lane.b32.xlu0 %v11853_v29, %s8309_s16  ;;  %v11868_v29 = vld [vmem:[#allocation35_spill] sm:$0xff] }
 0xd5e   : > { %5733 = vrot.lane.b32.xlu1 %v11854_v34, %s8309_s16  ;;  %v4958_v34 = vsub.f32 1.0, %v11868_v29 }
 0xd70   : > { %v5948_v47 = vpop.permute.xlu0 %5947 }
 0xd71   : > { %v5993_v10 = vadd.f32 %v5948_v47, %v11856_v33  ;;  %v11869_v47 = vld [vmem:[#allocation16_spill] sm:$0xff] }
 0xd72   : > { %v5950_v26 = vpop.permute.xlu1 %5949 }
 0xd73   : > { %v5994_v50 = vadd.f32 %v5950_v26, %v11858_v23  ;;  %v5117_v26 = vmul.f32 %v11867_v51, %v11869_v47  ;;  %v11874_v51 = vld [vmem:[#allocation57_spill] sm:$0xff] }
 0xd74   : > { %v5944_v18 = vpop.permute.xlu0 %5943 }
 0xd75   : > { %v5991_v5 = vadd.f32 %v5944_v18, %v11855_v59 }
 0xd76   : > { %v5946_v2 = vpop.permute.xlu1 %5945 }
 0xd77   : > { %8030 = vtanh.f32 %v5991_v5  ;;  %v5992_v24 = vadd.f32 %v5946_v2, %v11857_v45 }
 0xd78   : > { %v5956_v0 = vpop.permute.xlu0 %5955 }
 0xd79   : > { %8032 = vtanh.f32 %v5992_v24  ;;  %v5997_v19 = vadd.f32 %v5956_v0, %v11860_v44  ;;  %v11870_v0 = vld [vmem:[#allocation15_spill] sm:$0xff] }
 0xd7a   : > { %8034 = vtanh.f32 %v5993_v10  ;;  %v5958_v7 = vpop.permute.xlu1 %5957  ;;  %v5118_v24 = vmul.f32 %v11868_v29, %v11870_v0 }
 0xd7b   : > { %8036 = vtanh.f32 %v5994_v50  ;;  %v5998_v35 = vadd.f32 %v5958_v7, %v11864_v20 }
 0xd7c   : > { %v5952_v15 = vpop.permute.xlu0 %5951 }
 0xd7d   : > { %v5995_v56 = vadd.f32 %v5952_v15, %v11859_v17 }
 0xd7f   : > { %8038 = vtanh.f32 %v5995_v56 }
 0xd80   : > { %8040 = vtanh.f32 %v5997_v19  ;;  %v4994_v40 = vpop.permute.xlu0 %4993 }
 0xd81   : > { %v8031_v9 = vpop.eup %8030  ;;  %v5039_v14 = vmul.f32 %v4994_v40, %v4959_v4 }
 0xd82   : > { %6055 = vrot.lane.b32.xlu0 %v8031_v9, %s8308_s28 }
 0xd83   : > { %v8033_v8 = vpop.eup %8032  ;;  %v5135_v12 = vadd.f32 %v5119_v32, %v5039_v14 }
 0xd84   : > { %v8035_v62 = vpop.eup %8034  ;;  %6057 = vrot.lane.b32.xlu1 %v8033_v8, %s8308_s28 }
 0xd85   : > { %v8037_v21 = vpop.eup %8036  ;;  %v5151_v18 = vmax.f32 %v5135_v12, 0.0 }
 0xd86   : > { %6059 = vrot.lane.b32.xlu0 %v8035_v62, %s8308_s28 }
 0xd88   : > { %6061 = vrot.lane.b32.xlu1 %v8037_v21, %s8308_s28  ;;  %v5954_v39 = vpop.permute.xlu1 %5953 }
 0xd89   : > { %v8039_v42 = vpop.eup %8038  ;;  %v5996_v43 = vadd.f32 %v5954_v39, %v11862_v52 }
 0xd8a   : > { %6063 = vrot.lane.b32.xlu0 %v8039_v42, %s8308_s28  ;;  %v8041_v36 = vpop.eup %8040 }
 0xd8b   : > { %8042 = vtanh.f32 %v5996_v43 }
 0xd8c   : > { %v4996_v53 = vpop.permute.xlu1 %4995  ;;  %8044 = vtanh.f32 %v5998_v35  ;;  %v4990_v16 = vpop.permute.xlu0 %4989 }
 0xd8d   : > { %v5040_v57 = vmul.f32 %v4996_v53, %v4960_v1  ;;  %v5037_v10 = vmul.f32 %v4990_v16, %v4957_v13  ;;  %v11872_v1 = vld [vmem:[#allocation34_spill] sm:$0xff] }
 0xd8e   : > { %6067 = vrot.lane.b32.xlu0 %v8041_v36, %s8308_s28  ;;  %v11871_v36 = vld [vmem:[#allocation39_spill] sm:$0xff]  ;;  %v4964_v53 = vsub.f32 1.0, %v11872_v1  ;;  %v5124_v13 = vmul.f32 %v11872_v1, %v11874_v51 }
 0xd8f   : > { %v5136_v22 = vadd.f32 %v5120_v60, %v5040_v57  ;;  %v5133_v56 = vadd.f32 %v5117_v26, %v5037_v10  ;;  %v4963_v32 = vsub.f32 1.0, %v11871_v36  ;;  %v11873_v60 = vld [vmem:[#allocation26_spill] sm:$0xff]  ;;  %v11876_v10 = vld [vmem:[#allocation73_spill] sm:$0xff] }
 0xd90   : > { %v4992_v2 = vpop.permute.xlu1 %4991  ;;  %v5964_v9 = vpop.permute.xlu0 %5963  ;;  %v5123_v12 = vmul.f32 %v11871_v36, %v11873_v60 }
 0xd91   : > { %v5152_v5 = vmax.f32 %v5136_v22, 0.0  ;;  %v5038_v50 = vmul.f32 %v4992_v2, %v4958_v34  ;;  %v5149_v62 = vmax.f32 %v5133_v56, 0.0  ;;  %v6001_v14 = vadd.f32 %v5964_v9, %v10885_v30  ;;  %v11875_v34 = vld [vmem:[#allocation72_spill] sm:$0xff] }
 0xd92   : > { %v4961_v26 = vsub.f32 1.0, %v11875_v34  ;;  %v4962_v2 = vsub.f32 1.0, %v11876_v10  ;;  %v11878_v9 = vld [vmem:[#allocation56_spill] sm:$0xff] }
 0xd93   : > { %v11049_v15 = vpack.c.bf16 %v5152_v5, %v5151_v18  ;;  %v5134_v19 = vadd.f32 %v5118_v24, %v5038_v50  ;;  %v11877_v24 = vld [vmem:[#allocation22_spill] sm:$0xff] }
 0xd94   : > { %v5966_v7 = vpop.permute.xlu1 %5965  ;;  %v5960_v42 = vpop.permute.xlu0 %5959  ;;  %v5121_v50 = vmul.f32 %v11875_v34, %v11877_v24 }
 0xd95   : > { %v8043_v8 = vpop.eup %8042  ;;  %v5150_v21 = vmax.f32 %v5134_v19, 0.0  ;;  %v5999_v4 = vadd.f32 %v5960_v42, %v10897_v11  ;;  %v6002_v35 = vadd.f32 %v5966_v7, %v10890_v38 }
 0xd96   : > { %6065 = vrot.lane.b32.xlu1 %v8043_v8, %s8308_s28  ;;  %v8045_v27 = vpop.eup %8044  ;;  %v5122_v8 = vmul.f32 %v11876_v10, %v11878_v9  ;;  %v7603_v10 = vld [vmem:[#allocation7 + $0x28] sm:$0xff]  }
 0xd97   : > { %v11052_v40 = vpack.c.bf16 %v5150_v21, %v5149_v62  ;;  %8046 = vtanh.f32 %v5999_v4 }
 0xd98   : > { %v5962_v39 = vpop.permute.xlu1 %5961  ;;  %v5002_v54 = vpop.permute.xlu0 %5001 }
 0xd99   : > { %v6000_v43 = vadd.f32 %v5962_v39, %v10905_v37  ;;  %v5043_v57 = vmul.f32 %v5002_v54, %v4963_v32 }
 0xd9a   : > { %6069 = vrot.lane.b32.xlu1 %v8045_v27, %s8308_s28 }
 0xd9b   : > { %8048 = vtanh.f32 %v6000_v43  ;;  %v5139_v29 = vadd.f32 %v5123_v12, %v5043_v57 }
 0xd9c   : > { %v5004_v22 = vpop.permute.xlu1 %5003  ;;  %8050 = vtanh.f32 %v6001_v14  ;;  %v4998_v5 = vpop.permute.xlu0 %4997 }
 0xd9d   : > { %v5044_v16 = vmul.f32 %v5004_v22, %v4964_v53  ;;  %8052 = vtanh.f32 %v6002_v35  ;;  %v5041_v56 = vmul.f32 %v4998_v5, %v4961_v26  ;;  %v5155_v7 = vmax.f32 %v5139_v29, 0.0  ;;  %v7602_v26 = vld [vmem:[#allocation7 + $0x20] sm:$0xff]  }
 0xd9e   : > { %7336 = vmatprep.subr.bf16.mxu1 %v7602_v26 }
 0xd9f   : > { %v5140_v18 = vadd.f32 %v5124_v13, %v5044_v16  ;;  %v5137_v42 = vadd.f32 %v5121_v50, %v5041_v56  ;;  %7337 = vmatpush3.bf16.msra.mxu1 %v7602_v26 }
 0xda0   : > { %v5000_v19 = vpop.permute.xlu1 %4999  ;;  %v5972_v39 = vpop.permute.xlu0 %5971  ;;  %7338 = vmatprep.subr.bf16.mxu1 %v7603_v10 }
 0xda1   : > { %v5156_v62 = vmax.f32 %v5140_v18, 0.0  ;;  %v5042_v21 = vmul.f32 %v5000_v19, %v4962_v2  ;;  %v8047_v43 = vpop.eup %8046  ;;  %v5153_v32 = vmax.f32 %v5137_v42, 0.0  ;;  %v6005_v16 = vadd.f32 %v5972_v39, %v10921_v55 }
 0xda2   : > { %6071 = vrot.lane.b32.xlu0 %v8047_v43, %s8308_s28 }
 0xda3   : > { %v11071_v27 = vpack.c.bf16 %v5156_v62, %v5155_v7  ;;  %v5138_v4 = vadd.f32 %v5122_v8, %v5042_v21  ;;  %7339 = vmatpush3.bf16.msra.mxu1 %v7603_v10 }
 0xda4   : > { %v5974_v14 = vpop.permute.xlu1 %5973  ;;  %v5968_v1 = vpop.permute.xlu0 %5967 }
 0xda5   : > { %v8049_v36 = vpop.eup %8048  ;;  %v5154_v35 = vmax.f32 %v5138_v4, 0.0  ;;  %v6003_v12 = vadd.f32 %v5968_v1, %v10941_v6  ;;  %v6006_v29 = vadd.f32 %v5974_v14, %v10929_v63 }
 0xda6   : > { %6073 = vrot.lane.b32.xlu1 %v8049_v36, %s8308_s28  ;;  %v8051_v53 = vpop.eup %8050 }
 0xda7   : > { %v5167_v54 = vpack.c.bf16 %v5154_v35, %v5153_v32  ;;  %v8053_v22 = vpop.eup %8052  ;;  %6075 = vrot.lane.b32.xlu0 %v8051_v53, %s8308_s28  ;;  %8054 = vtanh.f32 %v6003_v12  ;;  %v11879_v32 = vld [vmem:[#allocation37_spill] sm:$0xff]  ;;  %v11880_v12 = vld [vmem:[#allocation79_spill] sm:$0xff] }
 0xda8   : > { %v5970_v57 = vpop.permute.xlu1 %5969  ;;  %v11081_v34 = vpop.permute.xlu0 %5719  ;;  %v4967_v35 = vsub.f32 1.0, %v11879_v32 }
 0xda9   : > { %v6004_v13 = vadd.f32 %v5970_v57, %v10944_v41  ;;  %v4968_v57 = vsub.f32 1.0, %v11880_v12 }
 0xdaa   : > { %6077 = vrot.lane.b32.xlu1 %v8053_v22, %s8308_s28  ;;  %v5127_v22 = vmul.f32 %v11879_v32, %v10902_v49 }
 0xdab   : > { %8056 = vtanh.f32 %v6004_v13 }
 0xdac   : > { %v11083_v18 = vpop.permute.xlu1 %5721  ;;  %8058 = vtanh.f32 %v6005_v16  ;;  %v11085_v5 = vpop.permute.xlu0 %5723 }
 0xdad   : > { %8060 = vtanh.f32 %v6006_v29 }
 0xdb0   : > { %v11087_v2 = vpop.permute.xlu1 %5725  ;;  %v11089_v50 = vpop.permute.xlu0 %5093 }
 0xdb1   : > { %v8055_v56 = vpop.eup %8054 }
 0xdb2   : > { %6079 = vrot.lane.b32.xlu0 %v8055_v56, %s8308_s28  ;;  %v11882_v56 = vld [vmem:[#allocation89_spill] sm:$0xff] }
 0xdb4   : > { %v11091_v19 = vpop.permute.xlu1 %5095  ;;  %v11095_v7 = vpop.permute.xlu0 %5097 }
 0xdb5   : > { %v8057_v8 = vpop.eup %8056 }
 0xdb6   : > { %6081 = vrot.lane.b32.xlu1 %v8057_v8, %s8308_s28  ;;  %v8059_v62 = vpop.eup %8058  ;;  %v4966_v8 = vsub.f32 1.0, %v11882_v56 }
 0xdb7   : > { %v8061_v42 = vpop.eup %8060  ;;  %6083 = vrot.lane.b32.xlu0 %v8059_v62, %s8308_s28  ;;  %v11883_v62 = vld [vmem:[#allocation60_spill] sm:$0xff] }
 0xdb8   : > { %v11097_v21 = vpop.permute.xlu1 %5099  ;;  %v5728_v4 = vpop.permute.xlu0 %5727 }
 0xdb9   : > { %v5763_v39 = vadd.f32 %v5728_v4, %v10941_v6 }
 0xdba   : > { %6085 = vrot.lane.b32.xlu1 %v8061_v42, %s8308_s28 }
 0xdbb   : > { %5186 = vrot.lane.b32.xlu0 %v11052_v40, %s8308_s28  ;;  %v6836_v36 = vmul.f32 -1.442695, %v5763_v39 }
 0xdbc   : > { %v5730_v43 = vpop.permute.xlu1 %5729  ;;  %v5010_v53 = vpop.permute.xlu0 %5009 }
 0xdbd   : > { %v5764_v14 = vadd.f32 %v5730_v43, %v10944_v41  ;;  %8062 = vpow2.f32 %v6836_v36  ;;  %v5047_v6 = vmul.f32 %v5010_v53, %v4967_v35  ;;  %v5128_v41 = vmul.f32 %v11880_v12, %v10924_v31 }
 0xdbe   : > { %5188 = vrot.lane.b32.xlu1 %v11049_v15, %s8308_s28  ;;  %v11881_v15 = vld [vmem:[#allocation78_spill] sm:$0xff]  ;;  %v5126_v43 = vmul.f32 %v11882_v56, %v10908_v46  ;;  %v11886_v56 = vld [vmem:[#allocation13_spill] sm:$0xff] }
 0xdbf   : > { %v6837_v1 = vmul.f32 -1.442695, %v5764_v14  ;;  %5190 = vrot.lane.b32.xlu0 %v5167_v54, %s8308_s28  ;;  %v5143_v16 = vadd.f32 %v5127_v22, %v5047_v6  ;;  %v4965_v29 = vsub.f32 1.0, %v11881_v15  ;;  %v5125_v42 = vmul.f32 %v11881_v15, %v11883_v62 }
 0xdc0   : > { %v5012_v13 = vpop.permute.xlu1 %5011  ;;  %v5006_v10 = vpop.permute.xlu0 %5005 }
 0xdc1   : > { %v5048_v40 = vmul.f32 %v5012_v13, %v4968_v57  ;;  %8064 = vpow2.f32 %v6837_v1  ;;  %v5045_v4 = vmul.f32 %v5006_v10, %v4965_v29  ;;  %v5159_v54 = vmax.f32 %v5143_v16, 0.0  ;;  %v11885_v57 = vld [vmem:[#allocation90_spill] sm:$0xff] }
 0xdc2   : > { %5192 = vrot.lane.b32.xlu1 %v11071_v27, %s8308_s28  ;;  %v11884_v27 = vld [vmem:[#allocation87_spill] sm:$0xff]  ;;  %v4972_v22 = vsub.f32 1.0, %v11885_v57 }
 0xdc3   : > { %v5144_v26 = vadd.f32 %v5128_v41, %v5048_v40  ;;  %v5141_v32 = vadd.f32 %v5125_v42, %v5045_v4  ;;  %v4971_v35 = vsub.f32 1.0, %v11884_v27  ;;  %v5131_v6 = vmul.f32 %v11884_v27, %v11095_v7  ;;  %v11887_v4 = vld [vmem:[#allocation88_spill] sm:$0xff]  ;;  %v11888_v27 = vld [vmem:[#allocation29_spill] sm:$0xff] }
 0xdc4   : > { %v5008_v39 = vpop.permute.xlu1 %5007  ;;  %v5018_v12 = vpop.permute.xlu0 %5017  ;;  %v5132_v40 = vmul.f32 %v11885_v57, %v11097_v21 }
 0xdc5   : > { %v5160_v14 = vmax.f32 %v5144_v26, 0.0  ;;  %v5046_v36 = vmul.f32 %v5008_v39, %v4966_v8  ;;  %v5051_v13 = vmul.f32 %v5018_v12, %v4971_v35  ;;  %v5157_v15 = vmax.f32 %v5141_v32, 0.0  ;;  %v11129_v26 = vld [vmem:[#allocation7 + $0x30] sm:$0xff]  }
 0xdc6   : > { %v5751_v8 = vadd.f32 %v11886_v56, %v11855_v59  ;;  %v4969_v39 = vsub.f32 1.0, %v11887_v4  ;;  %v4970_v35 = vsub.f32 1.0, %v11888_v27  ;;  %7376 = vmatprep.subr.bf16.mxu1 %v11129_v26  ;;  %v11889_v32 = vld [vmem:[#allocation19_spill] sm:$0xff]  ;;  %v5130_v59 = vmul.f32 %v11888_v27, %v11091_v19 }
 0xdc7   : > { %v5170_v53 = vpack.c.bf16 %v5160_v14, %v5159_v54  ;;  %v5142_v1 = vadd.f32 %v5126_v43, %v5046_v36  ;;  %v8063_v10 = vpop.eup %8062  ;;  %v5147_v42 = vadd.f32 %v5131_v6, %v5051_v13 }
 0xdc8   : > { %v5020_v41 = vpop.permute.xlu1 %5019  ;;  %v5827_v43 = vadd.f32 1.0, %v8063_v10  ;;  %v5014_v36 = vpop.permute.xlu0 %5013 }
 0xdc9   : > { %v5158_v16 = vmax.f32 %v5142_v1, 0.0  ;;  %v5052_v29 = vmul.f32 %v5020_v41, %v4972_v22  ;;  %5196 = vrot.lane.b32.xlu1 %v5170_v53, %s8308_s28  ;;  %v5752_v53 = vadd.f32 %v11889_v32, %v11857_v45  ;;  %v5129_v1 = vmul.f32 %v11887_v4, %v11089_v50  ;;  %v11891_v4 = vld [vmem:[#allocation28_spill] sm:$0xff] }
 0xdca   : > { %v5049_v12 = vmul.f32 %v5014_v36, %v4969_v39  ;;  %8066 = vrcp.f32 %v5827_v43  ;;  %v5163_v6 = vmax.f32 %v5147_v42, 0.0  ;;  %v5754_v39 = vadd.f32 %v11891_v4, %v11858_v23  ;;  %v11892_v23 = vld [vmem:[#allocation61_spill] sm:$0xff] }
 0xdcb   : > { %v5169_v54 = vpack.c.bf16 %v5158_v16, %v5157_v15  ;;  %v5148_v14 = vadd.f32 %v5132_v40, %v5052_v29  ;;  %v8065_v22 = vpop.eup %8064  ;;  %v11890_v40 = vld [vmem:[#allocation18_spill] sm:$0xff]  ;;  %v6824_v16 = vmul.f32 -1.442695, %v5751_v8  ;;  %v6825_v36 = vmul.f32 -1.442695, %v5752_v53 }
 0xdcc   : > { %v5016_v57 = vpop.permute.xlu1 %5015  ;;  %v5753_v15 = vadd.f32 %v11890_v40, %v11856_v33  ;;  %v5828_v45 = vadd.f32 1.0, %v8065_v22  ;;  %v5145_v29 = vadd.f32 %v5129_v1, %v5049_v12  ;;  %v11893_v53 = vld [vmem:[#allocation58_spill] sm:$0xff] }
 0xdcd   : > { %v5164_v13 = vmax.f32 %v5148_v14, 0.0  ;;  %v5050_v41 = vmul.f32 %v5016_v57, %v4970_v35  ;;  %5194 = vrot.lane.b32.xlu0 %v5169_v54, %s8308_s28  ;;  %v6827_v14 = vmul.f32 -1.442695, %v5754_v39  ;;  %v5757_v35 = vadd.f32 %v11892_v23, %v11860_v44  ;;  %v11894_v57 = vld [vmem:[#allocation62_spill] sm:$0xff]  ;;  %v11169_v39 = vpop.permute.xlu0 %5731 }
 0xdce   : > { %8068 = vrcp.f32 %v5828_v45  ;;  %v5161_v27 = vmax.f32 %v5145_v29, 0.0  ;;  %v6826_v42 = vmul.f32 -1.442695, %v5753_v15  ;;  %v5755_v1 = vadd.f32 %v11893_v53, %v11859_v17  ;;  %v11895_v17 = vld [vmem:[#allocation66_spill] sm:$0xff] }
 0xdcf   : > { %v5172_v10 = vpack.c.bf16 %v5164_v13, %v5163_v6  ;;  %v5146_v56 = vadd.f32 %v5130_v59, %v5050_v41  ;;  %8070 = vpow2.f32 %v6824_v16  ;;  %v5756_v22 = vadd.f32 %v11894_v57, %v11862_v52 }
 0xdd0   : > { %8072 = vpow2.f32 %v6825_v36  ;;  %v6830_v6 = vmul.f32 -1.442695, %v5757_v35  ;;  %v5734_v23 = vpop.permute.xlu1 %5733 }
 0xdd1   : > { %v5162_v43 = vmax.f32 %v5146_v56, 0.0  ;;  %5200 = vrot.lane.b32.xlu1 %v5172_v10, %s8308_s28  ;;  %8074 = vpow2.f32 %v6826_v42  ;;  %v6829_v15 = vmul.f32 -1.442695, %v5756_v22 }
 0xdd2   : > { %8076 = vpow2.f32 %v6827_v14  ;;  %v5761_v14 = vadd.f32 %v11085_v5, %v10885_v30 }
 0xdd3   : > { %v5171_v54 = vpack.c.bf16 %v5162_v43, %v5161_v27  ;;  %8078 = vpow2.f32 %v6830_v6  ;;  %v5759_v27 = vadd.f32 %v11081_v34, %v10897_v11 }
 0xdd4   : > { %v11149_v33 = vpop.eup %8066 }
 0xdd5   : > { %5198 = vrot.lane.b32.xlu0 %v5171_v54, %s8308_s28  ;;  %v11153_v8 = vmul.f32 %v11149_v33, %v11089_v50  ;;  %v6828_v50 = vmul.f32 -1.442695, %v5755_v1  ;;  %v6832_v57 = vmul.f32 -1.442695, %v5759_v27 }
 0xdd7   : > { %8080 = vpow2.f32 %v6828_v50 }
 0xdd8   : > { %v11157_v32 = vpop.eup %8068 }
 0xdd9   : > { %v11163_v59 = vmul.f32 %v11157_v32, %v11091_v19  ;;  %v8071_v12 = vpop.eup %8070  ;;  %v5758_v19 = vadd.f32 %v11895_v17, %v11864_v20  ;;  %v5760_v20 = vadd.f32 %v11083_v18, %v10905_v37  ;;  %v6834_v37 = vmul.f32 -1.442695, %v5761_v14 }
 0xdda   : > { %v8073_v13 = vpop.eup %8072  ;;  %v5815_v41 = vadd.f32 1.0, %v8071_v12  ;;  %v5762_v18 = vadd.f32 %v11087_v2, %v10890_v38 }
 0xddb   : > { %v8075_v40 = vpop.eup %8074  ;;  %v5816_v44 = vadd.f32 1.0, %v8073_v13  ;;  %v6831_v52 = vmul.f32 -1.442695, %v5758_v19  ;;  %v6833_v6 = vmul.f32 -1.442695, %v5760_v20 }
 0xddc   : > { %v8077_v16 = vpop.eup %8076  ;;  %v5817_v45 = vadd.f32 1.0, %v8075_v40  ;;  %8082 = vrcp.f32 %v5815_v41 }
 0xddd   : > { %8084 = vpow2.f32 %v6829_v15  ;;  %v5818_v29 = vadd.f32 1.0, %v8077_v16  ;;  %v8079_v10 = vpop.eup %8078 }
 0xdde   : > { %8086 = vrcp.f32 %v5816_v44  ;;  %v5821_v43 = vadd.f32 1.0, %v8079_v10 }
 0xddf   : > { %8088 = vrcp.f32 %v5817_v45 }
 0xde0   : > { %8090 = vrcp.f32 %v5818_v29  ;;  %v6835_v29 = vmul.f32 -1.442695, %v5762_v18 }
 0xde1   : > { %8092 = vpow2.f32 %v6831_v52  ;;  %v8081_v56 = vpop.eup %8080 }
 0xde2   : > { %v5819_v54 = vadd.f32 1.0, %v8081_v56  ;;  %8094 = vrcp.f32 %v5821_v43 }
 0xde4   : > { %8096 = vrcp.f32 %v5819_v54 }
 0xde6   : > { %v8083_v4 = vpop.eup %8082 }
 0xde7   : > { %v8085_v36 = vpop.eup %8084  ;;  %v6023_v35 = vsub.f32 1.0, %v8083_v4  ;;  %v6119_v11 = vmul.f32 %v8083_v4, %v11869_v47 }
 0xde8   : > { %v8087_v42 = vpop.eup %8086  ;;  %v5820_v1 = vadd.f32 1.0, %v8085_v36 }
 0xde9   : > { %v8089_v53 = vpop.eup %8088  ;;  %v6024_v34 = vsub.f32 1.0, %v8087_v42  ;;  %v6120_v40 = vmul.f32 %v8087_v42, %v11870_v0 }
 0xdea   : > { %v8091_v50 = vpop.eup %8090  ;;  %v6025_v30 = vsub.f32 1.0, %v8089_v53  ;;  %8098 = vrcp.f32 %v5820_v1  ;;  %v6121_v45 = vmul.f32 %v8089_v53, %v11863_v25 }
 0xdeb   : > { %v8093_v5 = vpop.eup %8092  ;;  %8100 = vpow2.f32 %v6832_v57  ;;  %v6026_v17 = vsub.f32 1.0, %v8091_v50  ;;  %v6122_v38 = vmul.f32 %v8091_v50, %v11866_v48 }
 0xdec   : > { %8102 = vpow2.f32 %v6833_v6  ;;  %v5822_v19 = vadd.f32 1.0, %v8093_v5  ;;  %v8095_v27 = vpop.eup %8094 }
 0xded   : > { %8104 = vpow2.f32 %v6834_v37 }
 0xdee   : > { %8106 = vrcp.f32 %v5822_v19  ;;  %v8097_v25 = vpop.eup %8096 }
 0xdef   : > { %8108 = vpow2.f32 %v6835_v29  ;;  %v6027_v1 = vsub.f32 1.0, %v8097_v25  ;;  %v6123_v18 = vmul.f32 %v8097_v25, %v11877_v24 }
 0xdf4   : > { %v6056_v12 = vpop.permute.xlu0 %6055  ;;  %v8099_v42 = vpop.eup %8098 }
 0xdf5   : > { %v6103_v22 = vmul.f32 %v6056_v12, %v6023_v35  ;;  %v8101_v35 = vpop.eup %8100  ;;  %v5765_v12 = vadd.f32 %v11169_v39, %v10921_v55 }
 0xdf6   : > { %v6058_v13 = vpop.permute.xlu1 %6057  ;;  %v8103_v48 = vpop.eup %8102  ;;  %v5823_v57 = vadd.f32 1.0, %v8101_v35 }
 0xdf7   : > { %v6135_v41 = vadd.f32 %v6119_v11, %v6103_v22  ;;  %v6104_v15 = vmul.f32 %v6058_v13, %v6024_v34  ;;  %v8105_v53 = vpop.eup %8104  ;;  %v5824_v6 = vadd.f32 1.0, %v8103_v48  ;;  %v5766_v11 = vadd.f32 %v5734_v23, %v10929_v63 }
 0xdf8   : > { %v6060_v44 = vpop.permute.xlu0 %6059  ;;  %v8107_v50 = vpop.eup %8106  ;;  %v5825_v37 = vadd.f32 1.0, %v8105_v53  ;;  %v6028_v13 = vsub.f32 1.0, %v8099_v42  ;;  %8110 = vrcp.f32 %v5823_v57  ;;  %v6125_v63 = vmul.f32 %v8095_v27, %v11873_v60 }
 0xdf9   : > { %v6105_v16 = vmul.f32 %v6060_v44, %v6025_v30  ;;  %v6136_v47 = vadd.f32 %v6120_v40, %v6104_v15  ;;  %v6151_v52 = vmax.f32 %v6135_v41, 0.0  ;;  %v6029_v30 = vsub.f32 1.0, %v8095_v27  ;;  %v8109_v5 = vpop.eup %8108 }
 0xdfa   : > { %v6062_v2 = vpop.permute.xlu1 %6061  ;;  %v6838_v41 = vmul.f32 -1.442695, %v5765_v12  ;;  %v6124_v40 = vmul.f32 %v8099_v42, %v11878_v9  ;;  %8112 = vrcp.f32 %v5824_v6  ;;  %v5826_v23 = vadd.f32 1.0, %v8109_v5 }
 0xdfb   : > { %v6152_v10 = vmax.f32 %v6136_v47, 0.0  ;;  %v6137_v56 = vadd.f32 %v6121_v45, %v6105_v16  ;;  %v6106_v4 = vmul.f32 %v6062_v2, %v6026_v17  ;;  %v6839_v16 = vmul.f32 -1.442695, %v5766_v11 }
 0xdfc   : > { %v6064_v14 = vpop.permute.xlu0 %6063  ;;  %8114 = vrcp.f32 %v5825_v37  ;;  %v6030_v45 = vsub.f32 1.0, %v8107_v50  ;;  %v6126_v24 = vmul.f32 %v8107_v50, %v11874_v51 }
 0xdfd   : > { %v6167_v0 = vpack.c.bf16 %v6152_v10, %v6151_v52  ;;  %v6138_v36 = vadd.f32 %v6122_v38, %v6106_v4  ;;  %v6153_v43 = vmax.f32 %v6137_v56, 0.0  ;;  %v6107_v22 = vmul.f32 %v6064_v14, %v6027_v1 }
 0xdfe   : > { %8116 = vpow2.f32 %v6838_v41 }
 0xdff   : > { %v6154_v20 = vmax.f32 %v6138_v36, 0.0  ;;  %6188 = vrot.lane.b32.xlu0 %v6167_v0, %s8308_s28  ;;  %v6139_v44 = vadd.f32 %v6123_v18, %v6107_v22  ;;  %8118 = vpow2.f32 %v6839_v16  ;;  %v6036_v16 = vsub.f32 1.0, %v11157_v32 }
 0xe00   : > { %v6068_v34 = vpop.permute.xlu0 %6067  ;;  %8120 = vrcp.f32 %v5826_v23 }
 0xe01   : > { %v6168_v54 = vpack.c.bf16 %v6154_v20, %v6153_v43  ;;  %v6109_v39 = vmul.f32 %v6068_v34, %v6029_v30  ;;  %v6155_v19 = vmax.f32 %v6139_v44, 0.0 }
 0xe02   : > { %v8111_v60 = vpop.eup %8110 }
 0xe03   : > { %6190 = vrot.lane.b32.xlu1 %v6168_v54, %s8308_s28  ;;  %v6141_v9 = vadd.f32 %v6125_v63, %v6109_v39  ;;  %v6031_v27 = vsub.f32 1.0, %v8111_v60  ;;  %v6127_v54 = vmul.f32 %v8111_v60, %v11883_v62 }
 0xe04   : > { %v8113_v0 = vpop.eup %8112 }
 0xe05   : > { %v6157_v10 = vmax.f32 %v6141_v9, 0.0  ;;  %v6032_v25 = vsub.f32 1.0, %v8113_v0  ;;  %v6128_v53 = vmul.f32 %v8113_v0, %v10908_v46 }
 0xe06   : > { %v8115_v36 = vpop.eup %8114 }
 0xe07   : > { %v6033_v22 = vsub.f32 1.0, %v8115_v36  ;;  %v6129_v50 = vmul.f32 %v8115_v36, %v10902_v49  ;;  %v6035_v49 = vsub.f32 1.0, %v11149_v33 }
 0xe08   : > { %v6066_v15 = vpop.permute.xlu1 %6065  ;;  %v8117_v51 = vpop.eup %8116 }
 0xe09   : > { %v6108_v55 = vmul.f32 %v6066_v15, %v6028_v13  ;;  %v8119_v43 = vpop.eup %8118  ;;  %v5829_v48 = vadd.f32 1.0, %v8117_v51  ;;  %v7605_v51 = vld [vmem:[#allocation7 + $0x38] sm:$0xff]  }
 0xe0a   : > { %v8121_v42 = vpop.eup %8120  ;;  %v5830_v12 = vadd.f32 1.0, %v8119_v43 }
 0xe0b   : > { %v6140_v47 = vadd.f32 %v6124_v40, %v6108_v55  ;;  %v6034_v34 = vsub.f32 1.0, %v8121_v42  ;;  %v6130_v18 = vmul.f32 %v8121_v42, %v10924_v31  ;;  %8122 = vrcp.f32 %v5829_v48 }
 0xe0c   : > { %v6070_v17 = vpop.permute.xlu1 %6069  ;;  %8124 = vrcp.f32 %v5830_v12 }
 0xe0d   : > { %v6156_v29 = vmax.f32 %v6140_v47, 0.0  ;;  %v6110_v38 = vmul.f32 %v6070_v17, %v6030_v45 }
 0xe0f   : > { %v6169_v2 = vpack.c.bf16 %v6156_v29, %v6155_v19  ;;  %v6142_v52 = vadd.f32 %v6126_v24, %v6110_v38 }
 0xe11   : > { %v6158_v56 = vmax.f32 %v6142_v52, 0.0  ;;  %6192 = vrot.lane.b32.xlu0 %v6169_v2, %s8308_s28 }
 0xe13   : > { %v6170_v4 = vpack.c.bf16 %v6158_v56, %v6157_v10 }
 0xe14   : > { %v6072_v20 = vpop.permute.xlu0 %6071 }
 0xe15   : > { %6194 = vrot.lane.b32.xlu1 %v6170_v4, %s8308_s28  ;;  %v6111_v14 = vmul.f32 %v6072_v20, %v6031_v27  ;;  %v8123_v39 = vpop.eup %8122 }
 0xe16   : > { %v8125_v63 = vpop.eup %8124  ;;  %v6037_v17 = vsub.f32 1.0, %v8123_v39  ;;  %v6133_v38 = vmul.f32 %v8123_v39, %v11095_v7 }
 0xe17   : > { %v6143_v57 = vadd.f32 %v6127_v54, %v6111_v14  ;;  %v6038_v9 = vsub.f32 1.0, %v8125_v63  ;;  %v6134_v56 = vmul.f32 %v8125_v63, %v11097_v21 }
 0xe18   : > { %v6074_v35 = vpop.permute.xlu1 %6073 }
 0xe19   : > { %v6112_v1 = vmul.f32 %v6074_v35, %v6032_v25  ;;  %v6076_v11 = vpop.permute.xlu0 %6075  ;;  %v6159_v62 = vmax.f32 %v6143_v57, 0.0 }
 0xe1a   : > { %v6113_v37 = vmul.f32 %v6076_v11, %v6033_v22  ;;  %v6795_v22 = vld [vmem:[%s11713_s20 + $0x1] ss:$0 sm:$0xff] }
 0xe1b   : > { %v6144_v6 = vadd.f32 %v6128_v53, %v6112_v1 }
 0xe1c   : > { %v6078_v13 = vpop.permute.xlu1 %6077  ;;  %v6145_v41 = vadd.f32 %v6129_v50, %v6113_v37 }
 0xe1d   : > { %v6160_v30 = vmax.f32 %v6144_v6, 0.0  ;;  %v6114_v5 = vmul.f32 %v6078_v13, %v6034_v34 }
 0xe1e   : > { %v6161_v15 = vmax.f32 %v6145_v41, 0.0 }
 0xe1f   : > { %v6171_v46 = vpack.c.bf16 %v6160_v30, %v6159_v62  ;;  %v6146_v40 = vadd.f32 %v6130_v18, %v6114_v5  ;;  %v11897_v18 = vld [vmem:[#allocation36_spill] sm:$0xff]  ;;  %v11898_v5 = vld [vmem:[#allocation38_spill] sm:$0xff] }
 0xe21   : > { %v6162_v44 = vmax.f32 %v6146_v40, 0.0  ;;  %6196 = vrot.lane.b32.xlu0 %v6171_v46, %s8308_s28  ;;  %v11899_v40 = vld [vmem:[#allocation49_spill] sm:$0xff] }
 0xe23   : > { %v6172_v55 = vpack.c.bf16 %v6162_v44, %v6161_v15  ;;  %v11900_v44 = vld [vmem:[#allocation51_spill] sm:$0xff] }
 0xe24   : > { %v6080_v31 = vpop.permute.xlu0 %6079 }
 0xe25   : > { %6198 = vrot.lane.b32.xlu1 %v6172_v55, %s8308_s28  ;;  %v6115_v23 = vmul.f32 %v6080_v31, %v6035_v49 }
 0xe27   : > { %v6147_v24 = vadd.f32 %v11153_v8, %v6115_v23  ;;  %v11901_v23 = vld [vmem:[#allocation74_spill] sm:$0xff] }
 0xe28   : > { %v6082_v47 = vpop.permute.xlu1 %6081 }
 0xe29   : > { %v6116_v45 = vmul.f32 %v6082_v47, %v6036_v16  ;;  %v6084_v29 = vpop.permute.xlu0 %6083  ;;  %v6163_v33 = vmax.f32 %v6147_v24, 0.0 }
 0xe2a   : > { %v6117_v2 = vmul.f32 %v6084_v29, %v6037_v17  ;;  %v11902_v17 = vld [vmem:[#allocation63_spill] sm:$0xff] }
 0xe2b   : > { %v6148_v19 = vadd.f32 %v11163_v59, %v6116_v45 }
 0xe2c   : > { %v6086_v52 = vpop.permute.xlu1 %6085  ;;  %v6149_v60 = vadd.f32 %v6133_v38, %v6117_v2  ;;  %v11904_v2 = vld [vmem:[#allocation75_spill] sm:$0xff] }
 0xe2d   : > { %v6164_v10 = vmax.f32 %v6148_v19, 0.0  ;;  %v6118_v32 = vmul.f32 %v6086_v52, %v6038_v9  ;;  %v5187_v36 = vpop.permute.xlu0 %5186  ;;  %v11903_v9 = vld [vmem:[#allocation53_spill] sm:$0xff] }
 0xe2e   : > { %7340 = vmatprep.mubr.msk.bf16.mxu1 %vm1200_vm2, %v5187_v36  ;;  %v6165_v59 = vmax.f32 %v6149_v60, 0.0 }
 0xe2f   : > { %v6173_v4 = vpack.c.bf16 %v6164_v10, %v6163_v33  ;;  %v6150_v0 = vadd.f32 %v6134_v56, %v6118_v32 }
 0xe30   : > { %v5189_v8 = vpop.permute.xlu1 %5188 }
 0xe31   : > { %v6166_v27 = vmax.f32 %v6150_v0, 0.0  ;;  %6200 = vrot.lane.b32.xlu0 %v6173_v4, %s8308_s28  ;;  %7341 = vmatmul.mubr.msk.bf16.vlgmr.msra.gmra.mrb[120].mxu1 %vm1200_vm2, %v5189_v8  ;;  %v5191_v43 = vpop.permute.xlu0 %5190  ;;  %v11905_v4 = vld [vmem:[#allocation81_spill] sm:$0xff]  ;;  %v11906_v8 = vld [vmem:[#allocation76_spill] sm:$0xff] }
 0xe32   : > { %7377 = vmatpush3.bf16.msra.mxu1 %v11129_v26  ;;  %7344 = vmatprep.mubr.msk.bf16.mxu1 %vm1200_vm2, %v5191_v43 }
 0xe33   : > { %v6174_v7 = vpack.c.bf16 %v6166_v27, %v6165_v59  ;;  %7378 = vmatprep.subr.bf16.mxu1 %v7605_v51 }
 0xe34   : > { %v5193_v21 = vpop.permute.xlu1 %5192 }
 0xe35   : > { %6202 = vrot.lane.b32.xlu1 %v6174_v7, %s8308_s28  ;;  %v11907_v7 = vld [vmem:[#allocation77_spill] sm:$0xff] }
 0xe36   : > { %7379 = vmatpush3.bf16.msra.mxu1 %v7605_v51 }
 0xe39   : > { %7345 = vmatmul.mubr.msk.bf16.gmra.mrb[124].mxu1 %vm1200_vm2, %v5193_v21  ;;  %v11908_v21 = vld [vmem:[#allocation83_spill] sm:$0xff] }
 0xe3b   : > { %v5197_v25 = vpop.permute.xlu1 %5196 }
 0xe3f   : > { %v5195_v20 = vpop.permute.xlu0 %5194 }
 0xe40   : > { %7348 = vmatprep.mubr.msk.bf16.mxu1 %vm1200_vm2, %v5195_v20 }
 0xe41   : > { %7349 = vmatmul.mubr.msk.bf16.gmra.mrb[128].mxu1 %vm1200_vm2, %v5197_v25 }
 0xe43   : > { %v5201_v54 = vpop.permute.xlu1 %5200 }
 0xe47   : > { %v5199_v42 = vpop.permute.xlu0 %5198 }
 0xe48   : > { %7352 = vmatprep.mubr.msk.bf16.mxu1 %vm1200_vm2, %v5199_v42 }
 0xe49   : > { %7353 = vmatmul.mubr.msk.bf16.gmra.mrb[132].mxu1 %vm1200_vm2, %v5201_v54 }
 0xe71   : > { %v6189_v26 = vpop.permute.xlu0 %6188 }
 0xe72   : > { %7380 = vmatprep.mubr.msk.bf16.mxu1 %vm1200_vm2, %v6189_v26 }
 0xe75   : > { %v6191_v14 = vpop.permute.xlu1 %6190 }
 0xe76   : > { %7381 = vmatmul.mubr.msk.bf16.vlgmr.msra.gmra.mrb[120].mxu1 %vm1200_vm2, %v6191_v14 }
 0xe83   : > { %v6193_v35 = vpop.permute.xlu0 %6192 }
 0xe84   : > { %7384 = vmatprep.mubr.msk.bf16.mxu1 %vm1200_vm2, %v6193_v35 }
 0xe87   : > { %v6195_v48 = vpop.permute.xlu1 %6194 }
 0xe88   : > { %7385 = vmatmul.mubr.msk.bf16.gmra.mrb[124].mxu1 %vm1200_vm2, %v6195_v48 }
 0xe93   : > { %v6197_v53 = vpop.permute.xlu0 %6196 }
 0xe94   : > { %7388 = vmatprep.mubr.msk.bf16.mxu1 %vm1200_vm2, %v6197_v53 }
 0xe97   : > { %v6199_v1 = vpop.permute.xlu1 %6198 }
 0xe98   : > { %7389 = vmatmul.mubr.msk.bf16.gmra.mrb[128].mxu1 %vm1200_vm2, %v6199_v1 }
 0xea3   : > { %v6201_v12 = vpop.permute.xlu0 %6200 }
 0xea4   : > { %7392 = vmatprep.mubr.msk.bf16.mxu1 %vm1200_vm2, %v6201_v12 }
 0xea7   : > { %v6203_v57 = vpop.permute.xlu1 %6202 }
 0xea8   : > { %7393 = vmatmul.mubr.msk.bf16.gmra.mrb[132].mxu1 %vm1200_vm2, %v6203_v57 }
 0xf49   : > { %v7382_v6 = vpop.f32.mrb[120].mxu1 }
 0xf4a   : > { %v7428_v11 = vadd.f32 %v7382_v6, %v6795_v22  ;;  %v6274_v34 = vpop.f32.mrb[121].mxu1 }
 0xf4b   : > { %v7429_v50 = vadd.f32 %v6795_v22, %v6274_v34  ;;  %v7383_v37 = vpop.f32.mrb[122].mxu1 }
 0xf4c   : > { %v6355_v13 = vadd.f32 %v7428_v11, %v11897_v18  ;;  %v7430_v62 = vadd.f32 %v7383_v37, %v6795_v22  ;;  %v6277_v30 = vpop.f32.mrb[123].mxu1 }
 0xf4d   : > { %v6353_v41 = vadd.f32 %v7429_v50, %v11898_v5  ;;  %v7431_v46 = vadd.f32 %v6795_v22, %v6277_v30 }
 0xf4e   : > { %6371 = vst.msk [vmem:[%s11233_s22 + $0x10] sm:$0xff] %vm1200_vm2, %v6355_v13  ;;  %v6356_v15 = vadd.f32 %v7430_v62, %v11899_v40 }
 0xf4f   : > { %6369 = vst.msk [vmem:[%s11233_s22] sm:$0xff] %vm1200_vm2, %v6353_v41  ;;  %v6354_v55 = vadd.f32 %v7431_v46, %v11900_v44 }
 0xf50   : > { %6372 = vst.msk [vmem:[%s11233_s22 + $0x18] sm:$0xff] %vm1200_vm2, %v6356_v15 }
 0xf51   : > { %6370 = vst.msk [vmem:[%s11233_s22 + $0x8] sm:$0xff] %vm1200_vm2, %v6354_v55 }
 0xf5b   : > { %v7386_v49 = vpop.f32.mrb[124].mxu1 }
 0xf5c   : > { %v7432_v39 = vadd.f32 %v7386_v49, %v6795_v22  ;;  %v6290_v31 = vpop.f32.mrb[125].mxu1 }
 0xf5d   : > { %v7433_v16 = vadd.f32 %v6795_v22, %v6290_v31  ;;  %v7387_v63 = vpop.f32.mrb[126].mxu1 }
 0xf5e   : > { %v6359_v47 = vadd.f32 %v7432_v39, %v11901_v23  ;;  %v7434_v45 = vadd.f32 %v7387_v63, %v6795_v22  ;;  %v6293_v24 = vpop.f32.mrb[127].mxu1 }
 0xf5f   : > { %v6357_v19 = vadd.f32 %v7433_v16, %v11902_v17  ;;  %v7435_v29 = vadd.f32 %v6795_v22, %v6293_v24 }
 0xf60   : > { %6375 = vst.msk [vmem:[%s11233_s22 + $0x30] sm:$0xff] %vm1200_vm2, %v6359_v47  ;;  %v6360_v38 = vadd.f32 %v7434_v45, %v11903_v9 }
 0xf61   : > { %6373 = vst.msk [vmem:[%s11233_s22 + $0x20] sm:$0xff] %vm1200_vm2, %v6357_v19  ;;  %v6358_v52 = vadd.f32 %v7435_v29, %v11904_v2 }
 0xf62   : > { %6376 = vst.msk [vmem:[%s11233_s22 + $0x38] sm:$0xff] %vm1200_vm2, %v6360_v38 }
 0xf63   : > { %6374 = vst.msk [vmem:[%s11233_s22 + $0x28] sm:$0xff] %vm1200_vm2, %v6358_v52 }
 0xf6b   : > { %v7390_v33 = vpop.f32.mrb[128].mxu1 }
 0xf6c   : > { %v7436_v10 = vadd.f32 %v7390_v33, %v6795_v22  ;;  %v6306_v56 = vpop.f32.mrb[129].mxu1 }
 0xf6d   : > { %v7437_v32 = vadd.f32 %v6795_v22, %v6306_v56  ;;  %v7391_v60 = vpop.f32.mrb[130].mxu1 }
 0xf6e   : > { %v6363_v0 = vadd.f32 %v7436_v10, %v11905_v4  ;;  %v7438_v36 = vadd.f32 %v7391_v60, %v6795_v22  ;;  %v6309_v51 = vpop.f32.mrb[131].mxu1 }
 0xf6f   : > { %v6361_v59 = vadd.f32 %v7437_v32, %v11906_v8  ;;  %v7439_v27 = vadd.f32 %v6795_v22, %v6309_v51 }
 0xf70   : > { %6379 = vst.msk [vmem:[%s11233_s22 + $0x50] sm:$0xff] %vm1200_vm2, %v6363_v0  ;;  %v6364_v43 = vadd.f32 %v7438_v36, %v11907_v7 }
 0xf71   : > { %6377 = vst.msk [vmem:[%s11233_s22 + $0x40] sm:$0xff] %vm1200_vm2, %v6361_v59  ;;  %v6362_v20 = vadd.f32 %v7439_v27, %v11908_v21 }
 0xf72   : > { %6380 = vst.msk [vmem:[%s11233_s22 + $0x58] sm:$0xff] %vm1200_vm2, %v6364_v43 }
 0xf73   : > { %6378 = vst.msk [vmem:[%s11233_s22 + $0x48] sm:$0xff] %vm1200_vm2, %v6362_v20 }
 0xf7b   : > { %v7394_v25 = vpop.f32.mrb[132].mxu1 }
 0xf7c   : > { %v7440_v42 = vadd.f32 %v7394_v25, %v6795_v22  ;;  %v6322_v54 = vpop.f32.mrb[133].mxu1 }
 0xf7d   : > { %v7441_v26 = vadd.f32 %v6795_v22, %v6322_v54  ;;  %v7395_v14 = vpop.f32.mrb[134].mxu1 }
 0xf7e   : > { %v6367_v35 = vadd.f32 %v7440_v42, %v11847_v61  ;;  %v7442_v48 = vadd.f32 %v7395_v14, %v6795_v22  ;;  %v6325_v53 = vpop.f32.mrb[135].mxu1 }
 0xf7f   : > { %v6365_v1 = vadd.f32 %v7441_v26, %v11845_v58  ;;  %v7443_v12 = vadd.f32 %v6795_v22, %v6325_v53 }
 0xf80   : > { %6383 = vst.msk [vmem:[%s11233_s22 + $0x70] sm:$0xff] %vm1200_vm2, %v6367_v35  ;;  %v6368_v57 = vadd.f32 %v7442_v48, %v11848_v28 }
 0xf81   : > { %6381 = vst.msk [vmem:[%s11233_s22 + $0x60] sm:$0xff] %vm1200_vm2, %v6365_v1  ;;  %v6366_v6 = vadd.f32 %v7443_v12, %v11846_v3 }
 0xf82   : > { %6384 = vst.msk [vmem:[%s11233_s22 + $0x78] sm:$0xff] %vm1200_vm2, %v6368_v57 }
 0xf83   : > { %6382 = vst.msk [vmem:[%s11233_s22 + $0x68] sm:$0xff] %vm1200_vm2, %v6366_v6 }
 0xf84 PF: > { %s11909_s23 = sld [smem:[#allocation12_spill]] }
 0xf8a   : > { %s29_s21 = sadd.s32 1, %s11909_s23  }
 0xf8b   : > { %p26_p8 = scmp.ge.s32.totalorder %s29_s21, 4  }
 0xf8d   :  { %28 = sbr.rel (!%p26_p8) target bundleno = 8 (0x8), region = 156 }
 0xf94   :  { %6407 = vsyncpa [#allocation3], 1 }
 0xf95   :  { %6409 = vsyncpa [#allocation3 + $0x1], 1 }
 0xf96   :  { %6410 = vsyncpa [#allocation5], 1 }
 0xf97   :  { %6411 = vsyncpa [#allocation8], 1 }

</bundles_post_ra>
